<compile_context>
chip_gen: v7x
topology: tpu7x:2x2x1
jax: 0.10.0
libtpu: 0.0.40
codegen_flags: <defaults>
</compile_context>

<pallas_src>
import functools

import jax
import jax.numpy as jnp
from jax import lax
from jax.experimental import pallas as pl
from jax.experimental.pallas import tpu as pltpu

EPS = 1e-5
OUT_CHANNELS = [64, 64, 128, 128, 256, 256]
POOL = [None, "max", None, "max", None]
BOTTOM_OUTPUT = 40
CONV_OUTPUT = 14


# ---------------------------------------------------------------------------
# In-kernel helpers (only iota / compare / cast -> one-hot MXU selections)
# ---------------------------------------------------------------------------
def _shift_matrices(rows, length, dtype):
    """One-hot (rows, rows) matrices S_prev, S_next with
         (S_prev @ x)[r] = x[r-1]   (zero at every per-sample sequence start)
         (S_next @ x)[r] = x[r+1]   (zero at every per-sample sequence end)
    so a k=3 / pad=1 conv over the flattened (batch*length, C) rows is exact."""
    rr = lax.broadcasted_iota(jnp.int32, (rows, rows), 0)
    cc = lax.broadcasted_iota(jnp.int32, (rows, rows), 1)
    prev_ok = cc == rr - 1            # r == 0 excluded automatically (cc == -1)
    next_ok = cc == rr + 1            # r == rows-1 excluded automatically (cc == rows)
    for b in range(1, rows // length):            # interior batch boundaries
        prev_ok = jnp.logical_and(prev_ok, rr != b * length)
        next_ok = jnp.logical_and(next_ok, rr != b * length - 1)
    return prev_ok.astype(dtype), next_ok.astype(dtype)


def _pool_matrices(rows, dtype):
    """(rows//2, rows) one-hot selectors of even / odd rows for MaxPool1d(2)."""
    half = rows // 2
    jj = lax.broadcasted_iota(jnp.int32, (half, rows), 0)
    rr = lax.broadcasted_iota(jnp.int32, (half, rows), 1)
    return (rr == 2 * jj).astype(dtype), (rr == 2 * jj + 1).astype(dtype)


# ---------------------------------------------------------------------------
# The single fused kernel
# ---------------------------------------------------------------------------
def _bottom_kernel(x_ref, *refs, batch, seq_len):
    w_refs = refs[0:12:2]      # 6 x (3, Cin, Cout)  BN-folded conv weights
    s_refs = refs[1:12:2]      # 6 x (1, Cout)       conv bias + BN shift (folded)
    fcw_ref = refs[12]         # (CONV_OUTPUT, 256, BOTTOM_OUTPUT) permuted FC weight
    fcb_ref = refs[13]         # (1, BOTTOM_OUTPUT)
    o_ref = refs[14]           # (batch, BOTTOM_OUTPUT)

    x = x_ref[...]             # (batch*seq_len, Cin); activations stay on-chip from here on
    length = seq_len
    for i in range(len(OUT_CHANNELS)):
        rows = x.shape[0]
        s_prev, s_next = _shift_matrices(rows, length, x.dtype)
        x_m1 = jnp.dot(s_prev, x, preferred_element_type=jnp.float32)   # x[l-1]
        x_p1 = jnp.dot(s_next, x, preferred_element_type=jnp.float32)   # x[l+1]
        w = w_refs[i]
        y = jnp.dot(x_m1, w[0], preferred_element_type=jnp.float32)
        y = y + jnp.dot(x, w[1], preferred_element_type=jnp.float32)
        y = y + jnp.dot(x_p1, w[2], preferred_element_type=jnp.float32)
        y = y + s_refs[i][...]                       # bias + BatchNorm affine (folded)
        y = jnp.maximum(y, 0.0)                      # ReLU
        if i < len(POOL) and POOL[i] == "max":       # fused MaxPool1d(2)
            sel_e, sel_o = _pool_matrices(rows, y.dtype)
            y = jnp.maximum(
                jnp.dot(sel_e, y, preferred_element_type=jnp.float32),
                jnp.dot(sel_o, y, preferred_element_type=jnp.float32))
            length //= 2
        x = y
        # Dropout(p=0.05): eval mode -> identity.

    # Final Linear on the (batch*CONV_OUTPUT, 256) rows; fc weight was permuted in the
    # wrapper so no channel-major transpose / flatten is needed here.
    rows = x.shape[0]
    bb = lax.broadcasted_iota(jnp.int32, (batch, rows), 0)
    rr = lax.broadcasted_iota(jnp.int32, (batch, rows), 1)
    acc = jnp.zeros((batch, BOTTOM_OUTPUT), jnp.float32)
    for l in range(length):                          # length == CONV_OUTPUT == 14
        gather_l = (rr == bb * length + l).astype(x.dtype)                 # (batch, rows)
        rows_l = jnp.dot(gather_l, x, preferred_element_type=jnp.float32)  # (batch, 256)
        acc = acc + jnp.dot(rows_l, fcw_ref[l], preferred_element_type=jnp.float32)
    o_ref[...] = acc + fcb_ref[...]


# ---------------------------------------------------------------------------
# Wrapper: parameter folding + single pallas_call
# ---------------------------------------------------------------------------
@jax.jit
def bottom_conv1d_forward(x_ncl, conv_params, fc_w, fc_b):
    b, cin, seq = x_ncl.shape
    # NCL -> flattened (B*L, C) rows with channels on TPU lanes (tiny, one-time).
    x_rows = jnp.transpose(x_ncl, (0, 2, 1)).reshape(b * seq, cin)

    args = [x_rows]
    for p in conv_params:
        scale = p["gamma"] / jnp.sqrt(p["rvar"] + EPS)
        # fold BN scale into conv weights; conv bias + BN shift into one vector
        w = jnp.transpose(p["w"], (2, 1, 0)) * scale[None, None, :]   # (K, Cin, Cout)
        sh = (p["b"] * scale + p["beta"] - p["rmean"] * scale).reshape(1, -1)
        args += [w, sh]
    # Permute fc weight so the Linear consumes the natural (B, L, C) row layout:
    # fcw_p[l, c, o] = fc_w[o, c*CONV_OUTPUT + l]
    fcw_p = jnp.transpose(
        fc_w.reshape(BOTTOM_OUTPUT, OUT_CHANNELS[-1], CONV_OUTPUT), (2, 1, 0))
    args += [fcw_p, fc_b.reshape(1, BOTTOM_OUTPUT)]

    kern = functools.partial(_bottom_kernel, batch=b, seq_len=seq)
    return pl.pallas_call(
        kern,
        out_shape=jax.ShapeDtypeStruct((b, BOTTOM_OUTPUT), jnp.float32),
        in_specs=[pl.BlockSpec(memory_space=pltpu.MemorySpace.VMEM)] * len(args),
        out_specs=pl.BlockSpec(memory_space=pltpu.MemorySpace.VMEM),
    )(*args)


# ---------------------------------------------------------------------------
# Pure-JAX reference for correctness checking
# ---------------------------------------------------------------------------
def reference_forward(x_ncl, conv_params, fc_w, fc_b):
    x = x_ncl
    for i, p in enumerate(conv_params):
        y = jax.lax.conv_general_dilated(
            x, p["w"], window_strides=(1,), padding=((1, 1),),
            dimension_numbers=("NCH", "OIH", "NCH"),
            precision=jax.lax.Precision.HIGHEST)
        y = y + p["b"][None, :, None]
        scale = p["gamma"] / jnp.sqrt(p["rvar"] + EPS)
        shift = p["beta"] - p["rmean"] * scale
        y = y * scale[None, :, None] + shift[None, :, None]
        y = jnp.maximum(y, 0.0)
        if i < len(POOL) and POOL[i] == "max":
            bb, cc, ll = y.shape
            y = jnp.max(y.reshape(bb, cc, ll // 2, 2), axis=-1)
        x = y
    flat = x.reshape(x.shape[0], -1)
    return jnp.dot(flat, fc_w.T, precision=jax.lax.Precision.HIGHEST) + fc_b


# ---------------------------------------------------------------------------
# Deterministic synthetic parameters
# ---------------------------------------------------------------------------
def init_params(key):
    conv_params = []
    in_ch = 4
    for oc in OUT_CHANNELS:
        key, k1, k2, k3, k4, k5, k6 = jax.random.split(key, 7)
        fan_in = in_ch * 3
        conv_params.append(dict(
            w=jax.random.normal(k1, (oc, in_ch, 3), jnp.float32) * jnp.sqrt(2.0 / fan_in),
            b=0.01 * jax.random.normal(k2, (oc,), jnp.float32),
            gamma=1.0 + 0.1 * jax.random.normal(k3, (oc,), jnp.float32),
            beta=0.1 * jax.random.normal(k4, (oc,), jnp.float32),
            rmean=0.1 * jax.random.normal(k5, (oc,), jnp.float32),
            rvar=1.0 + 0.1 * jnp.abs(jax.random.normal(k6, (oc,), jnp.float32)),
        ))
        in_ch = oc
    key, kf1, kf2 = jax.random.split(key, 3)
    fc_in = OUT_CHANNELS[-1] * CONV_OUTPUT  # 256 * 14 = 3584
    fc_w = jax.random.normal(kf1, (BOTTOM_OUTPUT, fc_in), jnp.float32) * jnp.sqrt(1.0 / fc_in)
    fc_b = 0.01 * jax.random.normal(kf2, (BOTTOM_OUTPUT,), jnp.float32)
    return conv_params, fc_w, fc_b


if __name__ == "__main__":
    key = jax.random.PRNGKey(0)
    kx, kp = jax.random.split(key)
    B, C, L = 2, 4, 56  # n_input = 224 = 4 * 56 (NCL, PyTorch convention)
    x = jax.random.normal(kx, (B, C, L), jnp.float32)
    conv_params, fc_w, fc_b = init_params(kp)

    out = bottom_conv1d_forward(x, conv_params, fc_w, fc_b)
    out = jax.block_until_ready(out)
    assert out.shape == (B, BOTTOM_OUTPUT), out.shape

    ref = reference_forward(x, conv_params, fc_w, fc_b)
    if not jnp.allclose(out, ref, atol=2e-2, rtol=2e-2):
        max_err = float(jnp.max(jnp.abs(out - ref)))
        raise ValueError(f"Pallas output mismatch vs reference, max abs err = {max_err}")

    print("KERNEL_OK")
</pallas_src>

<mosaic_0001>
module attributes {stable_mosaic.version = 11 : i64} {
  func.func @_bottom_kernel(%arg0: memref<112x4xf32, #tpu.memory_space<vmem>>, %arg1: memref<3x4x64xf32, #tpu.memory_space<vmem>>, %arg2: memref<1x64xf32, #tpu.memory_space<vmem>>, %arg3: memref<3x64x64xf32, #tpu.memory_space<vmem>>, %arg4: memref<1x64xf32, #tpu.memory_space<vmem>>, %arg5: memref<3x64x128xf32, #tpu.memory_space<vmem>>, %arg6: memref<1x128xf32, #tpu.memory_space<vmem>>, %arg7: memref<3x128x128xf32, #tpu.memory_space<vmem>>, %arg8: memref<1x128xf32, #tpu.memory_space<vmem>>, %arg9: memref<3x128x256xf32, #tpu.memory_space<vmem>>, %arg10: memref<1x256xf32, #tpu.memory_space<vmem>>, %arg11: memref<3x256x256xf32, #tpu.memory_space<vmem>>, %arg12: memref<1x256xf32, #tpu.memory_space<vmem>>, %arg13: memref<14x256x40xf32, #tpu.memory_space<vmem>>, %arg14: memref<1x40xf32, #tpu.memory_space<vmem>>, %arg15: memref<2x40xf32, #tpu.memory_space<vmem>>) attributes {dimension_semantics = [], scalar_prefetch = 0 : i64, scratch_operands = 0 : i64, tpu.core_type = #tpu.core_type<tc>} {
    %c0 = arith.constant 0 : index
    %c0_0 = arith.constant 0 : index
    %0 = vector.load %arg0[%c0, %c0_0] : memref<112x4xf32, #tpu.memory_space<vmem>>, vector<112x4xf32>
    %1 = tpu.iota {dimensions = array<i32: 0>} : vector<112x112xi32>
    %2 = tpu.iota {dimensions = array<i32: 1>} : vector<112x112xi32>
    %c1_i32 = arith.constant 1 : i32
    %3 = vector.broadcast %c1_i32 : i32 to vector<112x112xi32>
    %4 = arith.subi %1, %3 : vector<112x112xi32>
    %5 = arith.cmpi eq, %2, %4 : vector<112x112xi32>
    %c1_i32_1 = arith.constant 1 : i32
    %6 = vector.broadcast %c1_i32_1 : i32 to vector<112x112xi32>
    %7 = arith.addi %1, %6 : vector<112x112xi32>
    %8 = arith.cmpi eq, %2, %7 : vector<112x112xi32>
    %c56_i32 = arith.constant 56 : i32
    %9 = vector.broadcast %c56_i32 : i32 to vector<112x112xi32>
    %10 = arith.cmpi ne, %1, %9 : vector<112x112xi32>
    %11 = arith.andi %5, %10 : vector<112x112xi1>
    %c55_i32 = arith.constant 55 : i32
    %12 = vector.broadcast %c55_i32 : i32 to vector<112x112xi32>
    %13 = arith.cmpi ne, %1, %12 : vector<112x112xi32>
    %14 = arith.andi %8, %13 : vector<112x112xi1>
    %15 = arith.extui %11 : vector<112x112xi1> to vector<112x112xi32>
    %16 = arith.sitofp %15 : vector<112x112xi32> to vector<112x112xf32>
    %17 = arith.extui %14 : vector<112x112xi1> to vector<112x112xi32>
    %18 = arith.sitofp %17 : vector<112x112xi32> to vector<112x112xf32>
    %cst = arith.constant dense<0.000000e+00> : vector<112x4xf32>
    %19 = tpu.matmul %16, %0, %cst {dimension_numbers = #tpu.dot_dimension_numbers<[1], [0], [0], [1], [0, 0, 1, 1], [], []>} : vector<112x112xf32>, vector<112x4xf32>, vector<112x4xf32> -> vector<112x4xf32>
    %cst_2 = arith.constant dense<0.000000e+00> : vector<112x4xf32>
    %20 = tpu.matmul %18, %0, %cst_2 {dimension_numbers = #tpu.dot_dimension_numbers<[1], [0], [0], [1], [0, 0, 1, 1], [], []>} : vector<112x112xf32>, vector<112x4xf32>, vector<112x4xf32> -> vector<112x4xf32>
    %c0_3 = arith.constant 0 : index
    %c0_4 = arith.constant 0 : index
    %c0_5 = arith.constant 0 : index
    %21 = vector.load %arg1[%c0_3, %c0_4, %c0_5] : memref<3x4x64xf32, #tpu.memory_space<vmem>>, vector<1x4x64xf32>
    %22 = vector.shape_cast %21 : vector<1x4x64xf32> to vector<4x64xf32>
    %cst_6 = arith.constant dense<0.000000e+00> : vector<112x64xf32>
    %23 = tpu.matmul %19, %22, %cst_6 {dimension_numbers = #tpu.dot_dimension_numbers<[1], [0], [0], [1], [0, 0, 1, 1], [], []>} : vector<112x4xf32>, vector<4x64xf32>, vector<112x64xf32> -> vector<112x64xf32>
    %c1 = arith.constant 1 : index
    %c0_7 = arith.constant 0 : index
    %c0_8 = arith.constant 0 : index
    %24 = vector.load %arg1[%c1, %c0_7, %c0_8] : memref<3x4x64xf32, #tpu.memory_space<vmem>>, vector<1x4x64xf32>
    %25 = vector.shape_cast %24 : vector<1x4x64xf32> to vector<4x64xf32>
    %cst_9 = arith.constant dense<0.000000e+00> : vector<112x64xf32>
    %26 = tpu.matmul %0, %25, %cst_9 {dimension_numbers = #tpu.dot_dimension_numbers<[1], [0], [0], [1], [0, 0, 1, 1], [], []>} : vector<112x4xf32>, vector<4x64xf32>, vector<112x64xf32> -> vector<112x64xf32>
    %27 = arith.addf %23, %26 : vector<112x64xf32>
    %c2 = arith.constant 2 : index
    %c0_10 = arith.constant 0 : index
    %c0_11 = arith.constant 0 : index
    %28 = vector.load %arg1[%c2, %c0_10, %c0_11] : memref<3x4x64xf32, #tpu.memory_space<vmem>>, vector<1x4x64xf32>
    %29 = vector.shape_cast %28 : vector<1x4x64xf32> to vector<4x64xf32>
    %cst_12 = arith.constant dense<0.000000e+00> : vector<112x64xf32>
    %30 = tpu.matmul %20, %29, %cst_12 {dimension_numbers = #tpu.dot_dimension_numbers<[1], [0], [0], [1], [0, 0, 1, 1], [], []>} : vector<112x4xf32>, vector<4x64xf32>, vector<112x64xf32> -> vector<112x64xf32>
    %31 = arith.addf %27, %30 : vector<112x64xf32>
    %c0_13 = arith.constant 0 : index
    %c0_14 = arith.constant 0 : index
    %32 = vector.load %arg2[%c0_13, %c0_14] : memref<1x64xf32, #tpu.memory_space<vmem>>, vector<1x64xf32>
    %33 = vector.broadcast %32 : vector<1x64xf32> to vector<112x64xf32>
    %34 = arith.addf %31, %33 : vector<112x64xf32>
    %cst_15 = arith.constant 0.000000e+00 : f32
    %35 = vector.broadcast %cst_15 : f32 to vector<112x64xf32>
    %36 = arith.maximumf %34, %35 : vector<112x64xf32>
    %37 = tpu.iota {dimensions = array<i32: 0>} : vector<112x112xi32>
    %38 = tpu.iota {dimensions = array<i32: 1>} : vector<112x112xi32>
    %c1_i32_16 = arith.constant 1 : i32
    %39 = vector.broadcast %c1_i32_16 : i32 to vector<112x112xi32>
    %40 = arith.subi %37, %39 : vector<112x112xi32>
    %41 = arith.cmpi eq, %38, %40 : vector<112x112xi32>
    %c1_i32_17 = arith.constant 1 : i32
    %42 = vector.broadcast %c1_i32_17 : i32 to vector<112x112xi32>
    %43 = arith.addi %37, %42 : vector<112x112xi32>
    %44 = arith.cmpi eq, %38, %43 : vector<112x112xi32>
    %c56_i32_18 = arith.constant 56 : i32
    %45 = vector.broadcast %c56_i32_18 : i32 to vector<112x112xi32>
    %46 = arith.cmpi ne, %37, %45 : vector<112x112xi32>
    %47 = arith.andi %41, %46 : vector<112x112xi1>
    %c55_i32_19 = arith.constant 55 : i32
    %48 = vector.broadcast %c55_i32_19 : i32 to vector<112x112xi32>
    %49 = arith.cmpi ne, %37, %48 : vector<112x112xi32>
    %50 = arith.andi %44, %49 : vector<112x112xi1>
    %51 = arith.extui %47 : vector<112x112xi1> to vector<112x112xi32>
    %52 = arith.sitofp %51 : vector<112x112xi32> to vector<112x112xf32>
    %53 = arith.extui %50 : vector<112x112xi1> to vector<112x112xi32>
    %54 = arith.sitofp %53 : vector<112x112xi32> to vector<112x112xf32>
    %cst_20 = arith.constant dense<0.000000e+00> : vector<112x64xf32>
    %55 = tpu.matmul %52, %36, %cst_20 {dimension_numbers = #tpu.dot_dimension_numbers<[1], [0], [0], [1], [0, 0, 1, 1], [], []>} : vector<112x112xf32>, vector<112x64xf32>, vector<112x64xf32> -> vector<112x64xf32>
    %cst_21 = arith.constant dense<0.000000e+00> : vector<112x64xf32>
    %56 = tpu.matmul %54, %36, %cst_21 {dimension_numbers = #tpu.dot_dimension_numbers<[1], [0], [0], [1], [0, 0, 1, 1], [], []>} : vector<112x112xf32>, vector<112x64xf32>, vector<112x64xf32> -> vector<112x64xf32>
    %c0_22 = arith.constant 0 : index
    %c0_23 = arith.constant 0 : index
    %c0_24 = arith.constant 0 : index
    %57 = vector.load %arg3[%c0_22, %c0_23, %c0_24] : memref<3x64x64xf32, #tpu.memory_space<vmem>>, vector<1x64x64xf32>
    %58 = vector.shape_cast %57 : vector<1x64x64xf32> to vector<64x64xf32>
    %cst_25 = arith.constant dense<0.000000e+00> : vector<112x64xf32>
    %59 = tpu.matmul %55, %58, %cst_25 {dimension_numbers = #tpu.dot_dimension_numbers<[1], [0], [0], [1], [0, 0, 1, 1], [], []>} : vector<112x64xf32>, vector<64x64xf32>, vector<112x64xf32> -> vector<112x64xf32>
    %c1_26 = arith.constant 1 : index
    %c0_27 = arith.constant 0 : index
    %c0_28 = arith.constant 0 : index
    %60 = vector.load %arg3[%c1_26, %c0_27, %c0_28] : memref<3x64x64xf32, #tpu.memory_space<vmem>>, vector<1x64x64xf32>
    %61 = vector.shape_cast %60 : vector<1x64x64xf32> to vector<64x64xf32>
    %cst_29 = arith.constant dense<0.000000e+00> : vector<112x64xf32>
    %62 = tpu.matmul %36, %61, %cst_29 {dimension_numbers = #tpu.dot_dimension_numbers<[1], [0], [0], [1], [0, 0, 1, 1], [], []>} : vector<112x64xf32>, vector<64x64xf32>, vector<112x64xf32> -> vector<112x64xf32>
    %63 = arith.addf %59, %62 : vector<112x64xf32>
    %c2_30 = arith.constant 2 : index
    %c0_31 = arith.constant 0 : index
    %c0_32 = arith.constant 0 : index
    %64 = vector.load %arg3[%c2_30, %c0_31, %c0_32] : memref<3x64x64xf32, #tpu.memory_space<vmem>>, vector<1x64x64xf32>
    %65 = vector.shape_cast %64 : vector<1x64x64xf32> to vector<64x64xf32>
    %cst_33 = arith.constant dense<0.000000e+00> : vector<112x64xf32>
    %66 = tpu.matmul %56, %65, %cst_33 {dimension_numbers = #tpu.dot_dimension_numbers<[1], [0], [0], [1], [0, 0, 1, 1], [], []>} : vector<112x64xf32>, vector<64x64xf32>, vector<112x64xf32> -> vector<112x64xf32>
    %67 = arith.addf %63, %66 : vector<112x64xf32>
    %c0_34 = arith.constant 0 : index
    %c0_35 = arith.constant 0 : index
    %68 = vector.load %arg4[%c0_34, %c0_35] : memref<1x64xf32, #tpu.memory_space<vmem>>, vector<1x64xf32>
    %69 = vector.broadcast %68 : vector<1x64xf32> to vector<112x64xf32>
    %70 = arith.addf %67, %69 : vector<112x64xf32>
    %cst_36 = arith.constant 0.000000e+00 : f32
    %71 = vector.broadcast %cst_36 : f32 to vector<112x64xf32>
    %72 = arith.maximumf %70, %71 : vector<112x64xf32>
    %73 = tpu.iota {dimensions = array<i32: 0>} : vector<56x112xi32>
    %74 = tpu.iota {dimensions = array<i32: 1>} : vector<56x112xi32>
    %c2_i32 = arith.constant 2 : i32
    %75 = vector.broadcast %c2_i32 : i32 to vector<56x112xi32>
    %76 = arith.muli %75, %73 : vector<56x112xi32>
    %77 = arith.cmpi eq, %74, %76 : vector<56x112xi32>
    %78 = arith.extui %77 : vector<56x112xi1> to vector<56x112xi32>
    %79 = arith.sitofp %78 : vector<56x112xi32> to vector<56x112xf32>
    %c2_i32_37 = arith.constant 2 : i32
    %80 = vector.broadcast %c2_i32_37 : i32 to vector<56x112xi32>
    %81 = arith.muli %80, %73 : vector<56x112xi32>
    %c1_i32_38 = arith.constant 1 : i32
    %82 = vector.broadcast %c1_i32_38 : i32 to vector<56x112xi32>
    %83 = arith.addi %81, %82 : vector<56x112xi32>
    %84 = arith.cmpi eq, %74, %83 : vector<56x112xi32>
    %85 = arith.extui %84 : vector<56x112xi1> to vector<56x112xi32>
    %86 = arith.sitofp %85 : vector<56x112xi32> to vector<56x112xf32>
    %cst_39 = arith.constant dense<0.000000e+00> : vector<56x64xf32>
    %87 = tpu.matmul %79, %72, %cst_39 {dimension_numbers = #tpu.dot_dimension_numbers<[1], [0], [0], [1], [0, 0, 1, 1], [], []>} : vector<56x112xf32>, vector<112x64xf32>, vector<56x64xf32> -> vector<56x64xf32>
    %cst_40 = arith.constant dense<0.000000e+00> : vector<56x64xf32>
    %88 = tpu.matmul %86, %72, %cst_40 {dimension_numbers = #tpu.dot_dimension_numbers<[1], [0], [0], [1], [0, 0, 1, 1], [], []>} : vector<56x112xf32>, vector<112x64xf32>, vector<56x64xf32> -> vector<56x64xf32>
    %89 = arith.maximumf %87, %88 : vector<56x64xf32>
    %90 = tpu.iota {dimensions = array<i32: 0>} : vector<56x56xi32>
    %91 = tpu.iota {dimensions = array<i32: 1>} : vector<56x56xi32>
    %c1_i32_41 = arith.constant 1 : i32
    %92 = vector.broadcast %c1_i32_41 : i32 to vector<56x56xi32>
    %93 = arith.subi %90, %92 : vector<56x56xi32>
    %94 = arith.cmpi eq, %91, %93 : vector<56x56xi32>
    %c1_i32_42 = arith.constant 1 : i32
    %95 = vector.broadcast %c1_i32_42 : i32 to vector<56x56xi32>
    %96 = arith.addi %90, %95 : vector<56x56xi32>
    %97 = arith.cmpi eq, %91, %96 : vector<56x56xi32>
    %c28_i32 = arith.constant 28 : i32
    %98 = vector.broadcast %c28_i32 : i32 to vector<56x56xi32>
    %99 = arith.cmpi ne, %90, %98 : vector<56x56xi32>
    %100 = arith.andi %94, %99 : vector<56x56xi1>
    %c27_i32 = arith.constant 27 : i32
    %101 = vector.broadcast %c27_i32 : i32 to vector<56x56xi32>
    %102 = arith.cmpi ne, %90, %101 : vector<56x56xi32>
    %103 = arith.andi %97, %102 : vector<56x56xi1>
    %104 = arith.extui %100 : vector<56x56xi1> to vector<56x56xi32>
    %105 = arith.sitofp %104 : vector<56x56xi32> to vector<56x56xf32>
    %106 = arith.extui %103 : vector<56x56xi1> to vector<56x56xi32>
    %107 = arith.sitofp %106 : vector<56x56xi32> to vector<56x56xf32>
    %cst_43 = arith.constant dense<0.000000e+00> : vector<56x64xf32>
    %108 = tpu.matmul %105, %89, %cst_43 {dimension_numbers = #tpu.dot_dimension_numbers<[1], [0], [0], [1], [0, 0, 1, 1], [], []>} : vector<56x56xf32>, vector<56x64xf32>, vector<56x64xf32> -> vector<56x64xf32>
    %cst_44 = arith.constant dense<0.000000e+00> : vector<56x64xf32>
    %109 = tpu.matmul %107, %89, %cst_44 {dimension_numbers = #tpu.dot_dimension_numbers<[1], [0], [0], [1], [0, 0, 1, 1], [], []>} : vector<56x56xf32>, vector<56x64xf32>, vector<56x64xf32> -> vector<56x64xf32>
    %c0_45 = arith.constant 0 : index
    %c0_46 = arith.constant 0 : index
    %c0_47 = arith.constant 0 : index
    %110 = vector.load %arg5[%c0_45, %c0_46, %c0_47] : memref<3x64x128xf32, #tpu.memory_space<vmem>>, vector<1x64x128xf32>
    %111 = vector.shape_cast %110 : vector<1x64x128xf32> to vector<64x128xf32>
    %cst_48 = arith.constant dense<0.000000e+00> : vector<56x128xf32>
    %112 = tpu.matmul %108, %111, %cst_48 {dimension_numbers = #tpu.dot_dimension_numbers<[1], [0], [0], [1], [0, 0, 1, 1], [], []>} : vector<56x64xf32>, vector<64x128xf32>, vector<56x128xf32> -> vector<56x128xf32>
    %c1_49 = arith.constant 1 : index
    %c0_50 = arith.constant 0 : index
    %c0_51 = arith.constant 0 : index
    %113 = vector.load %arg5[%c1_49, %c0_50, %c0_51] : memref<3x64x128xf32, #tpu.memory_space<vmem>>, vector<1x64x128xf32>
    %114 = vector.shape_cast %113 : vector<1x64x128xf32> to vector<64x128xf32>
    %cst_52 = arith.constant dense<0.000000e+00> : vector<56x128xf32>
    %115 = tpu.matmul %89, %114, %cst_52 {dimension_numbers = #tpu.dot_dimension_numbers<[1], [0], [0], [1], [0, 0, 1, 1], [], []>} : vector<56x64xf32>, vector<64x128xf32>, vector<56x128xf32> -> vector<56x128xf32>
    %116 = arith.addf %112, %115 : vector<56x128xf32>
    %c2_53 = arith.constant 2 : index
    %c0_54 = arith.constant 0 : index
    %c0_55 = arith.constant 0 : index
    %117 = vector.load %arg5[%c2_53, %c0_54, %c0_55] : memref<3x64x128xf32, #tpu.memory_space<vmem>>, vector<1x64x128xf32>
    %118 = vector.shape_cast %117 : vector<1x64x128xf32> to vector<64x128xf32>
    %cst_56 = arith.constant dense<0.000000e+00> : vector<56x128xf32>
    %119 = tpu.matmul %109, %118, %cst_56 {dimension_numbers = #tpu.dot_dimension_numbers<[1], [0], [0], [1], [0, 0, 1, 1], [], []>} : vector<56x64xf32>, vector<64x128xf32>, vector<56x128xf32> -> vector<56x128xf32>
    %120 = arith.addf %116, %119 : vector<56x128xf32>
    %c0_57 = arith.constant 0 : index
    %c0_58 = arith.constant 0 : index
    %121 = vector.load %arg6[%c0_57, %c0_58] : memref<1x128xf32, #tpu.memory_space<vmem>>, vector<1x128xf32>
    %122 = vector.broadcast %121 : vector<1x128xf32> to vector<56x128xf32>
    %123 = arith.addf %120, %122 : vector<56x128xf32>
    %cst_59 = arith.constant 0.000000e+00 : f32
    %124 = vector.broadcast %cst_59 : f32 to vector<56x128xf32>
    %125 = arith.maximumf %123, %124 : vector<56x128xf32>
    %126 = tpu.iota {dimensions = array<i32: 0>} : vector<56x56xi32>
    %127 = tpu.iota {dimensions = array<i32: 1>} : vector<56x56xi32>
    %c1_i32_60 = arith.constant 1 : i32
    %128 = vector.broadcast %c1_i32_60 : i32 to vector<56x56xi32>
    %129 = arith.subi %126, %128 : vector<56x56xi32>
    %130 = arith.cmpi eq, %127, %129 : vector<56x56xi32>
    %c1_i32_61 = arith.constant 1 : i32
    %131 = vector.broadcast %c1_i32_61 : i32 to vector<56x56xi32>
    %132 = arith.addi %126, %131 : vector<56x56xi32>
    %133 = arith.cmpi eq, %127, %132 : vector<56x56xi32>
    %c28_i32_62 = arith.constant 28 : i32
    %134 = vector.broadcast %c28_i32_62 : i32 to vector<56x56xi32>
    %135 = arith.cmpi ne, %126, %134 : vector<56x56xi32>
    %136 = arith.andi %130, %135 : vector<56x56xi1>
    %c27_i32_63 = arith.constant 27 : i32
    %137 = vector.broadcast %c27_i32_63 : i32 to vector<56x56xi32>
    %138 = arith.cmpi ne, %126, %137 : vector<56x56xi32>
    %139 = arith.andi %133, %138 : vector<56x56xi1>
    %140 = arith.extui %136 : vector<56x56xi1> to vector<56x56xi32>
    %141 = arith.sitofp %140 : vector<56x56xi32> to vector<56x56xf32>
    %142 = arith.extui %139 : vector<56x56xi1> to vector<56x56xi32>
    %143 = arith.sitofp %142 : vector<56x56xi32> to vector<56x56xf32>
    %cst_64 = arith.constant dense<0.000000e+00> : vector<56x128xf32>
    %144 = tpu.matmul %141, %125, %cst_64 {dimension_numbers = #tpu.dot_dimension_numbers<[1], [0], [0], [1], [0, 0, 1, 1], [], []>} : vector<56x56xf32>, vector<56x128xf32>, vector<56x128xf32> -> vector<56x128xf32>
    %cst_65 = arith.constant dense<0.000000e+00> : vector<56x128xf32>
    %145 = tpu.matmul %143, %125, %cst_65 {dimension_numbers = #tpu.dot_dimension_numbers<[1], [0], [0], [1], [0, 0, 1, 1], [], []>} : vector<56x56xf32>, vector<56x128xf32>, vector<56x128xf32> -> vector<56x128xf32>
    %c0_66 = arith.constant 0 : index
    %c0_67 = arith.constant 0 : index
    %c0_68 = arith.constant 0 : index
    %146 = vector.load %arg7[%c0_66, %c0_67, %c0_68] : memref<3x128x128xf32, #tpu.memory_space<vmem>>, vector<1x128x128xf32>
    %147 = vector.shape_cast %146 : vector<1x128x128xf32> to vector<128x128xf32>
    %cst_69 = arith.constant dense<0.000000e+00> : vector<56x128xf32>
    %148 = tpu.matmul %144, %147, %cst_69 {dimension_numbers = #tpu.dot_dimension_numbers<[1], [0], [0], [1], [0, 0, 1, 1], [], []>} : vector<56x128xf32>, vector<128x128xf32>, vector<56x128xf32> -> vector<56x128xf32>
    %c1_70 = arith.constant 1 : index
    %c0_71 = arith.constant 0 : index
    %c0_72 = arith.constant 0 : index
    %149 = vector.load %arg7[%c1_70, %c0_71, %c0_72] : memref<3x128x128xf32, #tpu.memory_space<vmem>>, vector<1x128x128xf32>
    %150 = vector.shape_cast %149 : vector<1x128x128xf32> to vector<128x128xf32>
    %cst_73 = arith.constant dense<0.000000e+00> : vector<56x128xf32>
    %151 = tpu.matmul %125, %150, %cst_73 {dimension_numbers = #tpu.dot_dimension_numbers<[1], [0], [0], [1], [0, 0, 1, 1], [], []>} : vector<56x128xf32>, vector<128x128xf32>, vector<56x128xf32> -> vector<56x128xf32>
    %152 = arith.addf %148, %151 : vector<56x128xf32>
    %c2_74 = arith.constant 2 : index
    %c0_75 = arith.constant 0 : index
    %c0_76 = arith.constant 0 : index
    %153 = vector.load %arg7[%c2_74, %c0_75, %c0_76] : memref<3x128x128xf32, #tpu.memory_space<vmem>>, vector<1x128x128xf32>
    %154 = vector.shape_cast %153 : vector<1x128x128xf32> to vector<128x128xf32>
    %cst_77 = arith.constant dense<0.000000e+00> : vector<56x128xf32>
    %155 = tpu.matmul %145, %154, %cst_77 {dimension_numbers = #tpu.dot_dimension_numbers<[1], [0], [0], [1], [0, 0, 1, 1], [], []>} : vector<56x128xf32>, vector<128x128xf32>, vector<56x128xf32> -> vector<56x128xf32>
    %156 = arith.addf %152, %155 : vector<56x128xf32>
    %c0_78 = arith.constant 0 : index
    %c0_79 = arith.constant 0 : index
    %157 = vector.load %arg8[%c0_78, %c0_79] : memref<1x128xf32, #tpu.memory_space<vmem>>, vector<1x128xf32>
    %158 = vector.broadcast %157 : vector<1x128xf32> to vector<56x128xf32>
    %159 = arith.addf %156, %158 : vector<56x128xf32>
    %cst_80 = arith.constant 0.000000e+00 : f32
    %160 = vector.broadcast %cst_80 : f32 to vector<56x128xf32>
    %161 = arith.maximumf %159, %160 : vector<56x128xf32>
    %162 = tpu.iota {dimensions = array<i32: 0>} : vector<28x56xi32>
    %163 = tpu.iota {dimensions = array<i32: 1>} : vector<28x56xi32>
    %c2_i32_81 = arith.constant 2 : i32
    %164 = vector.broadcast %c2_i32_81 : i32 to vector<28x56xi32>
    %165 = arith.muli %164, %162 : vector<28x56xi32>
    %166 = arith.cmpi eq, %163, %165 : vector<28x56xi32>
    %167 = arith.extui %166 : vector<28x56xi1> to vector<28x56xi32>
    %168 = arith.sitofp %167 : vector<28x56xi32> to vector<28x56xf32>
    %c2_i32_82 = arith.constant 2 : i32
    %169 = vector.broadcast %c2_i32_82 : i32 to vector<28x56xi32>
    %170 = arith.muli %169, %162 : vector<28x56xi32>
    %c1_i32_83 = arith.constant 1 : i32
    %171 = vector.broadcast %c1_i32_83 : i32 to vector<28x56xi32>
    %172 = arith.addi %170, %171 : vector<28x56xi32>
    %173 = arith.cmpi eq, %163, %172 : vector<28x56xi32>
    %174 = arith.extui %173 : vector<28x56xi1> to vector<28x56xi32>
    %175 = arith.sitofp %174 : vector<28x56xi32> to vector<28x56xf32>
    %cst_84 = arith.constant dense<0.000000e+00> : vector<28x128xf32>
    %176 = tpu.matmul %168, %161, %cst_84 {dimension_numbers = #tpu.dot_dimension_numbers<[1], [0], [0], [1], [0, 0, 1, 1], [], []>} : vector<28x56xf32>, vector<56x128xf32>, vector<28x128xf32> -> vector<28x128xf32>
    %cst_85 = arith.constant dense<0.000000e+00> : vector<28x128xf32>
    %177 = tpu.matmul %175, %161, %cst_85 {dimension_numbers = #tpu.dot_dimension_numbers<[1], [0], [0], [1], [0, 0, 1, 1], [], []>} : vector<28x56xf32>, vector<56x128xf32>, vector<28x128xf32> -> vector<28x128xf32>
    %178 = arith.maximumf %176, %177 : vector<28x128xf32>
    %179 = tpu.iota {dimensions = array<i32: 0>} : vector<28x28xi32>
    %180 = tpu.iota {dimensions = array<i32: 1>} : vector<28x28xi32>
    %c1_i32_86 = arith.constant 1 : i32
    %181 = vector.broadcast %c1_i32_86 : i32 to vector<28x28xi32>
    %182 = arith.subi %179, %181 : vector<28x28xi32>
    %183 = arith.cmpi eq, %180, %182 : vector<28x28xi32>
    %c1_i32_87 = arith.constant 1 : i32
    %184 = vector.broadcast %c1_i32_87 : i32 to vector<28x28xi32>
    %185 = arith.addi %179, %184 : vector<28x28xi32>
    %186 = arith.cmpi eq, %180, %185 : vector<28x28xi32>
    %c14_i32 = arith.constant 14 : i32
    %187 = vector.broadcast %c14_i32 : i32 to vector<28x28xi32>
    %188 = arith.cmpi ne, %179, %187 : vector<28x28xi32>
    %189 = arith.andi %183, %188 : vector<28x28xi1>
    %c13_i32 = arith.constant 13 : i32
    %190 = vector.broadcast %c13_i32 : i32 to vector<28x28xi32>
    %191 = arith.cmpi ne, %179, %190 : vector<28x28xi32>
    %192 = arith.andi %186, %191 : vector<28x28xi1>
    %193 = arith.extui %189 : vector<28x28xi1> to vector<28x28xi32>
    %194 = arith.sitofp %193 : vector<28x28xi32> to vector<28x28xf32>
    %195 = arith.extui %192 : vector<28x28xi1> to vector<28x28xi32>
    %196 = arith.sitofp %195 : vector<28x28xi32> to vector<28x28xf32>
    %cst_88 = arith.constant dense<0.000000e+00> : vector<28x128xf32>
    %197 = tpu.matmul %194, %178, %cst_88 {dimension_numbers = #tpu.dot_dimension_numbers<[1], [0], [0], [1], [0, 0, 1, 1], [], []>} : vector<28x28xf32>, vector<28x128xf32>, vector<28x128xf32> -> vector<28x128xf32>
    %cst_89 = arith.constant dense<0.000000e+00> : vector<28x128xf32>
    %198 = tpu.matmul %196, %178, %cst_89 {dimension_numbers = #tpu.dot_dimension_numbers<[1], [0], [0], [1], [0, 0, 1, 1], [], []>} : vector<28x28xf32>, vector<28x128xf32>, vector<28x128xf32> -> vector<28x128xf32>
    %c0_90 = arith.constant 0 : index
    %c0_91 = arith.constant 0 : index
    %c0_92 = arith.constant 0 : index
    %199 = vector.load %arg9[%c0_90, %c0_91, %c0_92] : memref<3x128x256xf32, #tpu.memory_space<vmem>>, vector<1x128x256xf32>
    %200 = vector.shape_cast %199 : vector<1x128x256xf32> to vector<128x256xf32>
    %cst_93 = arith.constant dense<0.000000e+00> : vector<28x256xf32>
    %201 = tpu.matmul %197, %200, %cst_93 {dimension_numbers = #tpu.dot_dimension_numbers<[1], [0], [0], [1], [0, 0, 1, 1], [], []>} : vector<28x128xf32>, vector<128x256xf32>, vector<28x256xf32> -> vector<28x256xf32>
    %c1_94 = arith.constant 1 : index
    %c0_95 = arith.constant 0 : index
    %c0_96 = arith.constant 0 : index
    %202 = vector.load %arg9[%c1_94, %c0_95, %c0_96] : memref<3x128x256xf32, #tpu.memory_space<vmem>>, vector<1x128x256xf32>
    %203 = vector.shape_cast %202 : vector<1x128x256xf32> to vector<128x256xf32>
    %cst_97 = arith.constant dense<0.000000e+00> : vector<28x256xf32>
    %204 = tpu.matmul %178, %203, %cst_97 {dimension_numbers = #tpu.dot_dimension_numbers<[1], [0], [0], [1], [0, 0, 1, 1], [], []>} : vector<28x128xf32>, vector<128x256xf32>, vector<28x256xf32> -> vector<28x256xf32>
    %205 = arith.addf %201, %204 : vector<28x256xf32>
    %c2_98 = arith.constant 2 : index
    %c0_99 = arith.constant 0 : index
    %c0_100 = arith.constant 0 : index
    %206 = vector.load %arg9[%c2_98, %c0_99, %c0_100] : memref<3x128x256xf32, #tpu.memory_space<vmem>>, vector<1x128x256xf32>
    %207 = vector.shape_cast %206 : vector<1x128x256xf32> to vector<128x256xf32>
    %cst_101 = arith.constant dense<0.000000e+00> : vector<28x256xf32>
    %208 = tpu.matmul %198, %207, %cst_101 {dimension_numbers = #tpu.dot_dimension_numbers<[1], [0], [0], [1], [0, 0, 1, 1], [], []>} : vector<28x128xf32>, vector<128x256xf32>, vector<28x256xf32> -> vector<28x256xf32>
    %209 = arith.addf %205, %208 : vector<28x256xf32>
    %c0_102 = arith.constant 0 : index
    %c0_103 = arith.constant 0 : index
    %210 = vector.load %arg10[%c0_102, %c0_103] : memref<1x256xf32, #tpu.memory_space<vmem>>, vector<1x256xf32>
    %211 = vector.broadcast %210 : vector<1x256xf32> to vector<28x256xf32>
    %212 = arith.addf %209, %211 : vector<28x256xf32>
    %cst_104 = arith.constant 0.000000e+00 : f32
    %213 = vector.broadcast %cst_104 : f32 to vector<28x256xf32>
    %214 = arith.maximumf %212, %213 : vector<28x256xf32>
    %215 = tpu.iota {dimensions = array<i32: 0>} : vector<28x28xi32>
    %216 = tpu.iota {dimensions = array<i32: 1>} : vector<28x28xi32>
    %c1_i32_105 = arith.constant 1 : i32
    %217 = vector.broadcast %c1_i32_105 : i32 to vector<28x28xi32>
    %218 = arith.subi %215, %217 : vector<28x28xi32>
    %219 = arith.cmpi eq, %216, %218 : vector<28x28xi32>
    %c1_i32_106 = arith.constant 1 : i32
    %220 = vector.broadcast %c1_i32_106 : i32 to vector<28x28xi32>
    %221 = arith.addi %215, %220 : vector<28x28xi32>
    %222 = arith.cmpi eq, %216, %221 : vector<28x28xi32>
    %c14_i32_107 = arith.constant 14 : i32
    %223 = vector.broadcast %c14_i32_107 : i32 to vector<28x28xi32>
    %224 = arith.cmpi ne, %215, %223 : vector<28x28xi32>
    %225 = arith.andi %219, %224 : vector<28x28xi1>
    %c13_i32_108 = arith.constant 13 : i32
    %226 = vector.broadcast %c13_i32_108 : i32 to vector<28x28xi32>
    %227 = arith.cmpi ne, %215, %226 : vector<28x28xi32>
    %228 = arith.andi %222, %227 : vector<28x28xi1>
    %229 = arith.extui %225 : vector<28x28xi1> to vector<28x28xi32>
    %230 = arith.sitofp %229 : vector<28x28xi32> to vector<28x28xf32>
    %231 = arith.extui %228 : vector<28x28xi1> to vector<28x28xi32>
    %232 = arith.sitofp %231 : vector<28x28xi32> to vector<28x28xf32>
    %cst_109 = arith.constant dense<0.000000e+00> : vector<28x256xf32>
    %233 = tpu.matmul %230, %214, %cst_109 {dimension_numbers = #tpu.dot_dimension_numbers<[1], [0], [0], [1], [0, 0, 1, 1], [], []>} : vector<28x28xf32>, vector<28x256xf32>, vector<28x256xf32> -> vector<28x256xf32>
    %cst_110 = arith.constant dense<0.000000e+00> : vector<28x256xf32>
    %234 = tpu.matmul %232, %214, %cst_110 {dimension_numbers = #tpu.dot_dimension_numbers<[1], [0], [0], [1], [0, 0, 1, 1], [], []>} : vector<28x28xf32>, vector<28x256xf32>, vector<28x256xf32> -> vector<28x256xf32>
    %c0_111 = arith.constant 0 : index
    %c0_112 = arith.constant 0 : index
    %c0_113 = arith.constant 0 : index
    %235 = vector.load %arg11[%c0_111, %c0_112, %c0_113] : memref<3x256x256xf32, #tpu.memory_space<vmem>>, vector<1x256x256xf32>
    %236 = vector.shape_cast %235 : vector<1x256x256xf32> to vector<256x256xf32>
    %cst_114 = arith.constant dense<0.000000e+00> : vector<28x256xf32>
    %237 = tpu.matmul %233, %236, %cst_114 {dimension_numbers = #tpu.dot_dimension_numbers<[1], [0], [0], [1], [0, 0, 1, 1], [], []>} : vector<28x256xf32>, vector<256x256xf32>, vector<28x256xf32> -> vector<28x256xf32>
    %c1_115 = arith.constant 1 : index
    %c0_116 = arith.constant 0 : index
    %c0_117 = arith.constant 0 : index
    %238 = vector.load %arg11[%c1_115, %c0_116, %c0_117] : memref<3x256x256xf32, #tpu.memory_space<vmem>>, vector<1x256x256xf32>
    %239 = vector.shape_cast %238 : vector<1x256x256xf32> to vector<256x256xf32>
    %cst_118 = arith.constant dense<0.000000e+00> : vector<28x256xf32>
    %240 = tpu.matmul %214, %239, %cst_118 {dimension_numbers = #tpu.dot_dimension_numbers<[1], [0], [0], [1], [0, 0, 1, 1], [], []>} : vector<28x256xf32>, vector<256x256xf32>, vector<28x256xf32> -> vector<28x256xf32>
    %241 = arith.addf %237, %240 : vector<28x256xf32>
    %c2_119 = arith.constant 2 : index
    %c0_120 = arith.constant 0 : index
    %c0_121 = arith.constant 0 : index
    %242 = vector.load %arg11[%c2_119, %c0_120, %c0_121] : memref<3x256x256xf32, #tpu.memory_space<vmem>>, vector<1x256x256xf32>
    %243 = vector.shape_cast %242 : vector<1x256x256xf32> to vector<256x256xf32>
    %cst_122 = arith.constant dense<0.000000e+00> : vector<28x256xf32>
    %244 = tpu.matmul %234, %243, %cst_122 {dimension_numbers = #tpu.dot_dimension_numbers<[1], [0], [0], [1], [0, 0, 1, 1], [], []>} : vector<28x256xf32>, vector<256x256xf32>, vector<28x256xf32> -> vector<28x256xf32>
    %245 = arith.addf %241, %244 : vector<28x256xf32>
    %c0_123 = arith.constant 0 : index
    %c0_124 = arith.constant 0 : index
    %246 = vector.load %arg12[%c0_123, %c0_124] : memref<1x256xf32, #tpu.memory_space<vmem>>, vector<1x256xf32>
    %247 = vector.broadcast %246 : vector<1x256xf32> to vector<28x256xf32>
    %248 = arith.addf %245, %247 : vector<28x256xf32>
    %cst_125 = arith.constant 0.000000e+00 : f32
    %249 = vector.broadcast %cst_125 : f32 to vector<28x256xf32>
    %250 = arith.maximumf %248, %249 : vector<28x256xf32>
    %251 = tpu.iota {dimensions = array<i32: 0>} : vector<2x28xi32>
    %252 = tpu.iota {dimensions = array<i32: 1>} : vector<2x28xi32>
    %cst_126 = arith.constant 0.000000e+00 : f32
    %253 = vector.broadcast %cst_126 : f32 to vector<2x40xf32>
    %c14_i32_127 = arith.constant 14 : i32
    %254 = vector.broadcast %c14_i32_127 : i32 to vector<2x28xi32>
    %255 = arith.muli %251, %254 : vector<2x28xi32>
    %c0_i32 = arith.constant 0 : i32
    %256 = vector.broadcast %c0_i32 : i32 to vector<2x28xi32>
    %257 = arith.addi %255, %256 : vector<2x28xi32>
    %258 = arith.cmpi eq, %252, %257 : vector<2x28xi32>
    %259 = arith.extui %258 : vector<2x28xi1> to vector<2x28xi32>
    %260 = arith.sitofp %259 : vector<2x28xi32> to vector<2x28xf32>
    %cst_128 = arith.constant dense<0.000000e+00> : vector<2x256xf32>
    %261 = tpu.matmul %260, %250, %cst_128 {dimension_numbers = #tpu.dot_dimension_numbers<[1], [0], [0], [1], [0, 0, 1, 1], [], []>} : vector<2x28xf32>, vector<28x256xf32>, vector<2x256xf32> -> vector<2x256xf32>
    %c0_129 = arith.constant 0 : index
    %c0_130 = arith.constant 0 : index
    %c0_131 = arith.constant 0 : index
    %262 = vector.load %arg13[%c0_129, %c0_130, %c0_131] : memref<14x256x40xf32, #tpu.memory_space<vmem>>, vector<1x256x40xf32>
    %263 = vector.shape_cast %262 : vector<1x256x40xf32> to vector<256x40xf32>
    %cst_132 = arith.constant dense<0.000000e+00> : vector<2x40xf32>
    %264 = tpu.matmul %261, %263, %cst_132 {dimension_numbers = #tpu.dot_dimension_numbers<[1], [0], [0], [1], [0, 0, 1, 1], [], []>} : vector<2x256xf32>, vector<256x40xf32>, vector<2x40xf32> -> vector<2x40xf32>
    %265 = arith.addf %253, %264 : vector<2x40xf32>
    %c14_i32_133 = arith.constant 14 : i32
    %266 = vector.broadcast %c14_i32_133 : i32 to vector<2x28xi32>
    %267 = arith.muli %251, %266 : vector<2x28xi32>
    %c1_i32_134 = arith.constant 1 : i32
    %268 = vector.broadcast %c1_i32_134 : i32 to vector<2x28xi32>
    %269 = arith.addi %267, %268 : vector<2x28xi32>
    %270 = arith.cmpi eq, %252, %269 : vector<2x28xi32>
    %271 = arith.extui %270 : vector<2x28xi1> to vector<2x28xi32>
    %272 = arith.sitofp %271 : vector<2x28xi32> to vector<2x28xf32>
    %cst_135 = arith.constant dense<0.000000e+00> : vector<2x256xf32>
    %273 = tpu.matmul %272, %250, %cst_135 {dimension_numbers = #tpu.dot_dimension_numbers<[1], [0], [0], [1], [0, 0, 1, 1], [], []>} : vector<2x28xf32>, vector<28x256xf32>, vector<2x256xf32> -> vector<2x256xf32>
    %c1_136 = arith.constant 1 : index
    %c0_137 = arith.constant 0 : index
    %c0_138 = arith.constant 0 : index
    %274 = vector.load %arg13[%c1_136, %c0_137, %c0_138] : memref<14x256x40xf32, #tpu.memory_space<vmem>>, vector<1x256x40xf32>
    %275 = vector.shape_cast %274 : vector<1x256x40xf32> to vector<256x40xf32>
    %cst_139 = arith.constant dense<0.000000e+00> : vector<2x40xf32>
    %276 = tpu.matmul %273, %275, %cst_139 {dimension_numbers = #tpu.dot_dimension_numbers<[1], [0], [0], [1], [0, 0, 1, 1], [], []>} : vector<2x256xf32>, vector<256x40xf32>, vector<2x40xf32> -> vector<2x40xf32>
    %277 = arith.addf %265, %276 : vector<2x40xf32>
    %c14_i32_140 = arith.constant 14 : i32
    %278 = vector.broadcast %c14_i32_140 : i32 to vector<2x28xi32>
    %279 = arith.muli %251, %278 : vector<2x28xi32>
    %c2_i32_141 = arith.constant 2 : i32
    %280 = vector.broadcast %c2_i32_141 : i32 to vector<2x28xi32>
    %281 = arith.addi %279, %280 : vector<2x28xi32>
    %282 = arith.cmpi eq, %252, %281 : vector<2x28xi32>
    %283 = arith.extui %282 : vector<2x28xi1> to vector<2x28xi32>
    %284 = arith.sitofp %283 : vector<2x28xi32> to vector<2x28xf32>
    %cst_142 = arith.constant dense<0.000000e+00> : vector<2x256xf32>
    %285 = tpu.matmul %284, %250, %cst_142 {dimension_numbers = #tpu.dot_dimension_numbers<[1], [0], [0], [1], [0, 0, 1, 1], [], []>} : vector<2x28xf32>, vector<28x256xf32>, vector<2x256xf32> -> vector<2x256xf32>
    %c2_143 = arith.constant 2 : index
    %c0_144 = arith.constant 0 : index
    %c0_145 = arith.constant 0 : index
    %286 = vector.load %arg13[%c2_143, %c0_144, %c0_145] : memref<14x256x40xf32, #tpu.memory_space<vmem>>, vector<1x256x40xf32>
    %287 = vector.shape_cast %286 : vector<1x256x40xf32> to vector<256x40xf32>
    %cst_146 = arith.constant dense<0.000000e+00> : vector<2x40xf32>
    %288 = tpu.matmul %285, %287, %cst_146 {dimension_numbers = #tpu.dot_dimension_numbers<[1], [0], [0], [1], [0, 0, 1, 1], [], []>} : vector<2x256xf32>, vector<256x40xf32>, vector<2x40xf32> -> vector<2x40xf32>
    %289 = arith.addf %277, %288 : vector<2x40xf32>
    %c14_i32_147 = arith.constant 14 : i32
    %290 = vector.broadcast %c14_i32_147 : i32 to vector<2x28xi32>
    %291 = arith.muli %251, %290 : vector<2x28xi32>
    %c3_i32 = arith.constant 3 : i32
    %292 = vector.broadcast %c3_i32 : i32 to vector<2x28xi32>
    %293 = arith.addi %291, %292 : vector<2x28xi32>
    %294 = arith.cmpi eq, %252, %293 : vector<2x28xi32>
    %295 = arith.extui %294 : vector<2x28xi1> to vector<2x28xi32>
    %296 = arith.sitofp %295 : vector<2x28xi32> to vector<2x28xf32>
    %cst_148 = arith.constant dense<0.000000e+00> : vector<2x256xf32>
    %297 = tpu.matmul %296, %250, %cst_148 {dimension_numbers = #tpu.dot_dimension_numbers<[1], [0], [0], [1], [0, 0, 1, 1], [], []>} : vector<2x28xf32>, vector<28x256xf32>, vector<2x256xf32> -> vector<2x256xf32>
    %c3 = arith.constant 3 : index
    %c0_149 = arith.constant 0 : index
    %c0_150 = arith.constant 0 : index
    %298 = vector.load %arg13[%c3, %c0_149, %c0_150] : memref<14x256x40xf32, #tpu.memory_space<vmem>>, vector<1x256x40xf32>
    %299 = vector.shape_cast %298 : vector<1x256x40xf32> to vector<256x40xf32>
    %cst_151 = arith.constant dense<0.000000e+00> : vector<2x40xf32>
    %300 = tpu.matmul %297, %299, %cst_151 {dimension_numbers = #tpu.dot_dimension_numbers<[1], [0], [0], [1], [0, 0, 1, 1], [], []>} : vector<2x256xf32>, vector<256x40xf32>, vector<2x40xf32> -> vector<2x40xf32>
    %301 = arith.addf %289, %300 : vector<2x40xf32>
    %c14_i32_152 = arith.constant 14 : i32
    %302 = vector.broadcast %c14_i32_152 : i32 to vector<2x28xi32>
    %303 = arith.muli %251, %302 : vector<2x28xi32>
    %c4_i32 = arith.constant 4 : i32
    %304 = vector.broadcast %c4_i32 : i32 to vector<2x28xi32>
    %305 = arith.addi %303, %304 : vector<2x28xi32>
    %306 = arith.cmpi eq, %252, %305 : vector<2x28xi32>
    %307 = arith.extui %306 : vector<2x28xi1> to vector<2x28xi32>
    %308 = arith.sitofp %307 : vector<2x28xi32> to vector<2x28xf32>
    %cst_153 = arith.constant dense<0.000000e+00> : vector<2x256xf32>
    %309 = tpu.matmul %308, %250, %cst_153 {dimension_numbers = #tpu.dot_dimension_numbers<[1], [0], [0], [1], [0, 0, 1, 1], [], []>} : vector<2x28xf32>, vector<28x256xf32>, vector<2x256xf32> -> vector<2x256xf32>
    %c4 = arith.constant 4 : index
    %c0_154 = arith.constant 0 : index
    %c0_155 = arith.constant 0 : index
    %310 = vector.load %arg13[%c4, %c0_154, %c0_155] : memref<14x256x40xf32, #tpu.memory_space<vmem>>, vector<1x256x40xf32>
    %311 = vector.shape_cast %310 : vector<1x256x40xf32> to vector<256x40xf32>
    %cst_156 = arith.constant dense<0.000000e+00> : vector<2x40xf32>
    %312 = tpu.matmul %309, %311, %cst_156 {dimension_numbers = #tpu.dot_dimension_numbers<[1], [0], [0], [1], [0, 0, 1, 1], [], []>} : vector<2x256xf32>, vector<256x40xf32>, vector<2x40xf32> -> vector<2x40xf32>
    %313 = arith.addf %301, %312 : vector<2x40xf32>
    %c14_i32_157 = arith.constant 14 : i32
    %314 = vector.broadcast %c14_i32_157 : i32 to vector<2x28xi32>
    %315 = arith.muli %251, %314 : vector<2x28xi32>
    %c5_i32 = arith.constant 5 : i32
    %316 = vector.broadcast %c5_i32 : i32 to vector<2x28xi32>
    %317 = arith.addi %315, %316 : vector<2x28xi32>
    %318 = arith.cmpi eq, %252, %317 : vector<2x28xi32>
    %319 = arith.extui %318 : vector<2x28xi1> to vector<2x28xi32>
    %320 = arith.sitofp %319 : vector<2x28xi32> to vector<2x28xf32>
    %cst_158 = arith.constant dense<0.000000e+00> : vector<2x256xf32>
    %321 = tpu.matmul %320, %250, %cst_158 {dimension_numbers = #tpu.dot_dimension_numbers<[1], [0], [0], [1], [0, 0, 1, 1], [], []>} : vector<2x28xf32>, vector<28x256xf32>, vector<2x256xf32> -> vector<2x256xf32>
    %c5 = arith.constant 5 : index
    %c0_159 = arith.constant 0 : index
    %c0_160 = arith.constant 0 : index
    %322 = vector.load %arg13[%c5, %c0_159, %c0_160] : memref<14x256x40xf32, #tpu.memory_space<vmem>>, vector<1x256x40xf32>
    %323 = vector.shape_cast %322 : vector<1x256x40xf32> to vector<256x40xf32>
    %cst_161 = arith.constant dense<0.000000e+00> : vector<2x40xf32>
    %324 = tpu.matmul %321, %323, %cst_161 {dimension_numbers = #tpu.dot_dimension_numbers<[1], [0], [0], [1], [0, 0, 1, 1], [], []>} : vector<2x256xf32>, vector<256x40xf32>, vector<2x40xf32> -> vector<2x40xf32>
    %325 = arith.addf %313, %324 : vector<2x40xf32>
    %c14_i32_162 = arith.constant 14 : i32
    %326 = vector.broadcast %c14_i32_162 : i32 to vector<2x28xi32>
    %327 = arith.muli %251, %326 : vector<2x28xi32>
    %c6_i32 = arith.constant 6 : i32
    %328 = vector.broadcast %c6_i32 : i32 to vector<2x28xi32>
    %329 = arith.addi %327, %328 : vector<2x28xi32>
    %330 = arith.cmpi eq, %252, %329 : vector<2x28xi32>
    %331 = arith.extui %330 : vector<2x28xi1> to vector<2x28xi32>
    %332 = arith.sitofp %331 : vector<2x28xi32> to vector<2x28xf32>
    %cst_163 = arith.constant dense<0.000000e+00> : vector<2x256xf32>
    %333 = tpu.matmul %332, %250, %cst_163 {dimension_numbers = #tpu.dot_dimension_numbers<[1], [0], [0], [1], [0, 0, 1, 1], [], []>} : vector<2x28xf32>, vector<28x256xf32>, vector<2x256xf32> -> vector<2x256xf32>
    %c6 = arith.constant 6 : index
    %c0_164 = arith.constant 0 : index
    %c0_165 = arith.constant 0 : index
    %334 = vector.load %arg13[%c6, %c0_164, %c0_165] : memref<14x256x40xf32, #tpu.memory_space<vmem>>, vector<1x256x40xf32>
    %335 = vector.shape_cast %334 : vector<1x256x40xf32> to vector<256x40xf32>
    %cst_166 = arith.constant dense<0.000000e+00> : vector<2x40xf32>
    %336 = tpu.matmul %333, %335, %cst_166 {dimension_numbers = #tpu.dot_dimension_numbers<[1], [0], [0], [1], [0, 0, 1, 1], [], []>} : vector<2x256xf32>, vector<256x40xf32>, vector<2x40xf32> -> vector<2x40xf32>
    %337 = arith.addf %325, %336 : vector<2x40xf32>
    %c14_i32_167 = arith.constant 14 : i32
    %338 = vector.broadcast %c14_i32_167 : i32 to vector<2x28xi32>
    %339 = arith.muli %251, %338 : vector<2x28xi32>
    %c7_i32 = arith.constant 7 : i32
    %340 = vector.broadcast %c7_i32 : i32 to vector<2x28xi32>
    %341 = arith.addi %339, %340 : vector<2x28xi32>
    %342 = arith.cmpi eq, %252, %341 : vector<2x28xi32>
    %343 = arith.extui %342 : vector<2x28xi1> to vector<2x28xi32>
    %344 = arith.sitofp %343 : vector<2x28xi32> to vector<2x28xf32>
    %cst_168 = arith.constant dense<0.000000e+00> : vector<2x256xf32>
    %345 = tpu.matmul %344, %250, %cst_168 {dimension_numbers = #tpu.dot_dimension_numbers<[1], [0], [0], [1], [0, 0, 1, 1], [], []>} : vector<2x28xf32>, vector<28x256xf32>, vector<2x256xf32> -> vector<2x256xf32>
    %c7 = arith.constant 7 : index
    %c0_169 = arith.constant 0 : index
    %c0_170 = arith.constant 0 : index
    %346 = vector.load %arg13[%c7, %c0_169, %c0_170] : memref<14x256x40xf32, #tpu.memory_space<vmem>>, vector<1x256x40xf32>
    %347 = vector.shape_cast %346 : vector<1x256x40xf32> to vector<256x40xf32>
    %cst_171 = arith.constant dense<0.000000e+00> : vector<2x40xf32>
    %348 = tpu.matmul %345, %347, %cst_171 {dimension_numbers = #tpu.dot_dimension_numbers<[1], [0], [0], [1], [0, 0, 1, 1], [], []>} : vector<2x256xf32>, vector<256x40xf32>, vector<2x40xf32> -> vector<2x40xf32>
    %349 = arith.addf %337, %348 : vector<2x40xf32>
    %c14_i32_172 = arith.constant 14 : i32
    %350 = vector.broadcast %c14_i32_172 : i32 to vector<2x28xi32>
    %351 = arith.muli %251, %350 : vector<2x28xi32>
    %c8_i32 = arith.constant 8 : i32
    %352 = vector.broadcast %c8_i32 : i32 to vector<2x28xi32>
    %353 = arith.addi %351, %352 : vector<2x28xi32>
    %354 = arith.cmpi eq, %252, %353 : vector<2x28xi32>
    %355 = arith.extui %354 : vector<2x28xi1> to vector<2x28xi32>
    %356 = arith.sitofp %355 : vector<2x28xi32> to vector<2x28xf32>
    %cst_173 = arith.constant dense<0.000000e+00> : vector<2x256xf32>
    %357 = tpu.matmul %356, %250, %cst_173 {dimension_numbers = #tpu.dot_dimension_numbers<[1], [0], [0], [1], [0, 0, 1, 1], [], []>} : vector<2x28xf32>, vector<28x256xf32>, vector<2x256xf32> -> vector<2x256xf32>
    %c8 = arith.constant 8 : index
    %c0_174 = arith.constant 0 : index
    %c0_175 = arith.constant 0 : index
    %358 = vector.load %arg13[%c8, %c0_174, %c0_175] : memref<14x256x40xf32, #tpu.memory_space<vmem>>, vector<1x256x40xf32>
    %359 = vector.shape_cast %358 : vector<1x256x40xf32> to vector<256x40xf32>
    %cst_176 = arith.constant dense<0.000000e+00> : vector<2x40xf32>
    %360 = tpu.matmul %357, %359, %cst_176 {dimension_numbers = #tpu.dot_dimension_numbers<[1], [0], [0], [1], [0, 0, 1, 1], [], []>} : vector<2x256xf32>, vector<256x40xf32>, vector<2x40xf32> -> vector<2x40xf32>
    %361 = arith.addf %349, %360 : vector<2x40xf32>
    %c14_i32_177 = arith.constant 14 : i32
    %362 = vector.broadcast %c14_i32_177 : i32 to vector<2x28xi32>
    %363 = arith.muli %251, %362 : vector<2x28xi32>
    %c9_i32 = arith.constant 9 : i32
    %364 = vector.broadcast %c9_i32 : i32 to vector<2x28xi32>
    %365 = arith.addi %363, %364 : vector<2x28xi32>
    %366 = arith.cmpi eq, %252, %365 : vector<2x28xi32>
    %367 = arith.extui %366 : vector<2x28xi1> to vector<2x28xi32>
    %368 = arith.sitofp %367 : vector<2x28xi32> to vector<2x28xf32>
    %cst_178 = arith.constant dense<0.000000e+00> : vector<2x256xf32>
    %369 = tpu.matmul %368, %250, %cst_178 {dimension_numbers = #tpu.dot_dimension_numbers<[1], [0], [0], [1], [0, 0, 1, 1], [], []>} : vector<2x28xf32>, vector<28x256xf32>, vector<2x256xf32> -> vector<2x256xf32>
    %c9 = arith.constant 9 : index
    %c0_179 = arith.constant 0 : index
    %c0_180 = arith.constant 0 : index
    %370 = vector.load %arg13[%c9, %c0_179, %c0_180] : memref<14x256x40xf32, #tpu.memory_space<vmem>>, vector<1x256x40xf32>
    %371 = vector.shape_cast %370 : vector<1x256x40xf32> to vector<256x40xf32>
    %cst_181 = arith.constant dense<0.000000e+00> : vector<2x40xf32>
    %372 = tpu.matmul %369, %371, %cst_181 {dimension_numbers = #tpu.dot_dimension_numbers<[1], [0], [0], [1], [0, 0, 1, 1], [], []>} : vector<2x256xf32>, vector<256x40xf32>, vector<2x40xf32> -> vector<2x40xf32>
    %373 = arith.addf %361, %372 : vector<2x40xf32>
    %c14_i32_182 = arith.constant 14 : i32
    %374 = vector.broadcast %c14_i32_182 : i32 to vector<2x28xi32>
    %375 = arith.muli %251, %374 : vector<2x28xi32>
    %c10_i32 = arith.constant 10 : i32
    %376 = vector.broadcast %c10_i32 : i32 to vector<2x28xi32>
    %377 = arith.addi %375, %376 : vector<2x28xi32>
    %378 = arith.cmpi eq, %252, %377 : vector<2x28xi32>
    %379 = arith.extui %378 : vector<2x28xi1> to vector<2x28xi32>
    %380 = arith.sitofp %379 : vector<2x28xi32> to vector<2x28xf32>
    %cst_183 = arith.constant dense<0.000000e+00> : vector<2x256xf32>
    %381 = tpu.matmul %380, %250, %cst_183 {dimension_numbers = #tpu.dot_dimension_numbers<[1], [0], [0], [1], [0, 0, 1, 1], [], []>} : vector<2x28xf32>, vector<28x256xf32>, vector<2x256xf32> -> vector<2x256xf32>
    %c10 = arith.constant 10 : index
    %c0_184 = arith.constant 0 : index
    %c0_185 = arith.constant 0 : index
    %382 = vector.load %arg13[%c10, %c0_184, %c0_185] : memref<14x256x40xf32, #tpu.memory_space<vmem>>, vector<1x256x40xf32>
    %383 = vector.shape_cast %382 : vector<1x256x40xf32> to vector<256x40xf32>
    %cst_186 = arith.constant dense<0.000000e+00> : vector<2x40xf32>
    %384 = tpu.matmul %381, %383, %cst_186 {dimension_numbers = #tpu.dot_dimension_numbers<[1], [0], [0], [1], [0, 0, 1, 1], [], []>} : vector<2x256xf32>, vector<256x40xf32>, vector<2x40xf32> -> vector<2x40xf32>
    %385 = arith.addf %373, %384 : vector<2x40xf32>
    %c14_i32_187 = arith.constant 14 : i32
    %386 = vector.broadcast %c14_i32_187 : i32 to vector<2x28xi32>
    %387 = arith.muli %251, %386 : vector<2x28xi32>
    %c11_i32 = arith.constant 11 : i32
    %388 = vector.broadcast %c11_i32 : i32 to vector<2x28xi32>
    %389 = arith.addi %387, %388 : vector<2x28xi32>
    %390 = arith.cmpi eq, %252, %389 : vector<2x28xi32>
    %391 = arith.extui %390 : vector<2x28xi1> to vector<2x28xi32>
    %392 = arith.sitofp %391 : vector<2x28xi32> to vector<2x28xf32>
    %cst_188 = arith.constant dense<0.000000e+00> : vector<2x256xf32>
    %393 = tpu.matmul %392, %250, %cst_188 {dimension_numbers = #tpu.dot_dimension_numbers<[1], [0], [0], [1], [0, 0, 1, 1], [], []>} : vector<2x28xf32>, vector<28x256xf32>, vector<2x256xf32> -> vector<2x256xf32>
    %c11 = arith.constant 11 : index
    %c0_189 = arith.constant 0 : index
    %c0_190 = arith.constant 0 : index
    %394 = vector.load %arg13[%c11, %c0_189, %c0_190] : memref<14x256x40xf32, #tpu.memory_space<vmem>>, vector<1x256x40xf32>
    %395 = vector.shape_cast %394 : vector<1x256x40xf32> to vector<256x40xf32>
    %cst_191 = arith.constant dense<0.000000e+00> : vector<2x40xf32>
    %396 = tpu.matmul %393, %395, %cst_191 {dimension_numbers = #tpu.dot_dimension_numbers<[1], [0], [0], [1], [0, 0, 1, 1], [], []>} : vector<2x256xf32>, vector<256x40xf32>, vector<2x40xf32> -> vector<2x40xf32>
    %397 = arith.addf %385, %396 : vector<2x40xf32>
    %c14_i32_192 = arith.constant 14 : i32
    %398 = vector.broadcast %c14_i32_192 : i32 to vector<2x28xi32>
    %399 = arith.muli %251, %398 : vector<2x28xi32>
    %c12_i32 = arith.constant 12 : i32
    %400 = vector.broadcast %c12_i32 : i32 to vector<2x28xi32>
    %401 = arith.addi %399, %400 : vector<2x28xi32>
    %402 = arith.cmpi eq, %252, %401 : vector<2x28xi32>
    %403 = arith.extui %402 : vector<2x28xi1> to vector<2x28xi32>
    %404 = arith.sitofp %403 : vector<2x28xi32> to vector<2x28xf32>
    %cst_193 = arith.constant dense<0.000000e+00> : vector<2x256xf32>
    %405 = tpu.matmul %404, %250, %cst_193 {dimension_numbers = #tpu.dot_dimension_numbers<[1], [0], [0], [1], [0, 0, 1, 1], [], []>} : vector<2x28xf32>, vector<28x256xf32>, vector<2x256xf32> -> vector<2x256xf32>
    %c12 = arith.constant 12 : index
    %c0_194 = arith.constant 0 : index
    %c0_195 = arith.constant 0 : index
    %406 = vector.load %arg13[%c12, %c0_194, %c0_195] : memref<14x256x40xf32, #tpu.memory_space<vmem>>, vector<1x256x40xf32>
    %407 = vector.shape_cast %406 : vector<1x256x40xf32> to vector<256x40xf32>
    %cst_196 = arith.constant dense<0.000000e+00> : vector<2x40xf32>
    %408 = tpu.matmul %405, %407, %cst_196 {dimension_numbers = #tpu.dot_dimension_numbers<[1], [0], [0], [1], [0, 0, 1, 1], [], []>} : vector<2x256xf32>, vector<256x40xf32>, vector<2x40xf32> -> vector<2x40xf32>
    %409 = arith.addf %397, %408 : vector<2x40xf32>
    %c14_i32_197 = arith.constant 14 : i32
    %410 = vector.broadcast %c14_i32_197 : i32 to vector<2x28xi32>
    %411 = arith.muli %251, %410 : vector<2x28xi32>
    %c13_i32_198 = arith.constant 13 : i32
    %412 = vector.broadcast %c13_i32_198 : i32 to vector<2x28xi32>
    %413 = arith.addi %411, %412 : vector<2x28xi32>
    %414 = arith.cmpi eq, %252, %413 : vector<2x28xi32>
    %415 = arith.extui %414 : vector<2x28xi1> to vector<2x28xi32>
    %416 = arith.sitofp %415 : vector<2x28xi32> to vector<2x28xf32>
    %cst_199 = arith.constant dense<0.000000e+00> : vector<2x256xf32>
    %417 = tpu.matmul %416, %250, %cst_199 {dimension_numbers = #tpu.dot_dimension_numbers<[1], [0], [0], [1], [0, 0, 1, 1], [], []>} : vector<2x28xf32>, vector<28x256xf32>, vector<2x256xf32> -> vector<2x256xf32>
    %c13 = arith.constant 13 : index
    %c0_200 = arith.constant 0 : index
    %c0_201 = arith.constant 0 : index
    %418 = vector.load %arg13[%c13, %c0_200, %c0_201] : memref<14x256x40xf32, #tpu.memory_space<vmem>>, vector<1x256x40xf32>
    %419 = vector.shape_cast %418 : vector<1x256x40xf32> to vector<256x40xf32>
    %cst_202 = arith.constant dense<0.000000e+00> : vector<2x40xf32>
    %420 = tpu.matmul %417, %419, %cst_202 {dimension_numbers = #tpu.dot_dimension_numbers<[1], [0], [0], [1], [0, 0, 1, 1], [], []>} : vector<2x256xf32>, vector<256x40xf32>, vector<2x40xf32> -> vector<2x40xf32>
    %421 = arith.addf %409, %420 : vector<2x40xf32>
    %c0_203 = arith.constant 0 : index
    %c0_204 = arith.constant 0 : index
    %422 = vector.load %arg14[%c0_203, %c0_204] : memref<1x40xf32, #tpu.memory_space<vmem>>, vector<1x40xf32>
    %423 = vector.broadcast %422 : vector<1x40xf32> to vector<2x40xf32>
    %424 = arith.addf %421, %423 : vector<2x40xf32>
    %c0_205 = arith.constant 0 : index
    %c0_206 = arith.constant 0 : index
    %425 = vector.load %arg15[%c0_205, %c0_206] : memref<2x40xf32, #tpu.memory_space<vmem>>, vector<2x40xf32>
    tpu.vector_store %arg15[%c0_205, %c0_206], %424 {strides = array<i32>} : memref<2x40xf32, #tpu.memory_space<vmem>>, vector<2x40xf32>,
    return
  }
}

</mosaic_0001>

<bundles_post_ra>
// kernel: bottom_conv1d_forward.1
= control target key start
LH: loop header
LB: loop body
LE: loop exit
PB: predicated region body
PF: predicated region fallthrough
CT: control target
= control target key end

     0   :  { %v65_v3 = vlaneseq  ;;  %vm250_vm0 = vcmask 916480   ;;  %s16249_s0 = inlined_call_operand.vmem [shape: f32[112,4], index: 0, kind: input, shape index: {}]   ;;  %s16250_s1 = inlined_call_operand.vmem [shape: f32[3,4,64], index: 1, kind: input, shape index: {}]   ;;  %s16251_s2 = inlined_call_operand.vmem [shape: f32[1,64], index: 2, kind: input, shape index: {}]   ;;  %s16252_s3 = inlined_call_operand.vmem [shape: f32[3,64,64], index: 3, kind: input, shape index: {}]   ;;  %s16253_s4 = inlined_call_operand.vmem [shape: f32[1,64], index: 4, kind: input, shape index: {}]   ;;  %s16254_s5 = inlined_call_operand.vmem [shape: f32[3,64,128], index: 5, kind: input, shape index: {}]   ;;  %s16255_s6 = inlined_call_operand.vmem [shape: f32[1,128], index: 6, kind: input, shape index: {}]   ;;  %s16256_s7 = inlined_call_operand.vmem [shape: f32[3,128,128], index: 7, kind: input, shape index: {}]   ;;  %s16257_s8 = inlined_call_operand.vmem [shape: f32[1,128], index: 8, kind: input, shape index: {}]   ;;  %s16258_s9 = inlined_call_operand.vmem [shape: f32[3,128,256], index: 9, kind: input, shape index: {}]   ;;  %s16259_s10 = inlined_call_operand.vmem [shape: f32[1,256], index: 10, kind: input, shape index: {}]   ;;  %s16260_s11 = inlined_call_operand.vmem [shape: f32[3,256,256], index: 11, kind: input, shape index: {}]   ;;  %s16261_s12 = inlined_call_operand.vmem [shape: f32[1,256], index: 12, kind: input, shape index: {}]   ;;  %s16262_s13 = inlined_call_operand.vmem [shape: f32[14,256,40], index: 13, kind: input, shape index: {}]   ;;  %s16263_s14 = inlined_call_operand.vmem [shape: f32[1,40], index: 14, kind: input, shape index: {}]   ;;  %s16264_s15 = inlined_call_operand.hbm [shape: f32[2,40], index: 15, kind: output, shape index: {}]  }
   0x1   :  { %v12209_v0 = vld [vmem:[%s16249_s0] sm:$0xff]  ;;  %v12214_v1 = vld [vmem:[%s16249_s0 + $0x8] sm:$0xff]  ;;  %v12219_v2 = vld [vmem:[%s16249_s0 + $0x10] sm:$0xff] }
   0x2   :  { %v10718_v4 = vpack.c.bf16 %v12214_v1, %v12209_v0  ;;  %v12226_v5 = vld [vmem:[%s16249_s0 + $0x18] sm:$0xff]  ;;  %v12233_v7 = vld [vmem:[%s16249_s0 + $0x20] sm:$0xff]  ;;  %v12238_v8 = vld [vmem:[%s16249_s0 + $0x28] sm:$0xff]  ;;  %v12240_v9 = vshrl.u32 %v65_v3, 7  ;;  %v12242_v10 = vand.u32 127, %v65_v3 }
   0x3   :  { %v10722_v6 = vpack.c.bf16 %v12226_v5, %v12219_v2  ;;  %v10726_v12 = vpack.c.bf16 %v12238_v8, %v12233_v7  ;;  %v12250_v13 = vld [vmem:[%s16249_s0 + $0x30] sm:$0xff]  ;;  %v12255_v14 = vld [vmem:[%s16249_s0 + $0x38] sm:$0xff] }
   0x4   :  { %10719 = vmatprep.subr.bf16.mxu0 %v10718_v4  ;;  %10747 = vmatprep.subr.bf16.mxu1 %v10718_v4  ;;  %v7754_v11 = vadd.s32 4294967295, %v12240_v9 }
   0x5   :  { %10721 = vmatpush3.bf16.msra.mxu0 %v10718_v4  ;;  %10749 = vmatpush3.bf16.msra.mxu1 %v10718_v4 }
   0x6   :  { %10723 = vmatprep.subr.bf16.mxu0 %v10722_v6  ;;  %10751 = vmatprep.subr.bf16.mxu1 %v10722_v6  ;;  %vm96_vm1 = vcmp.eq.s32.totalorder %v12242_v10, %v7754_v11 }
   0x7   :  { %20 = vsyncpa [#allocation3], 0  ;;  %v16265_v15 = vmov 0.0   ;;  %v10730_v17 = vpack.c.bf16 %v12255_v14, %v12250_v13  ;;  %v12268_v18 = vld [vmem:[%s16249_s0 + $0x40] sm:$0xff]  ;;  %v12273_v19 = vld [vmem:[%s16249_s0 + $0x48] sm:$0xff]  ;;  %v110_v23 = vadd.s32 1, %v12240_v9 }
   0x8   :  { %v12259_v16 = vsel %vm96_vm1, 1.0, %v16265_v15  ;;  %v10734_v20 = vpack.c.bf16 %v12273_v19, %v12268_v18  ;;  %v12280_v21 = vld [vmem:[%s16249_s0 + $0x50] sm:$0xff]  ;;  %v12285_v22 = vld [vmem:[%s16249_s0 + $0x58] sm:$0xff]  ;;  %v12291_v25 = vadd.s32 8, %v12240_v9  ;;  %v12296_v26 = vld [vmem:[%s16249_s0 + $0x60] sm:$0xff]  ;;  %v12304_v28 = vadd.s32 16, %v12240_v9 }
   0x9   :  { %10725 = vmatpush3.bf16.msra.mxu0 %v10722_v6  ;;  %9794 = vmatprep.mubr.msk.f32.mxu0 %vm250_vm0, %v12259_v16  ;;  %v10738_v24 = vpack.c.bf16 %v12285_v22, %v12280_v21  ;;  %v12301_v27 = vld [vmem:[%s16249_s0 + $0x68] sm:$0xff]  ;;  %vm124_vm2 = vcmp.eq.s32.totalorder %v12242_v10, %v110_v23  ;;  %v12311_v30 = vadd.s32 24, %v12240_v9  ;;  %v12314_v31 = vadd.s32 32, %v12240_v9  ;;  %v7824_v43 = vld [vmem:[%s16250_s1 + $0x4] sm:$0xf] }
   0xa   :  { %10727 = vmatprep.subr.bf16.mxu0 %v10726_v12  ;;  %10753 = vmatpush3.bf16.msra.mxu1 %v10722_v6  ;;  %v12308_v29 = vsel %vm124_vm2, 1.0, %v16265_v15  ;;  %v10742_v32 = vpack.c.bf16 %v12301_v27, %v12296_v26  ;;  %v12321_v33 = vadd.s32 4294967295, %v12291_v25  ;;  %v7756_v34 = vadd.s32 4294967295, %v12304_v28  ;;  %v12399_v57 = vld [vmem:[%s16250_s1] sm:$0xf] }
   0xb   :  { %10755 = vmatprep.subr.bf16.mxu1 %v10726_v12  ;;  %9843 = vmatprep.mubr.msk.f32.mxu1 %vm250_vm0, %v12308_v29  ;;  %v12325_v35 = vadd.s32 1, %v12291_v25  ;;  %v12328_v36 = vadd.s32 40, %v12240_v9  ;;  %v112_v37 = vadd.s32 1, %v12304_v28  ;;  %v12332_v38 = vadd.s32 4294967295, %v12311_v30 }
   0xc   :  { %16281 = vst [vmem:[#allocation5_spill] sm:$0xff] %v12321_v33  ;;  %v7758_v39 = vadd.s32 4294967295, %v12314_v31  ;;  %vm97_vm3 = vcmp.eq.s32.totalorder %v12242_v10, %v12321_v33  ;;  %v12338_v40 = vadd.s32 48, %v12240_v9  ;;  %v73_v41 = vadd.s32 56, %v12240_v9 }
   0xd   :  { %10729 = vmatpush3.bf16.msra.mxu0 %v10726_v12  ;;  %16282 = vst [vmem:[#allocation6_spill] sm:$0xff] %v12325_v35  ;;  %16283 = vst [vmem:[#allocation7_spill] sm:$0xff] %v12332_v38  ;;  %vm98_vm4 = vcmp.eq.s32.totalorder %v12242_v10, %v7756_v34  ;;  %vm125_vm5 = vcmp.eq.s32.totalorder %v12242_v10, %v12325_v35  ;;  %v12345_v42 = vadd.s32 1, %v12311_v30  ;;  %vm651_vm6 = vcmask 1043456  }
   0xe   :  { %10731 = vmatprep.subr.bf16.mxu0 %v10730_v17  ;;  %10757 = vmatpush3.bf16.msra.mxu1 %v10726_v12  ;;  %v7759_v44 = vadd.s32 4294967295, %v12328_v36  ;;  %vm126_vm7 = vcmp.eq.s32.totalorder %v12242_v10, %v112_v37  ;;  %v114_v45 = vadd.s32 1, %v12314_v31  ;;  %v12357_v46 = vsel %vm97_vm3, 1.0, %v16265_v15 }
   0xf   :  { %10759 = vmatprep.subr.bf16.mxu1 %v10730_v17  ;;  %16284 = vst [vmem:[#allocation8_spill] sm:$0xff] %v12345_v42  ;;  %vm99_vm8 = vcmp.eq.s32.totalorder %v12242_v10, %v12332_v38  ;;  %vm100_vm9 = vcmp.eq.s32.totalorder %v12242_v10, %v7758_v39  ;;  %v12363_v47 = vadd.s32 1, %v12338_v40  ;;  %v12366_v48 = vsel %vm98_vm4, 1.0, %v16265_v15 }
  0x10   :  { %v7760_v49 = vadd.s32 4294967295, %v12338_v40  ;;  %v7761_v50 = vadd.s32 4294967295, %v73_v41  ;;  %v12373_v51 = vsel %vm125_vm5, 1.0, %v16265_v15  ;;  %v74_v52 = vadd.s32 64, %v12240_v9 }
  0x11   :  { %10733 = vmatpush3.bf16.msra.mxu0 %v10730_v17  ;;  %16285 = vst [vmem:[#allocation9_spill] sm:$0xff] %v12363_v47  ;;  %v12378_v53 = vsel %vm126_vm7, 1.0, %v16265_v15  ;;  %vm127_vm10 = vcmp.eq.s32.totalorder %v12242_v10, %v12345_v42  ;;  %v115_v54 = vadd.s32 1, %v12328_v36  ;;  %v12389_v55 = vsel %vm99_vm8, 1.0, %v16265_v15 }
  0x12   :  { %10735 = vmatprep.subr.bf16.mxu0 %v10734_v20  ;;  %10761 = vmatpush3.bf16.msra.mxu1 %v10730_v17  ;;  %v12392_v56 = vsel %vm100_vm9, 1.0, %v16265_v15  ;;  %vm101_vm11 = vcmp.eq.s32.totalorder %v12242_v10, %v7759_v44  ;;  %vm128_vm12 = vcmp.eq.s32.totalorder %v12242_v10, %v114_v45  ;;  %vm145_vm13 = vcmp.ne.s32.totalorder %v73_v41, 56 }
  0x13   :  { %10763 = vmatprep.subr.bf16.mxu1 %v10734_v20  ;;  %v75_v58 = vadd.s32 72, %v12240_v9  ;;  %vm130_vm14 = vcmp.eq.s32.totalorder %v12242_v10, %v12363_v47  ;;  %vm172_vm15 = vcmp.ne.s32.totalorder %v12338_v40, 55  ;;  %vm102_vm1 = vcmp.eq.s32.totalorder %v12242_v10, %v7760_v49 }
  0x14   :  { %vm103_vm2 = vcmp.eq.s32.totalorder %v12242_v10, %v7761_v50  ;;  %v76_v59 = vadd.s32 80, %v12240_v9  ;;  %v12418_v60 = vsel %vm127_vm10, 1.0, %v16265_v15  ;;  %v7762_v61 = vadd.s32 4294967295, %v74_v52  ;;  %vm186_vm7 = vmand %vm130_vm14, %vm172_vm15 }
  0x15   :  { %10737 = vmatpush3.bf16.msra.mxu0 %v10734_v20  ;;  %v12422_v62 = vsel %vm128_vm12, 1.0, %v16265_v15  ;;  %vm129_vm4 = vcmp.eq.s32.totalorder %v12242_v10, %v115_v54  ;;  %v117_v63 = vadd.s32 1, %v73_v41  ;;  %v118_v3 = vadd.s32 1, %v74_v52  ;;  %vm159_vm9 = vmand %vm103_vm2, %vm145_vm13 }
  0x16   :  { %10739 = vmatprep.subr.bf16.mxu0 %v10738_v24  ;;  %10765 = vmatpush3.bf16.msra.mxu1 %v10734_v20  ;;  %v12437_v4 = vsel %vm101_vm11, 1.0, %v16265_v15  ;;  %v77_v6 = vadd.s32 88, %v12240_v9  ;;  %v78_v11 = vadd.s32 96, %v12240_v9  ;;  %v12446_v12 = vsel %vm102_vm1, 1.0, %v16265_v15 }
  0x17   :  { %10767 = vmatprep.subr.bf16.mxu1 %v10738_v24  ;;  %v7763_v17 = vadd.s32 4294967295, %v75_v58  ;;  %v7764_v20 = vadd.s32 4294967295, %v76_v59  ;;  %v12456_v23 = vsel %vm129_vm4, 1.0, %v16265_v15  ;;  %vm104_vm11 = vcmp.eq.s32.totalorder %v12242_v10, %v7762_v61 }
  0x18   :  { %vm131_vm12 = vcmp.eq.s32.totalorder %v12242_v10, %v117_v63  ;;  %vm132_vm13 = vcmp.eq.s32.totalorder %v12242_v10, %v118_v3  ;;  %v120_v34 = vadd.s32 1, %v76_v59  ;;  %v12469_v37 = vsel %vm159_vm9, 1.0, %v16265_v15 }
  0x19   :  { %10741 = vmatpush3.bf16.msra.mxu0 %v10738_v24  ;;  %v7765_v39 = vadd.s32 4294967295, %v77_v6  ;;  %v7766_v41 = vadd.s32 4294967295, %v78_v11  ;;  %vm105_vm15 = vcmp.eq.s32.totalorder %v12242_v10, %v7763_v17  ;;  %v79_v44 = vadd.s32 104, %v12240_v9 }
  0x1a   :  { %10743 = vmatprep.subr.bf16.mxu0 %v10742_v32  ;;  %10769 = vmatpush3.bf16.msra.mxu1 %v10738_v24  ;;  %v12460_v24 = vsel %vm186_vm7, 1.0, %v16265_v15  ;;  %v12481_v45 = vsel %vm131_vm12, 1.0, %v16265_v15  ;;  %vm106_vm1 = vcmp.eq.s32.totalorder %v12242_v10, %v7764_v20  ;;  %v12485_v49 = vsel %vm132_vm13, 1.0, %v16265_v15 }
  0x1b   :  { %10771 = vmatprep.subr.bf16.mxu1 %v10742_v32  ;;  %v121_v50 = vadd.s32 1, %v77_v6  ;;  %vm134_vm4 = vcmp.eq.s32.totalorder %v12242_v10, %v120_v34  ;;  %v122_v52 = vadd.s32 1, %v78_v11  ;;  %v12494_v54 = vsel %vm105_vm15, 1.0, %v16265_v15 }
  0x1c   :  { %vm107_vm7 = vcmp.eq.s32.totalorder %v12242_v10, %v7765_v39  ;;  %v7767_v59 = vadd.s32 4294967295, %v79_v44  ;;  %vm108_vm9 = vcmp.eq.s32.totalorder %v12242_v10, %v7766_v41  ;;  %v12509_v63 = vsel %vm134_vm4, 1.0, %v16265_v15 }
  0x1d   :  { %10745 = vmatpush3.bf16.msra.mxu0 %v10742_v32  ;;  %v123_v3 = vadd.s32 1, %v79_v44  ;;  %vm136_vm12 = vcmp.eq.s32.totalorder %v12242_v10, %v122_v52  ;;  %v12518_v6 = vsel %vm107_vm7, 1.0, %v16265_v15  ;;  %v12523_v11 = vsel %vm108_vm9, 1.0, %v16265_v15 }
  0x1e   :  { %10773 = vmatpush3.bf16.msra.mxu1 %v10742_v32  ;;  %9864 = vmatprep.subr.msk.mxu0 %vm651_vm6, %v7824_v43  ;;  %v119_v32 = vadd.s32 1, %v75_v58  ;;  %v12499_v58 = vsel %vm106_vm1, 1.0, %v16265_v15  ;;  %vm109_vm13 = vcmp.eq.s32.totalorder %v12242_v10, %v7767_v59  ;;  %v12532_v20 = vsel %vm136_vm12, 1.0, %v16265_v15 }
  0x1f   :  { %vm137_vm15 = vcmp.eq.s32.totalorder %v12242_v10, %v123_v3  ;;  %vm608_vm1 = vcmask 31744   ;;  %vm12123_vm4 = vmmov 0  }
  0x20   :  { %9795 = vmatmul.mubr.msk.f32.vlgmr.msra.gmra.mrb[0].mxu0 %vm250_vm0, %v12357_v46  ;;  %vm133_vm2 = vcmp.eq.s32.totalorder %v12242_v10, %v119_v32  ;;  %v12540_v32 = vsel %vm109_vm13, 1.0, %v16265_v15  ;;  %v12547_v34 = vsel %vm137_vm15, 1.0, %v16265_v15 }
  0x21   :  { %9797 = vmatprep.mubr.msk.f32.mxu0 %vm250_vm0, %v12366_v48  ;;  %9844 = vmatmul.mubr.msk.f32.vlgmr.msra.gmra.mrb[0].mxu1 %vm250_vm0, %v12373_v51  ;;  %v12505_v61 = vsel %vm133_vm2, 1.0, %v16265_v15  ;;  %vm1488_vm2 = vcmask 523264  }
  0x22   :  { %9846 = vmatprep.mubr.msk.f32.mxu1 %vm250_vm0, %v12378_v53  ;;  %9865 = vmatpush3.msk.msra.mxu0 %vm651_vm6, %v7824_v43  ;;  %v12474_v43 = vsel %vm104_vm11, 1.0, %v16265_v15  ;;  %vm135_vm11 = vcmp.eq.s32.totalorder %v12242_v10, %v121_v50 }
  0x23   :  { %9887 = vmatprep.subr.msk.mxu0 %vm651_vm6, %v12399_v57  ;;  %v12529_v17 = vsel %vm135_vm11, 1.0, %v16265_v15 }
  0x24   :  { %9798 = vmatmul.mubr.msk.f32.gmra.mrb[2].mxu0 %vm250_vm0, %v12389_v55 }
  0x25   :  { %9800 = vmatprep.mubr.msk.f32.mxu0 %vm250_vm0, %v12392_v56  ;;  %9847 = vmatmul.mubr.msk.f32.gmra.mrb[2].mxu1 %vm250_vm0, %v12418_v60 }
  0x26   :  { %9849 = vmatprep.mubr.msk.f32.mxu1 %vm250_vm0, %v12422_v62 }
  0x28   :  { %9801 = vmatmul.mubr.msk.f32.gmra.mrb[4].mxu0 %vm250_vm0, %v12437_v4 }
  0x29   :  { %9803 = vmatprep.mubr.msk.f32.mxu0 %vm250_vm0, %v12446_v12  ;;  %9850 = vmatmul.mubr.msk.f32.gmra.mrb[4].mxu1 %vm250_vm0, %v12456_v23 }
  0x2a   :  { %9852 = vmatprep.mubr.msk.f32.mxu1 %vm250_vm0, %v12460_v24 }
  0x2c   :  { %9804 = vmatmul.mubr.msk.f32.gmra.mrb[6].mxu0 %vm250_vm0, %v12469_v37 }
  0x2d   :  { %9806 = vmatprep.mubr.msk.f32.mxu0 %vm250_vm0, %v12474_v43  ;;  %9853 = vmatmul.mubr.msk.f32.gmra.mrb[6].mxu1 %vm250_vm0, %v12481_v45 }
  0x2e   :  { %9855 = vmatprep.mubr.msk.f32.mxu1 %vm250_vm0, %v12485_v49 }
  0x30   :  { %9807 = vmatmul.mubr.msk.f32.gmra.mrb[8].mxu0 %vm250_vm0, %v12494_v54 }
  0x31   :  { %9809 = vmatprep.mubr.msk.f32.mxu0 %vm250_vm0, %v12499_v58  ;;  %9856 = vmatmul.mubr.msk.f32.gmra.mrb[8].mxu1 %vm250_vm0, %v12505_v61 }
  0x32   :  { %9858 = vmatprep.mubr.msk.f32.mxu1 %vm250_vm0, %v12509_v63 }
  0x34   :  { %9810 = vmatmul.mubr.msk.f32.gmra.mrb[10].mxu0 %vm250_vm0, %v12518_v6 }
  0x35   :  { %9812 = vmatprep.mubr.msk.f32.mxu0 %vm250_vm0, %v12523_v11  ;;  %9859 = vmatmul.mubr.msk.f32.gmra.mrb[10].mxu1 %vm250_vm0, %v12529_v17 }
  0x36   :  { %9861 = vmatprep.mubr.msk.f32.mxu1 %vm250_vm0, %v12532_v20 }
  0x38   :  { %9813 = vmatmul.mubr.msk.f32.gmra.mrb[12].mxu0 %vm250_vm0, %v12540_v32 }
  0x39   :  { %9862 = vmatmul.mubr.msk.f32.gmra.mrb[12].mxu1 %vm250_vm0, %v12547_v34  ;;  %9866 = vmatprep.mubr.msk.f32.mxu0 %vm608_vm1, %v12209_v0  ;;  %v7855_v0 = vld [vmem:[%s16250_s1 + $0x8] sm:$0xf] }
  0x3a   :  { %9961 = vmatprep.mubr.msk.f32.mxu1 %vm250_vm0, %v12259_v16 }
  0x3c   :  { %9867 = vmatmul.mubr.msk.f32.vlgmr.msra.gmra.mrb[14].mxu0 %vm608_vm1, %v12214_v1 }
  0x3d   :  { %9869 = vmatprep.mubr.msk.f32.mxu0 %vm608_vm1, %v12219_v2  ;;  %9888 = vmatpush3.msk.msra.mxu0 %vm651_vm6, %v12399_v57 }
  0x3e   :  { %9910 = vmatprep.subr.msk.mxu0 %vm651_vm6, %v7855_v0 }
  0x40   :  { %9870 = vmatmul.mubr.msk.f32.gmra.mrb[16].mxu0 %vm608_vm1, %v12226_v5 }
  0x41   :  { %9872 = vmatprep.mubr.msk.f32.mxu0 %vm608_vm1, %v12233_v7 }
  0x44   :  { %9873 = vmatmul.mubr.msk.f32.gmra.mrb[18].mxu0 %vm608_vm1, %v12238_v8 }
  0x45   :  { %9875 = vmatprep.mubr.msk.f32.mxu0 %vm608_vm1, %v12250_v13 }
  0x48   :  { %9876 = vmatmul.mubr.msk.f32.gmra.mrb[20].mxu0 %vm608_vm1, %v12255_v14 }
  0x49   :  { %9878 = vmatprep.mubr.msk.f32.mxu0 %vm608_vm1, %v12268_v18 }
  0x4c   :  { %9879 = vmatmul.mubr.msk.f32.gmra.mrb[22].mxu0 %vm608_vm1, %v12273_v19 }
  0x4d   :  { %9881 = vmatprep.mubr.msk.f32.mxu0 %vm608_vm1, %v12280_v21 }
  0x50   :  { %9882 = vmatmul.mubr.msk.f32.gmra.mrb[24].mxu0 %vm608_vm1, %v12285_v22 }
  0x51   :  { %9884 = vmatprep.mubr.msk.f32.mxu0 %vm608_vm1, %v12296_v26 }
  0x54   :  { %9885 = vmatmul.mubr.msk.f32.gmra.mrb[26].mxu0 %vm608_vm1, %v12301_v27 }
  0xf3   :  { %v9796_v1 = vpop.f32.mrb[0].mxu0 }
  0xf4   :  { %v359_v2 = vpop.f32.mrb[1].mxu0  ;;  %v9845_v5 = vpop.f32.mrb[0].mxu1 }
  0xf5   :  { %9889 = vmatprep.mubr.msk.f32.mxu0 %vm608_vm1, %v359_v2  ;;  %v536_v7 = vpop.f32.mrb[1].mxu1 }
  0xf6   :  { %9890 = vmatmul.mubr.msk.f32.vlgmr.msra.gmra.mrb[14].mxu0 %vm608_vm1, %v9796_v1 }
  0xf7   :  { %v9799_v8 = vpop.f32.mrb[2].mxu0  ;;  %9911 = vmatpush3.msk.msra.mxu0 %vm651_vm6, %v7855_v0 }
  0xf8   :  { %v369_v13 = vpop.f32.mrb[3].mxu0  ;;  %v9848_v14 = vpop.f32.mrb[2].mxu1 }
  0xf9   :  { %9892 = vmatprep.mubr.msk.f32.mxu0 %vm608_vm1, %v369_v13  ;;  %v546_v18 = vpop.f32.mrb[3].mxu1 }
  0xfa   :  { %9893 = vmatmul.mubr.msk.f32.gmra.mrb[16].mxu0 %vm608_vm1, %v9799_v8 }
  0xfb   :  { %v9802_v19 = vpop.f32.mrb[4].mxu0 }
  0xfc   :  { %v379_v21 = vpop.f32.mrb[5].mxu0  ;;  %v9851_v22 = vpop.f32.mrb[4].mxu1 }
  0xfd   :  { %9895 = vmatprep.mubr.msk.f32.mxu0 %vm608_vm1, %v379_v21  ;;  %v556_v26 = vpop.f32.mrb[5].mxu1 }
  0xfe   :  { %9896 = vmatmul.mubr.msk.f32.gmra.mrb[18].mxu0 %vm608_vm1, %v9802_v19 }
  0xff   :  { %v9805_v27 = vpop.f32.mrb[6].mxu0 }
 0x100   :  { %v389_v57 = vpop.f32.mrb[7].mxu0  ;;  %v9854_v39 = vpop.f32.mrb[6].mxu1 }
 0x101   :  { %9898 = vmatprep.mubr.msk.f32.mxu0 %vm608_vm1, %v389_v57  ;;  %v566_v41 = vpop.f32.mrb[7].mxu1 }
 0x102   :  { %9899 = vmatmul.mubr.msk.f32.gmra.mrb[20].mxu0 %vm608_vm1, %v9805_v27 }
 0x103   :  { %v9808_v44 = vpop.f32.mrb[8].mxu0 }
 0x104   :  { %v399_v50 = vpop.f32.mrb[9].mxu0  ;;  %v9857_v52 = vpop.f32.mrb[8].mxu1 }
 0x105   :  { %9901 = vmatprep.mubr.msk.f32.mxu0 %vm608_vm1, %v399_v50  ;;  %v576_v59 = vpop.f32.mrb[9].mxu1 }
 0x106   :  { %9902 = vmatmul.mubr.msk.f32.gmra.mrb[22].mxu0 %vm608_vm1, %v9808_v44 }
 0x107   :  { %v9811_v3 = vpop.f32.mrb[10].mxu0 }
 0x108   :  { %v409_v0 = vpop.f32.mrb[11].mxu0  ;;  %v9860_v1 = vpop.f32.mrb[10].mxu1 }
 0x109   :  { %9904 = vmatprep.mubr.msk.f32.mxu0 %vm608_vm1, %v409_v0  ;;  %v586_v2 = vpop.f32.mrb[11].mxu1 }
 0x10a   :  { %9905 = vmatmul.mubr.msk.f32.gmra.mrb[24].mxu0 %vm608_vm1, %v9811_v3 }
 0x10b   :  { %v9814_v8 = vpop.f32.mrb[12].mxu0 }
 0x10c   :  { %v419_v13 = vpop.f32.mrb[13].mxu0  ;;  %v9863_v19 = vpop.f32.mrb[12].mxu1 }
 0x10d   :  { %9907 = vmatprep.mubr.msk.f32.mxu0 %vm608_vm1, %v419_v13  ;;  %v596_v21 = vpop.f32.mrb[13].mxu1 }
 0x10e   :  { %9908 = vmatmul.mubr.msk.f32.gmra.mrb[26].mxu0 %vm608_vm1, %v9814_v8 }
 0x10f   :  { %9912 = vmatprep.mubr.msk.f32.mxu0 %vm608_vm1, %v536_v7 }
 0x112   :  { %9913 = vmatmul.mubr.msk.f32.vlgmr.msra.gmra.mrb[14].mxu0 %vm608_vm1, %v9845_v5  ;;  %v7871_v5 = vld [vmem:[%s16251_s2] ss:$0 sm:$0xff] }
 0x113   :  { %9915 = vmatprep.mubr.msk.f32.mxu0 %vm608_vm1, %v546_v18 }
 0x116   :  { %9916 = vmatmul.mubr.msk.f32.gmra.mrb[16].mxu0 %vm608_vm1, %v9848_v14 }
 0x117   :  { %9918 = vmatprep.mubr.msk.f32.mxu0 %vm608_vm1, %v556_v26 }
 0x11a   :  { %9919 = vmatmul.mubr.msk.f32.gmra.mrb[18].mxu0 %vm608_vm1, %v9851_v22 }
 0x11b   :  { %9921 = vmatprep.mubr.msk.f32.mxu0 %vm608_vm1, %v566_v41 }
 0x11e   :  { %9922 = vmatmul.mubr.msk.f32.gmra.mrb[20].mxu0 %vm608_vm1, %v9854_v39 }
 0x11f   :  { %9924 = vmatprep.mubr.msk.f32.mxu0 %vm608_vm1, %v576_v59 }
 0x122   :  { %9925 = vmatmul.mubr.msk.f32.gmra.mrb[22].mxu0 %vm608_vm1, %v9857_v52 }
 0x123   :  { %9927 = vmatprep.mubr.msk.f32.mxu0 %vm608_vm1, %v586_v2 }
 0x126   :  { %9928 = vmatmul.mubr.msk.f32.gmra.mrb[24].mxu0 %vm608_vm1, %v9860_v1 }
 0x127   :  { %9930 = vmatprep.mubr.msk.f32.mxu0 %vm608_vm1, %v596_v21 }
 0x12a   :  { %9931 = vmatmul.mubr.msk.f32.gmra.mrb[26].mxu0 %vm608_vm1, %v9863_v19 }
 0x1e5   :  { %v9914_v7 = vpop.f32.mrb[14].mxu0 }
 0x1e6   :  { %v12621_v14 = vadd.f32 %v9914_v7, %v7871_v5  ;;  %v1083_v18 = vpop.f32.mrb[15].mxu0 }
 0x1e7   :  { %v12623_v22 = vadd.f32 %v7871_v5, %v1083_v18 }
 0x1e8   :  { %v16269_v26 = vmax.f32 %v12621_v14, 0.0 }
 0x1e9   :  { %v16272_v27 = vmax.f32 %v12623_v22, 0.0  ;;  %v9917_v57 = vpop.f32.mrb[16].mxu0 }
 0x1ea   :  { %v12627_v39 = vadd.f32 %v9917_v57, %v7871_v5  ;;  %v1093_v41 = vpop.f32.mrb[17].mxu0 }
 0x1eb   :  { %v10774_v44 = vpack.c.bf16 %v16269_v26, %v16272_v27  ;;  %v12633_v50 = vadd.f32 %v7871_v5, %v1093_v41 }
 0x1ec   :  { %v16267_v52 = vmax.f32 %v12627_v39, 0.0 }
 0x1ed   :  { %v16268_v59 = vmax.f32 %v12633_v50, 0.0  ;;  %v9920_v3 = vpop.f32.mrb[18].mxu0  ;;  %10775 = vmatprep.subr.bf16.mxu1 %v10774_v44 }
 0x1ee   :  { %v12637_v0 = vadd.f32 %v9920_v3, %v7871_v5  ;;  %v1103_v1 = vpop.f32.mrb[19].mxu0  ;;  %10777 = vmatpush3.bf16.msra.mxu1 %v10774_v44 }
 0x1ef   :  { %v10778_v2 = vpack.c.bf16 %v16267_v52, %v16268_v59  ;;  %v12643_v8 = vadd.f32 %v7871_v5, %v1103_v1 }
 0x1f0   :  { %v16270_v13 = vmax.f32 %v12637_v0, 0.0 }
 0x1f1   :  { %v16271_v19 = vmax.f32 %v12643_v8, 0.0  ;;  %v9923_v21 = vpop.f32.mrb[20].mxu0  ;;  %10779 = vmatprep.subr.bf16.mxu1 %v10778_v2 }
 0x1f2   :  { %v12647_v7 = vadd.f32 %v9923_v21, %v7871_v5  ;;  %v1113_v18 = vpop.f32.mrb[21].mxu0  ;;  %10781 = vmatpush3.bf16.msra.mxu1 %v10778_v2 }
 0x1f3   :  { %v10782_v57 = vpack.c.bf16 %v16270_v13, %v16271_v19  ;;  %v12653_v41 = vadd.f32 %v7871_v5, %v1113_v18 }
 0x1f4   :  { %v16275_v3 = vmax.f32 %v12647_v7, 0.0 }
 0x1f5   :  { %v16276_v1 = vmax.f32 %v12653_v41, 0.0  ;;  %v9926_v15 = vpop.f32.mrb[22].mxu0  ;;  %10783 = vmatprep.subr.bf16.mxu1 %v10782_v57 }
 0x1f6   :  { %v12657_v52 = vadd.f32 %v9926_v15, %v7871_v5  ;;  %v1123_v59 = vpop.f32.mrb[23].mxu0  ;;  %10785 = vmatpush3.bf16.msra.mxu1 %v10782_v57 }
 0x1f7   :  { %v10786_v21 = vpack.c.bf16 %v16275_v3, %v16276_v1  ;;  %v12663_v26 = vadd.f32 %v7871_v5, %v1123_v59 }
 0x1f8   :  { %v16280_v18 = vmax.f32 %v12657_v52, 0.0 }
 0x1f9   :  { %v1195_v13 = vmax.f32 %v12663_v26, 0.0  ;;  %v9929_v19 = vpop.f32.mrb[24].mxu0  ;;  %10787 = vmatprep.subr.bf16.mxu1 %v10786_v21  ;;  %v7936_v26 = vld [vmem:[%s16252_s3 + $0x80] sm:$0xff] }
 0x1fa   :  { %v12667_v27 = vadd.f32 %v9929_v19, %v7871_v5  ;;  %v1133_v35 = vpop.f32.mrb[25].mxu0  ;;  %10789 = vmatpush3.bf16.msra.mxu1 %v10786_v21 }
 0x1fb   :  { %v10790_v15 = vpack.c.bf16 %v16280_v18, %v1195_v13  ;;  %v12673_v33 = vadd.f32 %v7871_v5, %v1133_v35 }
 0x1fc   :  { %v1198_v59 = vmax.f32 %v12667_v27, 0.0 }
 0x1fd   :  { %v1197_v3 = vmax.f32 %v12673_v33, 0.0  ;;  %v9932_v1 = vpop.f32.mrb[26].mxu0  ;;  %10791 = vmatprep.subr.bf16.mxu1 %v10790_v15  ;;  %v7937_v33 = vld [vmem:[%s16252_s3 + $0x88] sm:$0xff] }
 0x1fe   :  { %v12677_v47 = vadd.f32 %v9932_v1, %v7871_v5  ;;  %v1143_v42 = vpop.f32.mrb[27].mxu0  ;;  %10793 = vmatpush3.bf16.msra.mxu1 %v10790_v15 }
 0x1ff   :  { %v10794_v19 = vpack.c.bf16 %v1198_v59, %v1197_v3  ;;  %v12683_v38 = vadd.f32 %v7871_v5, %v1143_v42  ;;  %v7900_v42 = vld [vmem:[%s16252_s3 + $0x40] sm:$0xff]  ;;  %v7905_v5 = vld [vmem:[%s16252_s3 + $0x68] sm:$0xff] }
 0x200   :  { %v1200_v35 = vmax.f32 %v12677_v47, 0.0  ;;  %v7939_v47 = vld [vmem:[%s16252_s3 + $0x98] sm:$0xff] }
 0x201   :  { %v1199_v18 = vmax.f32 %v12683_v38, 0.0  ;;  %10795 = vmatprep.subr.bf16.mxu1 %v10794_v19  ;;  %v7938_v38 = vld [vmem:[%s16252_s3 + $0x90] sm:$0xff] }
 0x202   :  { %10797 = vmatpush3.bf16.msra.mxu1 %v10794_v19 }
 0x203   :  { %v10798_v1 = vpack.c.bf16 %v1200_v35, %v1199_v18 }
 0x205   :  { %10799 = vmatprep.subr.bf16.mxu1 %v10798_v1 }
 0x206   :  { %10801 = vmatpush3.bf16.msra.mxu1 %v10798_v1 }
 0x207   :  { %10803 = vmatprep.subr.bf16.mxu1 %v10774_v44 }
 0x209   :  { %9962 = vmatmul.mubr.msk.f32.vlgmr.msra.gmra.mrb[14].mxu1 %vm250_vm0, %v12357_v46 }
 0x20a   :  { %10805 = vmatpush3.bf16.msra.mxu1 %v10774_v44  ;;  %9964 = vmatprep.mubr.msk.f32.mxu1 %vm250_vm0, %v12366_v48  ;;  %v7906_v44 = vld [vmem:[%s16252_s3 + $0x70] sm:$0xff] }
 0x20b   :  { %10807 = vmatprep.subr.bf16.mxu1 %v10778_v2 }
 0x20d   :  { %9965 = vmatmul.mubr.msk.f32.gmra.mrb[16].mxu1 %vm250_vm0, %v12389_v55 }
 0x20e   :  { %10809 = vmatpush3.bf16.msra.mxu1 %v10778_v2  ;;  %9967 = vmatprep.mubr.msk.f32.mxu1 %vm250_vm0, %v12392_v56  ;;  %v7907_v2 = vld [vmem:[%s16252_s3 + $0x78] sm:$0xff] }
 0x20f   :  { %10811 = vmatprep.subr.bf16.mxu1 %v10782_v57 }
 0x211   :  { %9968 = vmatmul.mubr.msk.f32.gmra.mrb[18].mxu1 %vm250_vm0, %v12437_v4 }
 0x212   :  { %10813 = vmatpush3.bf16.msra.mxu1 %v10782_v57  ;;  %9970 = vmatprep.mubr.msk.f32.mxu1 %vm250_vm0, %v12446_v12  ;;  %v10842_v57 = vpack.c.bf16 %v7907_v2, %v7906_v44 }
 0x213   :  { %10815 = vmatprep.subr.bf16.mxu1 %v10786_v21 }
 0x215   :  { %9971 = vmatmul.mubr.msk.f32.gmra.mrb[20].mxu1 %vm250_vm0, %v12469_v37  ;;  %v7901_v37 = vld [vmem:[%s16252_s3 + $0x48] sm:$0xff] }
 0x216   :  { %10817 = vmatpush3.bf16.msra.mxu1 %v10786_v21  ;;  %9973 = vmatprep.mubr.msk.f32.mxu1 %vm250_vm0, %v12474_v43  ;;  %v10830_v43 = vpack.c.bf16 %v7901_v37, %v7900_v42  ;;  %v1471_v21 = vld [vmem:[%s16252_s3] sm:$0xff]  ;;  %v1478_v42 = vld [vmem:[%s16252_s3 + $0x38] sm:$0xff]  ;;  %v16289_v37 = vmax.f32 %v12627_v39, 0.0  ;;  %v16293_v39 = vmax.f32 %v12647_v7, 0.0 }
 0x217   :  { %10819 = vmatprep.subr.bf16.mxu1 %v10790_v15  ;;  %v7940_v7 = vld [vmem:[%s16252_s3 + $0xa0] sm:$0xff] }
 0x219   :  { %9974 = vmatmul.mubr.msk.f32.gmra.mrb[22].mxu1 %vm250_vm0, %v12494_v54  ;;  %v7902_v54 = vld [vmem:[%s16252_s3 + $0x50] sm:$0xff] }
 0x21a   :  { %10821 = vmatpush3.bf16.msra.mxu1 %v10790_v15  ;;  %9976 = vmatprep.mubr.msk.f32.mxu1 %vm250_vm0, %v12499_v58  ;;  %v7903_v58 = vld [vmem:[%s16252_s3 + $0x58] sm:$0xff]  ;;  %v1472_v15 = vld [vmem:[%s16252_s3 + $0x8] sm:$0xff] }
 0x21b   :  { %10823 = vmatprep.subr.bf16.mxu1 %v10794_v19 }
 0x21d   :  { %9977 = vmatmul.mubr.msk.f32.gmra.mrb[24].mxu1 %vm250_vm0, %v12518_v6  ;;  %v10834_v6 = vpack.c.bf16 %v7903_v58, %v7902_v54  ;;  %v16292_v54 = vmax.f32 %v12653_v41, 0.0  ;;  %v7941_v41 = vld [vmem:[%s16252_s3 + $0xa8] sm:$0xff]  ;;  %v7943_v58 = vld [vmem:[%s16252_s3 + $0xb8] sm:$0xff] }
 0x21e   :  { %10825 = vmatpush3.bf16.msra.mxu1 %v10794_v19  ;;  %9979 = vmatprep.mubr.msk.f32.mxu1 %vm250_vm0, %v12523_v11  ;;  %v7904_v11 = vld [vmem:[%s16252_s3 + $0x60] sm:$0xff]  ;;  %v10846_v19 = vpack.c.bf16 %v1472_v15, %v1471_v21 }
 0x21f   :  { %10827 = vmatprep.subr.bf16.mxu1 %v10798_v1 }
 0x221   :  { %9980 = vmatmul.mubr.msk.f32.gmra.mrb[26].mxu1 %vm250_vm0, %v12540_v32  ;;  %v10838_v32 = vpack.c.bf16 %v7905_v5, %v7904_v11 }
 0x222   :  { %10829 = vmatpush3.bf16.msra.mxu1 %v10798_v1  ;;  %10010 = vmatprep.mubr.msk.f32.mxu1 %vm250_vm0, %v12308_v29  ;;  %v16288_v1 = vmax.f32 %v12633_v50, 0.0 }
 0x223   :  { %10831 = vmatprep.subr.bf16.mxu1 %v10830_v43 }
 0x225   :  { %10011 = vmatmul.mubr.msk.f32.vlgmr.msra.gmra.mrb[28].mxu1 %vm250_vm0, %v12373_v51 }
 0x226   :  { %10013 = vmatprep.mubr.msk.f32.mxu1 %vm250_vm0, %v12378_v53  ;;  %10833 = vmatpush3.bf16.msra.mxu1 %v10830_v43  ;;  %v16291_v43 = vmax.f32 %v12637_v0, 0.0 }
 0x227   :  { %10835 = vmatprep.subr.bf16.mxu1 %v10834_v6 }
 0x229   :  { %10014 = vmatmul.mubr.msk.f32.gmra.mrb[30].mxu1 %vm250_vm0, %v12418_v60 }
 0x22a   :  { %10016 = vmatprep.mubr.msk.f32.mxu1 %vm250_vm0, %v12422_v62  ;;  %10837 = vmatpush3.bf16.msra.mxu1 %v10834_v6 }
 0x22b   :  { %10839 = vmatprep.subr.bf16.mxu1 %v10838_v32 }
 0x22d   :  { %10017 = vmatmul.mubr.msk.f32.gmra.mrb[32].mxu1 %vm250_vm0, %v12456_v23 }
 0x22e   :  { %10019 = vmatprep.mubr.msk.f32.mxu1 %vm250_vm0, %v12460_v24  ;;  %10841 = vmatpush3.bf16.msra.mxu1 %v10838_v32  ;;  %v1473_v24 = vld [vmem:[%s16252_s3 + $0x10] sm:$0xff] }
 0x22f   :  { %10843 = vmatprep.subr.bf16.mxu1 %v10842_v57 }
 0x231   :  { %10020 = vmatmul.mubr.msk.f32.gmra.mrb[34].mxu1 %vm250_vm0, %v12481_v45  ;;  %v1474_v45 = vld [vmem:[%s16252_s3 + $0x18] sm:$0xff] }
 0x232   :  { %10022 = vmatprep.mubr.msk.f32.mxu1 %vm250_vm0, %v12485_v49  ;;  %10845 = vmatpush3.bf16.msra.mxu1 %v10842_v57  ;;  %v16286_v49 = vmax.f32 %v12623_v22, 0.0  ;;  %v1477_v22 = vld [vmem:[%s16252_s3 + $0x30] sm:$0xff] }
 0x233   :  { %10847 = vmatprep.subr.bf16.mxu1 %v10846_v19  ;;  %v10858_v50 = vpack.c.bf16 %v1478_v42, %v1477_v22 }
 0x235   :  { %10023 = vmatmul.mubr.msk.f32.gmra.mrb[36].mxu1 %vm250_vm0, %v12505_v61  ;;  %v10850_v61 = vpack.c.bf16 %v1474_v45, %v1473_v24 }
 0x236   :  { %10025 = vmatprep.mubr.msk.f32.mxu1 %vm250_vm0, %v12509_v63  ;;  %v1475_v63 = vld [vmem:[%s16252_s3 + $0x20] sm:$0xff] }
 0x239   :  { %10026 = vmatmul.mubr.msk.f32.gmra.mrb[38].mxu1 %vm250_vm0, %v12529_v17  ;;  %v1476_v17 = vld [vmem:[%s16252_s3 + $0x28] sm:$0xff] }
 0x23a   :  { %10028 = vmatprep.mubr.msk.f32.mxu1 %vm250_vm0, %v12532_v20  ;;  %v16287_v20 = vmax.f32 %v12621_v14, 0.0  ;;  %v16290_v14 = vmax.f32 %v12643_v8, 0.0  ;;  %v16294_v8 = vmax.f32 %v12657_v52, 0.0  ;;  %v10862_v52 = vpack.c.bf16 %v7937_v33, %v7936_v26 }
 0x23d   :  { %10029 = vmatmul.mubr.msk.f32.gmra.mrb[40].mxu1 %vm250_vm0, %v12547_v34  ;;  %v10854_v34 = vpack.c.bf16 %v1476_v17, %v1475_v63 }
 0x23e   :  { %10047 = vmatprep.mubr.msk.f32.mxu1 %vm1488_vm2, %v16286_v49 }
 0x241   :  { %10048 = vmatmul.mubr.msk.f32.vlgmr.msra.gmra.mrb[42].mxu1 %vm1488_vm2, %v16287_v20 }
 0x242   :  { %10050 = vmatprep.mubr.msk.f32.mxu1 %vm1488_vm2, %v16288_v1  ;;  %10849 = vmatpush3.bf16.msra.mxu1 %v10846_v19 }
 0x243   :  { %10851 = vmatprep.subr.bf16.mxu1 %v10850_v61 }
 0x245   :  { %10051 = vmatmul.mubr.msk.f32.gmra.mrb[44].mxu1 %vm1488_vm2, %v16289_v37 }
 0x246   :  { %10053 = vmatprep.mubr.msk.f32.mxu1 %vm1488_vm2, %v16290_v14  ;;  %10853 = vmatpush3.bf16.msra.mxu1 %v10850_v61 }
 0x247   :  { %10855 = vmatprep.subr.bf16.mxu1 %v10854_v34 }
 0x249   :  { %10054 = vmatmul.mubr.msk.f32.gmra.mrb[46].mxu1 %vm1488_vm2, %v16291_v43 }
 0x24a   :  { %10056 = vmatprep.mubr.msk.f32.mxu1 %vm1488_vm2, %v16292_v54  ;;  %10857 = vmatpush3.bf16.msra.mxu1 %v10854_v34  ;;  %v12122_v54 = vmov 0.0|0.0  }
 0x24b   :  { %10859 = vmatprep.subr.bf16.mxu1 %v10858_v50  ;;  %10878 = vmatprep.subr.bf16.mxu0 %v12122_v54 }
 0x24d   :  { %10057 = vmatmul.mubr.msk.f32.gmra.mrb[48].mxu1 %vm1488_vm2, %v16293_v39  ;;  %v16295_v39 = vmov 0.0  }
 0x24e   :  { %10059 = vmatprep.mubr.msk.f32.mxu1 %vm1488_vm2, %v1195_v13  ;;  %10861 = vmatpush3.bf16.msra.mxu1 %v10858_v50  ;;  %v10866_v13 = vpack.c.bf16 %v7939_v47, %v7938_v38 }
 0x24f   :  { %10863 = vmatprep.subr.bf16.mxu1 %v10862_v52  ;;  %10170 = vmatprep.mubr.msk.f32.mxu0 %vm12123_vm4, %v16295_v39 }
 0x251   :  { %10060 = vmatmul.mubr.msk.f32.gmra.mrb[50].mxu1 %vm1488_vm2, %v16294_v8  ;;  %v7958_v8 = vld [vmem:[%s16253_s4] ss:$0 sm:$0xff] }
 0x252   :  { %10062 = vmatprep.mubr.msk.f32.mxu1 %vm1488_vm2, %v1197_v3 }
 0x255   :  { %10063 = vmatmul.mubr.msk.f32.gmra.mrb[52].mxu1 %vm1488_vm2, %v1198_v59  ;;  %v10870_v59 = vpack.c.bf16 %v7941_v41, %v7940_v7 }
 0x256   :  { %10065 = vmatprep.mubr.msk.f32.mxu1 %vm1488_vm2, %v1199_v18 }
 0x259   :  { %10066 = vmatmul.mubr.msk.f32.gmra.mrb[54].mxu1 %vm1488_vm2, %v1200_v35  ;;  %v7942_v35 = vld [vmem:[%s16252_s3 + $0xb0] sm:$0xff] }
 0x25a   :  { %v10874_v5 = vpack.c.bf16 %v7943_v58, %v7942_v35 }
 0x2dc   :  { %v9963_v27 = vpop.f32.mrb[14].mxu1 }
 0x2dd   :  { %v1267_v0 = vpop.f32.mrb[15].mxu1 }
 0x2de   :  { %10084 = vmatprep.mubr.msk.f32.mxu1 %vm1488_vm2, %v1267_v0 }
 0x2df   :  { %10085 = vmatmul.mubr.msk.f32.vlgmr.msra.gmra.mrb[42].mxu1 %vm1488_vm2, %v9963_v27 }
 0x2e0   :  { %v9966_v3 = vpop.f32.mrb[16].mxu1  ;;  %10865 = vmatpush3.bf16.msra.mxu1 %v10862_v52 }
 0x2e1   :  { %v1277_v18 = vpop.f32.mrb[17].mxu1  ;;  %10867 = vmatprep.subr.bf16.mxu1 %v10866_v13 }
 0x2e2   :  { %10087 = vmatprep.mubr.msk.f32.mxu1 %vm1488_vm2, %v1277_v18 }
 0x2e3   :  { %10088 = vmatmul.mubr.msk.f32.gmra.mrb[44].mxu1 %vm1488_vm2, %v9966_v3 }
 0x2e4   :  { %v9969_v6 = vpop.f32.mrb[18].mxu1  ;;  %10869 = vmatpush3.bf16.msra.mxu1 %v10866_v13 }
 0x2e5   :  { %v1287_v11 = vpop.f32.mrb[19].mxu1  ;;  %10871 = vmatprep.subr.bf16.mxu1 %v10870_v59 }
 0x2e6   :  { %10090 = vmatprep.mubr.msk.f32.mxu1 %vm1488_vm2, %v1287_v11 }
 0x2e7   :  { %10091 = vmatmul.mubr.msk.f32.gmra.mrb[46].mxu1 %vm1488_vm2, %v9969_v6 }
 0x2e8   :  { %v9972_v32 = vpop.f32.mrb[20].mxu1  ;;  %10873 = vmatpush3.bf16.msra.mxu1 %v10870_v59 }
 0x2e9   :  { %v1297_v44 = vpop.f32.mrb[21].mxu1  ;;  %10875 = vmatprep.subr.bf16.mxu1 %v10874_v5 }
 0x2ea   :  { %10093 = vmatprep.mubr.msk.f32.mxu1 %vm1488_vm2, %v1297_v44 }
 0x2eb   :  { %10094 = vmatmul.mubr.msk.f32.gmra.mrb[48].mxu1 %vm1488_vm2, %v9972_v32 }
 0x2ec   :  { %v9975_v2 = vpop.f32.mrb[22].mxu1  ;;  %10877 = vmatpush3.bf16.msra.mxu1 %v10874_v5 }
 0x2ed   :  { %v1307_v57 = vpop.f32.mrb[23].mxu1  ;;  %10929 = vmatprep.subr.bf16.mxu1 %v12122_v54 }
 0x2ee   :  { %10096 = vmatprep.mubr.msk.f32.mxu1 %vm1488_vm2, %v1307_v57 }
 0x2ef   :  { %10097 = vmatmul.mubr.msk.f32.gmra.mrb[50].mxu1 %vm1488_vm2, %v9975_v2 }
 0x2f0   :  { %v9978_v21 = vpop.f32.mrb[24].mxu1 }
 0x2f1   :  { %v1317_v15 = vpop.f32.mrb[25].mxu1 }
 0x2f2   :  { %10099 = vmatprep.mubr.msk.f32.mxu1 %vm1488_vm2, %v1317_v15 }
 0x2f3   :  { %10100 = vmatmul.mubr.msk.f32.gmra.mrb[52].mxu1 %vm1488_vm2, %v9978_v21 }
 0x2f4   :  { %v9981_v19 = vpop.f32.mrb[26].mxu1 }
 0x2f5   :  { %v1327_v24 = vpop.f32.mrb[27].mxu1 }
 0x2f6   :  { %10102 = vmatprep.mubr.msk.f32.mxu1 %vm1488_vm2, %v1327_v24 }
 0x2f7   :  { %10103 = vmatmul.mubr.msk.f32.gmra.mrb[54].mxu1 %vm1488_vm2, %v9981_v19 }
 0x2f8   :  { %v10012_v45 = vpop.f32.mrb[28].mxu1 }
 0x2f9   :  { %v1402_v49 = vpop.f32.mrb[29].mxu1 }
 0x2fa   :  { %10121 = vmatprep.mubr.msk.f32.mxu1 %vm1488_vm2, %v1402_v49 }
 0x2fb   :  { %10122 = vmatmul.mubr.msk.f32.vlgmr.msra.gmra.mrb[42].mxu1 %vm1488_vm2, %v10012_v45 }
 0x2fc   :  { %v10015_v61 = vpop.f32.mrb[30].mxu1 }
 0x2fd   :  { %v1412_v63 = vpop.f32.mrb[31].mxu1 }
 0x2fe   :  { %10124 = vmatprep.mubr.msk.f32.mxu1 %vm1488_vm2, %v1412_v63 }
 0x2ff   :  { %10125 = vmatmul.mubr.msk.f32.gmra.mrb[44].mxu1 %vm1488_vm2, %v10015_v61 }
 0x300   :  { %v10018_v17 = vpop.f32.mrb[32].mxu1 }
 0x301   :  { %v1422_v20 = vpop.f32.mrb[33].mxu1 }
 0x302   :  { %10127 = vmatprep.mubr.msk.f32.mxu1 %vm1488_vm2, %v1422_v20 }
 0x303   :  { %10128 = vmatmul.mubr.msk.f32.gmra.mrb[46].mxu1 %vm1488_vm2, %v10018_v17 }
 0x304   :  { %v10021_v1 = vpop.f32.mrb[34].mxu1 }
 0x305   :  { %v1432_v34 = vpop.f32.mrb[35].mxu1 }
 0x306   :  { %10130 = vmatprep.mubr.msk.f32.mxu1 %vm1488_vm2, %v1432_v34 }
 0x307   :  { %10131 = vmatmul.mubr.msk.f32.gmra.mrb[48].mxu1 %vm1488_vm2, %v10021_v1 }
 0x308   :  { %v10024_v22 = vpop.f32.mrb[36].mxu1 }
 0x309   :  { %v1442_v42 = vpop.f32.mrb[37].mxu1 }
 0x30a   :  { %10133 = vmatprep.mubr.msk.f32.mxu1 %vm1488_vm2, %v1442_v42 }
 0x30b   :  { %10134 = vmatmul.mubr.msk.f32.gmra.mrb[50].mxu1 %vm1488_vm2, %v10024_v22 }
 0x30c   :  { %v10027_v37 = vpop.f32.mrb[38].mxu1 }
 0x30d   :  { %v1452_v14 = vpop.f32.mrb[39].mxu1 }
 0x30e   :  { %10136 = vmatprep.mubr.msk.f32.mxu1 %vm1488_vm2, %v1452_v14 }
 0x30f   :  { %10137 = vmatmul.mubr.msk.f32.gmra.mrb[52].mxu1 %vm1488_vm2, %v10027_v37 }
 0x310   :  { %v10030_v50 = vpop.f32.mrb[40].mxu1 }
 0x311   :  { %v1462_v43 = vpop.f32.mrb[41].mxu1 }
 0x312   :  { %10139 = vmatprep.mubr.msk.f32.mxu1 %vm1488_vm2, %v1462_v43 }
 0x313   :  { %10140 = vmatmul.mubr.msk.f32.gmra.mrb[54].mxu1 %vm1488_vm2, %v10030_v50 }
 0x314   :  { %10289 = vmatprep.mubr.msk.f32.mxu1 %vm12123_vm4, %v16295_v39 }
 0x3ce   :  { %v10123_v26 = vpop.f32.mrb[42].mxu1 }
 0x3cf   :  { %v2051_v33 = vadd.f32 %v10123_v26, %v7958_v8  ;;  %v1960_v52 = vpop.f32.mrb[43].mxu1 }
 0x3d0   :  { %v2050_v38 = vadd.f32 %v7958_v8, %v1960_v52 }
 0x3d1   :  { %v2065_v47 = vmax.f32 %v2051_v33, 0.0 }
 0x3d2   :  { %v2064_v27 = vmax.f32 %v2050_v38, 0.0  ;;  %v10126_v0 = vpop.f32.mrb[44].mxu1 }
 0x3d3   :  { %v2053_v13 = vadd.f32 %v10126_v0, %v7958_v8  ;;  %v1970_v7 = vpop.f32.mrb[45].mxu1 }
 0x3d4   :  { %v10879_v41 = vpack.c.bf16 %v2065_v47, %v2064_v27  ;;  %v2052_v3 = vadd.f32 %v7958_v8, %v1970_v7  ;;  %v2078_v47 = vmul.u32 2, %v12240_v9 }
 0x3d5   :  { %v2067_v18 = vmax.f32 %v2053_v13, 0.0 }
 0x3d6   :  { %v2066_v59 = vmax.f32 %v2052_v3, 0.0  ;;  %v10129_v35 = vpop.f32.mrb[46].mxu1  ;;  %10880 = vmatpush3.bf16.msra.mxu0 %v10879_v41  ;;  %vm2085_vm7 = vcmp.eq.s32.totalorder %v12242_v10, %v2078_v47  ;;  %v2079_v3 = vmul.u32 2, %v12291_v25 }
 0x3d7   :  { %v2055_v58 = vadd.f32 %v10129_v35, %v7958_v8  ;;  %v1980_v6 = vpop.f32.mrb[47].mxu1  ;;  %10881 = vmatprep.subr.bf16.mxu0 %v12122_v54 }
 0x3d8   :  { %v10882_v11 = vpack.c.bf16 %v2067_v18, %v2066_v59  ;;  %v2054_v5 = vadd.f32 %v7958_v8, %v1980_v6  ;;  %v12906_v59 = vsel %vm2085_vm7, 1.0, %v16295_v39  ;;  %vm2086_vm9 = vcmp.eq.s32.totalorder %v12242_v10, %v2079_v3 }
 0x3d9   :  { %v2069_v32 = vmax.f32 %v2055_v58, 0.0  ;;  %v12916_v35 = vsel %vm2086_vm9, 1.0, %v16295_v39  ;;  %v2081_v58 = vmul.u32 2, %v12311_v30 }
 0x3da   :  { %v2068_v44 = vmax.f32 %v2054_v5, 0.0  ;;  %v10132_v2 = vpop.f32.mrb[48].mxu1  ;;  %10883 = vmatpush3.bf16.msra.mxu0 %v10882_v11  ;;  %v2084_v5 = vmul.u32 2, %v12338_v40 }
 0x3db   :  { %v2057_v57 = vadd.f32 %v10132_v2, %v7958_v8  ;;  %v1990_v21 = vpop.f32.mrb[49].mxu1  ;;  %10884 = vmatprep.subr.bf16.mxu0 %v12122_v54  ;;  %vm2088_vm12 = vcmp.eq.s32.totalorder %v12242_v10, %v2081_v58 }
 0x3dc   :  { %v10885_v15 = vpack.c.bf16 %v2069_v32, %v2068_v44  ;;  %v2056_v19 = vadd.f32 %v7958_v8, %v1990_v21  ;;  %v12936_v6 = vsel %vm2088_vm12, 1.0, %v16295_v39  ;;  %vm2091_vm1 = vcmp.eq.s32.totalorder %v12242_v10, %v2084_v5 }
 0x3dd   :  { %v2071_v24 = vmax.f32 %v2057_v57, 0.0  ;;  %v2106_v32 = vadd.s32 1, %v2078_v47  ;;  %v7965_v40 = vsel %vm2091_vm1, 1.0, %v16295_v39  ;;  %v2107_v44 = vadd.s32 1, %v2079_v3 }
 0x3de   :  { %v2070_v45 = vmax.f32 %v2056_v19, 0.0  ;;  %v10135_v49 = vpop.f32.mrb[50].mxu1  ;;  %10886 = vmatpush3.bf16.msra.mxu0 %v10885_v15 }
 0x3df   :  { %v2059_v61 = vadd.f32 %v10135_v49, %v7958_v8  ;;  %v2000_v63 = vpop.f32.mrb[51].mxu1  ;;  %10887 = vmatprep.subr.bf16.mxu0 %v12122_v54  ;;  %vm2113_vm7 = vcmp.eq.s32.totalorder %v12242_v10, %v2106_v32  ;;  %vm2114_vm9 = vcmp.eq.s32.totalorder %v12242_v10, %v2107_v44 }
 0x3e0   :  { %v10888_v17 = vpack.c.bf16 %v2071_v24, %v2070_v45  ;;  %v2058_v20 = vadd.f32 %v7958_v8, %v2000_v63  ;;  %v12965_v2 = vsel %vm2113_vm7, 1.0, %v16295_v39  ;;  %v12974_v21 = vsel %vm2114_vm9, 1.0, %v16295_v39 }
 0x3e1   :  { %v2073_v1 = vmax.f32 %v2059_v61, 0.0  ;;  %v2112_v63 = vadd.s32 1, %v2084_v5  ;;  %vm2386_vm7 = vcmp.ne.s32.totalorder %v12311_v30, 28  ;;  %vm2400_vm9 = vcmp.ne.s32.totalorder %v12311_v30, 27  ;;  %v8021_v30 = vld [vmem:[%s16254_s5 + $0x70] sm:$0xff] }
 0x3e2   :  { %v2072_v34 = vmax.f32 %v2058_v20, 0.0  ;;  %v10138_v22 = vpop.f32.mrb[52].mxu1  ;;  %10889 = vmatpush3.bf16.msra.mxu0 %v10888_v17 }
 0x3e3   :  { %v2061_v42 = vadd.f32 %v10138_v22, %v7958_v8  ;;  %v2010_v37 = vpop.f32.mrb[53].mxu1  ;;  %10890 = vmatprep.subr.bf16.mxu0 %v12122_v54  ;;  %vm2119_vm1 = vcmp.eq.s32.totalorder %v12242_v10, %v2112_v63 }
 0x3e4   :  { %v10891_v14 = vpack.c.bf16 %v2073_v1, %v2072_v34  ;;  %v2060_v50 = vadd.f32 %v7958_v8, %v2010_v37  ;;  %v7972_v20 = vsel %vm2119_vm1, 1.0, %v16295_v39 }
 0x3e5   :  { %v2075_v43 = vmax.f32 %v2061_v42, 0.0 }
 0x3e6   :  { %v2074_v26 = vmax.f32 %v2060_v50, 0.0  ;;  %v10141_v33 = vpop.f32.mrb[54].mxu1  ;;  %10892 = vmatpush3.bf16.msra.mxu0 %v10891_v14 }
 0x3e7   :  { %v2063_v52 = vadd.f32 %v10141_v33, %v7958_v8  ;;  %v2020_v38 = vpop.f32.mrb[55].mxu1  ;;  %10893 = vmatprep.subr.bf16.mxu0 %v12122_v54 }
 0x3e8   :  { %v10894_v27 = vpack.c.bf16 %v2075_v43, %v2074_v26  ;;  %v2062_v0 = vadd.f32 %v7958_v8, %v2020_v38  ;;  %v2080_v8 = vmul.u32 2, %v12304_v28 }
 0x3e9   :  { %v2077_v13 = vmax.f32 %v2063_v52, 0.0 }
 0x3ea   :  { %v2076_v7 = vmax.f32 %v2062_v0, 0.0  ;;  %10895 = vmatpush3.bf16.msra.mxu0 %v10894_v27  ;;  %vm2087_vm11 = vcmp.eq.s32.totalorder %v12242_v10, %v2080_v8  ;;  %v2108_v57 = vadd.s32 1, %v2080_v8 }
 0x3eb   :  { %10896 = vmatprep.subr.bf16.mxu0 %v12122_v54  ;;  %v12926_v28 = vsel %vm2087_vm11, 1.0, %v16295_v39 }
 0x3ec   :  { %v10897_v18 = vpack.c.bf16 %v2077_v13, %v2076_v7  ;;  %vm2115_vm11 = vcmp.eq.s32.totalorder %v12242_v10, %v2108_v57 }
 0x3ed   :  { %v12982_v19 = vsel %vm2115_vm11, 1.0, %v16295_v39  ;;  %vm2393_vm11 = vmand %vm99_vm8, %vm2386_vm7  ;;  %vm3899_vm8 = vcmask 228352  }
 0x3ee   :  { %10898 = vmatpush3.bf16.msra.mxu0 %v10897_v18 }
 0x3ef   :  { %10899 = vmatprep.subr.bf16.mxu0 %v12122_v54 }
 0x3f1   :  { %10171 = vmatmul.mubr.msk.f32.vlgmr.msra.gmra.mrb[28].mxu0 %vm250_vm0, %v12906_v59 }
 0x3f2   :  { %10901 = vmatpush3.bf16.msra.mxu0 %v10879_v41  ;;  %10173 = vmatprep.mubr.msk.f32.mxu0 %vm12123_vm4, %v16295_v39  ;;  %v2082_v41 = vmul.u32 2, %v12314_v31 }
 0x3f3   :  { %10902 = vmatprep.subr.bf16.mxu0 %v12122_v54 }
 0x3f4   :  { %vm2089_vm13 = vcmp.eq.s32.totalorder %v12242_v10, %v2082_v41  ;;  %v2110_v24 = vadd.s32 1, %v2082_v41 }
 0x3f5   :  { %10174 = vmatmul.mubr.msk.f32.gmra.mrb[30].mxu0 %vm250_vm0, %v12916_v35  ;;  %v7963_v31 = vsel %vm2089_vm13, 1.0, %v16295_v39 }
 0x3f6   :  { %10904 = vmatpush3.bf16.msra.mxu0 %v10882_v11  ;;  %10176 = vmatprep.mubr.msk.f32.mxu0 %vm12123_vm4, %v16295_v39  ;;  %v2083_v11 = vmul.u32 2, %v12328_v36  ;;  %vm2117_vm13 = vcmp.eq.s32.totalorder %v12242_v10, %v2110_v24 }
 0x3f7   :  { %10905 = vmatprep.subr.bf16.mxu0 %v12122_v54  ;;  %v7970_v61 = vsel %vm2117_vm13, 1.0, %v16295_v39 }
 0x3f8   :  { %vm2090_vm15 = vcmp.eq.s32.totalorder %v12242_v10, %v2083_v11  ;;  %v2111_v49 = vadd.s32 1, %v2083_v11 }
 0x3f9   :  { %10177 = vmatmul.mubr.msk.f32.gmra.mrb[32].mxu0 %vm250_vm0, %v12926_v28  ;;  %v7964_v36 = vsel %vm2090_vm15, 1.0, %v16295_v39 }
 0x3fa   :  { %10907 = vmatpush3.bf16.msra.mxu0 %v10885_v15  ;;  %10179 = vmatprep.mubr.msk.f32.mxu0 %vm12123_vm4, %v16295_v39  ;;  %v2109_v15 = vadd.s32 1, %v2081_v58  ;;  %vm2118_vm15 = vcmp.eq.s32.totalorder %v12242_v10, %v2111_v49 }
 0x3fb   :  { %10908 = vmatprep.subr.bf16.mxu0 %v12122_v54 }
 0x3fc   :  { %vm2116_vm12 = vcmp.eq.s32.totalorder %v12242_v10, %v2109_v15 }
 0x3fd   :  { %10180 = vmatmul.mubr.msk.f32.gmra.mrb[34].mxu0 %vm250_vm0, %v12936_v6  ;;  %v12990_v45 = vsel %vm2116_vm12, 1.0, %v16295_v39  ;;  %vm13103_vm12 = vmand %vm127_vm10, %vm2400_vm9  ;;  %vm3868_vm10 = vcmp.ne.s32.totalorder %v12291_v25, 14 }
 0x3fe   :  { %10910 = vmatpush3.bf16.msra.mxu0 %v10888_v17  ;;  %10182 = vmatprep.mubr.msk.f32.mxu0 %vm12123_vm4, %v16295_v39  ;;  %v7971_v17 = vsel %vm2118_vm15, 1.0, %v16295_v39 }
 0x3ff   :  { %10911 = vmatprep.subr.bf16.mxu0 %v12122_v54 }
 0x401   :  { %10183 = vmatmul.mubr.msk.f32.gmra.mrb[36].mxu0 %vm250_vm0, %v7963_v31 }
 0x402   :  { %10913 = vmatpush3.bf16.msra.mxu0 %v10891_v14  ;;  %10185 = vmatprep.mubr.msk.f32.mxu0 %vm12123_vm4, %v16295_v39 }
 0x403   :  { %10914 = vmatprep.subr.bf16.mxu0 %v12122_v54 }
 0x405   :  { %10186 = vmatmul.mubr.msk.f32.gmra.mrb[38].mxu0 %vm250_vm0, %v7964_v36 }
 0x406   :  { %10916 = vmatpush3.bf16.msra.mxu0 %v10894_v27  ;;  %10188 = vmatprep.mubr.msk.f32.mxu0 %vm12123_vm4, %v16295_v39 }
 0x407   :  { %10917 = vmatprep.subr.bf16.mxu0 %v12122_v54 }
 0x409   :  { %10189 = vmatmul.mubr.msk.f32.gmra.mrb[40].mxu0 %vm250_vm0, %v7965_v40 }
 0x40a   :  { %10919 = vmatpush3.bf16.msra.mxu0 %v10897_v18  ;;  %10219 = vmatprep.mubr.msk.f32.mxu0 %vm12123_vm4, %v16295_v39 }
 0x40b   :  { %10920 = vmatprep.subr.bf16.mxu0 %v12122_v54 }
 0x40d   :  { %10220 = vmatmul.mubr.msk.f32.vlgmr.msra.gmra.mrb[42].mxu0 %vm250_vm0, %v12965_v2 }
 0x40e   :  { %10222 = vmatprep.mubr.msk.f32.mxu0 %vm12123_vm4, %v16295_v39 }
 0x411   :  { %10223 = vmatmul.mubr.msk.f32.gmra.mrb[44].mxu0 %vm250_vm0, %v12974_v21 }
 0x412   :  { %10225 = vmatprep.mubr.msk.f32.mxu0 %vm12123_vm4, %v16295_v39 }
 0x415   :  { %10226 = vmatmul.mubr.msk.f32.gmra.mrb[46].mxu0 %vm250_vm0, %v12982_v19 }
 0x416   :  { %10228 = vmatprep.mubr.msk.f32.mxu0 %vm12123_vm4, %v16295_v39 }
 0x419   :  { %10229 = vmatmul.mubr.msk.f32.gmra.mrb[48].mxu0 %vm250_vm0, %v12990_v45 }
 0x41a   :  { %10231 = vmatprep.mubr.msk.f32.mxu0 %vm12123_vm4, %v16295_v39 }
 0x41d   :  { %10232 = vmatmul.mubr.msk.f32.gmra.mrb[50].mxu0 %vm250_vm0, %v7970_v61 }
 0x41e   :  { %10234 = vmatprep.mubr.msk.f32.mxu0 %vm12123_vm4, %v16295_v39 }
 0x421   :  { %10235 = vmatmul.mubr.msk.f32.gmra.mrb[52].mxu0 %vm250_vm0, %v7971_v17 }
 0x422   :  { %10237 = vmatprep.mubr.msk.f32.mxu0 %vm12123_vm4, %v16295_v39 }
 0x425   :  { %10238 = vmatmul.mubr.msk.f32.gmra.mrb[54].mxu0 %vm250_vm0, %v7972_v20  ;;  %vm2439_vm0 = vcmask 457728  }
 0x426   :  { %10254 = vmatprep.mubr.msk.f32.mxu0 %vm12123_vm4, %v16295_v39 }
 0x4c4   :  { %v2221_v1 = vpop.f32.mrb[28].mxu0 }
 0x4c5   :  { %v10172_v34 = vpop.f32.mrb[29].mxu0 }
 0x4c6   :  { %v8015_v34 = vld [vmem:[%s16254_s5 + $0x40] sm:$0xff] }
 0x4c8   :  { %v2226_v22 = vpop.f32.mrb[30].mxu0 }
 0x4c9   :  { %v10175_v42 = vpop.f32.mrb[31].mxu0 }
 0x4ca   :  { %v2682_v42 = vld [vmem:[%s16254_s5] sm:$0xff] }
 0x4cc   :  { %v2231_v37 = vpop.f32.mrb[32].mxu0 }
 0x4cd   :  { %v10178_v14 = vpop.f32.mrb[33].mxu0 }
 0x4d0   :  { %v2236_v50 = vpop.f32.mrb[34].mxu0 }
 0x4d1   :  { %v10181_v43 = vpop.f32.mrb[35].mxu0 }
 0x4d4   :  { %v2241_v26 = vpop.f32.mrb[36].mxu0 }
 0x4d5   :  { %v10184_v33 = vpop.f32.mrb[37].mxu0 }
 0x4d6   :  { %v2684_v33 = vld [vmem:[%s16254_s5 + $0x10] sm:$0xff] }
 0x4d8   :  { %v2246_v52 = vpop.f32.mrb[38].mxu0 }
 0x4d9   :  { %v10187_v38 = vpop.f32.mrb[39].mxu0 }
 0x4dc   :  { %v2251_v47 = vpop.f32.mrb[40].mxu0 }
 0x4dd   :  { %v10190_v27 = vpop.f32.mrb[41].mxu0 }
 0x4e0   :  { %v2342_v0 = vpop.f32.mrb[42].mxu0 }
 0x4e1   :  { %v13011_v13 = vmax.f32 %v2221_v1, %v2342_v0  ;;  %v10221_v7 = vpop.f32.mrb[43].mxu0  ;;  %v8020_v0 = vld [vmem:[%s16254_s5 + $0x68] sm:$0xff] }
 0x4e2   :  { %v2686_v7 = vld [vmem:[%s16254_s5 + $0x20] sm:$0xff] }
 0x4e4   :  { %v2347_v3 = vpop.f32.mrb[44].mxu0 }
 0x4e5   :  { %v13013_v18 = vmax.f32 %v2226_v22, %v2347_v3  ;;  %v10224_v8 = vpop.f32.mrb[45].mxu0  ;;  %v8016_v22 = vld [vmem:[%s16254_s5 + $0x48] sm:$0xff] }
 0x4e6   :  { %v10939_v14 = vpack.c.bf16 %v8016_v22, %v8015_v34  ;;  %v2687_v3 = vld [vmem:[%s16254_s5 + $0x28] sm:$0xff]  ;;  %v8037_v34 = vld [vmem:[%s16254_s5 + $0x80] sm:$0xff] }
 0x4e7   :  { %v10921_v58 = vpack.c.bf16 %v13013_v18, %v13011_v13  ;;  %v8038_v22 = vld [vmem:[%s16254_s5 + $0x88] sm:$0xff] }
 0x4e8   :  { %v2352_v41 = vpop.f32.mrb[46].mxu0 }
 0x4e9   :  { %v13017_v11 = vmax.f32 %v2231_v37, %v2352_v41  ;;  %v10227_v31 = vpop.f32.mrb[47].mxu0  ;;  %10922 = vmatpush3.bf16.msra.mxu0 %v10921_v58  ;;  %10931 = vmatpush3.bf16.msra.mxu1 %v10921_v58  ;;  %v2683_v37 = vld [vmem:[%s16254_s5 + $0x8] sm:$0xff] }
 0x4ea   :  { %10923 = vmatprep.subr.bf16.mxu0 %v12122_v54  ;;  %10932 = vmatprep.subr.bf16.mxu1 %v12122_v54  ;;  %v10951_v43 = vpack.c.bf16 %v2683_v37, %v2682_v42  ;;  %v10963_v42 = vpack.c.bf16 %v8038_v22, %v8037_v34  ;;  %v8039_v37 = vld [vmem:[%s16254_s5 + $0x90] sm:$0xff] }
 0x4ec   :  { %v2357_v5 = vpop.f32.mrb[48].mxu0 }
 0x4ed   :  { %v13021_v36 = vmax.f32 %v2236_v50, %v2357_v5  ;;  %v10230_v32 = vpop.f32.mrb[49].mxu0  ;;  %v8017_v50 = vld [vmem:[%s16254_s5 + $0x50] sm:$0xff]  ;;  %v10957_v5 = vpack.c.bf16 %v2687_v3, %v2686_v7 }
 0x4ee   :  { %v8022_v32 = vld [vmem:[%s16254_s5 + $0x78] sm:$0xff] }
 0x4ef   :  { %v10924_v40 = vpack.c.bf16 %v13021_v36, %v13017_v11 }
 0x4f0   :  { %v2362_v44 = vpop.f32.mrb[50].mxu0 }
 0x4f1   :  { %v13025_v57 = vmax.f32 %v2241_v26, %v2362_v44  ;;  %v10233_v15 = vpop.f32.mrb[51].mxu0  ;;  %10925 = vmatpush3.bf16.msra.mxu0 %v10924_v40  ;;  %10934 = vmatpush3.bf16.msra.mxu1 %v10924_v40  ;;  %v8018_v26 = vld [vmem:[%s16254_s5 + $0x58] sm:$0xff]  ;;  %v2688_v40 = vld [vmem:[%s16254_s5 + $0x30] sm:$0xff] }
 0x4f2   :  { %10926 = vmatprep.subr.bf16.mxu0 %v12122_v54  ;;  %10935 = vmatprep.subr.bf16.mxu1 %v12122_v54  ;;  %v10942_v38 = vpack.c.bf16 %v8018_v26, %v8017_v50  ;;  %v2689_v44 = vld [vmem:[%s16254_s5 + $0x38] sm:$0xff]  ;;  %v13128_v15 = vsel %vm2393_vm11, 1.0, %v16295_v39  ;;  %v8042_v26 = vld [vmem:[%s16254_s5 + $0xa8] sm:$0xff] }
 0x4f4   :  { %v2367_v24 = vpop.f32.mrb[52].mxu0 }
 0x4f5   :  { %v13029_v49 = vmax.f32 %v2246_v52, %v2367_v24  ;;  %v10236_v61 = vpop.f32.mrb[53].mxu0  ;;  %v2685_v52 = vld [vmem:[%s16254_s5 + $0x18] sm:$0xff]  ;;  %v13135_v24 = vsel %vm13103_vm12, 1.0, %v16295_v39 }
 0x4f6   :  { %v10954_v27 = vpack.c.bf16 %v2685_v52, %v2684_v33  ;;  %v10948_v61 = vpack.c.bf16 %v8022_v32, %v8021_v30  ;;  %v8043_v33 = vld [vmem:[%s16254_s5 + $0xb0] sm:$0xff]  ;;  %v8044_v52 = vld [vmem:[%s16254_s5 + $0xb8] sm:$0xff] }
 0x4f7   :  { %v10927_v63 = vpack.c.bf16 %v13029_v49, %v13025_v57 }
 0x4f8   :  { %v2372_v17 = vpop.f32.mrb[54].mxu0 }
 0x4f9   :  { %v13033_v20 = vmax.f32 %v2251_v47, %v2372_v17  ;;  %10928 = vmatpush3.bf16.msra.mxu0 %v10927_v63  ;;  %10937 = vmatpush3.bf16.msra.mxu1 %v10927_v63  ;;  %v10239_v1 = vpop.f32.mrb[55].mxu0  ;;  %v8019_v47 = vld [vmem:[%s16254_s5 + $0x60] sm:$0xff]  ;;  %v10960_v63 = vpack.c.bf16 %v2689_v44, %v2688_v40 }
 0x4fa   :  { %10252 = vmatprep.subr.mxu0 %v16295_v39  ;;  %10287 = vmatprep.subr.mxu1 %v16295_v39  ;;  %v10945_v31 = vpack.c.bf16 %v8020_v0, %v8019_v47  ;;  %v13171_v1 = vsel %vm130_vm14, 1.0, %v16295_v39  ;;  %vm12124_vm14 = vmmov 1  }
 0x4fd   :  { %10253 = vmatpush3.msra.mxu0 %v13033_v20  ;;  %10288 = vmatpush3.msra.mxu1 %v13033_v20 }
 0x4fe   :  { %10255 = vmatmul.mubr.msk.f32.vlgmr.msra.gmra.mrb[56].mxu0 %vm2439_vm0, %v12259_v16  ;;  %10290 = vmatmul.mubr.msk.f32.vlgmr.msra.gmra.mrb[56].mxu1 %vm2439_vm0, %v12308_v29 }
 0x4ff   :  { %10257 = vmatprep.mubr.msk.f32.mxu0 %vm12123_vm4, %v16295_v39  ;;  %10292 = vmatprep.mubr.msk.f32.mxu1 %vm12123_vm4, %v16295_v39 }
 0x500   :  { %10938 = vmatprep.subr.bf16.mxu0 %v12122_v54  ;;  %10950 = vmatprep.subr.bf16.mxu1 %v12122_v54 }
 0x501   :  { %10940 = vmatpush3.bf16.msra.mxu0 %v10939_v14  ;;  %10952 = vmatpush3.bf16.msra.mxu1 %v10951_v43  ;;  %v8040_v14 = vld [vmem:[%s16254_s5 + $0x98] sm:$0xff]  ;;  %v8041_v43 = vld [vmem:[%s16254_s5 + $0xa0] sm:$0xff] }
 0x502   :  { %10258 = vmatmul.mubr.msk.f32.gmra.mrb[58].mxu0 %vm2439_vm0, %v12357_v46  ;;  %10293 = vmatmul.mubr.msk.f32.gmra.mrb[58].mxu1 %vm2439_vm0, %v12373_v51  ;;  %v10966_v50 = vpack.c.bf16 %v8040_v14, %v8039_v37 }
 0x503   :  { %10260 = vmatprep.mubr.msk.f32.mxu0 %vm12123_vm4, %v16295_v39  ;;  %10295 = vmatprep.mubr.msk.f32.mxu1 %vm12123_vm4, %v16295_v39 }
 0x504   :  { %10941 = vmatprep.subr.bf16.mxu0 %v12122_v54  ;;  %10953 = vmatprep.subr.bf16.mxu1 %v12122_v54 }
 0x505   :  { %10943 = vmatpush3.bf16.msra.mxu0 %v10942_v38  ;;  %10955 = vmatpush3.bf16.msra.mxu1 %v10954_v27 }
 0x506   :  { %10261 = vmatmul.mubr.msk.f32.gmra.mrb[60].mxu0 %vm2439_vm0, %v12366_v48  ;;  %10296 = vmatmul.mubr.msk.f32.gmra.mrb[60].mxu1 %vm2439_vm0, %v12378_v53 }
 0x507   :  { %10263 = vmatprep.mubr.msk.f32.mxu0 %vm12123_vm4, %v16295_v39  ;;  %10298 = vmatprep.mubr.msk.f32.mxu1 %vm12123_vm4, %v16295_v39 }
 0x508   :  { %10944 = vmatprep.subr.bf16.mxu0 %v12122_v54  ;;  %10956 = vmatprep.subr.bf16.mxu1 %v12122_v54 }
 0x509   :  { %10946 = vmatpush3.bf16.msra.mxu0 %v10945_v31  ;;  %10958 = vmatpush3.bf16.msra.mxu1 %v10957_v5 }
 0x50a   :  { %10264 = vmatmul.mubr.msk.f32.gmra.mrb[62].mxu0 %vm2439_vm0, %v13128_v15  ;;  %10299 = vmatmul.mubr.msk.f32.gmra.mrb[62].mxu1 %vm2439_vm0, %v13135_v24 }
 0x50b   :  { %10266 = vmatprep.mubr.msk.f32.mxu0 %vm12123_vm4, %v16295_v39  ;;  %10301 = vmatprep.mubr.msk.f32.mxu1 %vm12123_vm4, %v16295_v39 }
 0x50c   :  { %10947 = vmatprep.subr.bf16.mxu0 %v12122_v54  ;;  %10959 = vmatprep.subr.bf16.mxu1 %v12122_v54 }
 0x50d   :  { %10949 = vmatpush3.bf16.msra.mxu0 %v10948_v61  ;;  %10961 = vmatpush3.bf16.msra.mxu1 %v10960_v63 }
 0x50e   :  { %10267 = vmatmul.mubr.msk.f32.gmra.mrb[64].mxu0 %vm2439_vm0, %v12392_v56  ;;  %10302 = vmatmul.mubr.msk.f32.gmra.mrb[64].mxu1 %vm2439_vm0, %v12422_v62 }
 0x50f   :  { %10269 = vmatprep.mubr.msk.f32.mxu0 %vm12123_vm4, %v16295_v39  ;;  %10304 = vmatprep.mubr.msk.f32.mxu1 %vm12123_vm4, %v16295_v39 }
 0x510   :  { %10962 = vmatprep.subr.bf16.mxu0 %v12122_v54  ;;  %10974 = vmatprep.subr.bf16.mxu1 %v12122_v54 }
 0x512   :  { %10270 = vmatmul.mubr.msk.f32.gmra.mrb[66].mxu0 %vm2439_vm0, %v12437_v4  ;;  %10305 = vmatmul.mubr.msk.f32.gmra.mrb[66].mxu1 %vm2439_vm0, %v12456_v23 }
 0x513   :  { %10272 = vmatprep.mubr.msk.f32.mxu0 %vm12123_vm4, %v16295_v39  ;;  %10307 = vmatprep.mubr.msk.f32.mxu1 %vm12123_vm4, %v16295_v39 }
 0x516   :  { %10273 = vmatmul.mubr.msk.f32.gmra.mrb[68].mxu0 %vm2439_vm0, %v12446_v12  ;;  %10308 = vmatmul.mubr.msk.f32.gmra.mrb[68].mxu1 %vm2439_vm0, %v13171_v1 }
 0x517   :  { %10326 = vmatprep.mubr.msk.f32.mxu0 %vm12123_vm4, %v16295_v39  ;;  %10363 = vmatprep.mubr.msk.f32.mxu1 %vm12123_vm4, %v16295_v39 }
 0x51a   :  { %10327 = vmatmul.mubr.msk.f32.vlgmr.msra.gmra.mrb[70].mxu0 %vm1488_vm2, %v13011_v13  ;;  %v10969_v13 = vpack.c.bf16 %v8042_v26, %v8041_v43 }
 0x51b   :  { %10329 = vmatprep.mubr.msk.f32.mxu0 %vm12123_vm4, %v16295_v39  ;;  %10964 = vmatpush3.bf16.msra.mxu0 %v10963_v42 }
 0x51c   :  { %10965 = vmatprep.subr.bf16.mxu0 %v12122_v54 }
 0x51e   :  { %10330 = vmatmul.mubr.msk.f32.gmra.mrb[72].mxu0 %vm1488_vm2, %v13013_v18  ;;  %v10972_v18 = vpack.c.bf16 %v8044_v52, %v8043_v33 }
 0x51f   :  { %10332 = vmatprep.mubr.msk.f32.mxu0 %vm12123_vm4, %v16295_v39  ;;  %10967 = vmatpush3.bf16.msra.mxu0 %v10966_v50 }
 0x520   :  { %10968 = vmatprep.subr.bf16.mxu0 %v12122_v54 }
 0x522   :  { %10333 = vmatmul.mubr.msk.f32.gmra.mrb[74].mxu0 %vm1488_vm2, %v13017_v11 }
 0x523   :  { %10335 = vmatprep.mubr.msk.f32.mxu0 %vm12123_vm4, %v16295_v39  ;;  %10970 = vmatpush3.bf16.msra.mxu0 %v10969_v13 }
 0x524   :  { %10971 = vmatprep.subr.bf16.mxu0 %v12122_v54 }
 0x526   :  { %10336 = vmatmul.mubr.msk.f32.gmra.mrb[76].mxu0 %vm1488_vm2, %v13021_v36 }
 0x527   :  { %10338 = vmatprep.mubr.msk.f32.mxu0 %vm12123_vm4, %v16295_v39  ;;  %10973 = vmatpush3.bf16.msra.mxu0 %v10972_v18 }
 0x528   :  { %10983 = vmatprep.subr.bf16.mxu0 %v12122_v54 }
 0x52a   :  { %10339 = vmatmul.mubr.msk.f32.gmra.mrb[78].mxu0 %vm1488_vm2, %v13025_v57 }
 0x52b   :  { %10341 = vmatprep.mubr.msk.f32.mxu0 %vm12123_vm4, %v16295_v39 }
 0x52e   :  { %10342 = vmatmul.mubr.msk.f32.gmra.mrb[80].mxu0 %vm1488_vm2, %v13029_v49 }
 0x52f   :  { %10344 = vmatprep.mubr.msk.f32.mxu0 %vm12123_vm4, %v16295_v39 }
 0x532   :  { %10345 = vmatmul.mubr.msk.f32.gmra.mrb[82].mxu0 %vm1488_vm2, %v13033_v20 }
 0x533   :  { %10400 = vmatprep.mubr.msk.f32.mxu0 %vm12123_vm4, %v16295_v39 }
 0x5d1   :  { %v2527_v11 = vpop.f32.mrb[56].mxu0  ;;  %v2648_v36 = vpop.f32.mrb[56].mxu1 }
 0x5d2   :  { %v10256_v38 = vpop.f32.mrb[57].mxu0  ;;  %10364 = vmatmul.mubr.msk.f32.vlgmr.msra.gmra.mrb[70].mxu1 %vm1488_vm2, %v2527_v11  ;;  %v10291_v57 = vpop.f32.mrb[57].mxu1  ;;  %10401 = vmatmul.mubr.msk.f32.vlgmr.msra.gmra.mrb[84].mxu0 %vm1488_vm2, %v2648_v36 }
 0x5d3   :  { %10366 = vmatprep.mubr.msk.f32.mxu1 %vm12123_vm4, %v16295_v39  ;;  %10403 = vmatprep.mubr.msk.f32.mxu0 %vm12123_vm4, %v16295_v39 }
 0x5d5   :  { %v2532_v49 = vpop.f32.mrb[58].mxu0  ;;  %v2653_v47 = vpop.f32.mrb[58].mxu1 }
 0x5d6   :  { %v10259_v20 = vpop.f32.mrb[59].mxu0  ;;  %10367 = vmatmul.mubr.msk.f32.gmra.mrb[72].mxu1 %vm1488_vm2, %v2532_v49  ;;  %v10294_v27 = vpop.f32.mrb[59].mxu1  ;;  %10404 = vmatmul.mubr.msk.f32.gmra.mrb[86].mxu0 %vm1488_vm2, %v2653_v47 }
 0x5d7   :  { %10369 = vmatprep.mubr.msk.f32.mxu1 %vm12123_vm4, %v16295_v39  ;;  %10406 = vmatprep.mubr.msk.f32.mxu0 %vm12123_vm4, %v16295_v39 }
 0x5d9   :  { %v2537_v0 = vpop.f32.mrb[60].mxu0  ;;  %v2658_v7 = vpop.f32.mrb[60].mxu1 }
 0x5da   :  { %v10262_v3 = vpop.f32.mrb[61].mxu0  ;;  %10370 = vmatmul.mubr.msk.f32.gmra.mrb[74].mxu1 %vm1488_vm2, %v2537_v0  ;;  %v10297_v8 = vpop.f32.mrb[61].mxu1  ;;  %10407 = vmatmul.mubr.msk.f32.gmra.mrb[88].mxu0 %vm1488_vm2, %v2658_v7 }
 0x5db   :  { %10372 = vmatprep.mubr.msk.f32.mxu1 %vm12123_vm4, %v16295_v39  ;;  %10409 = vmatprep.mubr.msk.f32.mxu0 %vm12123_vm4, %v16295_v39 }
 0x5dd   :  { %v2542_v58 = vpop.f32.mrb[62].mxu0  ;;  %v2663_v41 = vpop.f32.mrb[62].mxu1 }
 0x5de   :  { %v10265_v31 = vpop.f32.mrb[63].mxu0  ;;  %10373 = vmatmul.mubr.msk.f32.gmra.mrb[76].mxu1 %vm1488_vm2, %v2542_v58  ;;  %v10300_v30 = vpop.f32.mrb[63].mxu1  ;;  %10410 = vmatmul.mubr.msk.f32.gmra.mrb[90].mxu0 %vm1488_vm2, %v2663_v41  ;;  %v8052_v41 = vld [vmem:[%s16255_s6] ss:$0 sm:$0xff] }
 0x5df   :  { %10375 = vmatprep.mubr.msk.f32.mxu1 %vm12123_vm4, %v16295_v39  ;;  %10412 = vmatprep.mubr.msk.f32.mxu0 %vm12123_vm4, %v16295_v39 }
 0x5e1   :  { %v2547_v5 = vpop.f32.mrb[64].mxu0  ;;  %v2668_v32 = vpop.f32.mrb[64].mxu1 }
 0x5e2   :  { %v10268_v40 = vpop.f32.mrb[65].mxu0  ;;  %10376 = vmatmul.mubr.msk.f32.gmra.mrb[78].mxu1 %vm1488_vm2, %v2547_v5  ;;  %v10303_v44 = vpop.f32.mrb[65].mxu1  ;;  %10413 = vmatmul.mubr.msk.f32.gmra.mrb[92].mxu0 %vm1488_vm2, %v2668_v32 }
 0x5e3   :  { %10378 = vmatprep.mubr.msk.f32.mxu1 %vm12123_vm4, %v16295_v39  ;;  %10415 = vmatprep.mubr.msk.f32.mxu0 %vm12123_vm4, %v16295_v39 }
 0x5e5   :  { %v2552_v61 = vpop.f32.mrb[66].mxu0  ;;  %v2673_v63 = vpop.f32.mrb[66].mxu1 }
 0x5e6   :  { %v10271_v17 = vpop.f32.mrb[67].mxu0  ;;  %10379 = vmatmul.mubr.msk.f32.gmra.mrb[80].mxu1 %vm1488_vm2, %v2552_v61  ;;  %v10306_v34 = vpop.f32.mrb[67].mxu1  ;;  %10416 = vmatmul.mubr.msk.f32.gmra.mrb[94].mxu0 %vm1488_vm2, %v2673_v63 }
 0x5e7   :  { %10381 = vmatprep.mubr.msk.f32.mxu1 %vm12123_vm4, %v16295_v39  ;;  %10418 = vmatprep.mubr.msk.f32.mxu0 %vm12123_vm4, %v16295_v39 }
 0x5e9   :  { %v2557_v22 = vpop.f32.mrb[68].mxu0  ;;  %v2678_v42 = vpop.f32.mrb[68].mxu1 }
 0x5ea   :  { %10382 = vmatmul.mubr.msk.f32.gmra.mrb[82].mxu1 %vm1488_vm2, %v2557_v22  ;;  %v10274_v37 = vpop.f32.mrb[69].mxu0  ;;  %10419 = vmatmul.mubr.msk.f32.gmra.mrb[96].mxu0 %vm1488_vm2, %v2678_v42  ;;  %v10309_v14 = vpop.f32.mrb[69].mxu1  ;;  %vm13631_vm2 = vmpackc.low %vm651_vm6, %vm12124_vm14  ;;  %vm3876_vm6 = vcmp.ne.s32.totalorder %v12291_v25, 13 }
 0x5eb   :  { %10435 = vmatprep.mubr.msk.f32.mxu1 %vm12123_vm4, %v16295_v39  ;;  %10470 = vmatprep.mubr.msk.f32.mxu0 %vm12123_vm4, %v16295_v39 }
 0x5ed   :  { %v2786_v50 = vpop.f32.mrb[70].mxu0 }
 0x5ee   :  { %v10328_v43 = vpop.f32.mrb[71].mxu0 }
 0x5f1   :  { %v2791_v26 = vpop.f32.mrb[72].mxu0 }
 0x5f2   :  { %v10331_v13 = vpop.f32.mrb[73].mxu0 }
 0x5f5   :  { %v2796_v33 = vpop.f32.mrb[74].mxu0 }
 0x5f6   :  { %v10334_v52 = vpop.f32.mrb[75].mxu0 }
 0x5f9   :  { %v2801_v18 = vpop.f32.mrb[76].mxu0 }
 0x5fa   :  { %v10337_v11 = vpop.f32.mrb[77].mxu0 }
 0x5fd   :  { %v2806_v36 = vpop.f32.mrb[78].mxu0 }
 0x5fe   :  { %v10340_v38 = vpop.f32.mrb[79].mxu0 }
 0x601   :  { %v2811_v57 = vpop.f32.mrb[80].mxu0 }
 0x602   :  { %v10343_v49 = vpop.f32.mrb[81].mxu0 }
 0x605   :  { %v2816_v47 = vpop.f32.mrb[82].mxu0 }
 0x606   :  { %v10346_v20 = vpop.f32.mrb[83].mxu0 }
 0x6a5   :  { %v2907_v27 = vpop.f32.mrb[70].mxu1  ;;  %v3037_v0 = vpop.f32.mrb[84].mxu0 }
 0x6a6   :  { %v2908_v7 = vadd.f32 %v2907_v27, %v2786_v50  ;;  %v10365_v3 = vpop.f32.mrb[71].mxu1  ;;  %v10402_v8 = vpop.f32.mrb[85].mxu0 }
 0x6a8   :  { %v3071_v58 = vadd.f32 %v3037_v0, %v2908_v7 }
 0x6a9   :  { %v2912_v31 = vpop.f32.mrb[72].mxu1  ;;  %v3042_v30 = vpop.f32.mrb[86].mxu0 }
 0x6aa   :  { %v2913_v5 = vadd.f32 %v2912_v31, %v2791_v26  ;;  %v10368_v32 = vpop.f32.mrb[73].mxu1  ;;  %v10405_v40 = vpop.f32.mrb[87].mxu0  ;;  %v13282_v44 = vadd.f32 %v8052_v41, %v3071_v58 }
 0x6ac   :  { %v3072_v61 = vadd.f32 %v3042_v30, %v2913_v5  ;;  %v3092_v14 = vmax.f32 %v13282_v44, 0.0 }
 0x6ad   :  { %v2917_v63 = vpop.f32.mrb[74].mxu1  ;;  %v3047_v17 = vpop.f32.mrb[88].mxu0 }
 0x6ae   :  { %v13284_v34 = vadd.f32 %v8052_v41, %v3072_v61  ;;  %v2918_v22 = vadd.f32 %v2917_v63, %v2796_v33  ;;  %v10371_v42 = vpop.f32.mrb[75].mxu1  ;;  %v10408_v37 = vpop.f32.mrb[89].mxu0 }
 0x6b0   :  { %v3093_v50 = vmax.f32 %v13284_v34, 0.0  ;;  %v3073_v43 = vadd.f32 %v3047_v17, %v2918_v22 }
 0x6b1   :  { %v2922_v13 = vpop.f32.mrb[76].mxu1  ;;  %v3052_v52 = vpop.f32.mrb[90].mxu0 }
 0x6b2   :  { %v10975_v26 = vpack.c.bf16 %v3093_v50, %v3092_v14  ;;  %v2923_v11 = vadd.f32 %v2922_v13, %v2801_v18  ;;  %v10374_v38 = vpop.f32.mrb[77].mxu1  ;;  %v10411_v49 = vpop.f32.mrb[91].mxu0  ;;  %v13292_v20 = vadd.f32 %v8052_v41, %v3073_v43 }
 0x6b4   :  { %v3074_v33 = vadd.f32 %v3052_v52, %v2923_v11  ;;  %10976 = vmatpush3.bf16.msra.mxu1 %v10975_v26  ;;  %10985 = vmatpush3.bf16.msra.mxu0 %v10975_v26  ;;  %v3094_v18 = vmax.f32 %v13292_v20, 0.0 }
 0x6b5   :  { %v2927_v27 = vpop.f32.mrb[78].mxu1  ;;  %v3057_v0 = vpop.f32.mrb[92].mxu0  ;;  %10977 = vmatprep.subr.bf16.mxu1 %v12122_v54  ;;  %10986 = vmatprep.subr.bf16.mxu0 %v12122_v54 }
 0x6b6   :  { %v13296_v7 = vadd.f32 %v8052_v41, %v3074_v33  ;;  %v2928_v3 = vadd.f32 %v2927_v27, %v2806_v36  ;;  %v10377_v8 = vpop.f32.mrb[79].mxu1  ;;  %v10414_v58 = vpop.f32.mrb[93].mxu0  ;;  %v8067_v27 = vld [vmem:[%s16256_s7 + $0x80] sm:$0xff] }
 0x6b7   :  { %v3300_v8 = vld [vmem:[%s16256_s7 + $0x8] sm:$0xff]  ;;  %v8069_v58 = vld [vmem:[%s16256_s7 + $0x90] sm:$0xff] }
 0x6b8   :  { %v3095_v31 = vmax.f32 %v13296_v7, 0.0  ;;  %v3075_v30 = vadd.f32 %v3057_v0, %v2928_v3 }
 0x6b9   :  { %v2932_v5 = vpop.f32.mrb[80].mxu1  ;;  %v3062_v32 = vpop.f32.mrb[94].mxu0 }
 0x6ba   :  { %v10978_v40 = vpack.c.bf16 %v3095_v31, %v3094_v18  ;;  %v2933_v61 = vadd.f32 %v2932_v5, %v2811_v57  ;;  %v10380_v63 = vpop.f32.mrb[81].mxu1  ;;  %v10417_v17 = vpop.f32.mrb[95].mxu0  ;;  %v13304_v22 = vadd.f32 %v8052_v41, %v3075_v30  ;;  %v8070_v30 = vld [vmem:[%s16256_s7 + $0x98] sm:$0xff] }
 0x6bb   :  { %v8071_v63 = vld [vmem:[%s16256_s7 + $0xa0] sm:$0xff]  ;;  %v8072_v17 = vld [vmem:[%s16256_s7 + $0xa8] sm:$0xff] }
 0x6bc   :  { %v3076_v36 = vadd.f32 %v3062_v32, %v2933_v61  ;;  %10979 = vmatpush3.bf16.msra.mxu1 %v10978_v40  ;;  %10988 = vmatpush3.bf16.msra.mxu0 %v10978_v40  ;;  %v3096_v57 = vmax.f32 %v13304_v22, 0.0  ;;  %v10996_v32 = vpack.c.bf16 %v8070_v30, %v8069_v58  ;;  %v3301_v40 = vld [vmem:[%s16256_s7 + $0x10] sm:$0xff]  ;;  %v3302_v61 = vld [vmem:[%s16256_s7 + $0x18] sm:$0xff] }
 0x6bd   :  { %v2937_v42 = vpop.f32.mrb[82].mxu1  ;;  %v3067_v37 = vpop.f32.mrb[96].mxu0  ;;  %10980 = vmatprep.subr.bf16.mxu1 %v12122_v54  ;;  %10989 = vmatprep.subr.bf16.mxu0 %v12122_v54 }
 0x6be   :  { %v13308_v43 = vadd.f32 %v8052_v41, %v3076_v36  ;;  %v2938_v13 = vadd.f32 %v2937_v42, %v2816_v47  ;;  %v10383_v52 = vpop.f32.mrb[83].mxu1  ;;  %v10420_v26 = vpop.f32.mrb[97].mxu0  ;;  %v8068_v47 = vld [vmem:[%s16256_s7 + $0x88] sm:$0xff]  ;;  %v11020_v36 = vpack.c.bf16 %v3302_v61, %v3301_v40  ;;  %v10999_v42 = vpack.c.bf16 %v8072_v17, %v8071_v63  ;;  %v3311_v63 = vld [vmem:[%s16256_s7 + $0x60] sm:$0xff] }
 0x6bf   :  { %v10993_v3 = vpack.c.bf16 %v8068_v47, %v8067_v27  ;;  %v8076_v27 = vld [vmem:[%s16256_s7 + $0xc8] sm:$0xff] }
 0x6c0   :  { %v3097_v11 = vmax.f32 %v13308_v43, 0.0  ;;  %v3077_v38 = vadd.f32 %v3067_v37, %v2938_v13  ;;  %v3303_v37 = vld [vmem:[%s16256_s7 + $0x20] sm:$0xff]  ;;  %v3304_v13 = vld [vmem:[%s16256_s7 + $0x28] sm:$0xff] }
 0x6c1   :  { %v11023_v52 = vpack.c.bf16 %v3304_v13, %v3303_v37  ;;  %v3312_v17 = vld [vmem:[%s16256_s7 + $0x68] sm:$0xff]  ;;  %v3313_v37 = vld [vmem:[%s16256_s7 + $0x70] sm:$0xff]  ;;  %v3314_v13 = vld [vmem:[%s16256_s7 + $0x78] sm:$0xff] }
 0x6c2   :  { %v10981_v49 = vpack.c.bf16 %v3097_v11, %v3096_v57  ;;  %v3091_v33 = vadd.f32 %v8052_v41, %v3077_v38  ;;  %v3299_v41 = vld [vmem:[%s16256_s7] sm:$0xff]  ;;  %v3305_v38 = vld [vmem:[%s16256_s7 + $0x30] sm:$0xff] }
 0x6c3   :  { %v11017_v5 = vpack.c.bf16 %v3300_v8, %v3299_v41  ;;  %v3307_v41 = vld [vmem:[%s16256_s7 + $0x40] sm:$0xff]  ;;  %v3308_v8 = vld [vmem:[%s16256_s7 + $0x48] sm:$0xff] }
 0x6c4   :  { %10982 = vmatpush3.bf16.msra.mxu1 %v10981_v49  ;;  %10991 = vmatpush3.bf16.msra.mxu0 %v10981_v49  ;;  %v13324_v0 = vmax.f32 %v3091_v33, 0.0  ;;  %v3306_v49 = vld [vmem:[%s16256_s7 + $0x38] sm:$0xff]  ;;  %v8075_v33 = vld [vmem:[%s16256_s7 + $0xc0] sm:$0xff]  ;;  %v11029_v58 = vpack.c.bf16 %v3308_v8, %v3307_v41  ;;  %v8096_v41 = vld [vmem:[%s16256_s7 + $0x168] sm:$0xff] }
 0x6c5   :  { %10433 = vmatprep.subr.mxu1 %v16295_v39  ;;  %10468 = vmatprep.subr.mxu0 %v16295_v39  ;;  %v11026_v47 = vpack.c.bf16 %v3306_v49, %v3305_v38  ;;  %v8087_v49 = vld [vmem:[%s16256_s7 + $0x120] sm:$0xff]  ;;  %v8098_v8 = vld [vmem:[%s16256_s7 + $0x178] sm:$0xff] }
 0x6c8   :  { %10434 = vmatpush3.msra.mxu1 %v13324_v0  ;;  %10469 = vmatpush3.msra.mxu0 %v13324_v0 }
 0x6c9   :  { %10436 = vmatmul.mubr.msk.f32.vlgmr.msra.gmra.mrb[84].mxu1 %vm2439_vm0, %v12259_v16  ;;  %10992 = vmatprep.subr.bf16.mxu1 %v12122_v54 }
 0x6ca   :  { %10471 = vmatmul.mubr.msk.f32.vlgmr.msra.gmra.mrb[98].mxu0 %vm2439_vm0, %v12308_v29  ;;  %10994 = vmatpush3.bf16.msra.mxu1 %v10993_v3  ;;  %v11005_v3 = vpack.c.bf16 %v8076_v27, %v8075_v33  ;;  %v8088_v33 = vld [vmem:[%s16256_s7 + $0x128] sm:$0xff]  ;;  %v8090_v27 = vld [vmem:[%s16256_s7 + $0x138] sm:$0xff] }
 0x6cb   :  { %10438 = vmatprep.mubr.msk.f32.mxu1 %vm12123_vm4, %v16295_v39  ;;  %10473 = vmatprep.mubr.msk.f32.mxu0 %vm12123_vm4, %v16295_v39  ;;  %v11047_v44 = vpack.c.bf16 %v8088_v33, %v8087_v49 }
 0x6cc   :  { %10995 = vmatprep.subr.bf16.mxu1 %v12122_v54  ;;  %11016 = vmatprep.subr.bf16.mxu0 %v12122_v54 }
 0x6cd   :  { %10439 = vmatmul.mubr.msk.f32.gmra.mrb[86].mxu1 %vm2439_vm0, %v12357_v46  ;;  %11018 = vmatpush3.bf16.msra.mxu0 %v11017_v5  ;;  %v8073_v46 = vld [vmem:[%s16256_s7 + $0xb0] sm:$0xff] }
 0x6ce   :  { %10474 = vmatmul.mubr.msk.f32.gmra.mrb[100].mxu0 %vm2439_vm0, %v12373_v51  ;;  %10997 = vmatpush3.bf16.msra.mxu1 %v10996_v32  ;;  %v8074_v51 = vld [vmem:[%s16256_s7 + $0xb8] sm:$0xff]  ;;  %v3309_v5 = vld [vmem:[%s16256_s7 + $0x50] sm:$0xff] }
 0x6cf   :  { %10441 = vmatprep.mubr.msk.f32.mxu1 %vm12123_vm4, %v16295_v39  ;;  %10476 = vmatprep.mubr.msk.f32.mxu0 %vm12123_vm4, %v16295_v39  ;;  %v11002_v26 = vpack.c.bf16 %v8074_v51, %v8073_v46  ;;  %v3310_v32 = vld [vmem:[%s16256_s7 + $0x58] sm:$0xff]  ;;  %v11038_v46 = vpack.c.bf16 %v3314_v13, %v3313_v37 }
 0x6d0   :  { %10998 = vmatprep.subr.bf16.mxu1 %v12122_v54  ;;  %11019 = vmatprep.subr.bf16.mxu0 %v12122_v54  ;;  %v11032_v40 = vpack.c.bf16 %v3310_v32, %v3309_v5 }
 0x6d1   :  { %10442 = vmatmul.mubr.msk.f32.gmra.mrb[88].mxu1 %vm2439_vm0, %v12366_v48  ;;  %11021 = vmatpush3.bf16.msra.mxu0 %v11020_v36  ;;  %v11035_v36 = vpack.c.bf16 %v3312_v17, %v3311_v63 }
 0x6d2   :  { %10477 = vmatmul.mubr.msk.f32.gmra.mrb[102].mxu0 %vm2439_vm0, %v12378_v53  ;;  %11000 = vmatpush3.bf16.msra.mxu1 %v10999_v42 }
 0x6d3   :  { %10444 = vmatprep.mubr.msk.f32.mxu1 %vm12123_vm4, %v16295_v39  ;;  %10479 = vmatprep.mubr.msk.f32.mxu0 %vm12123_vm4, %v16295_v39 }
 0x6d4   :  { %11001 = vmatprep.subr.bf16.mxu1 %v12122_v54  ;;  %11022 = vmatprep.subr.bf16.mxu0 %v12122_v54 }
 0x6d5   :  { %10445 = vmatmul.mubr.msk.f32.gmra.mrb[90].mxu1 %vm2439_vm0, %v13128_v15  ;;  %11024 = vmatpush3.bf16.msra.mxu0 %v11023_v52  ;;  %v8077_v15 = vld [vmem:[%s16256_s7 + $0xd0] sm:$0xff] }
 0x6d6   :  { %10480 = vmatmul.mubr.msk.f32.gmra.mrb[104].mxu0 %vm2439_vm0, %v13135_v24  ;;  %11003 = vmatpush3.bf16.msra.mxu1 %v11002_v26  ;;  %v8078_v24 = vld [vmem:[%s16256_s7 + $0xd8] sm:$0xff]  ;;  %v8085_v52 = vld [vmem:[%s16256_s7 + $0x110] sm:$0xff] }
 0x6d7   :  { %10447 = vmatprep.mubr.msk.f32.mxu1 %vm12123_vm4, %v16295_v39  ;;  %10482 = vmatprep.mubr.msk.f32.mxu0 %vm12123_vm4, %v16295_v39  ;;  %v11008_v30 = vpack.c.bf16 %v8078_v24, %v8077_v15  ;;  %v8086_v26 = vld [vmem:[%s16256_s7 + $0x118] sm:$0xff] }
 0x6d8   :  { %11004 = vmatprep.subr.bf16.mxu1 %v12122_v54  ;;  %11025 = vmatprep.subr.bf16.mxu0 %v12122_v54  ;;  %v11044_v38 = vpack.c.bf16 %v8086_v26, %v8085_v52 }
 0x6d9   :  { %10448 = vmatmul.mubr.msk.f32.gmra.mrb[92].mxu1 %vm2439_vm0, %v12392_v56  ;;  %11027 = vmatpush3.bf16.msra.mxu0 %v11026_v47  ;;  %v8079_v56 = vld [vmem:[%s16256_s7 + $0xe0] sm:$0xff]  ;;  %v8092_v47 = vld [vmem:[%s16256_s7 + $0x148] sm:$0xff] }
 0x6da   :  { %10483 = vmatmul.mubr.msk.f32.gmra.mrb[106].mxu0 %vm2439_vm0, %v12422_v62  ;;  %11006 = vmatpush3.bf16.msra.mxu1 %v11005_v3  ;;  %v8080_v62 = vld [vmem:[%s16256_s7 + $0xe8] sm:$0xff]  ;;  %v8094_v3 = vld [vmem:[%s16256_s7 + $0x158] sm:$0xff] }
 0x6db   :  { %10450 = vmatprep.mubr.msk.f32.mxu1 %vm12123_vm4, %v16295_v39  ;;  %10485 = vmatprep.mubr.msk.f32.mxu0 %vm12123_vm4, %v16295_v39  ;;  %v11011_v61 = vpack.c.bf16 %v8080_v62, %v8079_v56 }
 0x6dc   :  { %11007 = vmatprep.subr.bf16.mxu1 %v12122_v54  ;;  %11028 = vmatprep.subr.bf16.mxu0 %v12122_v54 }
 0x6dd   :  { %10451 = vmatmul.mubr.msk.f32.gmra.mrb[94].mxu1 %vm2439_vm0, %v12437_v4  ;;  %11030 = vmatpush3.bf16.msra.mxu0 %v11029_v58  ;;  %v8081_v4 = vld [vmem:[%s16256_s7 + $0xf0] sm:$0xff] }
 0x6de   :  { %10486 = vmatmul.mubr.msk.f32.gmra.mrb[108].mxu0 %vm2439_vm0, %v12456_v23  ;;  %11009 = vmatpush3.bf16.msra.mxu1 %v11008_v30  ;;  %v8082_v23 = vld [vmem:[%s16256_s7 + $0xf8] sm:$0xff] }
 0x6df   :  { %10453 = vmatprep.mubr.msk.f32.mxu1 %vm12123_vm4, %v16295_v39  ;;  %11010 = vmatprep.subr.bf16.mxu1 %v12122_v54  ;;  %v11014_v42 = vpack.c.bf16 %v8082_v23, %v8081_v4 }
 0x6e0   :  { %10488 = vmatprep.mubr.msk.f32.mxu0 %vm12123_vm4, %v16295_v39  ;;  %11031 = vmatprep.subr.bf16.mxu0 %v12122_v54 }
 0x6e1   :  { %10454 = vmatmul.mubr.msk.f32.gmra.mrb[96].mxu1 %vm2439_vm0, %v12446_v12  ;;  %11033 = vmatpush3.bf16.msra.mxu0 %v11032_v40  ;;  %v8083_v12 = vld [vmem:[%s16256_s7 + $0x100] sm:$0xff] }
 0x6e2   :  { %11012 = vmatpush3.bf16.msra.mxu1 %v11011_v61  ;;  %10489 = vmatmul.mubr.msk.f32.gmra.mrb[110].mxu0 %vm2439_vm0, %v13171_v1  ;;  %v8084_v1 = vld [vmem:[%s16256_s7 + $0x108] sm:$0xff] }
 0x6e3   :  { %11013 = vmatprep.subr.bf16.mxu1 %v12122_v54  ;;  %10523 = vmatprep.mubr.msk.f32.mxu1 %vm12123_vm4, %v16295_v39  ;;  %v11041_v51 = vpack.c.bf16 %v8084_v1, %v8083_v12 }
 0x6e4   :  { %11034 = vmatprep.subr.bf16.mxu0 %v12122_v54  ;;  %10576 = vmatprep.mubr.msk.f32.mxu0 %vm12123_vm4, %v16295_v39 }
 0x6e5   :  { %11036 = vmatpush3.bf16.msra.mxu0 %v11035_v36 }
 0x6e6   :  { %11015 = vmatpush3.bf16.msra.mxu1 %v11014_v42  ;;  %11037 = vmatprep.subr.bf16.mxu0 %v12122_v54 }
 0x6e7   :  { %11040 = vmatprep.subr.bf16.mxu1 %v12122_v54 }
 0x6e9   :  { %10524 = vmatmul.mubr.f32.vlgmr.msra.gmra.mrb[98].mxu1 %v3092_v14  ;;  %11039 = vmatpush3.bf16.msra.mxu0 %v11038_v46  ;;  %v8089_v14 = vld [vmem:[%s16256_s7 + $0x130] sm:$0xff] }
 0x6ea   :  { %10526 = vmatprep.mubr.msk.f32.mxu1 %vm12123_vm4, %v16295_v39  ;;  %11042 = vmatpush3.bf16.msra.mxu1 %v11041_v51  ;;  %v11050_v34 = vpack.c.bf16 %v8090_v27, %v8089_v14 }
 0x6eb   :  { %11043 = vmatprep.subr.bf16.mxu1 %v12122_v54 }
 0x6ed   :  { %10527 = vmatmul.mubr.f32.gmra.mrb[100].mxu1 %v3093_v50  ;;  %v8091_v50 = vld [vmem:[%s16256_s7 + $0x140] sm:$0xff] }
 0x6ee   :  { %10529 = vmatprep.mubr.msk.f32.mxu1 %vm12123_vm4, %v16295_v39  ;;  %11045 = vmatpush3.bf16.msra.mxu1 %v11044_v38  ;;  %v11053_v20 = vpack.c.bf16 %v8092_v47, %v8091_v50 }
 0x6ef   :  { %11046 = vmatprep.subr.bf16.mxu1 %v12122_v54 }
 0x6f1   :  { %10530 = vmatmul.mubr.f32.gmra.mrb[102].mxu1 %v3094_v18  ;;  %v8093_v18 = vld [vmem:[%s16256_s7 + $0x150] sm:$0xff] }
 0x6f2   :  { %10532 = vmatprep.mubr.msk.f32.mxu1 %vm12123_vm4, %v16295_v39  ;;  %11048 = vmatpush3.bf16.msra.mxu1 %v11047_v44  ;;  %v11056_v7 = vpack.c.bf16 %v8094_v3, %v8093_v18 }
 0x6f3   :  { %11049 = vmatprep.subr.bf16.mxu1 %v12122_v54 }
 0x6f5   :  { %10533 = vmatmul.mubr.f32.gmra.mrb[104].mxu1 %v3095_v31  ;;  %v8095_v31 = vld [vmem:[%s16256_s7 + $0x160] sm:$0xff] }
 0x6f6   :  { %10535 = vmatprep.mubr.msk.f32.mxu1 %vm12123_vm4, %v16295_v39  ;;  %11051 = vmatpush3.bf16.msra.mxu1 %v11050_v34  ;;  %v11059_v22 = vpack.c.bf16 %v8096_v41, %v8095_v31 }
 0x6f7   :  { %11052 = vmatprep.subr.bf16.mxu1 %v12122_v54 }
 0x6f9   :  { %10536 = vmatmul.mubr.f32.gmra.mrb[106].mxu1 %v3096_v57  ;;  %v8097_v57 = vld [vmem:[%s16256_s7 + $0x170] sm:$0xff] }
 0x6fa   :  { %10538 = vmatprep.mubr.msk.f32.mxu1 %vm12123_vm4, %v16295_v39  ;;  %11054 = vmatpush3.bf16.msra.mxu1 %v11053_v20  ;;  %v11062_v43 = vpack.c.bf16 %v8098_v8, %v8097_v57 }
 0x6fb   :  { %11055 = vmatprep.subr.bf16.mxu1 %v12122_v54 }
 0x6fd   :  { %10539 = vmatmul.mubr.f32.gmra.mrb[108].mxu1 %v3097_v11 }
 0x6fe   :  { %10541 = vmatprep.mubr.msk.f32.mxu1 %vm12123_vm4, %v16295_v39  ;;  %11057 = vmatpush3.bf16.msra.mxu1 %v11056_v7 }
 0x6ff   :  { %11058 = vmatprep.subr.bf16.mxu1 %v12122_v54 }
 0x701   :  { %10542 = vmatmul.mubr.f32.gmra.mrb[110].mxu1 %v13324_v0 }
 0x702   :  { %11060 = vmatpush3.bf16.msra.mxu1 %v11059_v22  ;;  %10629 = vmatprep.mubr.msk.f32.mxu1 %vm12123_vm4, %v16295_v39 }
 0x703   :  { %11061 = vmatprep.subr.bf16.mxu1 %v12122_v54 }
 0x706   :  { %11063 = vmatpush3.bf16.msra.mxu1 %v11062_v43 }
 0x79c   :  { %v3165_v11 = vpop.f32.mrb[84].mxu1 }
 0x79d   :  { %v10437_v15 = vpop.f32.mrb[85].mxu1  ;;  %v3265_v24 = vpop.f32.mrb[98].mxu0  ;;  %10577 = vmatmul.mubr.f32.vlgmr.msra.gmra.mrb[112].mxu0 %v3165_v11  ;;  %v8099_v11 = vld [vmem:[%s16257_s8] ss:$0 sm:$0xff] }
 0x79e   :  { %v10472_v58 = vpop.f32.mrb[99].mxu0  ;;  %10630 = vmatmul.mubr.f32.vlgmr.msra.gmra.mrb[112].mxu1 %v3265_v24  ;;  %10579 = vmatprep.mubr.msk.f32.mxu0 %vm12123_vm4, %v16295_v39 }
 0x79f   :  { %10632 = vmatprep.mubr.msk.f32.mxu1 %vm12123_vm4, %v16295_v39 }
 0x7a0   :  { %v3170_v0 = vpop.f32.mrb[86].mxu1 }
 0x7a1   :  { %v10440_v30 = vpop.f32.mrb[87].mxu1  ;;  %v3270_v5 = vpop.f32.mrb[100].mxu0  ;;  %10580 = vmatmul.mubr.f32.gmra.mrb[114].mxu0 %v3170_v0 }
 0x7a2   :  { %v10475_v32 = vpop.f32.mrb[101].mxu0  ;;  %10633 = vmatmul.mubr.f32.gmra.mrb[114].mxu1 %v3270_v5  ;;  %10582 = vmatprep.mubr.msk.f32.mxu0 %vm12123_vm4, %v16295_v39 }
 0x7a3   :  { %10635 = vmatprep.mubr.msk.f32.mxu1 %vm12123_vm4, %v16295_v39 }
 0x7a4   :  { %v3175_v54 = vpop.f32.mrb[88].mxu1 }
 0x7a5   :  { %v10443_v56 = vpop.f32.mrb[89].mxu1  ;;  %v3275_v62 = vpop.f32.mrb[102].mxu0  ;;  %10583 = vmatmul.mubr.f32.gmra.mrb[116].mxu0 %v3175_v54 }
 0x7a6   :  { %v10478_v40 = vpop.f32.mrb[103].mxu0  ;;  %10636 = vmatmul.mubr.f32.gmra.mrb[116].mxu1 %v3275_v62  ;;  %10585 = vmatprep.mubr.msk.f32.mxu0 %vm12123_vm4, %v16295_v39 }
 0x7a7   :  { %10638 = vmatprep.mubr.msk.f32.mxu1 %vm12123_vm4, %v16295_v39 }
 0x7a8   :  { %v3180_v61 = vpop.f32.mrb[90].mxu1 }
 0x7a9   :  { %v10446_v63 = vpop.f32.mrb[91].mxu1  ;;  %v3280_v17 = vpop.f32.mrb[104].mxu0  ;;  %10586 = vmatmul.mubr.f32.gmra.mrb[118].mxu0 %v3180_v61 }
 0x7aa   :  { %v10481_v4 = vpop.f32.mrb[105].mxu0  ;;  %10639 = vmatmul.mubr.f32.gmra.mrb[118].mxu1 %v3280_v17  ;;  %10588 = vmatprep.mubr.msk.f32.mxu0 %vm12123_vm4, %v16295_v39 }
 0x7ab   :  { %10641 = vmatprep.mubr.msk.f32.mxu1 %vm12123_vm4, %v16295_v39 }
 0x7ac   :  { %v3185_v23 = vpop.f32.mrb[92].mxu1 }
 0x7ad   :  { %v10449_v36 = vpop.f32.mrb[93].mxu1  ;;  %v3285_v42 = vpop.f32.mrb[106].mxu0  ;;  %10589 = vmatmul.mubr.f32.gmra.mrb[120].mxu0 %v3185_v23 }
 0x7ae   :  { %v10484_v37 = vpop.f32.mrb[107].mxu0  ;;  %10642 = vmatmul.mubr.f32.gmra.mrb[120].mxu1 %v3285_v42  ;;  %10591 = vmatprep.mubr.msk.f32.mxu0 %vm12123_vm4, %v16295_v39 }
 0x7af   :  { %10644 = vmatprep.mubr.msk.f32.mxu1 %vm12123_vm4, %v16295_v39 }
 0x7b0   :  { %v3190_v13 = vpop.f32.mrb[94].mxu1 }
 0x7b1   :  { %v10452_v12 = vpop.f32.mrb[95].mxu1  ;;  %v3290_v1 = vpop.f32.mrb[108].mxu0  ;;  %10592 = vmatmul.mubr.f32.gmra.mrb[122].mxu0 %v3190_v13 }
 0x7b2   :  { %v10487_v46 = vpop.f32.mrb[109].mxu0  ;;  %10645 = vmatmul.mubr.f32.gmra.mrb[122].mxu1 %v3290_v1  ;;  %10594 = vmatprep.mubr.msk.f32.mxu0 %vm12123_vm4, %v16295_v39 }
 0x7b3   :  { %10647 = vmatprep.mubr.msk.f32.mxu1 %vm12123_vm4, %v16295_v39  ;;  %vm3872_vm4 = vmand %vm97_vm3, %vm3868_vm10 }
 0x7b4   :  { %v3195_v51 = vpop.f32.mrb[96].mxu1  ;;  %vm3880_vm3 = vmand %vm125_vm5, %vm3876_vm6 }
 0x7b5   :  { %10595 = vmatmul.mubr.f32.gmra.mrb[124].mxu0 %v3195_v51  ;;  %v3295_v52 = vpop.f32.mrb[110].mxu0  ;;  %v10455_v26 = vpop.f32.mrb[97].mxu1 }
 0x7b6   :  { %10648 = vmatmul.mubr.f32.gmra.mrb[124].mxu1 %v3295_v52  ;;  %v10490_v38 = vpop.f32.mrb[111].mxu0  ;;  %10664 = vmatprep.mubr.msk.f32.mxu0 %vm2439_vm0, %v12906_v59 }
 0x7b7   :  { %10684 = vmatprep.mubr.msk.f32.mxu1 %vm2439_vm0, %v12965_v2 }
 0x7bc   :  { %v3398_v49 = vpop.f32.mrb[98].mxu1 }
 0x7bd   :  { %v10525_v33 = vpop.f32.mrb[99].mxu1 }
 0x7c0   :  { %v3403_v44 = vpop.f32.mrb[100].mxu1 }
 0x7c1   :  { %v10528_v14 = vpop.f32.mrb[101].mxu1 }
 0x7c4   :  { %v3408_v27 = vpop.f32.mrb[102].mxu1 }
 0x7c5   :  { %v10531_v34 = vpop.f32.mrb[103].mxu1 }
 0x7c8   :  { %v3413_v50 = vpop.f32.mrb[104].mxu1 }
 0x7c9   :  { %v10534_v47 = vpop.f32.mrb[105].mxu1 }
 0x7cc   :  { %v3418_v20 = vpop.f32.mrb[106].mxu1 }
 0x7cd   :  { %v10537_v18 = vpop.f32.mrb[107].mxu1 }
 0x7d0   :  { %v3423_v3 = vpop.f32.mrb[108].mxu1 }
 0x7d1   :  { %v10540_v7 = vpop.f32.mrb[109].mxu1 }
 0x7d4   :  { %v3428_v31 = vpop.f32.mrb[110].mxu1 }
 0x7d5   :  { %v10543_v41 = vpop.f32.mrb[111].mxu1 }
 0x870   :  { %v3498_v22 = vpop.f32.mrb[112].mxu0 }
 0x871   :  { %v3499_v57 = vadd.f32 %v3498_v22, %v3398_v49  ;;  %v10578_v59 = vpop.f32.mrb[113].mxu0  ;;  %v3615_v8 = vpop.f32.mrb[112].mxu1 }
 0x872   :  { %v10631_v43 = vpop.f32.mrb[113].mxu1 }
 0x873   :  { %v3649_v2 = vadd.f32 %v3615_v8, %v3499_v57 }
 0x874   :  { %v3503_v15 = vpop.f32.mrb[114].mxu0 }
 0x875   :  { %v3504_v24 = vadd.f32 %v3503_v15, %v3403_v44  ;;  %v10581_v58 = vpop.f32.mrb[115].mxu0  ;;  %v3620_v0 = vpop.f32.mrb[114].mxu1  ;;  %v3663_v5 = vadd.f32 %v8099_v11, %v3649_v2 }
 0x876   :  { %v10634_v30 = vpop.f32.mrb[115].mxu1 }
 0x877   :  { %v3650_v32 = vadd.f32 %v3620_v0, %v3504_v24  ;;  %v3670_v17 = vmax.f32 %v3663_v5, 0.0 }
 0x878   :  { %v3508_v54 = vpop.f32.mrb[116].mxu0 }
 0x879   :  { %v3664_v56 = vadd.f32 %v8099_v11, %v3650_v32  ;;  %v3509_v62 = vadd.f32 %v3508_v54, %v3408_v27  ;;  %v10584_v40 = vpop.f32.mrb[117].mxu0  ;;  %v3625_v61 = vpop.f32.mrb[116].mxu1 }
 0x87a   :  { %v10637_v63 = vpop.f32.mrb[117].mxu1 }
 0x87b   :  { %v3671_v4 = vmax.f32 %v3664_v56, 0.0  ;;  %v3651_v23 = vadd.f32 %v3625_v61, %v3509_v62  ;;  %v8790_v63 = vld [vmem:[%s16262_s13 + $0xda0] sm:$0xff] }
 0x87c   :  { %v3513_v36 = vpop.f32.mrb[118].mxu0 }
 0x87d   :  { %v11064_v42 = vpack.c.bf16 %v3671_v4, %v3670_v17  ;;  %v3514_v37 = vadd.f32 %v3513_v36, %v3413_v50  ;;  %v10587_v13 = vpop.f32.mrb[119].mxu0  ;;  %v3630_v12 = vpop.f32.mrb[118].mxu1  ;;  %v3665_v46 = vadd.f32 %v8099_v11, %v3651_v23  ;;  %v13643_v23 = vsel %vm3872_vm4, 1.0, %v16295_v39  ;;  %v8127_v36 = vld [vmem:[%s16258_s9 + $0x108] sm:$0xff]  ;;  %v8154_v17 = vld [vmem:[%s16258_s9 + $0x1e0] sm:$0xff] }
 0x87e   :  { %v10640_v1 = vpop.f32.mrb[119].mxu1  ;;  %v8126_v13 = vld [vmem:[%s16258_s9 + $0x100] sm:$0xff] }
 0x87f   :  { %v3652_v51 = vadd.f32 %v3630_v12, %v3514_v37  ;;  %11065 = vmatprep.subr.bf16.mxu0 %v11064_v42  ;;  %11077 = vmatprep.subr.bf16.mxu1 %v11064_v42  ;;  %v3672_v14 = vmax.f32 %v3665_v46, 0.0  ;;  %v8128_v12 = vld [vmem:[%s16258_s9 + $0x110] sm:$0xff]  ;;  %v8131_v1 = vld [vmem:[%s16258_s9 + $0x128] sm:$0xff]  ;;  %v8133_v46 = vld [vmem:[%s16258_s9 + $0x138] sm:$0xff] }
 0x880   :  { %v3518_v52 = vpop.f32.mrb[120].mxu0  ;;  %11067 = vmatpush3.bf16.msra.mxu0 %v11064_v42  ;;  %11079 = vmatpush3.bf16.msra.mxu1 %v11064_v42  ;;  %v8129_v42 = vld [vmem:[%s16258_s9 + $0x118] sm:$0xff] }
 0x881   :  { %v3666_v26 = vadd.f32 %v8099_v11, %v3652_v51  ;;  %v3519_v38 = vadd.f32 %v3518_v52, %v3418_v20  ;;  %v10590_v49 = vpop.f32.mrb[121].mxu0  ;;  %v3635_v33 = vpop.f32.mrb[120].mxu1  ;;  %v11108_v25 = vpack.c.bf16 %v8129_v42, %v8127_v36  ;;  %v13678_v51 = vsel %vm3880_vm3, 1.0, %v16295_v39  ;;  %v4098_v36 = vld [vmem:[%s16258_s9 + $0x8] sm:$0xff]  ;;  %v4100_v42 = vld [vmem:[%s16258_s9 + $0x18] sm:$0xff] }
 0x882   :  { %v10643_v44 = vpop.f32.mrb[121].mxu1  ;;  %v11110_v52 = vpack.c.bf16 %v8128_v12, %v8126_v13  ;;  %v8132_v49 = vld [vmem:[%s16258_s9 + $0x130] sm:$0xff]  ;;  %v4097_v13 = vld [vmem:[%s16258_s9] sm:$0xff] }
 0x883   :  { %v3673_v27 = vmax.f32 %v3666_v26, 0.0  ;;  %v3653_v34 = vadd.f32 %v3635_v33, %v3519_v38  ;;  %v11112_v26 = vpack.c.bf16 %v8133_v46, %v8131_v1  ;;  %v8130_v38 = vld [vmem:[%s16258_s9 + $0x120] sm:$0xff]  ;;  %v8135_v33 = vld [vmem:[%s16258_s9 + $0x148] sm:$0xff]  ;;  %v8137_v44 = vld [vmem:[%s16258_s9 + $0x158] sm:$0xff] }
 0x884   :  { %v3523_v47 = vpop.f32.mrb[122].mxu0  ;;  %v4099_v12 = vld [vmem:[%s16258_s9 + $0x10] sm:$0xff]  ;;  %v4102_v1 = vld [vmem:[%s16258_s9 + $0x28] sm:$0xff]  ;;  %v4104_v46 = vld [vmem:[%s16258_s9 + $0x38] sm:$0xff] }
 0x885   :  { %v11068_v50 = vpack.c.bf16 %v3673_v27, %v3672_v14  ;;  %v3524_v18 = vadd.f32 %v3523_v47, %v3423_v3  ;;  %v10593_v7 = vpop.f32.mrb[123].mxu0  ;;  %v3640_v41 = vpop.f32.mrb[122].mxu1  ;;  %v3667_v57 = vadd.f32 %v8099_v11, %v3653_v34  ;;  %v11114_v14 = vpack.c.bf16 %v8132_v49, %v8130_v38  ;;  %v8134_v34 = vld [vmem:[%s16258_s9 + $0x140] sm:$0xff]  ;;  %v8136_v47 = vld [vmem:[%s16258_s9 + $0x150] sm:$0xff] }
 0x886   :  { %v10646_v22 = vpop.f32.mrb[123].mxu1  ;;  %v11116_v27 = vpack.c.bf16 %v8137_v44, %v8135_v33  ;;  %v11118_v7 = vpack.c.bf16 %v8136_v47, %v8134_v34  ;;  %v4101_v38 = vld [vmem:[%s16258_s9 + $0x20] sm:$0xff]  ;;  %v4103_v49 = vld [vmem:[%s16258_s9 + $0x30] sm:$0xff]  ;;  %v4106_v33 = vld [vmem:[%s16258_s9 + $0x48] sm:$0xff] }
 0x887   :  { %v3654_v59 = vadd.f32 %v3640_v41, %v3524_v18  ;;  %11069 = vmatprep.subr.bf16.mxu0 %v11068_v50  ;;  %11081 = vmatprep.subr.bf16.mxu1 %v11068_v50  ;;  %v3674_v58 = vmax.f32 %v3667_v57, 0.0  ;;  %v8141_v18 = vld [vmem:[%s16258_s9 + $0x178] sm:$0xff]  ;;  %v8138_v22 = vld [vmem:[%s16258_s9 + $0x160] sm:$0xff]  ;;  %v8140_v57 = vld [vmem:[%s16258_s9 + $0x170] sm:$0xff] }
 0x888   :  { %v3528_v8 = vpop.f32.mrb[124].mxu0  ;;  %11071 = vmatpush3.bf16.msra.mxu0 %v11068_v50  ;;  %11083 = vmatpush3.bf16.msra.mxu1 %v11068_v50  ;;  %v8139_v50 = vld [vmem:[%s16258_s9 + $0x168] sm:$0xff]  ;;  %v4108_v44 = vld [vmem:[%s16258_s9 + $0x58] sm:$0xff]  ;;  %v4105_v34 = vld [vmem:[%s16258_s9 + $0x40] sm:$0xff] }
 0x889   :  { %v3668_v20 = vadd.f32 %v8099_v11, %v3654_v59  ;;  %v3529_v43 = vadd.f32 %v3528_v8, %v3428_v31  ;;  %v3645_v2 = vpop.f32.mrb[124].mxu1  ;;  %v10596_v15 = vpop.f32.mrb[125].mxu0  ;;  %v11120_v41 = vpack.c.bf16 %v8141_v18, %v8139_v50  ;;  %v8143_v59 = vld [vmem:[%s16258_s9 + $0x188] sm:$0xff]  ;;  %v8145_v8 = vld [vmem:[%s16258_s9 + $0x198] sm:$0xff]  ;;  %v4107_v47 = vld [vmem:[%s16258_s9 + $0x50] sm:$0xff] }
 0x88a   :  { %v10649_v24 = vpop.f32.mrb[125].mxu1  ;;  %v8144_v15 = vld [vmem:[%s16258_s9 + $0x190] sm:$0xff]  ;;  %v4110_v50 = vld [vmem:[%s16258_s9 + $0x68] sm:$0xff]  ;;  %v11150_v18 = vpack.c.bf16 %v4107_v47, %v4105_v34 }
 0x88b   :  { %v3675_v0 = vmax.f32 %v3668_v20, 0.0  ;;  %v3655_v30 = vadd.f32 %v3645_v2, %v3529_v43  ;;  %v11122_v20 = vpack.c.bf16 %v8140_v57, %v8138_v22  ;;  %v11124_v43 = vpack.c.bf16 %v8145_v8, %v8143_v59  ;;  %v8142_v2 = vld [vmem:[%s16258_s9 + $0x180] sm:$0xff]  ;;  %v8147_v24 = vld [vmem:[%s16258_s9 + $0x1a8] sm:$0xff]  ;;  %v4111_v22 = vld [vmem:[%s16258_s9 + $0x70] sm:$0xff] }
 0x88c   :  { %v4114_v57 = vld [vmem:[%s16258_s9 + $0x88] sm:$0xff] }
 0x88d   :  { %v11072_v5 = vpack.c.bf16 %v3675_v0, %v3674_v58  ;;  %v3669_v3 = vadd.f32 %v8099_v11, %v3655_v30  ;;  %v8149_v58 = vld [vmem:[%s16258_s9 + $0x1b8] sm:$0xff]  ;;  %v11126_v0 = vpack.c.bf16 %v8144_v15, %v8142_v2  ;;  %v4118_v2 = vld [vmem:[%s16258_s9 + $0xa8] sm:$0xff] }
 0x88e   :  { %v11128_v30 = vpack.c.bf16 %v8149_v58, %v8147_v24  ;;  %v4117_v58 = vld [vmem:[%s16258_s9 + $0xa0] sm:$0xff]  ;;  %v8171_v47 = vld [vmem:[%s16258_s9 + $0x268] sm:$0xff] }
 0x88f   :  { %v3676_v32 = vmax.f32 %v3669_v3, 0.0  ;;  %11073 = vmatprep.subr.bf16.mxu0 %v11072_v5  ;;  %11085 = vmatprep.subr.bf16.mxu1 %v11072_v5  ;;  %v8148_v3 = vld [vmem:[%s16258_s9 + $0x1b0] sm:$0xff] }
 0x890   :  { %11075 = vmatpush3.bf16.msra.mxu0 %v11072_v5  ;;  %11087 = vmatpush3.bf16.msra.mxu1 %v11072_v5  ;;  %v8146_v5 = vld [vmem:[%s16258_s9 + $0x1a0] sm:$0xff] }
 0x891   :  { %10662 = vmatprep.subr.mxu0 %v3676_v32  ;;  %10682 = vmatprep.subr.mxu1 %v3676_v32 }
 0x894   :  { %10663 = vmatpush3.msra.mxu0 %v3676_v32  ;;  %10683 = vmatpush3.msra.mxu1 %v3676_v32  ;;  %v8151_v32 = vld [vmem:[%s16258_s9 + $0x1c8] sm:$0xff] }
 0x895   :  { %10665 = vmatmul.mubr.msk.f32.vlgmr.msra.gmra.mrb[126].mxu0 %vm2439_vm0, %v12916_v35  ;;  %10685 = vmatmul.mubr.msk.f32.vlgmr.msra.gmra.mrb[126].mxu1 %vm2439_vm0, %v12974_v21 }
 0x896   :  { %10667 = vmatprep.mubr.msk.f32.mxu0 %vm2439_vm0, %v12926_v28  ;;  %10687 = vmatprep.mubr.msk.f32.mxu1 %vm2439_vm0, %v12982_v19 }
 0x899   :  { %10668 = vmatmul.mubr.msk.f32.gmra.mrb[128].mxu0 %vm2439_vm0, %v12936_v6  ;;  %10688 = vmatmul.mubr.msk.f32.gmra.mrb[128].mxu1 %vm2439_vm0, %v12990_v45 }
 0x89a   :  { %4568 = vmatprep.mubr.f32.mxu1 %v16295_v39  ;;  %10698 = vmatprep.mubr.msk.f32.mxu0 %vm3899_vm8, %v12259_v16 }
 0x968   :  { %v10666_v35 = vpop.f32.mrb[126].mxu0  ;;  %v10686_v21 = vpop.f32.mrb[126].mxu1 }
 0x969   :  { %v13619_v31 = vmax.f32 %v10666_v35, %v10686_v21  ;;  %v3751_v28 = vpop.f32.mrb[127].mxu0  ;;  %v3844_v11 = vpop.f32.mrb[127].mxu1  ;;  %v8153_v35 = vld [vmem:[%s16258_s9 + $0x1d8] sm:$0xff]  ;;  %v11130_v21 = vpack.c.bf16 %v8148_v3, %v8146_v5 }
 0x96a   :  { %v13621_v54 = vmax.f32 %v3751_v28, %v3844_v11  ;;  %v11132_v28 = vpack.c.bf16 %v8153_v35, %v8151_v32  ;;  %v8150_v11 = vld [vmem:[%s16258_s9 + $0x1c0] sm:$0xff]  ;;  %v4123_v35 = vld [vmem:[%s16258_s9 + $0xd0] sm:$0xff] }
 0x96b   :  { %v4121_v32 = vld [vmem:[%s16258_s9 + $0xc0] sm:$0xff] }
 0x96c   :  { %v11088_v6 = vpack.c.bf16 %v13619_v31, %v13621_v54  ;;  %v10669_v19 = vpop.f32.mrb[128].mxu0  ;;  %v10689_v56 = vpop.f32.mrb[128].mxu1 }
 0x96d   :  { %v13626_v45 = vmax.f32 %v10669_v19, %v10689_v56  ;;  %v3761_v62 = vpop.f32.mrb[129].mxu0  ;;  %v3854_v40 = vpop.f32.mrb[129].mxu1  ;;  %v8155_v19 = vld [vmem:[%s16258_s9 + $0x1e8] sm:$0xff]  ;;  %v8157_v56 = vld [vmem:[%s16258_s9 + $0x1f8] sm:$0xff] }
 0x96e   :  { %v13628_v61 = vmax.f32 %v3761_v62, %v3854_v40  ;;  %11089 = vmatprep.subr.bf16.mxu0 %v11088_v6  ;;  %v11136_v40 = vpack.c.bf16 %v8157_v56, %v8155_v19  ;;  %v4125_v19 = vld [vmem:[%s16258_s9 + $0xe0] sm:$0xff]  ;;  %v4127_v56 = vld [vmem:[%s16258_s9 + $0xf0] sm:$0xff] }
 0x96f   :  { %11091 = vmatpush3.bf16.msra.mxu0 %v11088_v6 }
 0x970   :  { %v11092_v4 = vpack.c.bf16 %v13626_v45, %v13628_v61 }
 0x972   :  { %11094 = vmatprep.subr.msk.bf16.mxu0 %vm13631_vm2, %v11092_v4 }
 0x973   :  { %11097 = vmatpush3.bf16.msk.msra.mxu0 %vm13631_vm2, %v11092_v4 }
 0x974   :  { %11099 = vmatprep.subr.bf16.mxu0 %v11088_v6 }
 0x976   :  { %10699 = vmatmul.mubr.msk.f32.vlgmr.msra.gmra.mrb[130].mxu0 %vm3899_vm8, %v13643_v23 }
 0x977   :  { %11101 = vmatpush3.bf16.msra.mxu0 %v11088_v6  ;;  %10701 = vmatprep.mubr.msk.f32.mxu0 %vm3899_vm8, %v12366_v48  ;;  %v8152_v6 = vld [vmem:[%s16258_s9 + $0x1d0] sm:$0xff] }
 0x978   :  { %11104 = vmatprep.subr.msk.bf16.mxu0 %vm13631_vm2, %v11092_v4  ;;  %v11134_v62 = vpack.c.bf16 %v8152_v6, %v8150_v11  ;;  %v11166_v11 = vpack.c.bf16 %v4123_v35, %v4121_v32  ;;  %v8183_v32 = vld [vmem:[%s16258_s9 + $0x2c8] sm:$0xff]  ;;  %v8185_v35 = vld [vmem:[%s16258_s9 + $0x2d8] sm:$0xff] }
 0x97a   :  { %10702 = vmatmul.mubr.msk.f32.gmra.mrb[132].mxu0 %vm3899_vm8, %v12389_v55 }
 0x97b   :  { %11107 = vmatpush3.bf16.msk.msra.mxu0 %vm13631_vm2, %v11092_v4  ;;  %10712 = vmatprep.mubr.msk.f32.mxu0 %vm3899_vm8, %v12308_v29  ;;  %v8156_v4 = vld [vmem:[%s16258_s9 + $0x1f0] sm:$0xff] }
 0x97c   :  { %11109 = vmatprep.subr.bf16.mxu0 %v11108_v25  ;;  %v11138_v37 = vpack.c.bf16 %v8156_v4, %v8154_v17  ;;  %v11140_v25 = vpack.c.bf16 %v4100_v42, %v4098_v36  ;;  %v8161_v17 = vld [vmem:[%s16258_s9 + $0x218] sm:$0xff]  ;;  %v8158_v36 = vld [vmem:[%s16258_s9 + $0x200] sm:$0xff]  ;;  %v8160_v42 = vld [vmem:[%s16258_s9 + $0x210] sm:$0xff] }
 0x97e   :  { %10713 = vmatmul.mubr.msk.f32.vlgmr.msra.gmra.mrb[134].mxu0 %vm3899_vm8, %v13678_v51 }
 0x97f   :  { %11111 = vmatpush1.bf16.msra.mxu0 %v11110_v52  ;;  %10715 = vmatprep.mubr.msk.f32.mxu0 %vm3899_vm8, %v12378_v53  ;;  %v11142_v52 = vpack.c.bf16 %v4099_v12, %v4097_v13  ;;  %v11174_v13 = vpack.c.bf16 %v8160_v42, %v8158_v36  ;;  %v4478_v42 = vsub.s32 1, %v12240_v9 }
 0x980   :  { %11113 = vmatprep.subr.bf16.mxu0 %v11112_v26  ;;  %v11144_v26 = vpack.c.bf16 %v4104_v46, %v4102_v1  ;;  %v8162_v46 = vld [vmem:[%s16258_s9 + $0x220] sm:$0xff] }
 0x982   :  { %10716 = vmatmul.mubr.msk.f32.gmra.mrb[136].mxu0 %vm3899_vm8, %v12418_v60 }
 0x983   :  { %11115 = vmatpush1.bf16.msra.mxu0 %v11114_v14  ;;  %4226 = vmatprep.mubr.f32.mxu0 %v16295_v39  ;;  %v11146_v14 = vpack.c.bf16 %v4103_v49, %v4101_v38  ;;  %v8167_v38 = vld [vmem:[%s16258_s9 + $0x248] sm:$0xff]  ;;  %v8169_v49 = vld [vmem:[%s16258_s9 + $0x258] sm:$0xff] }
 0x984   :  { %11117 = vmatprep.subr.bf16.mxu0 %v11116_v27  ;;  %v11148_v27 = vpack.c.bf16 %v4108_v44, %v4106_v33  ;;  %v11180_v44 = vpack.c.bf16 %v8169_v49, %v8167_v38 }
 0x987   :  { %11119 = vmatpush1.bf16.msra.mxu0 %v11118_v7 }
 0x988   :  { %11121 = vmatprep.subr.bf16.mxu0 %v11120_v41  ;;  %v4109_v41 = vld [vmem:[%s16258_s9 + $0x60] sm:$0xff] }
 0x989   :  { %v11154_v59 = vpack.c.bf16 %v4111_v22, %v4109_v41  ;;  %v8170_v41 = vld [vmem:[%s16258_s9 + $0x260] sm:$0xff]  ;;  %v8172_v22 = vld [vmem:[%s16258_s9 + $0x270] sm:$0xff] }
 0x98b   :  { %11123 = vmatpush1.bf16.msra.mxu0 %v11122_v20  ;;  %v4113_v20 = vld [vmem:[%s16258_s9 + $0x80] sm:$0xff] }
 0x98c   :  { %11125 = vmatprep.subr.bf16.mxu0 %v11124_v43  ;;  %v4115_v43 = vld [vmem:[%s16258_s9 + $0x90] sm:$0xff] }
 0x98d   :  { %v11158_v15 = vpack.c.bf16 %v4115_v43, %v4113_v20  ;;  %v11186_v20 = vpack.c.bf16 %v8172_v22, %v8170_v41 }
 0x98f   :  { %11127 = vmatpush1.bf16.msra.mxu0 %v11126_v0  ;;  %v4119_v0 = vld [vmem:[%s16258_s9 + $0xb0] sm:$0xff] }
 0x990   :  { %11129 = vmatprep.subr.bf16.mxu0 %v11128_v30  ;;  %v4122_v30 = vld [vmem:[%s16258_s9 + $0xc8] sm:$0xff]  ;;  %v11162_v5 = vpack.c.bf16 %v4119_v0, %v4117_v58  ;;  %v8181_v58 = vld [vmem:[%s16258_s9 + $0x2b8] sm:$0xff] }
 0x993   :  { %11131 = vmatpush1.bf16.msra.mxu0 %v11130_v21  ;;  %v4126_v21 = vld [vmem:[%s16258_s9 + $0xe8] sm:$0xff] }
 0x994   :  { %11133 = vmatprep.subr.bf16.mxu0 %v11132_v28  ;;  %v4128_v28 = vld [vmem:[%s16258_s9 + $0xf8] sm:$0xff] }
 0x995   :  { %v11168_v6 = vpack.c.bf16 %v4128_v28, %v4126_v21  ;;  %v11196_v28 = vpack.c.bf16 %v8185_v35, %v8183_v32  ;;  %v8206_v32 = vld [vmem:[%s16260_s11 + $0x220] sm:$0xff]  ;;  %v8208_v35 = vld [vmem:[%s16260_s11 + $0x230] sm:$0xff] }
 0x997   :  { %11135 = vmatpush1.bf16.msra.mxu0 %v11134_v62  ;;  %v11170_v62 = vpack.c.bf16 %v4127_v56, %v4125_v19  ;;  %v8187_v19 = vld [vmem:[%s16258_s9 + $0x2e8] sm:$0xff]  ;;  %v8189_v56 = vld [vmem:[%s16258_s9 + $0x2f8] sm:$0xff] }
 0x998   :  { %11137 = vmatprep.subr.bf16.mxu0 %v11136_v40  ;;  %v8159_v40 = vld [vmem:[%s16258_s9 + $0x208] sm:$0xff] }
 0x999   :  { %v11172_v4 = vpack.c.bf16 %v8161_v17, %v8159_v40  ;;  %v11200_v40 = vpack.c.bf16 %v8189_v56, %v8187_v19  ;;  %v8186_v17 = vld [vmem:[%s16258_s9 + $0x2e0] sm:$0xff]  ;;  %v8212_v19 = vld [vmem:[%s16260_s11 + $0x250] sm:$0xff]  ;;  %v8215_v56 = vld [vmem:[%s16260_s11 + $0x268] sm:$0xff] }
 0x99b   :  { %11139 = vmatpush1.bf16.msra.mxu0 %v11138_v37  ;;  %v8163_v37 = vld [vmem:[%s16258_s9 + $0x228] sm:$0xff] }
 0x99c   :  { %11141 = vmatprep.subr.bf16.mxu0 %v11140_v25  ;;  %v8165_v25 = vld [vmem:[%s16258_s9 + $0x238] sm:$0xff] }
 0x99d   :  { %v11176_v1 = vpack.c.bf16 %v8165_v25, %v8163_v37  ;;  %v4470_v37 = vld [vmem:[%s16259_s10] sm:$0x3]  ;;  %v4474_v25 = vsub.s32 0, %v12240_v9 }
 0x99e   :  { %4227 = vmatmul.mubr.f32.vlgmr.msra.gmra.mrb[138].mxu0 %v13621_v54  ;;  %v4112_v54 = vld [vmem:[%s16258_s9 + $0x78] sm:$0xff] }
 0x99f   :  { %4232 = vmatprep.mubr.f32.mxu0 %v16295_v39  ;;  %11143 = vmatpush1.bf16.msra.mxu0 %v11142_v52  ;;  %v11152_v7 = vpack.c.bf16 %v4112_v54, %v4110_v50  ;;  %v8164_v52 = vld [vmem:[%s16258_s9 + $0x230] sm:$0xff]  ;;  %v8173_v50 = vld [vmem:[%s16258_s9 + $0x278] sm:$0xff] }
 0x9a0   :  { %11145 = vmatprep.subr.bf16.mxu0 %v11144_v26  ;;  %v11178_v33 = vpack.c.bf16 %v8164_v52, %v8162_v46 }
 0x9a2   :  { %4233 = vmatmul.mubr.f32.gmra.mrb[140].mxu0 %v13619_v31  ;;  %v4116_v31 = vld [vmem:[%s16258_s9 + $0x98] sm:$0xff] }
 0x9a3   :  { %4238 = vmatprep.mubr.f32.mxu0 %v16295_v39  ;;  %11147 = vmatpush1.bf16.msra.mxu0 %v11146_v14  ;;  %v11156_v8 = vpack.c.bf16 %v4116_v31, %v4114_v57  ;;  %v8166_v14 = vld [vmem:[%s16258_s9 + $0x240] sm:$0xff]  ;;  %v8175_v31 = vld [vmem:[%s16258_s9 + $0x288] sm:$0xff] }
 0x9a4   :  { %11149 = vmatprep.subr.bf16.mxu0 %v11148_v27  ;;  %v8168_v27 = vld [vmem:[%s16258_s9 + $0x250] sm:$0xff] }
 0x9a6   :  { %4239 = vmatmul.mubr.f32.gmra.mrb[142].mxu0 %v13628_v61  ;;  %v4120_v61 = vld [vmem:[%s16258_s9 + $0xb8] sm:$0xff] }
 0x9a7   :  { %4244 = vmatprep.mubr.f32.mxu0 %v16295_v39  ;;  %11151 = vmatpush1.bf16.msra.mxu0 %v11150_v18  ;;  %v11160_v24 = vpack.c.bf16 %v4120_v61, %v4118_v2  ;;  %v11182_v18 = vpack.c.bf16 %v8168_v27, %v8166_v14  ;;  %v8174_v2 = vld [vmem:[%s16258_s9 + $0x280] sm:$0xff]  ;;  %v8176_v61 = vld [vmem:[%s16258_s9 + $0x290] sm:$0xff] }
 0x9a8   :  { %11153 = vmatprep.subr.bf16.mxu0 %v11152_v7  ;;  %v11184_v7 = vpack.c.bf16 %v8173_v50, %v8171_v47 }
 0x9aa   :  { %4245 = vmatmul.mubr.f32.gmra.mrb[144].mxu0 %v13626_v45  ;;  %v4124_v45 = vld [vmem:[%s16258_s9 + $0xd8] sm:$0xff] }
 0x9ab   :  { %11155 = vmatpush1.bf16.msra.mxu0 %v11154_v59  ;;  %4315 = vmatprep.mubr.f32.mxu0 %v16295_v39  ;;  %v11164_v3 = vpack.c.bf16 %v4124_v45, %v4122_v30  ;;  %v8177_v59 = vld [vmem:[%s16258_s9 + $0x298] sm:$0xff]  ;;  %v11190_v30 = vpack.c.bf16 %v8176_v61, %v8174_v2 }
 0x9ac   :  { %11157 = vmatprep.subr.bf16.mxu0 %v11156_v8  ;;  %v11188_v43 = vpack.c.bf16 %v8177_v59, %v8175_v31 }
 0x9af   :  { %11159 = vmatpush1.bf16.msra.mxu0 %v11158_v15 }
 0x9b0   :  { %11161 = vmatprep.subr.bf16.mxu0 %v11160_v24  ;;  %v8179_v24 = vld [vmem:[%s16258_s9 + $0x2a8] sm:$0xff] }
 0x9b1   :  { %v11192_v45 = vpack.c.bf16 %v8181_v58, %v8179_v24  ;;  %v8203_v58 = vld [vmem:[%s16260_s11 + $0x208] sm:$0xff] }
 0x9b3   :  { %11163 = vmatpush1.bf16.msra.mxu0 %v11162_v5  ;;  %v8178_v5 = vld [vmem:[%s16258_s9 + $0x2a0] sm:$0xff] }
 0x9b4   :  { %11165 = vmatprep.subr.bf16.mxu0 %v11164_v3  ;;  %v8180_v3 = vld [vmem:[%s16258_s9 + $0x2b0] sm:$0xff] }
 0x9b5   :  { %v11194_v21 = vpack.c.bf16 %v8180_v3, %v8178_v5  ;;  %v8209_v5 = vld [vmem:[%s16260_s11 + $0x238] sm:$0xff] }
 0x9b7   :  { %11167 = vmatpush1.bf16.msra.mxu0 %v11166_v11  ;;  %v8182_v11 = vld [vmem:[%s16258_s9 + $0x2c0] sm:$0xff] }
 0x9b8   :  { %11169 = vmatprep.subr.bf16.mxu0 %v11168_v6  ;;  %v8184_v6 = vld [vmem:[%s16258_s9 + $0x2d0] sm:$0xff] }
 0x9bb   :  { %11171 = vmatpush1.bf16.msra.mxu0 %v11170_v62  ;;  %v11198_v62 = vpack.c.bf16 %v8184_v6, %v8182_v11  ;;  %v8210_v6 = vld [vmem:[%s16260_s11 + $0x240] sm:$0xff] }
 0x9bc   :  { %11173 = vmatprep.subr.bf16.mxu0 %v11172_v4  ;;  %v8188_v4 = vld [vmem:[%s16258_s9 + $0x2f0] sm:$0xff]  ;;  %s12125_s9 = smov [#allocation2]  }
 0x9bd   :  { %v11202_v36 = vpack.c.bf16 %v8188_v4, %v8186_v17  ;;  %v8214_v17 = vld [vmem:[%s16260_s11 + $0x260] sm:$0xff]  ;;  %v8216_v4 = vld [vmem:[%s16260_s11 + $0x270] sm:$0xff]  ;;  %s7746_s10 = sshll.u32 %s12125_s9, 4  ;;  %s7747_s10 = int_to_ptr.vmem [resolvable:$true] %s7746_s10 }
 0x9be   :  { %s12097_s16 = scalar_lea.vmem %s7747_s10, 32  ;;  %p12102_p1 = scmp.lt.s32.totalorder %s7747_s10, %s7747_s10 }
 0x9bf   :  { %p12098_p0 = scmp.ne.s32.totalorder %s7747_s10, %s12097_s16  ;;  %p12103_p2 = scmp.lt.s32.totalorder %s12097_s16, %s12097_s16 }
 0x9c1   :  { %p12104_p3 = por %p12103_p2, %p12102_p1 }
 0x9c3   :  { %p12105_p4 = pnand %p12104_p3, %p12098_p0 }
 0xa49   :  { %v10700_v12 = vpop.f32.mrb[130].mxu0 }
 0xa4a   :  { %v3981_v26 = vpop.f32.mrb[131].mxu0 }
 0xa4b   :  { %4316 = vmatmul.mubr.f32.vlgmr.msra.gmra.mrb[138].mxu0 %v3981_v26 }
 0xa4c   :  { %11175 = vmatpush1.bf16.msra.mxu0 %v11174_v13  ;;  %4321 = vmatprep.mubr.f32.mxu0 %v16295_v39 }
 0xa4d   :  { %11177 = vmatprep.subr.bf16.mxu0 %v11176_v1  ;;  %v10703_v34 = vpop.f32.mrb[132].mxu0  ;;  %v4475_v1 = vrot.slane %v4470_v37, %v4474_v25 }
 0xa4e   :  { %v3991_v54 = vpop.f32.mrb[133].mxu0 }
 0xa4f   :  { %4322 = vmatmul.mubr.f32.gmra.mrb[140].mxu0 %v10700_v12  ;;  %v4479_v12 = vrot.slane %v4470_v37, %v4478_v42  ;;  %v11238_v37 = vpack.c.bf16 %v8216_v4, %v8214_v17  ;;  %v8247_v17 = vld [vmem:[%s16260_s11 + $0x368] sm:$0xff]  ;;  %v8249_v4 = vld [vmem:[%s16260_s11 + $0x378] sm:$0xff] }
 0xa50   :  { %11179 = vmatpush1.bf16.msra.mxu0 %v11178_v33  ;;  %4327 = vmatprep.mubr.f32.mxu0 %v16295_v39 }
 0xa51   :  { %11181 = vmatprep.subr.bf16.mxu0 %v11180_v44  ;;  %v10714_v57 = vpop.f32.mrb[134].mxu0 }
 0xa52   :  { %v4078_v8 = vpop.f32.mrb[135].mxu0 }
 0xa53   :  { %4328 = vmatmul.mubr.f32.gmra.mrb[142].mxu0 %v3991_v54 }
 0xa54   :  { %11183 = vmatpush1.bf16.msra.mxu0 %v11182_v18  ;;  %4333 = vmatprep.mubr.f32.mxu0 %v16295_v39 }
 0xa55   :  { %11185 = vmatprep.subr.bf16.mxu0 %v11184_v7  ;;  %v10717_v15 = vpop.f32.mrb[136].mxu0 }
 0xa56   :  { %v4088_v0 = vpop.f32.mrb[137].mxu0 }
 0xa57   :  { %4334 = vmatmul.mubr.f32.gmra.mrb[144].mxu0 %v10703_v34 }
 0xa58   :  { %11187 = vmatpush1.bf16.msra.mxu0 %v11186_v20  ;;  %4437 = vmatprep.mubr.f32.mxu0 %v16295_v39 }
 0xa59   :  { %11189 = vmatprep.subr.bf16.mxu0 %v11188_v43 }
 0xa5c   :  { %11191 = vmatpush1.bf16.msra.mxu0 %v11190_v30 }
 0xa5d   :  { %11193 = vmatprep.subr.bf16.mxu0 %v11192_v45  ;;  %v8204_v45 = vld [vmem:[%s16260_s11 + $0x210] sm:$0xff] }
 0xa60   :  { %11195 = vmatpush1.bf16.msra.mxu0 %v11194_v21  ;;  %v8211_v21 = vld [vmem:[%s16260_s11 + $0x248] sm:$0xff] }
 0xa61   :  { %11197 = vmatprep.subr.bf16.mxu0 %v11196_v28  ;;  %v11230_v28 = vpack.c.bf16 %v8208_v35, %v8206_v32  ;;  %v8239_v32 = vld [vmem:[%s16260_s11 + $0x328] sm:$0xff]  ;;  %v8241_v35 = vld [vmem:[%s16260_s11 + $0x338] sm:$0xff] }
 0xa64   :  { %11199 = vmatpush1.bf16.msra.mxu0 %v11198_v62  ;;  %v11234_v62 = vpack.c.bf16 %v8212_v19, %v8210_v6  ;;  %v8243_v6 = vld [vmem:[%s16260_s11 + $0x348] sm:$0xff]  ;;  %v8245_v19 = vld [vmem:[%s16260_s11 + $0x358] sm:$0xff] }
 0xa65   :  { %11201 = vmatprep.subr.bf16.mxu0 %v11200_v40 }
 0xa68   :  { %11203 = vmatpush1.bf16.msra.mxu0 %v11202_v36  ;;  %v8219_v36 = vld [vmem:[%s16260_s11 + $0x288] sm:$0xff] }
 0xa6b   :  { %4438 = vmatmul.mubr.f32.vlgmr.msra.gmra.mrb[138].mxu0 %v4078_v8 }
 0xa6c   :  { %4443 = vmatprep.mubr.f32.mxu0 %v16295_v39 }
 0xa6f   :  { %4444 = vmatmul.mubr.f32.gmra.mrb[140].mxu0 %v10714_v57 }
 0xa70   :  { %4449 = vmatprep.mubr.f32.mxu0 %v16295_v39 }
 0xa73   :  { %4450 = vmatmul.mubr.f32.gmra.mrb[142].mxu0 %v4088_v0  ;;  %v8205_v0 = vld [vmem:[%s16260_s11 + $0x218] sm:$0xff] }
 0xa74   :  { %4455 = vmatprep.mubr.f32.mxu0 %v16295_v39  ;;  %v11224_v30 = vpack.c.bf16 %v8205_v0, %v8203_v58  ;;  %v8230_v0 = vld [vmem:[%s16260_s11 + $0x2e0] sm:$0xff] }
 0xa77   :  { %4456 = vmatmul.mubr.f32.gmra.mrb[144].mxu0 %v10717_v15 }
 0xa78   :  { %5256 = vmatprep.mubr.f32.mxu0 %v16295_v39 }
 0xb3e   :  { %v4439_v13 = vpop.f32.mrb[138].mxu0 }
 0xb3f   :  { %v4441_v46 = vpop.f32.mrb[139].mxu0  ;;  %v13988_v38 = vadd.f32 %v4475_v1, %v4439_v13 }
 0xb40   :  { %v13986_v52 = vadd.f32 %v4479_v12, %v4441_v46  ;;  %v8223_v46 = vld [vmem:[%s16260_s11 + $0x2a8] sm:$0xff] }
 0xb41   :  { %v4490_v50 = vmax.f32 %v13988_v38, 0.0  ;;  %v4695_v38 = vld [vmem:[%s16260_s11 + $0x68] sm:$0xff] }
 0xb42   :  { %v4445_v26 = vpop.f32.mrb[140].mxu0  ;;  %v4491_v27 = vmax.f32 %v13986_v52, 0.0 }
 0xb43   :  { %v13990_v49 = vadd.f32 %v4475_v1, %v4445_v26  ;;  %v4447_v33 = vpop.f32.mrb[141].mxu0 }
 0xb44   :  { %v13992_v44 = vadd.f32 %v4479_v12, %v4447_v33 }
 0xb45   :  { %v4492_v14 = vmax.f32 %v13990_v49, 0.0  ;;  %v4699_v49 = vld [vmem:[%s16260_s11 + $0x88] sm:$0xff] }
 0xb46   :  { %v4493_v34 = vmax.f32 %v13992_v44, 0.0  ;;  %v4451_v47 = vpop.f32.mrb[142].mxu0  ;;  %v4697_v44 = vld [vmem:[%s16260_s11 + $0x78] sm:$0xff] }
 0xb47   :  { %v4453_v54 = vpop.f32.mrb[143].mxu0  ;;  %v11206_v7 = vpack.c.bf16 %v4492_v14, %v4490_v50  ;;  %v14008_v57 = vadd.f32 %v4475_v1, %v4451_v47  ;;  %v8222_v47 = vld [vmem:[%s16260_s11 + $0x2a0] sm:$0xff] }
 0xb48   :  { %v11204_v18 = vpack.c.bf16 %v4493_v34, %v4491_v27  ;;  %v14006_v41 = vadd.f32 %v4479_v12, %v4453_v54  ;;  %v8224_v54 = vld [vmem:[%s16260_s11 + $0x2b0] sm:$0xff] }
 0xb49   :  { %v4494_v61 = vmax.f32 %v14008_v57, 0.0  ;;  %v11246_v52 = vpack.c.bf16 %v8224_v54, %v8222_v47  ;;  %v8255_v47 = vld [vmem:[%s16260_s11 + $0x3a8] sm:$0xff]  ;;  %v8257_v54 = vld [vmem:[%s16260_s11 + $0x3b8] sm:$0xff] }
 0xb4a   :  { %v4457_v22 = vpop.f32.mrb[144].mxu0  ;;  %11205 = vmatprep.subr.bf16.mxu1 %v11204_v18  ;;  %v4495_v43 = vmax.f32 %v14006_v41, 0.0  ;;  %v4703_v57 = vld [vmem:[%s16260_s11 + $0xa8] sm:$0xff] }
 0xb4b   :  { %v14010_v31 = vadd.f32 %v4475_v1, %v4457_v22  ;;  %v4459_v59 = vpop.f32.mrb[145].mxu0  ;;  %11207 = vmatpush1.bf16.msra.mxu1 %v11206_v7  ;;  %v8220_v1 = vld [vmem:[%s16260_s11 + $0x290] sm:$0xff] }
 0xb4c   :  { %v14012_v8 = vadd.f32 %v4479_v12, %v4459_v59  ;;  %v8218_v12 = vld [vmem:[%s16260_s11 + $0x280] sm:$0xff]  ;;  %v8228_v22 = vld [vmem:[%s16260_s11 + $0x2d0] sm:$0xff]  ;;  %v8231_v59 = vld [vmem:[%s16260_s11 + $0x2e8] sm:$0xff] }
 0xb4d   :  { %v4496_v20 = vmax.f32 %v14010_v31, 0.0  ;;  %v11242_v26 = vpack.c.bf16 %v8220_v1, %v8218_v12  ;;  %v8251_v12 = vld [vmem:[%s16260_s11 + $0x388] sm:$0xff]  ;;  %v8253_v1 = vld [vmem:[%s16260_s11 + $0x398] sm:$0xff] }
 0xb4e   :  { %v4497_v2 = vmax.f32 %v14012_v8, 0.0  ;;  %v4705_v8 = vld [vmem:[%s16260_s11 + $0xb8] sm:$0xff] }
 0xb4f   :  { %v11211_v24 = vpack.c.bf16 %v4496_v20, %v4494_v61  ;;  %v4709_v31 = vld [vmem:[%s16260_s11 + $0xd8] sm:$0xff] }
 0xb50   :  { %v11208_v15 = vpack.c.bf16 %v4497_v2, %v4495_v43 }
 0xb52   :  { %11210 = vmatprep.subr.msk.bf16.mxu1 %vm13631_vm2, %v11208_v15 }
 0xb53   :  { %11213 = vmatpush1.bf16.msk.msra.mxu1 %vm13631_vm2, %v11211_v24 }
 0xb54   :  { %11215 = vmatprep.subr.bf16.mxu1 %v11204_v18  ;;  %v8227_v18 = vld [vmem:[%s16260_s11 + $0x2c8] sm:$0xff] }
 0xb56   :  { %8192 = vmatmul.mubr.msk.f32.vlgmr.msra.gmra.mrb[130].mxu1 %vm3899_vm8, %v12259_v16  ;;  %v8202_v16 = vld [vmem:[%s16260_s11 + $0x200] sm:$0xff] }
 0xb57   :  { %11217 = vmatpush1.bf16.msra.mxu1 %v11206_v7  ;;  %4574 = vmatprep.mubr.f32.mxu1 %v16295_v39  ;;  %v8226_v7 = vld [vmem:[%s16260_s11 + $0x2c0] sm:$0xff] }
 0xb58   :  { %11220 = vmatprep.subr.msk.bf16.mxu1 %vm13631_vm2, %v11208_v15  ;;  %v8233_v15 = vld [vmem:[%s16260_s11 + $0x2f8] sm:$0xff] }
 0xb59   :  { %v11252_v58 = vpack.c.bf16 %v8233_v15, %v8231_v59 }
 0xb5a   :  { %8193 = vmatmul.mubr.msk.f32.gmra.mrb[132].mxu1 %vm3899_vm8, %v13643_v23  ;;  %v8207_v23 = vld [vmem:[%s16260_s11 + $0x228] sm:$0xff] }
 0xb5b   :  { %11223 = vmatpush1.bf16.msk.msra.mxu1 %vm13631_vm2, %v11211_v24  ;;  %4580 = vmatprep.mubr.f32.mxu1 %v16295_v39  ;;  %v11228_v3 = vpack.c.bf16 %v8209_v5, %v8207_v23  ;;  %v11250_v24 = vpack.c.bf16 %v8228_v22, %v8226_v7  ;;  %v8259_v7 = vld [vmem:[%s16260_s11 + $0x3c8] sm:$0xff]  ;;  %v8261_v22 = vld [vmem:[%s16260_s11 + $0x3d8] sm:$0xff] }
 0xb5c   :  { %11225 = vmatprep.subr.bf16.mxu1 %v11224_v30  ;;  %v8232_v30 = vld [vmem:[%s16260_s11 + $0x2f0] sm:$0xff]  ;;  %v11280_v15 = vpack.c.bf16 %v8261_v22, %v8259_v7  ;;  %v4710_v7 = vld [vmem:[%s16260_s11 + $0xe0] sm:$0xff] }
 0xb5d   :  { %v11254_v23 = vpack.c.bf16 %v8232_v30, %v8230_v0  ;;  %v8263_v0 = vld [vmem:[%s16260_s11 + $0x3e8] sm:$0xff]  ;;  %v8265_v30 = vld [vmem:[%s16260_s11 + $0x3f8] sm:$0xff]  ;;  %v4712_v22 = vld [vmem:[%s16260_s11 + $0xf0] sm:$0xff] }
 0xb5e   :  { %8194 = vmatmul.mubr.msk.f32.gmra.mrb[134].mxu1 %vm3899_vm8, %v12366_v48  ;;  %v11226_v48 = vpack.c.bf16 %v8204_v45, %v8202_v16  ;;  %v8235_v16 = vld [vmem:[%s16260_s11 + $0x308] sm:$0xff]  ;;  %v8237_v45 = vld [vmem:[%s16260_s11 + $0x318] sm:$0xff] }
 0xb5f   :  { %4586 = vmatprep.mubr.f32.mxu1 %v16295_v39  ;;  %v11256_v5 = vpack.c.bf16 %v8237_v45, %v8235_v16  ;;  %v11284_v45 = vpack.c.bf16 %v8265_v30, %v8263_v0  ;;  %v4714_v0 = vld [vmem:[%s16260_s11 + $0x100] sm:$0xff]  ;;  %v4716_v30 = vld [vmem:[%s16260_s11 + $0x110] sm:$0xff] }
 0xb62   :  { %8195 = vmatmul.mubr.msk.f32.gmra.mrb[136].mxu1 %vm3899_vm8, %v12389_v55  ;;  %v8213_v55 = vld [vmem:[%s16260_s11 + $0x258] sm:$0xff] }
 0xb63   :  { %4657 = vmatprep.mubr.f32.mxu1 %v16295_v39  ;;  %v11232_v11 = vpack.c.bf16 %v8213_v55, %v8211_v21  ;;  %v11260_v55 = vpack.c.bf16 %v8241_v35, %v8239_v32 }
 0xb66   :  { %8198 = vmatmul.mubr.msk.f32.vlgmr.msra.gmra.mrb[138].mxu1 %vm3899_vm8, %v12308_v29  ;;  %v8217_v29 = vld [vmem:[%s16260_s11 + $0x278] sm:$0xff] }
 0xb67   :  { %11227 = vmatpush1.bf16.msra.mxu1 %v11226_v48  ;;  %4663 = vmatprep.mubr.f32.mxu1 %v16295_v39  ;;  %v11236_v40 = vpack.c.bf16 %v8217_v29, %v8215_v56  ;;  %v8234_v48 = vld [vmem:[%s16260_s11 + $0x300] sm:$0xff]  ;;  %v11264_v29 = vpack.c.bf16 %v8245_v19, %v8243_v6 }
 0xb68   :  { %11229 = vmatprep.subr.bf16.mxu1 %v11228_v3  ;;  %v8236_v3 = vld [vmem:[%s16260_s11 + $0x310] sm:$0xff] }
 0xb69   :  { %v11258_v21 = vpack.c.bf16 %v8236_v3, %v8234_v48  ;;  %v4683_v48 = vld [vmem:[%s16260_s11 + $0x8] sm:$0xff]  ;;  %v4685_v3 = vld [vmem:[%s16260_s11 + $0x18] sm:$0xff] }
 0xb6a   :  { %8199 = vmatmul.mubr.msk.f32.gmra.mrb[140].mxu1 %vm3899_vm8, %v13678_v51  ;;  %v8221_v51 = vld [vmem:[%s16260_s11 + $0x298] sm:$0xff]  ;;  %v11288_v35 = vpack.c.bf16 %v4685_v3, %v4683_v48  ;;  %v4718_v48 = vld [vmem:[%s16260_s11 + $0x120] sm:$0xff]  ;;  %v4720_v3 = vld [vmem:[%s16260_s11 + $0x130] sm:$0xff] }
 0xb6b   :  { %11231 = vmatpush1.bf16.msra.mxu1 %v11230_v28  ;;  %4669 = vmatprep.mubr.f32.mxu1 %v16295_v39  ;;  %v11240_v13 = vpack.c.bf16 %v8221_v51, %v8219_v36  ;;  %v8238_v28 = vld [vmem:[%s16260_s11 + $0x320] sm:$0xff]  ;;  %v11268_v51 = vpack.c.bf16 %v8249_v4, %v8247_v17 }
 0xb6c   :  { %11233 = vmatprep.subr.bf16.mxu1 %v11232_v11  ;;  %v8240_v11 = vld [vmem:[%s16260_s11 + $0x330] sm:$0xff] }
 0xb6d   :  { %v11262_v56 = vpack.c.bf16 %v8240_v11, %v8238_v28  ;;  %v4687_v28 = vld [vmem:[%s16260_s11 + $0x28] sm:$0xff]  ;;  %v4689_v11 = vld [vmem:[%s16260_s11 + $0x38] sm:$0xff] }
 0xb6e   :  { %8200 = vmatmul.mubr.msk.f32.gmra.mrb[142].mxu1 %vm3899_vm8, %v12378_v53  ;;  %v8225_v53 = vld [vmem:[%s16260_s11 + $0x2b8] sm:$0xff]  ;;  %v11292_v19 = vpack.c.bf16 %v4689_v11, %v4687_v28  ;;  %v4722_v28 = vld [vmem:[%s16260_s11 + $0x140] sm:$0xff]  ;;  %v4724_v11 = vld [vmem:[%s16260_s11 + $0x150] sm:$0xff] }
 0xb6f   :  { %11235 = vmatpush1.bf16.msra.mxu1 %v11234_v62  ;;  %4675 = vmatprep.mubr.f32.mxu1 %v16295_v39  ;;  %v11244_v33 = vpack.c.bf16 %v8225_v53, %v8223_v46  ;;  %v8242_v62 = vld [vmem:[%s16260_s11 + $0x340] sm:$0xff]  ;;  %v11272_v53 = vpack.c.bf16 %v8253_v1, %v8251_v12  ;;  %v4700_v1 = vld [vmem:[%s16260_s11 + $0x90] sm:$0xff] }
 0xb70   :  { %11237 = vmatprep.subr.bf16.mxu1 %v11236_v40  ;;  %v8244_v40 = vld [vmem:[%s16260_s11 + $0x350] sm:$0xff]  ;;  %v4698_v12 = vld [vmem:[%s16260_s11 + $0x80] sm:$0xff] }
 0xb71   :  { %v11266_v36 = vpack.c.bf16 %v8244_v40, %v8242_v62  ;;  %v4691_v62 = vld [vmem:[%s16260_s11 + $0x48] sm:$0xff]  ;;  %v4693_v40 = vld [vmem:[%s16260_s11 + $0x58] sm:$0xff] }
 0xb72   :  { %8201 = vmatmul.mubr.msk.f32.gmra.mrb[144].mxu1 %vm3899_vm8, %v12418_v60  ;;  %v8229_v60 = vld [vmem:[%s16260_s11 + $0x2d8] sm:$0xff]  ;;  %v11296_v4 = vpack.c.bf16 %v4693_v40, %v4691_v62  ;;  %v4726_v62 = vld [vmem:[%s16260_s11 + $0x160] sm:$0xff]  ;;  %v4728_v40 = vld [vmem:[%s16260_s11 + $0x170] sm:$0xff] }
 0xb73   :  { %11239 = vmatpush1.bf16.msra.mxu1 %v11238_v37  ;;  %4875 = vmatprep.mubr.f32.mxu1 %v4491_v27  ;;  %v11248_v27 = vpack.c.bf16 %v8229_v60, %v8227_v18  ;;  %v8246_v37 = vld [vmem:[%s16260_s11 + $0x360] sm:$0xff]  ;;  %v11276_v60 = vpack.c.bf16 %v8257_v54, %v8255_v47  ;;  %v4708_v54 = vld [vmem:[%s16260_s11 + $0xd0] sm:$0xff] }
 0xb74   :  { %11241 = vmatprep.subr.bf16.mxu1 %v11240_v13  ;;  %v8248_v13 = vld [vmem:[%s16260_s11 + $0x370] sm:$0xff]  ;;  %v4706_v47 = vld [vmem:[%s16260_s11 + $0xc0] sm:$0xff] }
 0xb75   :  { %v11270_v46 = vpack.c.bf16 %v8248_v13, %v8246_v37  ;;  %v4694_v37 = vld [vmem:[%s16260_s11 + $0x60] sm:$0xff]  ;;  %v4696_v13 = vld [vmem:[%s16260_s11 + $0x70] sm:$0xff] }
 0xb76   :  { %v11302_v41 = vpack.c.bf16 %v4696_v13, %v4694_v37 }
 0xb77   :  { %11243 = vmatpush1.bf16.msra.mxu1 %v11242_v26  ;;  %v8250_v26 = vld [vmem:[%s16260_s11 + $0x380] sm:$0xff] }
 0xb78   :  { %11245 = vmatprep.subr.bf16.mxu1 %v11244_v33  ;;  %v8252_v33 = vld [vmem:[%s16260_s11 + $0x390] sm:$0xff] }
 0xb79   :  { %v11274_v18 = vpack.c.bf16 %v8252_v33, %v8250_v26  ;;  %v4707_v26 = vld [vmem:[%s16260_s11 + $0xc8] sm:$0xff] }
 0xb7a   :  { %v11312_v33 = vpack.c.bf16 %v4709_v31, %v4707_v26  ;;  %v4742_v26 = vld [vmem:[%s16260_s11 + $0x1e0] sm:$0xff]  ;;  %v4744_v31 = vld [vmem:[%s16260_s11 + $0x1f0] sm:$0xff] }
 0xb7b   :  { %11247 = vmatpush1.bf16.msra.mxu1 %v11246_v52  ;;  %v8254_v52 = vld [vmem:[%s16260_s11 + $0x3a0] sm:$0xff] }
 0xb7c   :  { %11249 = vmatprep.subr.bf16.mxu1 %v11248_v27  ;;  %v8256_v27 = vld [vmem:[%s16260_s11 + $0x3b0] sm:$0xff] }
 0xb7d   :  { %v11278_v59 = vpack.c.bf16 %v8256_v27, %v8254_v52  ;;  %v11314_v52 = vpack.c.bf16 %v4708_v54, %v4706_v47  ;;  %v11350_v47 = vpack.c.bf16 %v4744_v31, %v4742_v26 }
 0xb7f   :  { %11251 = vmatpush1.bf16.msra.mxu1 %v11250_v24  ;;  %v8258_v24 = vld [vmem:[%s16260_s11 + $0x3c0] sm:$0xff] }
 0xb80   :  { %11253 = vmatprep.subr.bf16.mxu1 %v11252_v58  ;;  %v8260_v58 = vld [vmem:[%s16260_s11 + $0x3d0] sm:$0xff] }
 0xb81   :  { %v11282_v16 = vpack.c.bf16 %v8260_v58, %v8258_v24  ;;  %v11318_v24 = vpack.c.bf16 %v4712_v22, %v4710_v7 }
 0xb83   :  { %11255 = vmatpush1.bf16.msra.mxu1 %v11254_v23  ;;  %v8262_v23 = vld [vmem:[%s16260_s11 + $0x3e0] sm:$0xff] }
 0xb84   :  { %11257 = vmatprep.subr.bf16.mxu1 %v11256_v5  ;;  %v8264_v5 = vld [vmem:[%s16260_s11 + $0x3f0] sm:$0xff] }
 0xb85   :  { %v11286_v32 = vpack.c.bf16 %v8264_v5, %v8262_v23  ;;  %v11322_v23 = vpack.c.bf16 %v4716_v30, %v4714_v0  ;;  %v8275_v0 = vld [vmem:[%s16260_s11 + $0x448] sm:$0xff]  ;;  %v8277_v30 = vld [vmem:[%s16260_s11 + $0x458] sm:$0xff] }
 0xb87   :  { %11259 = vmatpush1.bf16.msra.mxu1 %v11258_v21  ;;  %v4682_v21 = vld [vmem:[%s16260_s11] sm:$0xff] }
 0xb88   :  { %11261 = vmatprep.subr.bf16.mxu1 %v11260_v55  ;;  %v4684_v55 = vld [vmem:[%s16260_s11 + $0x10] sm:$0xff] }
 0xb89   :  { %v11290_v6 = vpack.c.bf16 %v4684_v55, %v4682_v21  ;;  %v11326_v21 = vpack.c.bf16 %v4720_v3, %v4718_v48  ;;  %v8276_v48 = vld [vmem:[%s16260_s11 + $0x450] sm:$0xff] }
 0xb8b   :  { %11263 = vmatpush1.bf16.msra.mxu1 %v11262_v56  ;;  %v4686_v56 = vld [vmem:[%s16260_s11 + $0x20] sm:$0xff] }
 0xb8c   :  { %11265 = vmatprep.subr.bf16.mxu1 %v11264_v29  ;;  %v4688_v29 = vld [vmem:[%s16260_s11 + $0x30] sm:$0xff] }
 0xb8d   :  { %v11294_v17 = vpack.c.bf16 %v4688_v29, %v4686_v56  ;;  %v11330_v56 = vpack.c.bf16 %v4724_v11, %v4722_v28  ;;  %v8278_v11 = vld [vmem:[%s16260_s11 + $0x460] sm:$0xff] }
 0xb8f   :  { %11267 = vmatpush1.bf16.msra.mxu1 %v11266_v36  ;;  %v4690_v36 = vld [vmem:[%s16260_s11 + $0x40] sm:$0xff] }
 0xb90   :  { %11269 = vmatprep.subr.bf16.mxu1 %v11268_v51  ;;  %v4692_v51 = vld [vmem:[%s16260_s11 + $0x50] sm:$0xff] }
 0xb93   :  { %11271 = vmatpush1.bf16.msra.mxu1 %v11270_v46  ;;  %v4702_v46 = vld [vmem:[%s16260_s11 + $0xa0] sm:$0xff] }
 0xb94   :  { %11273 = vmatprep.subr.bf16.mxu1 %v11272_v53  ;;  %v4704_v53 = vld [vmem:[%s16260_s11 + $0xb0] sm:$0xff] }
 0xb97   :  { %11275 = vmatpush1.bf16.msra.mxu1 %v11274_v18  ;;  %v4711_v18 = vld [vmem:[%s16260_s11 + $0xe8] sm:$0xff] }
 0xb98   :  { %11277 = vmatprep.subr.bf16.mxu1 %v11276_v60  ;;  %v4713_v60 = vld [vmem:[%s16260_s11 + $0xf8] sm:$0xff] }
 0xb99   :  { %v11316_v27 = vpack.c.bf16 %v4713_v60, %v4711_v18  ;;  %v8266_v18 = vld [vmem:[%s16260_s11 + $0x400] sm:$0xff]  ;;  %v8268_v60 = vld [vmem:[%s16260_s11 + $0x410] sm:$0xff] }
 0xb9a   :  { %v11354_v22 = vpack.c.bf16 %v8268_v60, %v8266_v18  ;;  %v8299_v18 = vld [vmem:[%s16260_s11 + $0x508] sm:$0xff]  ;;  %v8301_v60 = vld [vmem:[%s16260_s11 + $0x518] sm:$0xff] }
 0xb9b   :  { %11279 = vmatpush1.bf16.msra.mxu1 %v11278_v59  ;;  %v4715_v59 = vld [vmem:[%s16260_s11 + $0x108] sm:$0xff] }
 0xb9c   :  { %11281 = vmatprep.subr.bf16.mxu1 %v11280_v15  ;;  %v4717_v15 = vld [vmem:[%s16260_s11 + $0x118] sm:$0xff] }
 0xb9d   :  { %v11320_v58 = vpack.c.bf16 %v4717_v15, %v4715_v59 }
 0xb9f   :  { %11283 = vmatpush1.bf16.msra.mxu1 %v11282_v16  ;;  %v4719_v16 = vld [vmem:[%s16260_s11 + $0x128] sm:$0xff] }
 0xba0   :  { %11285 = vmatprep.subr.bf16.mxu1 %v11284_v45  ;;  %v4721_v45 = vld [vmem:[%s16260_s11 + $0x138] sm:$0xff] }
 0xba1   :  { %v11324_v5 = vpack.c.bf16 %v4721_v45, %v4719_v16 }
 0xba3   :  { %11287 = vmatpush1.bf16.msra.mxu1 %v11286_v32  ;;  %v4723_v32 = vld [vmem:[%s16260_s11 + $0x148] sm:$0xff] }
 0xba4   :  { %11289 = vmatprep.subr.bf16.mxu1 %v11288_v35  ;;  %v4725_v35 = vld [vmem:[%s16260_s11 + $0x158] sm:$0xff] }
 0xba5   :  { %v11328_v55 = vpack.c.bf16 %v4725_v35, %v4723_v32  ;;  %v8279_v32 = vld [vmem:[%s16260_s11 + $0x468] sm:$0xff]  ;;  %v8281_v35 = vld [vmem:[%s16260_s11 + $0x478] sm:$0xff] }
 0xba6   :  { %4876 = vmatmul.mubr.f32.vlgmr.msra.gmra.mrb[146].mxu1 %v4490_v50  ;;  %v11300_v50 = vpack.c.bf16 %v4697_v44, %v4695_v38  ;;  %v4730_v38 = vld [vmem:[%s16260_s11 + $0x180] sm:$0xff]  ;;  %v4732_v44 = vld [vmem:[%s16260_s11 + $0x190] sm:$0xff]  ;;  %v11364_v28 = vpack.c.bf16 %v8281_v35, %v8279_v32 }
 0xba7   :  { %4881 = vmatprep.mubr.f32.mxu1 %v4493_v34  ;;  %11291 = vmatpush1.bf16.msra.mxu1 %v11290_v6  ;;  %v11298_v34 = vpack.c.bf16 %v4692_v51, %v4690_v36  ;;  %v4727_v6 = vld [vmem:[%s16260_s11 + $0x168] sm:$0xff]  ;;  %v11334_v36 = vpack.c.bf16 %v4728_v40, %v4726_v62  ;;  %v11338_v37 = vpack.c.bf16 %v4732_v44, %v4730_v38  ;;  %v8289_v44 = vld [vmem:[%s16260_s11 + $0x4b8] sm:$0xff]  ;;  %v8306_v32 = vld [vmem:[%s16260_s11 + $0x540] sm:$0xff] }
 0xba8   :  { %11293 = vmatprep.subr.bf16.mxu1 %v11292_v19  ;;  %v4729_v19 = vld [vmem:[%s16260_s11 + $0x178] sm:$0xff]  ;;  %v8287_v38 = vld [vmem:[%s16260_s11 + $0x4a8] sm:$0xff]  ;;  %v8308_v35 = vld [vmem:[%s16260_s11 + $0x550] sm:$0xff] }
 0xba9   :  { %v11332_v29 = vpack.c.bf16 %v4729_v19, %v4727_v6  ;;  %v8280_v6 = vld [vmem:[%s16260_s11 + $0x470] sm:$0xff] }
 0xbaa   :  { %4882 = vmatmul.mubr.f32.gmra.mrb[148].mxu1 %v4492_v14  ;;  %v4701_v14 = vld [vmem:[%s16260_s11 + $0x98] sm:$0xff]  ;;  %v11366_v62 = vpack.c.bf16 %v8280_v6, %v8278_v11  ;;  %v8310_v6 = vld [vmem:[%s16260_s11 + $0x560] sm:$0xff] }
 0xbab   :  { %4887 = vmatprep.mubr.f32.mxu1 %v4495_v43  ;;  %11295 = vmatpush1.bf16.msra.mxu1 %v11294_v17  ;;  %v11304_v43 = vpack.c.bf16 %v4701_v14, %v4699_v49  ;;  %v4731_v17 = vld [vmem:[%s16260_s11 + $0x188] sm:$0xff]  ;;  %v4734_v49 = vld [vmem:[%s16260_s11 + $0x1a0] sm:$0xff]  ;;  %v4736_v14 = vld [vmem:[%s16260_s11 + $0x1b0] sm:$0xff] }
 0xbac   :  { %11297 = vmatprep.subr.bf16.mxu1 %v11296_v4  ;;  %v4733_v4 = vld [vmem:[%s16260_s11 + $0x198] sm:$0xff] }
 0xbad   :  { %v11336_v51 = vpack.c.bf16 %v4733_v4, %v4731_v17  ;;  %v8282_v4 = vld [vmem:[%s16260_s11 + $0x480] sm:$0xff] }
 0xbae   :  { %4888 = vmatmul.mubr.f32.gmra.mrb[150].mxu1 %v4494_v61  ;;  %v11308_v61 = vpack.c.bf16 %v4705_v8, %v4703_v57  ;;  %v4738_v57 = vld [vmem:[%s16260_s11 + $0x1c0] sm:$0xff]  ;;  %v4740_v8 = vld [vmem:[%s16260_s11 + $0x1d0] sm:$0xff] }
 0xbaf   :  { %4893 = vmatprep.mubr.f32.mxu1 %v4497_v2  ;;  %11299 = vmatpush1.bf16.msra.mxu1 %v11298_v34  ;;  %v11306_v2 = vpack.c.bf16 %v4700_v1, %v4698_v12  ;;  %v4735_v34 = vld [vmem:[%s16260_s11 + $0x1a8] sm:$0xff]  ;;  %v11342_v12 = vpack.c.bf16 %v4736_v14, %v4734_v49  ;;  %v8288_v49 = vld [vmem:[%s16260_s11 + $0x4b0] sm:$0xff] }
 0xbb0   :  { %11301 = vmatprep.subr.bf16.mxu1 %v11300_v50  ;;  %v4737_v50 = vld [vmem:[%s16260_s11 + $0x1b8] sm:$0xff] }
 0xbb1   :  { %v11340_v13 = vpack.c.bf16 %v4737_v50, %v4735_v34 }
 0xbb2   :  { %4894 = vmatmul.mubr.f32.gmra.mrb[152].mxu1 %v4496_v20  ;;  %v11310_v20 = vpack.c.bf16 %v4704_v53, %v4702_v46  ;;  %v11346_v46 = vpack.c.bf16 %v4740_v8, %v4738_v57  ;;  %v8290_v8 = vld [vmem:[%s16260_s11 + $0x4c0] sm:$0xff] }
 0xbb3   :  { %11303 = vmatpush1.bf16.msra.mxu1 %v11302_v41  ;;  %v4739_v41 = vld [vmem:[%s16260_s11 + $0x1c8] sm:$0xff] }
 0xbb4   :  { %11305 = vmatprep.subr.bf16.mxu1 %v11304_v43  ;;  %v4741_v43 = vld [vmem:[%s16260_s11 + $0x1d8] sm:$0xff] }
 0xbb5   :  { %v11344_v1 = vpack.c.bf16 %v4741_v43, %v4739_v41  ;;  %v8291_v41 = vld [vmem:[%s16260_s11 + $0x4c8] sm:$0xff]  ;;  %v8293_v43 = vld [vmem:[%s16260_s11 + $0x4d8] sm:$0xff] }
 0xbb6   :  { %v11376_v57 = vpack.c.bf16 %v8293_v43, %v8291_v41  ;;  %v8322_v43 = vld [vmem:[%s16260_s11 + $0x5c0] sm:$0xff] }
 0xbb7   :  { %11307 = vmatpush1.bf16.msra.mxu1 %v11306_v2  ;;  %v4743_v2 = vld [vmem:[%s16260_s11 + $0x1e8] sm:$0xff] }
 0xbb8   :  { %11309 = vmatprep.subr.bf16.mxu1 %v11308_v61  ;;  %v4745_v61 = vld [vmem:[%s16260_s11 + $0x1f8] sm:$0xff] }
 0xbb9   :  { %v11348_v53 = vpack.c.bf16 %v4745_v61, %v4743_v2  ;;  %v8292_v2 = vld [vmem:[%s16260_s11 + $0x4d0] sm:$0xff] }
 0xbba   :  { %v11378_v26 = vpack.c.bf16 %v8292_v2, %v8290_v8  ;;  %v8329_v8 = vld [vmem:[%s16260_s11 + $0x5f8] sm:$0xff] }
 0xbbb   :  { %11311 = vmatpush1.bf16.msra.mxu1 %v11310_v20  ;;  %v8267_v20 = vld [vmem:[%s16260_s11 + $0x408] sm:$0xff] }
 0xbbc   :  { %11313 = vmatprep.subr.bf16.mxu1 %v11312_v33  ;;  %v8269_v33 = vld [vmem:[%s16260_s11 + $0x418] sm:$0xff] }
 0xbbd   :  { %v11352_v54 = vpack.c.bf16 %v8269_v33, %v8267_v20  ;;  %v8294_v33 = vld [vmem:[%s16260_s11 + $0x4e0] sm:$0xff] }
 0xbbf   :  { %11315 = vmatpush1.bf16.msra.mxu1 %v11314_v52  ;;  %v8271_v52 = vld [vmem:[%s16260_s11 + $0x428] sm:$0xff] }
 0xbc0   :  { %11317 = vmatprep.subr.bf16.mxu1 %v11316_v27  ;;  %v8273_v27 = vld [vmem:[%s16260_s11 + $0x438] sm:$0xff] }
 0xbc1   :  { %v11356_v15 = vpack.c.bf16 %v8273_v27, %v8271_v52 }
 0xbc3   :  { %11319 = vmatpush1.bf16.msra.mxu1 %v11318_v24  ;;  %v8270_v24 = vld [vmem:[%s16260_s11 + $0x420] sm:$0xff] }
 0xbc4   :  { %11321 = vmatprep.subr.bf16.mxu1 %v11320_v58  ;;  %v8272_v58 = vld [vmem:[%s16260_s11 + $0x430] sm:$0xff] }
 0xbc5   :  { %v11358_v16 = vpack.c.bf16 %v8272_v58, %v8270_v24  ;;  %v8303_v24 = vld [vmem:[%s16260_s11 + $0x528] sm:$0xff]  ;;  %v8305_v58 = vld [vmem:[%s16260_s11 + $0x538] sm:$0xff] }
 0xbc7   :  { %11323 = vmatpush1.bf16.msra.mxu1 %v11322_v23  ;;  %v11360_v23 = vpack.c.bf16 %v8277_v30, %v8275_v0  ;;  %v11388_v30 = vpack.c.bf16 %v8305_v58, %v8303_v24  ;;  %v8412_v58 = vld [vmem:[%s16262_s13 + $0x310] sm:$0xff] }
 0xbc8   :  { %11325 = vmatprep.subr.bf16.mxu1 %v11324_v5  ;;  %v8274_v5 = vld [vmem:[%s16260_s11 + $0x440] sm:$0xff] }
 0xbcb   :  { %11327 = vmatpush1.bf16.msra.mxu1 %v11326_v21  ;;  %v11362_v21 = vpack.c.bf16 %v8276_v48, %v8274_v5  ;;  %v8309_v5 = vld [vmem:[%s16260_s11 + $0x558] sm:$0xff] }
 0xbcc   :  { %11329 = vmatprep.subr.bf16.mxu1 %v11328_v55 }
 0xbcf   :  { %11331 = vmatpush1.bf16.msra.mxu1 %v11330_v56  ;;  %v8283_v56 = vld [vmem:[%s16260_s11 + $0x488] sm:$0xff] }
 0xbd0   :  { %11333 = vmatprep.subr.bf16.mxu1 %v11332_v29  ;;  %v8285_v29 = vld [vmem:[%s16260_s11 + $0x498] sm:$0xff] }
 0xbd1   :  { %v11368_v17 = vpack.c.bf16 %v8285_v29, %v8283_v56  ;;  %v8315_v56 = vld [vmem:[%s16260_s11 + $0x588] sm:$0xff]  ;;  %v8317_v29 = vld [vmem:[%s16260_s11 + $0x598] sm:$0xff] }
 0xbd3   :  { %11335 = vmatpush1.bf16.msra.mxu1 %v11334_v36  ;;  %v8284_v36 = vld [vmem:[%s16260_s11 + $0x490] sm:$0xff] }
 0xbd4   :  { %11337 = vmatprep.subr.bf16.mxu1 %v11336_v51  ;;  %v11370_v34 = vpack.c.bf16 %v8284_v36, %v8282_v4  ;;  %v8316_v4 = vld [vmem:[%s16260_s11 + $0x590] sm:$0xff]  ;;  %v8319_v36 = vld [vmem:[%s16260_s11 + $0x5a8] sm:$0xff] }
 0xbd7   :  { %11339 = vmatpush1.bf16.msra.mxu1 %v11338_v37  ;;  %v11372_v37 = vpack.c.bf16 %v8289_v44, %v8287_v38 }
 0xbd8   :  { %11341 = vmatprep.subr.bf16.mxu1 %v11340_v13  ;;  %v8286_v13 = vld [vmem:[%s16260_s11 + $0x4a0] sm:$0xff] }
 0xbdb   :  { %11343 = vmatpush1.bf16.msra.mxu1 %v11342_v12  ;;  %v11374_v12 = vpack.c.bf16 %v8288_v49, %v8286_v13  ;;  %v8323_v13 = vld [vmem:[%s16260_s11 + $0x5c8] sm:$0xff]  ;;  %v8325_v49 = vld [vmem:[%s16260_s11 + $0x5d8] sm:$0xff] }
 0xbdc   :  { %11345 = vmatprep.subr.bf16.mxu1 %v11344_v1  ;;  %v11408_v41 = vpack.c.bf16 %v8325_v49, %v8323_v13  ;;  %v8424_v13 = vld [vmem:[%s16262_s13 + $0x370] sm:$0xff]  ;;  %v8425_v49 = vld [vmem:[%s16262_s13 + $0x378] sm:$0xff] }
 0xbdf   :  { %11347 = vmatpush1.bf16.msra.mxu1 %v11346_v46  ;;  %v8295_v46 = vld [vmem:[%s16260_s11 + $0x4e8] sm:$0xff] }
 0xbe0   :  { %11349 = vmatprep.subr.bf16.mxu1 %v11348_v53  ;;  %v8297_v53 = vld [vmem:[%s16260_s11 + $0x4f8] sm:$0xff] }
 0xbe1   :  { %v11380_v20 = vpack.c.bf16 %v8297_v53, %v8295_v46  ;;  %v8326_v53 = vld [vmem:[%s16260_s11 + $0x5e0] sm:$0xff] }
 0xbe3   :  { %11351 = vmatpush1.bf16.msra.mxu1 %v11350_v47  ;;  %v8296_v47 = vld [vmem:[%s16260_s11 + $0x4f0] sm:$0xff] }
 0xbe4   :  { %11353 = vmatprep.subr.bf16.mxu1 %v11352_v54  ;;  %v11382_v52 = vpack.c.bf16 %v8296_v47, %v8294_v33  ;;  %v8427_v33 = vld [vmem:[%s16262_s13 + $0x388] sm:$0xff] }
 0xc29   :  { %v4570_v7 = vpop.f32.mrb[130].mxu1 }
 0xc2a   :  { %v4572_v59 = vpop.f32.mrb[131].mxu1 }
 0xc2b   :  { %4964 = vmatprep.mubr.f32.mxu1 %v4572_v59  ;;  %v8300_v59 = vld [vmem:[%s16260_s11 + $0x510] sm:$0xff] }
 0xc2c   :  { %4965 = vmatmul.mubr.f32.vlgmr.msra.gmra.mrb[146].mxu1 %v4570_v7  ;;  %v11384_v7 = vpack.c.bf16 %v8301_v60, %v8299_v18  ;;  %v8410_v60 = vld [vmem:[%s16262_s13 + $0x300] sm:$0xff] }
 0xc2d   :  { %11355 = vmatpush1.bf16.msra.mxu1 %v11354_v22  ;;  %v4576_v45 = vpop.f32.mrb[132].mxu1  ;;  %v8298_v22 = vld [vmem:[%s16260_s11 + $0x500] sm:$0xff] }
 0xc2e   :  { %11357 = vmatprep.subr.bf16.mxu1 %v11356_v15  ;;  %v4578_v3 = vpop.f32.mrb[133].mxu1  ;;  %v11386_v0 = vpack.c.bf16 %v8300_v59, %v8298_v22  ;;  %v8429_v22 = vld [vmem:[%s16262_s13 + $0x398] sm:$0xff] }
 0xc2f   :  { %4970 = vmatprep.mubr.f32.mxu1 %v4578_v3 }
 0xc30   :  { %4971 = vmatmul.mubr.f32.gmra.mrb[148].mxu1 %v4576_v45  ;;  %v8304_v45 = vld [vmem:[%s16260_s11 + $0x530] sm:$0xff] }
 0xc31   :  { %11359 = vmatpush1.bf16.msra.mxu1 %v11358_v16  ;;  %v4582_v55 = vpop.f32.mrb[134].mxu1  ;;  %v8302_v16 = vld [vmem:[%s16260_s11 + $0x520] sm:$0xff] }
 0xc32   :  { %11361 = vmatprep.subr.bf16.mxu1 %v11360_v23  ;;  %v4584_v19 = vpop.f32.mrb[135].mxu1  ;;  %v8307_v23 = vld [vmem:[%s16260_s11 + $0x548] sm:$0xff]  ;;  %v11390_v48 = vpack.c.bf16 %v8304_v45, %v8302_v16 }
 0xc33   :  { %4976 = vmatprep.mubr.f32.mxu1 %v4584_v19  ;;  %v11392_v3 = vpack.c.bf16 %v8309_v5, %v8307_v23  ;;  %v8312_v19 = vld [vmem:[%s16260_s11 + $0x570] sm:$0xff]  ;;  %v8431_v16 = vld [vmem:[%s16262_s13 + $0x3a8] sm:$0xff]  ;;  %v8414_v5 = vld [vmem:[%s16262_s13 + $0x320] sm:$0xff] }
 0xc34   :  { %4977 = vmatmul.mubr.f32.gmra.mrb[150].mxu1 %v4582_v55  ;;  %v8313_v55 = vld [vmem:[%s16260_s11 + $0x578] sm:$0xff] }
 0xc35   :  { %11363 = vmatpush1.bf16.msra.mxu1 %v11362_v21  ;;  %v4588_v40 = vpop.f32.mrb[136].mxu1  ;;  %v8311_v21 = vld [vmem:[%s16260_s11 + $0x568] sm:$0xff] }
 0xc36   :  { %11365 = vmatprep.subr.bf16.mxu1 %v11364_v28  ;;  %v4590_v51 = vpop.f32.mrb[137].mxu1  ;;  %v11394_v28 = vpack.c.bf16 %v8308_v35, %v8306_v32  ;;  %v11396_v11 = vpack.c.bf16 %v8313_v55, %v8311_v21  ;;  %v8416_v35 = vld [vmem:[%s16262_s13 + $0x330] sm:$0xff]  ;;  %v8417_v21 = vld [vmem:[%s16262_s13 + $0x338] sm:$0xff]  ;;  %v8434_v55 = vld [vmem:[%s16262_s13 + $0x3c0] sm:$0xff] }
 0xc37   :  { %4982 = vmatprep.mubr.f32.mxu1 %v4590_v51  ;;  %v8321_v51 = vld [vmem:[%s16260_s11 + $0x5b8] sm:$0xff] }
 0xc38   :  { %4983 = vmatmul.mubr.f32.gmra.mrb[152].mxu1 %v4588_v40  ;;  %v11400_v40 = vpack.c.bf16 %v8317_v29, %v8315_v56  ;;  %v11404_v44 = vpack.c.bf16 %v8321_v51, %v8319_v36  ;;  %v8420_v29 = vld [vmem:[%s16262_s13 + $0x350] sm:$0xff]  ;;  %v8422_v36 = vld [vmem:[%s16262_s13 + $0x360] sm:$0xff]  ;;  %v8423_v51 = vld [vmem:[%s16262_s13 + $0x368] sm:$0xff] }
 0xc39   :  { %11367 = vmatpush1.bf16.msra.mxu1 %v11366_v62  ;;  %v14523_v50 = vpop.f32.mrb[138].mxu1  ;;  %v11398_v62 = vpack.c.bf16 %v8312_v19, %v8310_v6  ;;  %v8419_v6 = vld [vmem:[%s16262_s13 + $0x348] sm:$0xff] }
 0xc3a   :  { %11369 = vmatprep.subr.bf16.mxu1 %v11368_v17  ;;  %v4661_v14 = vpop.f32.mrb[139].mxu1  ;;  %v8314_v17 = vld [vmem:[%s16260_s11 + $0x580] sm:$0xff] }
 0xc3b   :  { %5118 = vmatprep.mubr.f32.mxu1 %v4661_v14  ;;  %v11402_v38 = vpack.c.bf16 %v8316_v4, %v8314_v17  ;;  %v8439_v17 = vld [vmem:[%s16262_s13 + $0x3e8] sm:$0xff] }
 0xc3d   :  { %11371 = vmatpush1.bf16.msra.mxu1 %v11370_v34  ;;  %v14537_v1 = vpop.f32.mrb[140].mxu1  ;;  %v8318_v34 = vld [vmem:[%s16260_s11 + $0x5a0] sm:$0xff] }
 0xc3e   :  { %11373 = vmatprep.subr.bf16.mxu1 %v11372_v37  ;;  %v14545_v61 = vpop.f32.mrb[141].mxu1  ;;  %v8320_v37 = vld [vmem:[%s16260_s11 + $0x5b0] sm:$0xff] }
 0xc3f   :  { %v11406_v14 = vpack.c.bf16 %v8320_v37, %v8318_v34  ;;  %v8441_v34 = vld [vmem:[%s16262_s13 + $0x3f8] sm:$0xff] }
 0xc41   :  { %11375 = vmatpush1.bf16.msra.mxu1 %v11374_v12  ;;  %v14553_v31 = vpop.f32.mrb[142].mxu1  ;;  %v8324_v12 = vld [vmem:[%s16260_s11 + $0x5d0] sm:$0xff] }
 0xc42   :  { %11377 = vmatprep.subr.bf16.mxu1 %v11376_v57  ;;  %v14561_v54 = vpop.f32.mrb[143].mxu1  ;;  %v8327_v57 = vld [vmem:[%s16260_s11 + $0x5e8] sm:$0xff]  ;;  %v11410_v2 = vpack.c.bf16 %v8324_v12, %v8322_v43 }
 0xc43   :  { %v11412_v46 = vpack.c.bf16 %v8329_v8, %v8327_v57 }
 0xc45   :  { %11379 = vmatpush1.bf16.msra.mxu1 %v11378_v26  ;;  %v14569_v27 = vpop.f32.mrb[144].mxu1  ;;  %v8328_v26 = vld [vmem:[%s16260_s11 + $0x5f0] sm:$0xff] }
 0xc46   :  { %11381 = vmatprep.subr.bf16.mxu1 %v11380_v20  ;;  %v14577_v15 = vpop.f32.mrb[145].mxu1  ;;  %v8426_v20 = vld [vmem:[%s16262_s13 + $0x380] sm:$0xff]  ;;  %v11414_v47 = vpack.c.bf16 %v8328_v26, %v8326_v53 }
 0xc47   :  { %v11552_v18 = vpack.c.bf16 %v8427_v33, %v8426_v20 }
 0xc49   :  { %11383 = vmatpush1.bf16.msra.mxu1 %v11382_v52  ;;  %v8411_v52 = vld [vmem:[%s16262_s13 + $0x308] sm:$0xff] }
 0xc4a   :  { %11385 = vmatprep.subr.bf16.mxu1 %v11384_v7  ;;  %v8428_v7 = vld [vmem:[%s16262_s13 + $0x390] sm:$0xff]  ;;  %v11554_v59 = vpack.c.bf16 %v8411_v52, %v8410_v60 }
 0xc4b   :  { %v11556_v24 = vpack.c.bf16 %v8429_v22, %v8428_v7 }
 0xc4d   :  { %11387 = vmatpush1.bf16.msra.mxu1 %v11386_v0  ;;  %v8413_v0 = vld [vmem:[%s16262_s13 + $0x318] sm:$0xff] }
 0xc4e   :  { %11389 = vmatprep.subr.bf16.mxu1 %v11388_v30  ;;  %v8430_v30 = vld [vmem:[%s16262_s13 + $0x3a0] sm:$0xff]  ;;  %v11558_v45 = vpack.c.bf16 %v8413_v0, %v8412_v58 }
 0xc4f   :  { %v11560_v23 = vpack.c.bf16 %v8431_v16, %v8430_v30 }
 0xc51   :  { %11391 = vmatpush1.bf16.msra.mxu1 %v11390_v48  ;;  %v8415_v48 = vld [vmem:[%s16262_s13 + $0x328] sm:$0xff] }
 0xc52   :  { %11393 = vmatprep.subr.bf16.mxu1 %v11392_v3  ;;  %v8432_v3 = vld [vmem:[%s16262_s13 + $0x3b0] sm:$0xff] }
 0xc55   :  { %11395 = vmatpush1.bf16.msra.mxu1 %v11394_v28 }
 0xc56   :  { %11397 = vmatprep.subr.bf16.mxu1 %v11396_v11  ;;  %v8418_v11 = vld [vmem:[%s16262_s13 + $0x340] sm:$0xff] }
 0xc57   :  { %v11570_v19 = vpack.c.bf16 %v8419_v6, %v8418_v11  ;;  %v8357_v11 = vld [vmem:[%s16262_s13 + $0x198] sm:$0xff] }
 0xc59   :  { %11399 = vmatpush1.bf16.msra.mxu1 %v11398_v62 }
 0xc5a   :  { %11401 = vmatprep.subr.bf16.mxu1 %v11400_v40  ;;  %v8438_v40 = vld [vmem:[%s16262_s13 + $0x3e0] sm:$0xff] }
 0xc5b   :  { %v11576_v4 = vpack.c.bf16 %v8439_v17, %v8438_v40  ;;  %v8342_v17 = vld [vmem:[%s16262_s13 + $0x120] sm:$0xff] }
 0xc5d   :  { %11403 = vmatpush1.bf16.msra.mxu1 %v11402_v38  ;;  %v11578_v38 = vpack.c.bf16 %v8423_v51, %v8422_v36  ;;  %v8360_v36 = vld [vmem:[%s16262_s13 + $0x1b0] sm:$0xff]  ;;  %v8361_v51 = vld [vmem:[%s16262_s13 + $0x1b8] sm:$0xff] }
 0xc5e   :  { %11405 = vmatprep.subr.bf16.mxu1 %v11404_v44  ;;  %v8440_v44 = vld [vmem:[%s16262_s13 + $0x3f0] sm:$0xff] }
 0xc5f   :  { %v11580_v37 = vpack.c.bf16 %v8441_v34, %v8440_v44  ;;  %v11448_v44 = vpack.c.bf16 %v8361_v51, %v8360_v36  ;;  %v8344_v34 = vld [vmem:[%s16262_s13 + $0x130] sm:$0xff]  ;;  %v5270_v51 = vld [vmem:[%s16262_s13 + $0x38] sm:$0xff] }
 0xc60   :  { %v5269_v36 = vld [vmem:[%s16262_s13 + $0x30] sm:$0xff] }
 0xc61   :  { %11407 = vmatpush1.bf16.msra.mxu1 %v11406_v14  ;;  %v11582_v14 = vpack.c.bf16 %v8425_v49, %v8424_v13  ;;  %v8362_v13 = vld [vmem:[%s16262_s13 + $0x1c0] sm:$0xff]  ;;  %v8363_v49 = vld [vmem:[%s16262_s13 + $0x1c8] sm:$0xff] }
 0xc62   :  { %11409 = vmatprep.subr.bf16.mxu1 %v11408_v41  ;;  %v5151_v41 = vld [vmem:[%s16261_s12] sm:$0x3] }
 0xc63   :  { %v5156_v43 = vrot.slane %v5151_v41, %v4474_v25  ;;  %v5160_v57 = vrot.slane %v5151_v41, %v4478_v42  ;;  %v11452_v41 = vpack.c.bf16 %v8363_v49, %v8362_v13  ;;  %v5271_v13 = vld [vmem:[%s16262_s13 + $0x40] sm:$0xff]  ;;  %v5272_v49 = vld [vmem:[%s16262_s13 + $0x48] sm:$0xff] }
 0xc65   :  { %11411 = vmatpush1.bf16.msra.mxu1 %v11410_v2 }
 0xc66   :  { %11413 = vmatprep.subr.bf16.mxu1 %v11412_v46 }
 0xc69   :  { %11415 = vmatpush1.bf16.msra.mxu1 %v11414_v47 }
 0xc6a   :  { %11553 = vmatprep.subr.bf16.mxu1 %v11552_v18 }
 0xc6c   :  { %5119 = vmatmul.mubr.f32.vlgmr.msra.gmra.mrb[146].mxu1 %v14523_v50  ;;  %v8433_v50 = vld [vmem:[%s16262_s13 + $0x3b8] sm:$0xff] }
 0xc6d   :  { %5124 = vmatprep.mubr.f32.mxu1 %v14545_v61  ;;  %11555 = vmatpush3.bf16.msra.mxu1 %v11554_v59  ;;  %v11562_v61 = vpack.c.bf16 %v8415_v48, %v8414_v5  ;;  %v11564_v32 = vpack.c.bf16 %v8433_v50, %v8432_v3 }
 0xc6e   :  { %11557 = vmatprep.subr.bf16.mxu1 %v11556_v24 }
 0xc70   :  { %5125 = vmatmul.mubr.f32.gmra.mrb[148].mxu1 %v14537_v1  ;;  %v8435_v1 = vld [vmem:[%s16262_s13 + $0x3c8] sm:$0xff] }
 0xc71   :  { %5130 = vmatprep.mubr.f32.mxu1 %v14561_v54  ;;  %11559 = vmatpush3.bf16.msra.mxu1 %v11558_v45  ;;  %v11566_v54 = vpack.c.bf16 %v8417_v21, %v8416_v35  ;;  %v11568_v28 = vpack.c.bf16 %v8435_v1, %v8434_v55  ;;  %v14781_v45 = vmul.u32 14, %v12240_v9  ;;  %v8354_v35 = vld [vmem:[%s16262_s13 + $0x180] sm:$0xff]  ;;  %v8355_v21 = vld [vmem:[%s16262_s13 + $0x188] sm:$0xff] }
 0xc72   :  { %11561 = vmatprep.subr.bf16.mxu1 %v11560_v23  ;;  %v11436_v55 = vpack.c.bf16 %v8355_v21, %v8354_v35  ;;  %v8338_v1 = vld [vmem:[%s16262_s13 + $0x100] sm:$0xff]  ;;  %v5281_v35 = vld [vmem:[%s16262_s13 + $0x90] sm:$0xff]  ;;  %v5282_v21 = vld [vmem:[%s16262_s13 + $0x98] sm:$0xff] }
 0xc73   :  { %vm5180_vm5 = vcmp.eq.s32.totalorder %v12242_v10, %v14781_v45 }
 0xc74   :  { %5131 = vmatmul.mubr.f32.gmra.mrb[150].mxu1 %v14553_v31  ;;  %v8436_v31 = vld [vmem:[%s16262_s13 + $0x3d0] sm:$0xff]  ;;  %v8330_v9 = vsel %vm5180_vm5, 1.0, %v16295_v39 }
 0xc75   :  { %5136 = vmatprep.mubr.f32.mxu1 %v14577_v15  ;;  %11563 = vmatpush3.bf16.msra.mxu1 %v11562_v61  ;;  %v8437_v15 = vld [vmem:[%s16262_s13 + $0x3d8] sm:$0xff] }
 0xc76   :  { %11565 = vmatprep.subr.bf16.mxu1 %v11564_v32  ;;  %v11572_v56 = vpack.c.bf16 %v8437_v15, %v8436_v31  ;;  %v5295_v32 = vadd.s32 1, %v14781_v45  ;;  %v8340_v15 = vld [vmem:[%s16262_s13 + $0x110] sm:$0xff] }
 0xc78   :  { %5137 = vmatmul.mubr.f32.gmra.mrb[152].mxu1 %v14569_v27  ;;  %v8421_v27 = vld [vmem:[%s16262_s13 + $0x358] sm:$0xff]  ;;  %vm5296_vm13 = vcmp.eq.s32.totalorder %v12242_v10, %v5295_v32  ;;  %v5264_v32 = vld [vmem:[%s16262_s13 + $0x8] sm:$0xff] }
 0xc79   :  { %11567 = vmatpush3.bf16.msra.mxu1 %v11566_v54  ;;  %v11574_v62 = vpack.c.bf16 %v8421_v27, %v8420_v29  ;;  %v8339_v54 = vld [vmem:[%s16262_s13 + $0x108] sm:$0xff]  ;;  %v8334_v6 = vsel %vm5296_vm13, 1.0, %v16295_v39  ;;  %v8358_v29 = vld [vmem:[%s16262_s13 + $0x1a0] sm:$0xff] }
 0xc7a   :  { %11569 = vmatprep.subr.bf16.mxu1 %v11568_v28  ;;  %v8356_v28 = vld [vmem:[%s16262_s13 + $0x190] sm:$0xff]  ;;  %v8359_v27 = vld [vmem:[%s16262_s13 + $0x1a8] sm:$0xff] }
 0xc7b   :  { %v11440_v31 = vpack.c.bf16 %v8357_v11, %v8356_v28  ;;  %v11444_v40 = vpack.c.bf16 %v8359_v27, %v8358_v29  ;;  %v11472_v28 = vpack.c.bf16 %v5282_v21, %v5281_v35  ;;  %v5265_v11 = vld [vmem:[%s16262_s13 + $0x10] sm:$0xff]  ;;  %v5267_v29 = vld [vmem:[%s16262_s13 + $0x20] sm:$0xff]  ;;  %v5268_v27 = vld [vmem:[%s16262_s13 + $0x28] sm:$0xff] }
 0xc7c   :  { %v8376_v35 = vld [vmem:[%s16262_s13 + $0x210] sm:$0xff]  ;;  %v8377_v21 = vld [vmem:[%s16262_s13 + $0x218] sm:$0xff] }
 0xc7d   :  { %11571 = vmatpush3.bf16.msra.mxu1 %v11570_v19  ;;  %v11438_v19 = vpack.c.bf16 %v8339_v54, %v8338_v1 }
 0xc7e   :  { %11573 = vmatprep.subr.bf16.mxu1 %v11572_v56  ;;  %v8341_v56 = vld [vmem:[%s16262_s13 + $0x118] sm:$0xff] }
 0xc81   :  { %11575 = vmatpush3.bf16.msra.mxu1 %v11574_v62  ;;  %v11442_v62 = vpack.c.bf16 %v8341_v56, %v8340_v15 }
 0xc82   :  { %11577 = vmatprep.subr.bf16.mxu1 %v11576_v4  ;;  %v8343_v4 = vld [vmem:[%s16262_s13 + $0x128] sm:$0xff] }
 0xc85   :  { %11579 = vmatpush3.bf16.msra.mxu1 %v11578_v38  ;;  %v11446_v38 = vpack.c.bf16 %v8343_v4, %v8342_v17  ;;  %v11478_v17 = vpack.c.bf16 %v5268_v27, %v5267_v29  ;;  %v8380_v29 = vld [vmem:[%s16262_s13 + $0x230] sm:$0xff]  ;;  %v8381_v27 = vld [vmem:[%s16262_s13 + $0x238] sm:$0xff] }
 0xc86   :  { %11581 = vmatprep.subr.bf16.mxu1 %v11580_v37  ;;  %v8345_v37 = vld [vmem:[%s16262_s13 + $0x138] sm:$0xff] }
 0xc89   :  { %11583 = vmatpush3.bf16.msra.mxu1 %v11582_v14  ;;  %v11450_v14 = vpack.c.bf16 %v8345_v37, %v8344_v34  ;;  %v11482_v34 = vpack.c.bf16 %v5270_v51, %v5269_v36  ;;  %v8382_v36 = vld [vmem:[%s16262_s13 + $0x240] sm:$0xff]  ;;  %v8383_v51 = vld [vmem:[%s16262_s13 + $0x248] sm:$0xff] }
 0xd3f   :  { %v5120_v12 = vpop.f32.mrb[146].mxu1 }
 0xd40   :  { %v5122_v8 = vpop.f32.mrb[147].mxu1  ;;  %v5163_v2 = vadd.f32 %v5156_v43, %v5120_v12  ;;  %v8347_v12 = vld [vmem:[%s16262_s13 + $0x148] sm:$0xff] }
 0xd41   :  { %v5164_v46 = vadd.f32 %v5160_v57, %v5122_v8  ;;  %v8365_v8 = vld [vmem:[%s16262_s13 + $0x1d8] sm:$0xff] }
 0xd42   :  { %v5171_v47 = vmax.f32 %v5163_v2, 0.0 }
 0xd43   :  { %v5126_v53 = vpop.f32.mrb[148].mxu1  ;;  %v5172_v60 = vmax.f32 %v5164_v46, 0.0 }
 0xd44   :  { %v5165_v26 = vadd.f32 %v5156_v43, %v5126_v53  ;;  %v5128_v20 = vpop.f32.mrb[149].mxu1  ;;  %v8348_v53 = vld [vmem:[%s16262_s13 + $0x150] sm:$0xff] }
 0xd45   :  { %v5166_v33 = vadd.f32 %v5160_v57, %v5128_v20  ;;  %v8366_v20 = vld [vmem:[%s16262_s13 + $0x1e0] sm:$0xff] }
 0xd46   :  { %v5173_v18 = vmax.f32 %v5165_v26, 0.0  ;;  %v8349_v26 = vld [vmem:[%s16262_s13 + $0x158] sm:$0xff] }
 0xd47   :  { %v5174_v52 = vmax.f32 %v5166_v33, 0.0  ;;  %v5132_v7 = vpop.f32.mrb[150].mxu1  ;;  %v8367_v33 = vld [vmem:[%s16262_s13 + $0x1e8] sm:$0xff] }
 0xd48   :  { %v14773_v22 = vpack.c.bf16 %v5173_v18, %v5171_v47  ;;  %v5134_v59 = vpop.f32.mrb[151].mxu1  ;;  %v5167_v24 = vadd.f32 %v5156_v43, %v5132_v7  ;;  %v11458_v47 = vpack.c.bf16 %v8349_v26, %v8348_v53  ;;  %v11460_v18 = vpack.c.bf16 %v8367_v33, %v8366_v20  ;;  %v5275_v20 = vld [vmem:[%s16262_s13 + $0x60] sm:$0xff]  ;;  %v5276_v33 = vld [vmem:[%s16262_s13 + $0x68] sm:$0xff] }
 0xd49   :  { %v14775_v25 = vpack.c.bf16 %v5174_v52, %v5172_v60  ;;  %v5168_v58 = vadd.f32 %v5160_v57, %v5134_v59  ;;  %v8350_v60 = vld [vmem:[%s16262_s13 + $0x160] sm:$0xff]  ;;  %v8351_v52 = vld [vmem:[%s16262_s13 + $0x168] sm:$0xff]  ;;  %v8368_v59 = vld [vmem:[%s16262_s13 + $0x1f0] sm:$0xff] }
 0xd4a   :  { %v5175_v23 = vmax.f32 %v5167_v24, 0.0  ;;  %v11462_v7 = vpack.c.bf16 %v8351_v52, %v8350_v60  ;;  %v8369_v24 = vld [vmem:[%s16262_s13 + $0x1f8] sm:$0xff]  ;;  %v11494_v60 = vpack.c.bf16 %v5276_v33, %v5275_v20  ;;  %v8388_v20 = vld [vmem:[%s16262_s13 + $0x270] sm:$0xff] }
 0xd4b   :  { %v5138_v42 = vpop.f32.mrb[152].mxu1  ;;  %11417 = vmatprep.subr.bf16.mxu0 %v14775_v25  ;;  %11627 = vmatprep.subr.bf16.mxu1 %v14775_v25  ;;  %v5176_v48 = vmax.f32 %v5168_v58, 0.0  ;;  %v11464_v58 = vpack.c.bf16 %v8369_v24, %v8368_v59  ;;  %v5278_v59 = vld [vmem:[%s16262_s13 + $0x78] sm:$0xff] }
 0xd4c   :  { %v5169_v0 = vadd.f32 %v5156_v43, %v5138_v42  ;;  %v5140_v30 = vpop.f32.mrb[153].mxu1  ;;  %11419 = vmatpush1.bf16.msra.mxu0 %v14773_v22  ;;  %v8346_v43 = vld [vmem:[%s16262_s13 + $0x140] sm:$0xff]  ;;  %v8352_v42 = vld [vmem:[%s16262_s13 + $0x170] sm:$0xff]  ;;  %v8389_v33 = vld [vmem:[%s16262_s13 + $0x278] sm:$0xff] }
 0xd4d   :  { %v5170_v16 = vadd.f32 %v5160_v57, %v5140_v30  ;;  %v8364_v57 = vld [vmem:[%s16262_s13 + $0x1d0] sm:$0xff]  ;;  %v11454_v2 = vpack.c.bf16 %v8347_v12, %v8346_v43  ;;  %v11486_v43 = vpack.c.bf16 %v5272_v49, %v5271_v13  ;;  %v8385_v49 = vld [vmem:[%s16262_s13 + $0x258] sm:$0xff] }
 0xd4e   :  { %v5177_v5 = vmax.f32 %v5169_v0, 0.0  ;;  %v11456_v46 = vpack.c.bf16 %v8365_v8, %v8364_v57  ;;  %v8353_v0 = vld [vmem:[%s16262_s13 + $0x178] sm:$0xff]  ;;  %v5273_v57 = vld [vmem:[%s16262_s13 + $0x50] sm:$0xff] }
 0xd4f   :  { %v5178_v3 = vmax.f32 %v5170_v16, 0.0  ;;  %v11466_v30 = vpack.c.bf16 %v8353_v0, %v8352_v42  ;;  %v5279_v16 = vld [vmem:[%s16262_s13 + $0x80] sm:$0xff]  ;;  %v5274_v8 = vld [vmem:[%s16262_s13 + $0x58] sm:$0xff]  ;;  %v8391_v0 = vld [vmem:[%s16262_s13 + $0x288] sm:$0xff] }
 0xd50   :  { %v14783_v50 = vpack.c.bf16 %v5177_v5, %v5175_v23  ;;  %v5280_v23 = vld [vmem:[%s16262_s13 + $0x88] sm:$0xff]  ;;  %v11490_v53 = vpack.c.bf16 %v5274_v8, %v5273_v57  ;;  %v8390_v42 = vld [vmem:[%s16262_s13 + $0x280] sm:$0xff]  ;;  %v8384_v13 = vld [vmem:[%s16262_s13 + $0x250] sm:$0xff] }
 0xd51   :  { %v14785_v61 = vpack.c.bf16 %v5178_v3, %v5176_v48  ;;  %v11468_v5 = vpack.c.bf16 %v5280_v23, %v5279_v16  ;;  %v8374_v16 = vld [vmem:[%s16262_s13 + $0x200] sm:$0xff]  ;;  %v8375_v23 = vld [vmem:[%s16262_s13 + $0x208] sm:$0xff] }
 0xd52   :  { %v8386_v57 = vld [vmem:[%s16262_s13 + $0x260] sm:$0xff]  ;;  %v8387_v8 = vld [vmem:[%s16262_s13 + $0x268] sm:$0xff] }
 0xd53   :  { %11422 = vmatprep.subr.msk.bf16.mxu0 %vm13631_vm2, %v14785_v61 }
 0xd54   :  { %11425 = vmatpush1.bf16.msk.msra.mxu0 %vm13631_vm2, %v14783_v50 }
 0xd55   :  { %11427 = vmatprep.subr.bf16.mxu0 %v14775_v25 }
 0xd57   :  { %8333 = vmatmul.mubr.msk.f32.vlgmr.msra.gmra.mrb[146].mxu0 %vm3899_vm8, %v8330_v9  ;;  %v5263_v9 = vld [vmem:[%s16262_s13] sm:$0xff] }
 0xd58   :  { %11429 = vmatpush1.bf16.msra.mxu0 %v14773_v22  ;;  %5366 = vmatprep.mubr.f32.mxu0 %v16295_v39  ;;  %v11470_v1 = vpack.c.bf16 %v5264_v32, %v5263_v9  ;;  %v11512_v9 = vpack.c.bf16 %v8375_v23, %v8374_v16  ;;  %v5910_v23 = vadd.s32 4, %v14781_v45 }
 0xd59   :  { %11432 = vmatprep.subr.msk.bf16.mxu0 %vm13631_vm2, %v14785_v61 }
 0xd5a   :  { %vm5911_vm0 = vcmp.eq.s32.totalorder %v12242_v10, %v5910_v23 }
 0xd5c   :  { %11435 = vmatpush1.bf16.msk.msra.mxu0 %vm13631_vm2, %v14783_v50 }
 0xd5d   :  { %11437 = vmatprep.subr.bf16.mxu0 %v11436_v55 }
 0xd5f   :  { %8337 = vmatmul.mubr.msk.f32.vlgmr.msra.gmra.mrb[148].mxu0 %vm3899_vm8, %v8334_v6  ;;  %v5266_v6 = vld [vmem:[%s16262_s13 + $0x18] sm:$0xff] }
 0xd60   :  { %11439 = vmatpush3.bf16.msra.mxu0 %v11438_v19  ;;  %v5283_v19 = vld [vmem:[%s16262_s13 + $0xa0] sm:$0xff]  ;;  %v11474_v15 = vpack.c.bf16 %v5266_v6, %v5265_v11  ;;  %v8379_v6 = vld [vmem:[%s16262_s13 + $0x228] sm:$0xff] }
 0xd61   :  { %11441 = vmatprep.subr.bf16.mxu0 %v11440_v31  ;;  %v5284_v31 = vld [vmem:[%s16262_s13 + $0xa8] sm:$0xff]  ;;  %v8378_v11 = vld [vmem:[%s16262_s13 + $0x220] sm:$0xff] }
 0xd62   :  { %v11476_v56 = vpack.c.bf16 %v5284_v31, %v5283_v19  ;;  %v8396_v19 = vld [vmem:[%s16262_s13 + $0x2b0] sm:$0xff]  ;;  %v8397_v31 = vld [vmem:[%s16262_s13 + $0x2b8] sm:$0xff] }
 0xd64   :  { %11443 = vmatpush3.bf16.msra.mxu0 %v11442_v62  ;;  %v5285_v62 = vld [vmem:[%s16262_s13 + $0xb0] sm:$0xff] }
 0xd65   :  { %11445 = vmatprep.subr.bf16.mxu0 %v11444_v40  ;;  %v5286_v40 = vld [vmem:[%s16262_s13 + $0xb8] sm:$0xff] }
 0xd66   :  { %v11480_v4 = vpack.c.bf16 %v5286_v40, %v5285_v62  ;;  %v8398_v62 = vld [vmem:[%s16262_s13 + $0x2c0] sm:$0xff]  ;;  %v8399_v40 = vld [vmem:[%s16262_s13 + $0x2c8] sm:$0xff] }
 0xd68   :  { %11447 = vmatpush3.bf16.msra.mxu0 %v11446_v38  ;;  %v5287_v38 = vld [vmem:[%s16262_s13 + $0xc0] sm:$0xff] }
 0xd69   :  { %11449 = vmatprep.subr.bf16.mxu0 %v11448_v44  ;;  %v5288_v44 = vld [vmem:[%s16262_s13 + $0xc8] sm:$0xff] }
 0xd6a   :  { %v11484_v37 = vpack.c.bf16 %v5288_v44, %v5287_v38  ;;  %v8400_v38 = vld [vmem:[%s16262_s13 + $0x2d0] sm:$0xff]  ;;  %v8401_v44 = vld [vmem:[%s16262_s13 + $0x2d8] sm:$0xff] }
 0xd6c   :  { %11451 = vmatpush3.bf16.msra.mxu0 %v11450_v14  ;;  %v5289_v14 = vld [vmem:[%s16262_s13 + $0xd0] sm:$0xff] }
 0xd6d   :  { %11453 = vmatprep.subr.bf16.mxu0 %v11452_v41  ;;  %v5290_v41 = vld [vmem:[%s16262_s13 + $0xd8] sm:$0xff] }
 0xd6e   :  { %v11488_v12 = vpack.c.bf16 %v5290_v41, %v5289_v14  ;;  %v8402_v14 = vld [vmem:[%s16262_s13 + $0x2e0] sm:$0xff]  ;;  %v8403_v41 = vld [vmem:[%s16262_s13 + $0x2e8] sm:$0xff] }
 0xd70   :  { %11455 = vmatpush3.bf16.msra.mxu0 %v11454_v2  ;;  %v5291_v2 = vld [vmem:[%s16262_s13 + $0xe0] sm:$0xff] }
 0xd71   :  { %11457 = vmatprep.subr.bf16.mxu0 %v11456_v46  ;;  %v5292_v46 = vld [vmem:[%s16262_s13 + $0xe8] sm:$0xff] }
 0xd72   :  { %v11492_v26 = vpack.c.bf16 %v5292_v46, %v5291_v2  ;;  %v8404_v2 = vld [vmem:[%s16262_s13 + $0x2f0] sm:$0xff]  ;;  %v8405_v46 = vld [vmem:[%s16262_s13 + $0x2f8] sm:$0xff] }
 0xd74   :  { %11459 = vmatpush3.bf16.msra.mxu0 %v11458_v47  ;;  %v5293_v47 = vld [vmem:[%s16262_s13 + $0xf0] sm:$0xff] }
 0xd75   :  { %11461 = vmatprep.subr.bf16.mxu0 %v11460_v18  ;;  %v5294_v18 = vld [vmem:[%s16262_s13 + $0xf8] sm:$0xff] }
 0xd76   :  { %v11496_v52 = vpack.c.bf16 %v5294_v18, %v5293_v47  ;;  %v11540_v47 = vpack.c.bf16 %v8389_v33, %v8388_v20  ;;  %v8459_v20 = vld [vmem:[%s16262_s13 + $0x468] sm:$0xff]  ;;  %v8476_v33 = vld [vmem:[%s16262_s13 + $0x4f0] sm:$0xff] }
 0xd78   :  { %11463 = vmatpush3.bf16.msra.mxu0 %v11462_v7  ;;  %v5277_v7 = vld [vmem:[%s16262_s13 + $0x70] sm:$0xff] }
 0xd79   :  { %11465 = vmatprep.subr.bf16.mxu0 %v11464_v58  ;;  %v11498_v24 = vpack.c.bf16 %v5278_v59, %v5277_v7  ;;  %v5546_v58 = vadd.s32 2, %v14781_v45 }
 0xd7b   :  { %vm5547_vm15 = vcmp.eq.s32.totalorder %v12242_v10, %v5546_v58 }
 0xd7c   :  { %11467 = vmatpush3.bf16.msra.mxu0 %v11466_v30  ;;  %v11510_v30 = vpack.c.bf16 %v8391_v0, %v8390_v42 }
 0xd7d   :  { %11469 = vmatprep.subr.bf16.mxu0 %v11468_v5  ;;  %v8392_v5 = vld [vmem:[%s16262_s13 + $0x290] sm:$0xff] }
 0xe2a   :  { %v14912_v48 = vpop.f32.mrb[146].mxu0 }
 0xe2b   :  { %v5260_v3 = vpop.f32.mrb[147].mxu0 }
 0xe32   :  { %v5368_v55 = vpop.f32.mrb[148].mxu0 }
 0xe33   :  { %v5370_v54 = vpop.f32.mrb[149].mxu0 }
 0xe34   :  { %5470 = vmatprep.mubr.f32.mxu0 %v5370_v54  ;;  %v11516_v54 = vpack.c.bf16 %v8377_v21, %v8376_v35  ;;  %v8464_v35 = vld [vmem:[%s16262_s13 + $0x490] sm:$0xff]  ;;  %v8465_v21 = vld [vmem:[%s16262_s13 + $0x498] sm:$0xff] }
 0xe35   :  { %5471 = vmatmul.mubr.f32.vlgmr.msra.gmra.mrb[150].mxu0 %v5368_v55  ;;  %v8394_v55 = vld [vmem:[%s16262_s13 + $0x2a0] sm:$0xff] }
 0xe36   :  { %11471 = vmatpush3.bf16.msra.mxu0 %v11470_v1  ;;  %5540 = vmatprep.mubr.f32.mxu0 %v5260_v3  ;;  %v8370_v3 = vsel %vm5547_vm15, 1.0, %v16295_v39  ;;  %v8395_v1 = vld [vmem:[%s16262_s13 + $0x2a8] sm:$0xff] }
 0xe37   :  { %11473 = vmatprep.subr.bf16.mxu0 %v11472_v28  ;;  %v11518_v28 = vpack.c.bf16 %v8395_v1, %v8394_v55  ;;  %v8442_v55 = vsel %vm5911_vm0, 1.0, %v16295_v39 }
 0xe3a   :  { %11475 = vmatpush3.bf16.msra.mxu0 %v11474_v15  ;;  %v11520_v15 = vpack.c.bf16 %v8379_v6, %v8378_v11  ;;  %v8449_v11 = vld [vmem:[%s16262_s13 + $0x418] sm:$0xff]  ;;  %v8466_v6 = vld [vmem:[%s16262_s13 + $0x4a0] sm:$0xff] }
 0xe3b   :  { %11477 = vmatprep.subr.bf16.mxu0 %v11476_v56  ;;  %v11522_v56 = vpack.c.bf16 %v8397_v31, %v8396_v19  ;;  %v8467_v19 = vld [vmem:[%s16262_s13 + $0x4a8] sm:$0xff] }
 0xe3e   :  { %11479 = vmatpush3.bf16.msra.mxu0 %v11478_v17  ;;  %v11524_v17 = vpack.c.bf16 %v8381_v27, %v8380_v29  ;;  %v8451_v29 = vld [vmem:[%s16262_s13 + $0x428] sm:$0xff]  ;;  %v8468_v27 = vld [vmem:[%s16262_s13 + $0x4b0] sm:$0xff] }
 0xe3f   :  { %11481 = vmatprep.subr.bf16.mxu0 %v11480_v4  ;;  %v11526_v4 = vpack.c.bf16 %v8399_v40, %v8398_v62  ;;  %v8469_v62 = vld [vmem:[%s16262_s13 + $0x4b8] sm:$0xff] }
 0xe42   :  { %11483 = vmatpush3.bf16.msra.mxu0 %v11482_v34  ;;  %v11528_v34 = vpack.c.bf16 %v8383_v51, %v8382_v36  ;;  %v8453_v36 = vld [vmem:[%s16262_s13 + $0x438] sm:$0xff]  ;;  %v8470_v51 = vld [vmem:[%s16262_s13 + $0x4c0] sm:$0xff] }
 0xe43   :  { %11485 = vmatprep.subr.bf16.mxu0 %v11484_v37  ;;  %v11530_v37 = vpack.c.bf16 %v8401_v44, %v8400_v38  ;;  %v8471_v38 = vld [vmem:[%s16262_s13 + $0x4c8] sm:$0xff] }
 0xe46   :  { %11487 = vmatpush3.bf16.msra.mxu0 %v11486_v43  ;;  %v11532_v43 = vpack.c.bf16 %v8385_v49, %v8384_v13  ;;  %v8455_v13 = vld [vmem:[%s16262_s13 + $0x448] sm:$0xff]  ;;  %v8472_v49 = vld [vmem:[%s16262_s13 + $0x4d0] sm:$0xff] }
 0xe47   :  { %11489 = vmatprep.subr.bf16.mxu0 %v11488_v12  ;;  %v11534_v12 = vpack.c.bf16 %v8403_v41, %v8402_v14  ;;  %v8473_v14 = vld [vmem:[%s16262_s13 + $0x4d8] sm:$0xff] }
 0xe4a   :  { %11491 = vmatpush3.bf16.msra.mxu0 %v11490_v53  ;;  %v11536_v53 = vpack.c.bf16 %v8387_v8, %v8386_v57  ;;  %v8457_v57 = vld [vmem:[%s16262_s13 + $0x458] sm:$0xff]  ;;  %v8474_v8 = vld [vmem:[%s16262_s13 + $0x4e0] sm:$0xff] }
 0xe4b   :  { %11493 = vmatprep.subr.bf16.mxu0 %v11492_v26  ;;  %v11538_v26 = vpack.c.bf16 %v8405_v46, %v8404_v2  ;;  %v8475_v2 = vld [vmem:[%s16262_s13 + $0x4e8] sm:$0xff] }
 0xe4e   :  { %11495 = vmatpush3.bf16.msra.mxu0 %v11494_v60 }
 0xe4f   :  { %11497 = vmatprep.subr.bf16.mxu0 %v11496_v52 }
 0xe52   :  { %11499 = vmatpush3.bf16.msra.mxu0 %v11498_v24 }
 0xe53   :  { %11501 = vmatprep.subr.bf16.mxu0 %v14775_v25 }
 0xe55   :  { %5541 = vmatmul.mubr.f32.vlgmr.msra.gmra.mrb[152].mxu0 %v14912_v48  ;;  %v8393_v48 = vld [vmem:[%s16262_s13 + $0x298] sm:$0xff] }
 0xe56   :  { %11503 = vmatpush1.bf16.msra.mxu0 %v14773_v22  ;;  %5617 = vmatprep.mubr.f32.mxu0 %v16295_v39  ;;  %v11514_v32 = vpack.c.bf16 %v8393_v48, %v8392_v5  ;;  %v8462_v5 = vld [vmem:[%s16262_s13 + $0x480] sm:$0xff]  ;;  %v8463_v48 = vld [vmem:[%s16262_s13 + $0x488] sm:$0xff] }
 0xe57   :  { %11506 = vmatprep.subr.msk.bf16.mxu0 %vm13631_vm2, %v14785_v61 }
 0xe5a   :  { %11509 = vmatpush1.bf16.msk.msra.mxu0 %vm13631_vm2, %v14783_v50 }
 0xe5b   :  { %11511 = vmatprep.subr.bf16.mxu0 %v11510_v30  ;;  %v5728_v30 = vadd.s32 3, %v14781_v45 }
 0xe5d   :  { %8373 = vmatmul.mubr.msk.f32.vlgmr.msra.gmra.mrb[154].mxu0 %vm3899_vm8, %v8370_v3  ;;  %vm5729_vm1 = vcmp.eq.s32.totalorder %v12242_v10, %v5728_v30  ;;  %v11594_v3 = vpack.c.bf16 %v8463_v48, %v8462_v5  ;;  %v6092_v5 = vadd.s32 5, %v14781_v45  ;;  %v8498_v48 = vld [vmem:[%s16262_s13 + $0x580] sm:$0xff] }
 0xe5e   :  { %11513 = vmatpush3.bf16.msra.mxu0 %v11512_v9  ;;  %v8406_v16 = vsel %vm5729_vm1, 1.0, %v16295_v39  ;;  %v8446_v9 = vld [vmem:[%s16262_s13 + $0x400] sm:$0xff] }
 0xe5f   :  { %11515 = vmatprep.subr.bf16.mxu0 %v11514_v32  ;;  %v8447_v32 = vld [vmem:[%s16262_s13 + $0x408] sm:$0xff]  ;;  %vm6093_vm7 = vcmp.eq.s32.totalorder %v12242_v10, %v6092_v5  ;;  %v8541_v5 = vld [vmem:[%s16262_s13 + $0x6b8] sm:$0xff] }
 0xe60   :  { %v11596_v1 = vpack.c.bf16 %v8447_v32, %v8446_v9  ;;  %v8482_v9 = vld [vmem:[%s16262_s13 + $0x500] sm:$0xff]  ;;  %v8483_v32 = vld [vmem:[%s16262_s13 + $0x508] sm:$0xff] }
 0xe62   :  { %11517 = vmatpush3.bf16.msra.mxu0 %v11516_v54  ;;  %v11598_v54 = vpack.c.bf16 %v8465_v21, %v8464_v35  ;;  %v8500_v35 = vld [vmem:[%s16262_s13 + $0x590] sm:$0xff]  ;;  %v8501_v21 = vld [vmem:[%s16262_s13 + $0x598] sm:$0xff] }
 0xe63   :  { %11519 = vmatprep.subr.bf16.mxu0 %v11518_v28  ;;  %v8448_v28 = vld [vmem:[%s16262_s13 + $0x410] sm:$0xff] }
 0xe64   :  { %v11600_v31 = vpack.c.bf16 %v8449_v11, %v8448_v28  ;;  %v11640_v11 = vpack.c.bf16 %v8501_v21, %v8500_v35  ;;  %v8524_v21 = vld [vmem:[%s16262_s13 + $0x630] sm:$0xff] }
 0xe66   :  { %11521 = vmatpush3.bf16.msra.mxu0 %v11520_v15  ;;  %v11602_v15 = vpack.c.bf16 %v8467_v19, %v8466_v6  ;;  %v8484_v6 = vld [vmem:[%s16262_s13 + $0x510] sm:$0xff]  ;;  %v8485_v19 = vld [vmem:[%s16262_s13 + $0x518] sm:$0xff] }
 0xe67   :  { %11523 = vmatprep.subr.bf16.mxu0 %v11522_v56  ;;  %v8450_v56 = vld [vmem:[%s16262_s13 + $0x420] sm:$0xff] }
 0xe68   :  { %v11604_v40 = vpack.c.bf16 %v8451_v29, %v8450_v56  ;;  %v8503_v56 = vld [vmem:[%s16262_s13 + $0x5a8] sm:$0xff]  ;;  %v8534_v29 = vld [vmem:[%s16262_s13 + $0x680] sm:$0xff] }
 0xe6a   :  { %11525 = vmatpush3.bf16.msra.mxu0 %v11524_v17  ;;  %v11606_v17 = vpack.c.bf16 %v8469_v62, %v8468_v27  ;;  %v8535_v27 = vld [vmem:[%s16262_s13 + $0x688] sm:$0xff]  ;;  %v11642_v62 = vpack.c.bf16 %v8485_v19, %v8484_v6 }
 0xe6b   :  { %11527 = vmatprep.subr.bf16.mxu0 %v11526_v4  ;;  %v8452_v4 = vld [vmem:[%s16262_s13 + $0x430] sm:$0xff] }
 0xe6c   :  { %v11608_v44 = vpack.c.bf16 %v8453_v36, %v8452_v4  ;;  %v11678_v36 = vpack.c.bf16 %v8535_v27, %v8534_v29  ;;  %v8526_v27 = vld [vmem:[%s16262_s13 + $0x640] sm:$0xff] }
 0xe6e   :  { %11529 = vmatpush3.bf16.msra.mxu0 %v11528_v34  ;;  %v11610_v34 = vpack.c.bf16 %v8471_v38, %v8470_v51  ;;  %v8518_v51 = vld [vmem:[%s16262_s13 + $0x600] sm:$0xff]  ;;  %v8519_v38 = vld [vmem:[%s16262_s13 + $0x608] sm:$0xff] }
 0xe6f   :  { %11531 = vmatprep.subr.bf16.mxu0 %v11530_v37  ;;  %v8454_v37 = vld [vmem:[%s16262_s13 + $0x440] sm:$0xff] }
 0xe70   :  { %v11612_v41 = vpack.c.bf16 %v8455_v13, %v8454_v37  ;;  %v8536_v37 = vld [vmem:[%s16262_s13 + $0x690] sm:$0xff]  ;;  %v8537_v13 = vld [vmem:[%s16262_s13 + $0x698] sm:$0xff] }
 0xe72   :  { %11533 = vmatpush3.bf16.msra.mxu0 %v11532_v43  ;;  %v11614_v43 = vpack.c.bf16 %v8473_v14, %v8472_v49 }
 0xe73   :  { %11535 = vmatprep.subr.bf16.mxu0 %v11534_v12  ;;  %v8456_v12 = vld [vmem:[%s16262_s13 + $0x450] sm:$0xff] }
 0xe74   :  { %v11616_v46 = vpack.c.bf16 %v8457_v57, %v8456_v12  ;;  %v8489_v12 = vld [vmem:[%s16262_s13 + $0x538] sm:$0xff] }
 0xe76   :  { %11537 = vmatpush3.bf16.msra.mxu0 %v11536_v53  ;;  %v11618_v53 = vpack.c.bf16 %v8475_v2, %v8474_v8  ;;  %v11682_v8 = vpack.c.bf16 %v8537_v13, %v8536_v37  ;;  %v8520_v2 = vld [vmem:[%s16262_s13 + $0x610] sm:$0xff]  ;;  %v8497_v13 = vld [vmem:[%s16262_s13 + $0x578] sm:$0xff] }
 0xe77   :  { %11539 = vmatprep.subr.bf16.mxu0 %v11538_v26  ;;  %v8458_v26 = vld [vmem:[%s16262_s13 + $0x460] sm:$0xff] }
 0xe7a   :  { %11541 = vmatpush3.bf16.msra.mxu0 %v11540_v47  ;;  %v8477_v47 = vld [vmem:[%s16262_s13 + $0x4f8] sm:$0xff] }
 0xe7b   :  { %11543 = vmatprep.subr.bf16.mxu0 %v14775_v25 }
 0xf08   :  { %v9308_v18 = vpop.f32.mrb[150].mxu0 }
 0xf09   :  { %v9309_v60 = vpop.f32.mrb[151].mxu0 }
 0xf0a   :  { %v9310_v52 = vadd.f32 %v9309_v60, %v9308_v18  ;;  %v11620_v18 = vpack.c.bf16 %v8459_v20, %v8458_v26  ;;  %v11622_v60 = vpack.c.bf16 %v8477_v47, %v8476_v33  ;;  %v8507_v26 = vld [vmem:[%s16262_s13 + $0x5c8] sm:$0xff]  ;;  %v8538_v20 = vld [vmem:[%s16262_s13 + $0x6a0] sm:$0xff] }
 0xf0b   :  { %v8539_v33 = vld [vmem:[%s16262_s13 + $0x6a8] sm:$0xff] }
 0xf28   :  { %v9343_v7 = vpop.f32.mrb[152].mxu0 }
 0xf29   :  { %v9344_v59 = vpop.f32.mrb[153].mxu0 }
 0xf2a   :  { %v9345_v24 = vadd.f32 %v9344_v59, %v9343_v7  ;;  %v8461_v7 = vld [vmem:[%s16262_s13 + $0x478] sm:$0xff] }
 0xf2c   :  { %v15115_v58 = vadd.f32 %v9345_v24, %v9310_v52  ;;  %v8460_v52 = vld [vmem:[%s16262_s13 + $0x470] sm:$0xff] }
 0xf2d   :  { %v11624_v59 = vpack.c.bf16 %v8461_v7, %v8460_v52  ;;  %v8491_v52 = vld [vmem:[%s16262_s13 + $0x548] sm:$0xff] }
 0xf30   :  { %v5619_v42 = vpop.f32.mrb[154].mxu0 }
 0xf31   :  { %v5621_v0 = vpop.f32.mrb[155].mxu0 }
 0xf32   :  { %5721 = vmatprep.mubr.f32.mxu0 %v5621_v0 }
 0xf33   :  { %5722 = vmatmul.mubr.f32.vlgmr.msra.gmra.mrb[156].mxu0 %v5619_v42 }
 0xf34   :  { %11545 = vmatpush1.bf16.msra.mxu0 %v14773_v22  ;;  %5799 = vmatprep.mubr.f32.mxu0 %v16295_v39 }
 0xf35   :  { %11548 = vmatprep.subr.msk.bf16.mxu0 %vm13631_vm2, %v14785_v61 }
 0xf38   :  { %11551 = vmatpush1.bf16.msk.msra.mxu0 %vm13631_vm2, %v14783_v50 }
 0xf39   :  { %11585 = vmatprep.subr.bf16.mxu0 %v14775_v25 }
 0xf3b   :  { %8409 = vmatmul.mubr.msk.f32.vlgmr.msra.gmra.mrb[158].mxu0 %vm3899_vm8, %v8406_v16 }
 0xf3c   :  { %11587 = vmatpush1.bf16.msra.mxu0 %v14773_v22  ;;  %5981 = vmatprep.mubr.f32.mxu0 %v16295_v39 }
 0xf3d   :  { %11590 = vmatprep.subr.msk.bf16.mxu0 %vm13631_vm2, %v14785_v61 }
 0xf40   :  { %11593 = vmatpush1.bf16.msk.msra.mxu0 %vm13631_vm2, %v14783_v50 }
 0xf41   :  { %11595 = vmatprep.subr.bf16.mxu0 %v11594_v3  ;;  %v8499_v3 = vld [vmem:[%s16262_s13 + $0x588] sm:$0xff] }
 0xf43   :  { %8445 = vmatmul.mubr.msk.f32.vlgmr.msra.gmra.mrb[160].mxu0 %vm3899_vm8, %v8442_v55 }
 0xf44   :  { %11597 = vmatpush3.bf16.msra.mxu0 %v11596_v1  ;;  %v8478_v1 = vsel %vm6093_vm7, 1.0, %v16295_v39 }
 0xf45   :  { %11599 = vmatprep.subr.bf16.mxu0 %v11598_v54  ;;  %v11638_v54 = vpack.c.bf16 %v8483_v32, %v8482_v9  ;;  %v8493_v9 = vld [vmem:[%s16262_s13 + $0x558] sm:$0xff] }
 0xf48   :  { %11601 = vmatpush3.bf16.msra.mxu0 %v11600_v31  ;;  %v8502_v31 = vld [vmem:[%s16262_s13 + $0x5a0] sm:$0xff] }
 0xf49   :  { %11603 = vmatprep.subr.bf16.mxu0 %v11602_v15  ;;  %v6274_v15 = vadd.s32 6, %v14781_v45  ;;  %v11644_v4 = vpack.c.bf16 %v8503_v56, %v8502_v31  ;;  %v8494_v31 = vld [vmem:[%s16262_s13 + $0x560] sm:$0xff] }
 0xf4b   :  { %vm6275_vm9 = vcmp.eq.s32.totalorder %v12242_v10, %v6274_v15  ;;  %v8495_v15 = vld [vmem:[%s16262_s13 + $0x568] sm:$0xff] }
 0xf4c   :  { %11605 = vmatpush3.bf16.msra.mxu0 %v11604_v40  ;;  %v8486_v40 = vld [vmem:[%s16262_s13 + $0x520] sm:$0xff]  ;;  %v8514_v49 = vsel %vm6275_vm9, 1.0, %v16295_v39 }
 0xf4d   :  { %11607 = vmatprep.subr.bf16.mxu0 %v11606_v17  ;;  %v8487_v17 = vld [vmem:[%s16262_s13 + $0x528] sm:$0xff] }
 0xf4e   :  { %v11646_v14 = vpack.c.bf16 %v8487_v17, %v8486_v40  ;;  %v8512_v40 = vld [vmem:[%s16262_s13 + $0x5f0] sm:$0xff]  ;;  %v8513_v17 = vld [vmem:[%s16262_s13 + $0x5f8] sm:$0xff] }
 0xf50   :  { %11609 = vmatpush3.bf16.msra.mxu0 %v11608_v44  ;;  %v8504_v44 = vld [vmem:[%s16262_s13 + $0x5b0] sm:$0xff] }
 0xf51   :  { %11611 = vmatprep.subr.bf16.mxu0 %v11610_v34  ;;  %v8505_v34 = vld [vmem:[%s16262_s13 + $0x5b8] sm:$0xff] }
 0xf52   :  { %v11648_v57 = vpack.c.bf16 %v8505_v34, %v8504_v44  ;;  %v8496_v44 = vld [vmem:[%s16262_s13 + $0x570] sm:$0xff]  ;;  %v11664_v34 = vpack.c.bf16 %v8513_v17, %v8512_v40  ;;  %v8558_v17 = vld [vmem:[%s16262_s13 + $0x720] sm:$0xff] }
 0xf54   :  { %11613 = vmatpush3.bf16.msra.mxu0 %v11612_v41  ;;  %v11680_v41 = vpack.c.bf16 %v8519_v38, %v8518_v51  ;;  %v11662_v51 = vpack.c.bf16 %v8495_v15, %v8494_v31  ;;  %v8557_v31 = vld [vmem:[%s16262_s13 + $0x718] sm:$0xff]  ;;  %v8574_v15 = vld [vmem:[%s16262_s13 + $0x7a0] sm:$0xff] }
 0xf55   :  { %11615 = vmatprep.subr.bf16.mxu0 %v11614_v43  ;;  %v8488_v43 = vld [vmem:[%s16262_s13 + $0x530] sm:$0xff] }
 0xf56   :  { %v11650_v47 = vpack.c.bf16 %v8489_v12, %v8488_v43  ;;  %v8547_v43 = vld [vmem:[%s16262_s13 + $0x6e8] sm:$0xff]  ;;  %v11666_v12 = vpack.c.bf16 %v8497_v13, %v8496_v44  ;;  %v8608_v13 = vld [vmem:[%s16262_s13 + $0x890] sm:$0xff] }
 0xf57   :  { %v8591_v44 = vld [vmem:[%s16262_s13 + $0x808] sm:$0xff] }
 0xf58   :  { %11617 = vmatpush3.bf16.msra.mxu0 %v11616_v46  ;;  %v8521_v46 = vld [vmem:[%s16262_s13 + $0x618] sm:$0xff] }
 0xf59   :  { %11619 = vmatprep.subr.bf16.mxu0 %v11618_v53  ;;  %v8506_v53 = vld [vmem:[%s16262_s13 + $0x5c0] sm:$0xff] }
 0xf5a   :  { %v11652_v7 = vpack.c.bf16 %v8507_v26, %v8506_v53  ;;  %v8548_v53 = vld [vmem:[%s16262_s13 + $0x6f0] sm:$0xff]  ;;  %v8549_v26 = vld [vmem:[%s16262_s13 + $0x6f8] sm:$0xff] }
 0xf5c   :  { %11621 = vmatpush3.bf16.msra.mxu0 %v11620_v18  ;;  %v11684_v18 = vpack.c.bf16 %v8521_v46, %v8520_v2  ;;  %v8530_v2 = vld [vmem:[%s16262_s13 + $0x660] sm:$0xff]  ;;  %v8531_v46 = vld [vmem:[%s16262_s13 + $0x668] sm:$0xff] }
 0xf5d   :  { %11623 = vmatprep.subr.bf16.mxu0 %v11622_v60  ;;  %v8490_v60 = vld [vmem:[%s16262_s13 + $0x540] sm:$0xff] }
 0xf60   :  { %11625 = vmatpush3.bf16.msra.mxu0 %v11624_v59  ;;  %v11686_v59 = vpack.c.bf16 %v8539_v33, %v8538_v20  ;;  %v11704_v20 = vpack.c.bf16 %v8531_v46, %v8530_v2  ;;  %v11706_v33 = vpack.c.bf16 %v8549_v26, %v8548_v53  ;;  %v8592_v46 = vld [vmem:[%s16262_s13 + $0x810] sm:$0xff]  ;;  %v8593_v53 = vld [vmem:[%s16262_s13 + $0x818] sm:$0xff]  ;;  %v8578_v26 = vld [vmem:[%s16262_s13 + $0x7c0] sm:$0xff] }
 0xf61   :  { %11669 = vmatprep.subr.bf16.mxu0 %v14775_v25 }
0x1006   :  { %v9378_v24 = vpop.f32.mrb[156].mxu0 }
0x1007   :  { %v9379_v42 = vpop.f32.mrb[157].mxu0 }
0x1008   :  { %v9380_v0 = vadd.f32 %v9379_v42, %v9378_v24  ;;  %v8522_v24 = vld [vmem:[%s16262_s13 + $0x620] sm:$0xff]  ;;  %v8523_v42 = vld [vmem:[%s16262_s13 + $0x628] sm:$0xff] }
0x100a   :  { %v15240_v30 = vadd.f32 %v9380_v0, %v15115_v58  ;;  %v11636_v58 = vpack.c.bf16 %v8499_v3, %v8498_v48  ;;  %v8508_v0 = vld [vmem:[%s16262_s13 + $0x5d0] sm:$0xff]  ;;  %v11654_v48 = vpack.c.bf16 %v8491_v52, %v8490_v60  ;;  %v11688_v3 = vpack.c.bf16 %v8523_v42, %v8522_v24 }
0x100e   :  { %v5801_v16 = vpop.f32.mrb[158].mxu0 }
0x100f   :  { %v5803_v23 = vpop.f32.mrb[159].mxu0 }
0x1010   :  { %5903 = vmatprep.mubr.f32.mxu1 %v5803_v23  ;;  %v8540_v23 = vld [vmem:[%s16262_s13 + $0x6b0] sm:$0xff] }
0x1011   :  { %5904 = vmatmul.mubr.f32.vlgmr.msra.gmra.mrb[154].mxu1 %v5801_v16  ;;  %v8509_v16 = vld [vmem:[%s16262_s13 + $0x5d8] sm:$0xff]  ;;  %v11690_v35 = vpack.c.bf16 %v8541_v5, %v8540_v23  ;;  %v6456_v5 = vadd.s32 7, %v14781_v45 }
0x1012   :  { %11629 = vmatpush1.bf16.msra.mxu1 %v14773_v22  ;;  %6163 = vmatprep.mubr.f32.mxu1 %v16295_v39  ;;  %v11656_v32 = vpack.c.bf16 %v8509_v16, %v8508_v0 }
0x1013   :  { %11632 = vmatprep.subr.msk.bf16.mxu1 %vm13631_vm2, %v14785_v61  ;;  %vm6457_vm11 = vcmp.eq.s32.totalorder %v12242_v10, %v6456_v5  ;;  %v8612_v5 = vld [vmem:[%s16262_s13 + $0x8b0] sm:$0xff] }
0x1016   :  { %11635 = vmatpush1.bf16.msk.msra.mxu1 %vm13631_vm2, %v14783_v50  ;;  %v5983_v55 = vpop.f32.mrb[160].mxu0 }
0x1017   :  { %v5985_v28 = vpop.f32.mrb[161].mxu0  ;;  %11637 = vmatprep.subr.bf16.mxu1 %v11636_v58  ;;  %v8492_v58 = vld [vmem:[%s16262_s13 + $0x550] sm:$0xff] }
0x1018   :  { %6085 = vmatprep.mubr.f32.mxu0 %v5985_v28  ;;  %v8542_v28 = vld [vmem:[%s16262_s13 + $0x6c0] sm:$0xff]  ;;  %v11658_v6 = vpack.c.bf16 %v8493_v9, %v8492_v58  ;;  %v8571_v58 = vld [vmem:[%s16262_s13 + $0x788] sm:$0xff] }
0x1019   :  { %8481 = vmatmul.mubr.msk.f32.vlgmr.msra.gmra.mrb[156].mxu1 %vm3899_vm8, %v8478_v1  ;;  %6086 = vmatmul.mubr.f32.vlgmr.msra.gmra.mrb[162].mxu0 %v5983_v55  ;;  %v8525_v55 = vld [vmem:[%s16262_s13 + $0x638] sm:$0xff]  ;;  %v8510_v1 = vld [vmem:[%s16262_s13 + $0x5e0] sm:$0xff] }
0x101a   :  { %11639 = vmatpush3.bf16.msra.mxu1 %v11638_v54  ;;  %11671 = vmatpush1.bf16.msra.mxu0 %v14773_v22  ;;  %v8511_v54 = vld [vmem:[%s16262_s13 + $0x5e8] sm:$0xff]  ;;  %v11692_v19 = vpack.c.bf16 %v8525_v55, %v8524_v21  ;;  %v8572_v21 = vld [vmem:[%s16262_s13 + $0x790] sm:$0xff]  ;;  %v8573_v55 = vld [vmem:[%s16262_s13 + $0x798] sm:$0xff] }
0x101b   :  { %11674 = vmatprep.subr.msk.bf16.mxu0 %vm13631_vm2, %v14785_v61  ;;  %11641 = vmatprep.subr.bf16.mxu1 %v11640_v11  ;;  %v8543_v11 = vld [vmem:[%s16262_s13 + $0x6c8] sm:$0xff]  ;;  %v11660_v56 = vpack.c.bf16 %v8511_v54, %v8510_v1  ;;  %v8550_v54 = vsel %vm6457_vm11, 1.0, %v16295_v39 }
0x101c   :  { %6345 = vmatprep.mubr.f32.mxu0 %v16295_v39  ;;  %v11694_v29 = vpack.c.bf16 %v8543_v11, %v8542_v28 }
0x101e   :  { %11643 = vmatpush3.bf16.msra.mxu1 %v11642_v62  ;;  %11677 = vmatpush1.bf16.msk.msra.mxu0 %vm13631_vm2, %v14783_v50  ;;  %v8527_v62 = vld [vmem:[%s16262_s13 + $0x648] sm:$0xff] }
0x101f   :  { %11645 = vmatprep.subr.bf16.mxu1 %v11644_v4  ;;  %11679 = vmatprep.subr.bf16.mxu0 %v11678_v36  ;;  %v8544_v4 = vld [vmem:[%s16262_s13 + $0x6d0] sm:$0xff]  ;;  %v8545_v36 = vld [vmem:[%s16262_s13 + $0x6d8] sm:$0xff]  ;;  %v11696_v38 = vpack.c.bf16 %v8527_v62, %v8526_v27  ;;  %v8606_v27 = vld [vmem:[%s16262_s13 + $0x880] sm:$0xff] }
0x1020   :  { %v11698_v37 = vpack.c.bf16 %v8545_v36, %v8544_v4  ;;  %v8607_v62 = vld [vmem:[%s16262_s13 + $0x888] sm:$0xff] }
0x1021   :  { %8517 = vmatmul.mubr.msk.f32.vlgmr.msra.gmra.mrb[164].mxu0 %vm3899_vm8, %v8514_v49  ;;  %v8528_v49 = vld [vmem:[%s16262_s13 + $0x650] sm:$0xff]  ;;  %v8559_v4 = vld [vmem:[%s16262_s13 + $0x728] sm:$0xff] }
0x1022   :  { %11647 = vmatpush3.bf16.msra.mxu1 %v11646_v14  ;;  %11681 = vmatpush3.bf16.msra.mxu0 %v11680_v41  ;;  %v8529_v14 = vld [vmem:[%s16262_s13 + $0x658] sm:$0xff]  ;;  %v8546_v41 = vld [vmem:[%s16262_s13 + $0x6e0] sm:$0xff] }
0x1023   :  { %11649 = vmatprep.subr.bf16.mxu1 %v11648_v57  ;;  %11683 = vmatprep.subr.bf16.mxu0 %v11682_v8  ;;  %v11700_v57 = vpack.c.bf16 %v8529_v14, %v8528_v49  ;;  %v11702_v8 = vpack.c.bf16 %v8547_v43, %v8546_v41  ;;  %v8609_v49 = vld [vmem:[%s16262_s13 + $0x898] sm:$0xff]  ;;  %v11730_v41 = vpack.c.bf16 %v8559_v4, %v8558_v17  ;;  %v8584_v17 = vld [vmem:[%s16262_s13 + $0x7f0] sm:$0xff] }
0x1024   :  { %v11766_v2 = vpack.c.bf16 %v8609_v49, %v8608_v13  ;;  %v8585_v4 = vld [vmem:[%s16262_s13 + $0x7f8] sm:$0xff] }
0x1025   :  { %v8569_v49 = vld [vmem:[%s16262_s13 + $0x778] sm:$0xff] }
0x1026   :  { %11651 = vmatpush3.bf16.msra.mxu1 %v11650_v47  ;;  %11685 = vmatpush3.bf16.msra.mxu0 %v11684_v18  ;;  %v8532_v47 = vld [vmem:[%s16262_s13 + $0x670] sm:$0xff]  ;;  %v8533_v18 = vld [vmem:[%s16262_s13 + $0x678] sm:$0xff] }
0x1027   :  { %11653 = vmatprep.subr.bf16.mxu1 %v11652_v7  ;;  %11687 = vmatprep.subr.bf16.mxu0 %v11686_v59  ;;  %v11708_v60 = vpack.c.bf16 %v8533_v18, %v8532_v47  ;;  %v8611_v47 = vld [vmem:[%s16262_s13 + $0x8a8] sm:$0xff] }
0x102a   :  { %11655 = vmatpush3.bf16.msra.mxu1 %v11654_v48  ;;  %11689 = vmatpush3.bf16.msra.mxu0 %v11688_v3  ;;  %v8570_v3 = vld [vmem:[%s16262_s13 + $0x780] sm:$0xff] }
0x102b   :  { %11657 = vmatprep.subr.bf16.mxu1 %v11656_v32  ;;  %11691 = vmatprep.subr.bf16.mxu0 %v11690_v35  ;;  %v8554_v32 = vld [vmem:[%s16262_s13 + $0x700] sm:$0xff]  ;;  %v8555_v35 = vld [vmem:[%s16262_s13 + $0x708] sm:$0xff] }
0x102c   :  { %v11722_v28 = vpack.c.bf16 %v8555_v35, %v8554_v32  ;;  %v8565_v32 = vld [vmem:[%s16262_s13 + $0x758] sm:$0xff] }
0x102e   :  { %11659 = vmatpush3.bf16.msra.mxu1 %v11658_v6  ;;  %11693 = vmatpush3.bf16.msra.mxu0 %v11692_v19  ;;  %v11724_v6 = vpack.c.bf16 %v8573_v55, %v8572_v21  ;;  %v8556_v19 = vld [vmem:[%s16262_s13 + $0x710] sm:$0xff] }
0x102f   :  { %11661 = vmatprep.subr.bf16.mxu1 %v11660_v56  ;;  %11695 = vmatprep.subr.bf16.mxu0 %v11694_v29  ;;  %v6638_v56 = vadd.s32 8, %v14781_v45  ;;  %v8575_v29 = vld [vmem:[%s16262_s13 + $0x7a8] sm:$0xff]  ;;  %v11726_v40 = vpack.c.bf16 %v8557_v31, %v8556_v19  ;;  %v8596_v55 = vld [vmem:[%s16262_s13 + $0x830] sm:$0xff] }
0x1030   :  { %v11728_v36 = vpack.c.bf16 %v8575_v29, %v8574_v15  ;;  %v8566_v15 = vld [vmem:[%s16262_s13 + $0x760] sm:$0xff] }
0x1031   :  { %vm6639_vm12 = vcmp.eq.s32.totalorder %v12242_v10, %v6638_v56  ;;  %v8567_v56 = vld [vmem:[%s16262_s13 + $0x768] sm:$0xff] }
0x1032   :  { %11663 = vmatpush3.bf16.msra.mxu1 %v11662_v51  ;;  %11697 = vmatpush3.bf16.msra.mxu0 %v11696_v38  ;;  %v11762_v51 = vpack.c.bf16 %v8607_v62, %v8606_v27  ;;  %v8590_v38 = vld [vmem:[%s16262_s13 + $0x800] sm:$0xff]  ;;  %v8586_v14 = vsel %vm6639_vm12, 1.0, %v16295_v39 }
0x1033   :  { %11665 = vmatprep.subr.bf16.mxu1 %v11664_v34  ;;  %11699 = vmatprep.subr.bf16.mxu0 %v11698_v37  ;;  %v8576_v34 = vld [vmem:[%s16262_s13 + $0x7b0] sm:$0xff]  ;;  %v8577_v37 = vld [vmem:[%s16262_s13 + $0x7b8] sm:$0xff]  ;;  %v11764_v43 = vpack.c.bf16 %v8591_v44, %v8590_v38  ;;  %v8598_v62 = vld [vmem:[%s16262_s13 + $0x840] sm:$0xff]  ;;  %v11746_v38 = vpack.c.bf16 %v8567_v56, %v8566_v15 }
0x1034   :  { %v8629_v15 = vld [vmem:[%s16262_s13 + $0x918] sm:$0xff]  ;;  %v8646_v56 = vld [vmem:[%s16262_s13 + $0x9a0] sm:$0xff] }
0x1036   :  { %11667 = vmatpush3.bf16.msra.mxu1 %v11666_v12  ;;  %11701 = vmatpush3.bf16.msra.mxu0 %v11700_v57  ;;  %v8560_v12 = vld [vmem:[%s16262_s13 + $0x730] sm:$0xff]  ;;  %v8561_v57 = vld [vmem:[%s16262_s13 + $0x738] sm:$0xff] }
0x1037   :  { %11711 = vmatprep.subr.bf16.mxu1 %v14775_v25  ;;  %11703 = vmatprep.subr.bf16.mxu0 %v11702_v8  ;;  %v11732_v8 = vpack.c.bf16 %v8577_v37, %v8576_v34  ;;  %v11734_v18 = vpack.c.bf16 %v8561_v57, %v8560_v12  ;;  %v8568_v34 = vld [vmem:[%s16262_s13 + $0x770] sm:$0xff]  ;;  %v11748_v37 = vpack.c.bf16 %v8585_v4, %v8584_v17  ;;  %v8619_v12 = vld [vmem:[%s16262_s13 + $0x8e8] sm:$0xff]  ;;  %v8630_v4 = vld [vmem:[%s16262_s13 + $0x920] sm:$0xff] }
0x1038   :  { %v11750_v57 = vpack.c.bf16 %v8569_v49, %v8568_v34  ;;  %v8663_v34 = vld [vmem:[%s16262_s13 + $0xa08] sm:$0xff]  ;;  %v8680_v49 = vld [vmem:[%s16262_s13 + $0xa90] sm:$0xff] }
0x103a   :  { %11705 = vmatpush3.bf16.msra.mxu0 %v11704_v20  ;;  %v8579_v20 = vld [vmem:[%s16262_s13 + $0x7c8] sm:$0xff] }
0x103b   :  { %11707 = vmatprep.subr.bf16.mxu0 %v11706_v33  ;;  %v8610_v33 = vld [vmem:[%s16262_s13 + $0x8a0] sm:$0xff] }
0x103e   :  { %11709 = vmatpush3.bf16.msra.mxu0 %v11708_v60  ;;  %v11768_v60 = vpack.c.bf16 %v8593_v53, %v8592_v46  ;;  %v8602_v46 = vld [vmem:[%s16262_s13 + $0x860] sm:$0xff]  ;;  %v8603_v53 = vld [vmem:[%s16262_s13 + $0x868] sm:$0xff] }
0x103f   :  { %11753 = vmatprep.subr.bf16.mxu0 %v14775_v25 }
0x10e4   :  { %v9413_v52 = vpop.f32.mrb[154].mxu1 }
0x10e5   :  { %v9414_v7 = vpop.f32.mrb[155].mxu1 }
0x10e6   :  { %v9415_v59 = vadd.f32 %v9414_v7, %v9413_v52  ;;  %v8562_v52 = vld [vmem:[%s16262_s13 + $0x740] sm:$0xff]  ;;  %v8563_v7 = vld [vmem:[%s16262_s13 + $0x748] sm:$0xff] }
0x10e8   :  { %v5909_v24 = vadd.f32 %v9415_v59, %v15240_v30  ;;  %v11720_v30 = vpack.c.bf16 %v8571_v58, %v8570_v3  ;;  %v11736_v59 = vpack.c.bf16 %v8579_v20, %v8578_v26  ;;  %v11738_v3 = vpack.c.bf16 %v8563_v7, %v8562_v52  ;;  %v8620_v26 = vld [vmem:[%s16262_s13 + $0x8f0] sm:$0xff]  ;;  %v8621_v20 = vld [vmem:[%s16262_s13 + $0x8f8] sm:$0xff] }
0x10ec   :  { %v6165_v42 = vpop.f32.mrb[156].mxu1  ;;  %v9448_v0 = vpop.f32.mrb[162].mxu0 }
0x10ed   :  { %v6167_v16 = vpop.f32.mrb[157].mxu1  ;;  %v9449_v23 = vpop.f32.mrb[163].mxu0 }
0x10ee   :  { %v9450_v48 = vadd.f32 %v9449_v23, %v9448_v0  ;;  %6267 = vmatprep.mubr.f32.mxu1 %v6167_v16  ;;  %v8595_v0 = vld [vmem:[%s16262_s13 + $0x828] sm:$0xff]  ;;  %v8580_v16 = vld [vmem:[%s16262_s13 + $0x7d0] sm:$0xff]  ;;  %v8581_v23 = vld [vmem:[%s16262_s13 + $0x7d8] sm:$0xff] }
0x10ef   :  { %6268 = vmatmul.mubr.f32.vlgmr.msra.gmra.mrb[158].mxu1 %v6165_v42  ;;  %v8594_v42 = vld [vmem:[%s16262_s13 + $0x820] sm:$0xff]  ;;  %v11740_v35 = vpack.c.bf16 %v8581_v23, %v8580_v16 }
0x10f0   :  { %v15468_v9 = vadd.f32 %v9450_v48, %v5909_v24  ;;  %11713 = vmatpush1.bf16.msra.mxu1 %v14773_v22  ;;  %6527 = vmatprep.mubr.f32.mxu1 %v16295_v39  ;;  %v11770_v24 = vpack.c.bf16 %v8611_v47, %v8610_v33  ;;  %v8613_v48 = vld [vmem:[%s16262_s13 + $0x8b8] sm:$0xff]  ;;  %v11772_v58 = vpack.c.bf16 %v8595_v0, %v8594_v42 }
0x10f1   :  { %11716 = vmatprep.subr.msk.bf16.mxu1 %vm13631_vm2, %v14785_v61  ;;  %v11774_v21 = vpack.c.bf16 %v8613_v48, %v8612_v5  ;;  %v11788_v33 = vpack.c.bf16 %v8603_v53, %v8602_v46  ;;  %v11790_v47 = vpack.c.bf16 %v8621_v20, %v8620_v26  ;;  %v6820_v48 = vadd.s32 9, %v14781_v45  ;;  %v8664_v53 = vld [vmem:[%s16262_s13 + $0xa10] sm:$0xff]  ;;  %v8665_v26 = vld [vmem:[%s16262_s13 + $0xa18] sm:$0xff]  ;;  %v8650_v20 = vld [vmem:[%s16262_s13 + $0x9c0] sm:$0xff] }
0x10f3   :  { %vm6821_vm10 = vcmp.eq.s32.totalorder %v12242_v10, %v6820_v48  ;;  %v8684_v48 = vld [vmem:[%s16262_s13 + $0xab0] sm:$0xff] }
0x10f4   :  { %11719 = vmatpush1.bf16.msk.msra.mxu1 %vm13631_vm2, %v14783_v50  ;;  %v6347_v1 = vpop.f32.mrb[164].mxu0 }
0x10f5   :  { %v6349_v11 = vpop.f32.mrb[165].mxu0  ;;  %11721 = vmatprep.subr.bf16.mxu1 %v11720_v30  ;;  %v8564_v30 = vld [vmem:[%s16262_s13 + $0x750] sm:$0xff] }
0x10f6   :  { %6449 = vmatprep.mubr.f32.mxu0 %v6349_v11  ;;  %v8614_v11 = vld [vmem:[%s16262_s13 + $0x8c0] sm:$0xff]  ;;  %v11742_v19 = vpack.c.bf16 %v8565_v32, %v8564_v30  ;;  %v8643_v30 = vld [vmem:[%s16262_s13 + $0x988] sm:$0xff] }
0x10f7   :  { %8553 = vmatmul.mubr.msk.f32.vlgmr.msra.gmra.mrb[160].mxu1 %vm3899_vm8, %v8550_v54  ;;  %6450 = vmatmul.mubr.f32.vlgmr.msra.gmra.mrb[166].mxu0 %v6347_v1  ;;  %v8597_v1 = vld [vmem:[%s16262_s13 + $0x838] sm:$0xff]  ;;  %v8582_v54 = vld [vmem:[%s16262_s13 + $0x7e0] sm:$0xff] }
0x10f8   :  { %11723 = vmatpush3.bf16.msra.mxu1 %v11722_v28  ;;  %11755 = vmatpush1.bf16.msra.mxu0 %v14773_v22  ;;  %v8583_v28 = vld [vmem:[%s16262_s13 + $0x7e8] sm:$0xff]  ;;  %v11776_v31 = vpack.c.bf16 %v8597_v1, %v8596_v55  ;;  %v8644_v55 = vld [vmem:[%s16262_s13 + $0x990] sm:$0xff]  ;;  %v8645_v1 = vld [vmem:[%s16262_s13 + $0x998] sm:$0xff] }
0x10f9   :  { %11758 = vmatprep.subr.msk.bf16.mxu0 %vm13631_vm2, %v14785_v61  ;;  %11725 = vmatprep.subr.bf16.mxu1 %v11724_v6  ;;  %v8615_v6 = vld [vmem:[%s16262_s13 + $0x8c8] sm:$0xff]  ;;  %v11744_v29 = vpack.c.bf16 %v8583_v28, %v8582_v54  ;;  %v8622_v28 = vsel %vm6821_vm10, 1.0, %v16295_v39 }
0x10fa   :  { %6709 = vmatprep.mubr.f32.mxu0 %v16295_v39  ;;  %v11778_v27 = vpack.c.bf16 %v8615_v6, %v8614_v11 }
0x10fc   :  { %11727 = vmatpush3.bf16.msra.mxu1 %v11726_v40  ;;  %11761 = vmatpush1.bf16.msk.msra.mxu0 %vm13631_vm2, %v14783_v50  ;;  %v8599_v40 = vld [vmem:[%s16262_s13 + $0x848] sm:$0xff] }
0x10fd   :  { %11729 = vmatprep.subr.bf16.mxu1 %v11728_v36  ;;  %11763 = vmatprep.subr.bf16.mxu0 %v11762_v51  ;;  %v8616_v36 = vld [vmem:[%s16262_s13 + $0x8d0] sm:$0xff]  ;;  %v8617_v51 = vld [vmem:[%s16262_s13 + $0x8d8] sm:$0xff]  ;;  %v11780_v44 = vpack.c.bf16 %v8599_v40, %v8598_v62  ;;  %v8678_v62 = vld [vmem:[%s16262_s13 + $0xa80] sm:$0xff] }
0x10fe   :  { %v11782_v13 = vpack.c.bf16 %v8617_v51, %v8616_v36  ;;  %v8679_v40 = vld [vmem:[%s16262_s13 + $0xa88] sm:$0xff] }
0x10ff   :  { %8589 = vmatmul.mubr.msk.f32.vlgmr.msra.gmra.mrb[168].mxu0 %vm3899_vm8, %v8586_v14  ;;  %v8600_v14 = vld [vmem:[%s16262_s13 + $0x850] sm:$0xff]  ;;  %v8631_v36 = vld [vmem:[%s16262_s13 + $0x928] sm:$0xff] }
0x1100   :  { %11731 = vmatpush3.bf16.msra.mxu1 %v11730_v41  ;;  %11765 = vmatpush3.bf16.msra.mxu0 %v11764_v43  ;;  %v8601_v41 = vld [vmem:[%s16262_s13 + $0x858] sm:$0xff]  ;;  %v8618_v43 = vld [vmem:[%s16262_s13 + $0x8e0] sm:$0xff] }
0x1101   :  { %11733 = vmatprep.subr.bf16.mxu1 %v11732_v8  ;;  %11767 = vmatprep.subr.bf16.mxu0 %v11766_v2  ;;  %v11784_v8 = vpack.c.bf16 %v8601_v41, %v8600_v14  ;;  %v11786_v2 = vpack.c.bf16 %v8619_v12, %v8618_v43  ;;  %v8681_v14 = vld [vmem:[%s16262_s13 + $0xa98] sm:$0xff]  ;;  %v11814_v43 = vpack.c.bf16 %v8631_v36, %v8630_v4  ;;  %v8656_v4 = vld [vmem:[%s16262_s13 + $0x9f0] sm:$0xff] }
0x1102   :  { %v11850_v46 = vpack.c.bf16 %v8681_v14, %v8680_v49  ;;  %v8657_v36 = vld [vmem:[%s16262_s13 + $0x9f8] sm:$0xff] }
0x1103   :  { %v8641_v14 = vld [vmem:[%s16262_s13 + $0x978] sm:$0xff] }
0x1104   :  { %11735 = vmatpush3.bf16.msra.mxu1 %v11734_v18  ;;  %11769 = vmatpush3.bf16.msra.mxu0 %v11768_v60  ;;  %v8604_v18 = vld [vmem:[%s16262_s13 + $0x870] sm:$0xff]  ;;  %v8605_v60 = vld [vmem:[%s16262_s13 + $0x878] sm:$0xff] }
0x1105   :  { %11737 = vmatprep.subr.bf16.mxu1 %v11736_v59  ;;  %11771 = vmatprep.subr.bf16.mxu0 %v11770_v24  ;;  %v11792_v52 = vpack.c.bf16 %v8605_v60, %v8604_v18  ;;  %v8683_v18 = vld [vmem:[%s16262_s13 + $0xaa8] sm:$0xff] }
0x1108   :  { %11739 = vmatpush3.bf16.msra.mxu1 %v11738_v3  ;;  %11773 = vmatpush3.bf16.msra.mxu0 %v11772_v58  ;;  %v8642_v58 = vld [vmem:[%s16262_s13 + $0x980] sm:$0xff] }
0x1109   :  { %11741 = vmatprep.subr.bf16.mxu1 %v11740_v35  ;;  %11775 = vmatprep.subr.bf16.mxu0 %v11774_v21  ;;  %v8626_v35 = vld [vmem:[%s16262_s13 + $0x900] sm:$0xff]  ;;  %v8627_v21 = vld [vmem:[%s16262_s13 + $0x908] sm:$0xff] }
0x110a   :  { %v11806_v11 = vpack.c.bf16 %v8627_v21, %v8626_v35  ;;  %v8637_v35 = vld [vmem:[%s16262_s13 + $0x958] sm:$0xff] }
0x110c   :  { %11743 = vmatpush3.bf16.msra.mxu1 %v11742_v19  ;;  %11777 = vmatpush3.bf16.msra.mxu0 %v11776_v31  ;;  %v11808_v19 = vpack.c.bf16 %v8645_v1, %v8644_v55  ;;  %v8628_v31 = vld [vmem:[%s16262_s13 + $0x910] sm:$0xff] }
0x110d   :  { %11745 = vmatprep.subr.bf16.mxu1 %v11744_v29  ;;  %11779 = vmatprep.subr.bf16.mxu0 %v11778_v27  ;;  %v7002_v29 = vadd.s32 10, %v14781_v45  ;;  %v8647_v27 = vld [vmem:[%s16262_s13 + $0x9a8] sm:$0xff]  ;;  %v11810_v17 = vpack.c.bf16 %v8629_v15, %v8628_v31  ;;  %v8668_v1 = vld [vmem:[%s16262_s13 + $0xa30] sm:$0xff] }
0x110e   :  { %v11812_v51 = vpack.c.bf16 %v8647_v27, %v8646_v56  ;;  %v8638_v56 = vld [vmem:[%s16262_s13 + $0x960] sm:$0xff] }
0x110f   :  { %vm7003_vm14 = vcmp.eq.s32.totalorder %v12242_v10, %v7002_v29  ;;  %v8639_v29 = vld [vmem:[%s16262_s13 + $0x968] sm:$0xff] }
0x1110   :  { %11747 = vmatpush3.bf16.msra.mxu1 %v11746_v38  ;;  %11781 = vmatpush3.bf16.msra.mxu0 %v11780_v44  ;;  %v11846_v38 = vpack.c.bf16 %v8679_v40, %v8678_v62  ;;  %v8662_v44 = vld [vmem:[%s16262_s13 + $0xa00] sm:$0xff]  ;;  %v8658_v41 = vsel %vm7003_vm14, 1.0, %v16295_v39 }
0x1111   :  { %11749 = vmatprep.subr.bf16.mxu1 %v11748_v37  ;;  %11783 = vmatprep.subr.bf16.mxu0 %v11782_v13  ;;  %v8648_v37 = vld [vmem:[%s16262_s13 + $0x9b0] sm:$0xff]  ;;  %v8649_v13 = vld [vmem:[%s16262_s13 + $0x9b8] sm:$0xff]  ;;  %v11848_v12 = vpack.c.bf16 %v8663_v34, %v8662_v44  ;;  %v8670_v40 = vld [vmem:[%s16262_s13 + $0xa40] sm:$0xff]  ;;  %v11830_v44 = vpack.c.bf16 %v8639_v29, %v8638_v56 }
0x1112   :  { %v8701_v56 = vld [vmem:[%s16262_s13 + $0xb18] sm:$0xff]  ;;  %v8718_v29 = vld [vmem:[%s16262_s13 + $0xba0] sm:$0xff] }
0x1114   :  { %11751 = vmatpush3.bf16.msra.mxu1 %v11750_v57  ;;  %11785 = vmatpush3.bf16.msra.mxu0 %v11784_v8  ;;  %v8632_v57 = vld [vmem:[%s16262_s13 + $0x930] sm:$0xff]  ;;  %v8633_v8 = vld [vmem:[%s16262_s13 + $0x938] sm:$0xff] }
0x1115   :  { %11795 = vmatprep.subr.bf16.mxu1 %v14775_v25  ;;  %11787 = vmatprep.subr.bf16.mxu0 %v11786_v2  ;;  %v11816_v2 = vpack.c.bf16 %v8649_v13, %v8648_v37  ;;  %v11818_v60 = vpack.c.bf16 %v8633_v8, %v8632_v57  ;;  %v8640_v37 = vld [vmem:[%s16262_s13 + $0x970] sm:$0xff]  ;;  %v11832_v13 = vpack.c.bf16 %v8657_v36, %v8656_v4  ;;  %v8691_v57 = vld [vmem:[%s16262_s13 + $0xae8] sm:$0xff]  ;;  %v8702_v36 = vld [vmem:[%s16262_s13 + $0xb20] sm:$0xff] }
0x1116   :  { %v11834_v8 = vpack.c.bf16 %v8641_v14, %v8640_v37  ;;  %v8734_v37 = vld [vmem:[%s16262_s13 + $0xc00] sm:$0xff]  ;;  %v8752_v14 = vld [vmem:[%s16262_s13 + $0xc90] sm:$0xff] }
0x1118   :  { %11789 = vmatpush3.bf16.msra.mxu0 %v11788_v33  ;;  %v8651_v33 = vld [vmem:[%s16262_s13 + $0x9c8] sm:$0xff] }
0x1119   :  { %11791 = vmatprep.subr.bf16.mxu0 %v11790_v47  ;;  %v8682_v47 = vld [vmem:[%s16262_s13 + $0xaa0] sm:$0xff] }
0x111c   :  { %11793 = vmatpush3.bf16.msra.mxu0 %v11792_v52  ;;  %v11852_v52 = vpack.c.bf16 %v8665_v26, %v8664_v53  ;;  %v8674_v53 = vld [vmem:[%s16262_s13 + $0xa60] sm:$0xff]  ;;  %v8675_v26 = vld [vmem:[%s16262_s13 + $0xa68] sm:$0xff] }
0x111d   :  { %11837 = vmatprep.subr.bf16.mxu0 %v14775_v25 }
0x11c2   :  { %v9483_v7 = vpop.f32.mrb[158].mxu1 }
0x11c3   :  { %v9484_v59 = vpop.f32.mrb[159].mxu1 }
0x11c4   :  { %v9485_v24 = vadd.f32 %v9484_v59, %v9483_v7  ;;  %v8634_v7 = vld [vmem:[%s16262_s13 + $0x940] sm:$0xff]  ;;  %v8635_v59 = vld [vmem:[%s16262_s13 + $0x948] sm:$0xff] }
0x11c6   :  { %v6273_v42 = vadd.f32 %v9485_v24, %v15468_v9  ;;  %v11804_v9 = vpack.c.bf16 %v8643_v30, %v8642_v58  ;;  %v11820_v24 = vpack.c.bf16 %v8651_v33, %v8650_v20  ;;  %v11822_v58 = vpack.c.bf16 %v8635_v59, %v8634_v7  ;;  %v8692_v20 = vld [vmem:[%s16262_s13 + $0xaf0] sm:$0xff]  ;;  %v8693_v33 = vld [vmem:[%s16262_s13 + $0xaf8] sm:$0xff] }
0x11ca   :  { %v6529_v0 = vpop.f32.mrb[160].mxu1  ;;  %v9518_v16 = vpop.f32.mrb[166].mxu0 }
0x11cb   :  { %v6531_v23 = vpop.f32.mrb[161].mxu1  ;;  %v9519_v5 = vpop.f32.mrb[167].mxu0 }
0x11cc   :  { %v9520_v3 = vadd.f32 %v9519_v5, %v9518_v16  ;;  %6631 = vmatprep.mubr.f32.mxu1 %v6531_v23  ;;  %v8667_v16 = vld [vmem:[%s16262_s13 + $0xa28] sm:$0xff]  ;;  %v8652_v23 = vld [vmem:[%s16262_s13 + $0x9d0] sm:$0xff]  ;;  %v8653_v5 = vld [vmem:[%s16262_s13 + $0x9d8] sm:$0xff] }
0x11cd   :  { %6632 = vmatmul.mubr.f32.vlgmr.msra.gmra.mrb[162].mxu1 %v6529_v0  ;;  %v8666_v0 = vld [vmem:[%s16262_s13 + $0xa20] sm:$0xff]  ;;  %v11824_v21 = vpack.c.bf16 %v8653_v5, %v8652_v23 }
0x11ce   :  { %v15689_v32 = vadd.f32 %v9520_v3, %v6273_v42  ;;  %11797 = vmatpush1.bf16.msra.mxu1 %v14773_v22  ;;  %6891 = vmatprep.mubr.f32.mxu1 %v16295_v39  ;;  %v11854_v42 = vpack.c.bf16 %v8683_v18, %v8682_v47  ;;  %v8685_v3 = vld [vmem:[%s16262_s13 + $0xab8] sm:$0xff]  ;;  %v11856_v30 = vpack.c.bf16 %v8667_v16, %v8666_v0 }
0x11cf   :  { %11800 = vmatprep.subr.msk.bf16.mxu1 %vm13631_vm2, %v14785_v61  ;;  %v11858_v55 = vpack.c.bf16 %v8685_v3, %v8684_v48  ;;  %v11872_v47 = vpack.c.bf16 %v8675_v26, %v8674_v53  ;;  %v11874_v18 = vpack.c.bf16 %v8693_v33, %v8692_v20  ;;  %v7184_v3 = vadd.s32 11, %v14781_v45  ;;  %v8722_v53 = vld [vmem:[%s16262_s13 + $0xbc0] sm:$0xff]  ;;  %v8736_v20 = vld [vmem:[%s16262_s13 + $0xc10] sm:$0xff]  ;;  %v8737_v33 = vld [vmem:[%s16262_s13 + $0xc18] sm:$0xff] }
0x11d1   :  { %vm7185_vm4 = vcmp.eq.s32.totalorder %v12242_v10, %v7184_v3  ;;  %v8756_v3 = vld [vmem:[%s16262_s13 + $0xcb0] sm:$0xff] }
0x11d2   :  { %11803 = vmatpush1.bf16.msk.msra.mxu1 %vm13631_vm2, %v14783_v50  ;;  %v6711_v54 = vpop.f32.mrb[168].mxu0 }
0x11d3   :  { %v6713_v6 = vpop.f32.mrb[169].mxu0  ;;  %11805 = vmatprep.subr.bf16.mxu1 %v11804_v9  ;;  %v8636_v9 = vld [vmem:[%s16262_s13 + $0x950] sm:$0xff] }
0x11d4   :  { %6813 = vmatprep.mubr.f32.mxu0 %v6713_v6  ;;  %v8686_v6 = vld [vmem:[%s16262_s13 + $0xac0] sm:$0xff]  ;;  %v11826_v31 = vpack.c.bf16 %v8637_v35, %v8636_v9  ;;  %v8715_v9 = vld [vmem:[%s16262_s13 + $0xb88] sm:$0xff] }
0x11d5   :  { %8625 = vmatmul.mubr.msk.f32.vlgmr.msra.gmra.mrb[164].mxu1 %vm3899_vm8, %v8622_v28  ;;  %6814 = vmatmul.mubr.f32.vlgmr.msra.gmra.mrb[170].mxu0 %v6711_v54  ;;  %v8669_v54 = vld [vmem:[%s16262_s13 + $0xa38] sm:$0xff]  ;;  %v8654_v28 = vld [vmem:[%s16262_s13 + $0x9e0] sm:$0xff] }
0x11d6   :  { %11807 = vmatpush3.bf16.msra.mxu1 %v11806_v11  ;;  %11839 = vmatpush1.bf16.msra.mxu0 %v14773_v22  ;;  %v8655_v11 = vld [vmem:[%s16262_s13 + $0x9e8] sm:$0xff]  ;;  %v11860_v15 = vpack.c.bf16 %v8669_v54, %v8668_v1  ;;  %v8716_v1 = vld [vmem:[%s16262_s13 + $0xb90] sm:$0xff]  ;;  %v8717_v54 = vld [vmem:[%s16262_s13 + $0xb98] sm:$0xff] }
0x11d7   :  { %11842 = vmatprep.subr.msk.bf16.mxu0 %vm13631_vm2, %v14785_v61  ;;  %11809 = vmatprep.subr.bf16.mxu1 %v11808_v19  ;;  %v8687_v19 = vld [vmem:[%s16262_s13 + $0xac8] sm:$0xff]  ;;  %v11828_v27 = vpack.c.bf16 %v8655_v11, %v8654_v28  ;;  %v8694_v11 = vsel %vm7185_vm4, 1.0, %v16295_v39 }
0x11d8   :  { %7073 = vmatprep.mubr.f32.mxu0 %v16295_v39  ;;  %v11862_v62 = vpack.c.bf16 %v8687_v19, %v8686_v6 }
0x11da   :  { %11811 = vmatpush3.bf16.msra.mxu1 %v11810_v17  ;;  %11845 = vmatpush1.bf16.msk.msra.mxu0 %vm13631_vm2, %v14783_v50  ;;  %v8671_v17 = vld [vmem:[%s16262_s13 + $0xa48] sm:$0xff] }
0x11db   :  { %11813 = vmatprep.subr.bf16.mxu1 %v11812_v51  ;;  %11847 = vmatprep.subr.bf16.mxu0 %v11846_v38  ;;  %v8688_v51 = vld [vmem:[%s16262_s13 + $0xad0] sm:$0xff]  ;;  %v8689_v38 = vld [vmem:[%s16262_s13 + $0xad8] sm:$0xff]  ;;  %v11864_v34 = vpack.c.bf16 %v8671_v17, %v8670_v40  ;;  %v8750_v40 = vld [vmem:[%s16262_s13 + $0xc80] sm:$0xff] }
0x11dc   :  { %v11866_v49 = vpack.c.bf16 %v8689_v38, %v8688_v51  ;;  %v8751_v17 = vld [vmem:[%s16262_s13 + $0xc88] sm:$0xff] }
0x11dd   :  { %8661 = vmatmul.mubr.msk.f32.vlgmr.msra.gmra.mrb[172].mxu0 %vm3899_vm8, %v8658_v41  ;;  %v8672_v41 = vld [vmem:[%s16262_s13 + $0xa50] sm:$0xff]  ;;  %v8703_v51 = vld [vmem:[%s16262_s13 + $0xb28] sm:$0xff] }
0x11de   :  { %11815 = vmatpush3.bf16.msra.mxu1 %v11814_v43  ;;  %11849 = vmatpush3.bf16.msra.mxu0 %v11848_v12  ;;  %v8673_v43 = vld [vmem:[%s16262_s13 + $0xa58] sm:$0xff]  ;;  %v8690_v12 = vld [vmem:[%s16262_s13 + $0xae0] sm:$0xff] }
0x11df   :  { %11817 = vmatprep.subr.bf16.mxu1 %v11816_v2  ;;  %11851 = vmatprep.subr.bf16.mxu0 %v11850_v46  ;;  %v11868_v2 = vpack.c.bf16 %v8673_v43, %v8672_v41  ;;  %v11870_v46 = vpack.c.bf16 %v8691_v57, %v8690_v12  ;;  %v8753_v41 = vld [vmem:[%s16262_s13 + $0xc98] sm:$0xff]  ;;  %v11898_v12 = vpack.c.bf16 %v8703_v51, %v8702_v36  ;;  %v8704_v57 = vld [vmem:[%s16262_s13 + $0xb30] sm:$0xff] }
0x11e0   :  { %v11934_v26 = vpack.c.bf16 %v8753_v41, %v8752_v14  ;;  %v8713_v36 = vld [vmem:[%s16262_s13 + $0xb78] sm:$0xff] }
0x11e1   :  { %v8761_v14 = vld [vmem:[%s16262_s13 + $0xcd8] sm:$0xff] }
0x11e2   :  { %11819 = vmatpush3.bf16.msra.mxu1 %v11818_v60  ;;  %11853 = vmatpush3.bf16.msra.mxu0 %v11852_v52  ;;  %v8676_v60 = vld [vmem:[%s16262_s13 + $0xa70] sm:$0xff]  ;;  %v8677_v52 = vld [vmem:[%s16262_s13 + $0xa78] sm:$0xff] }
0x11e3   :  { %11821 = vmatprep.subr.bf16.mxu1 %v11820_v24  ;;  %11855 = vmatprep.subr.bf16.mxu0 %v11854_v42  ;;  %v11876_v7 = vpack.c.bf16 %v8677_v52, %v8676_v60  ;;  %v8755_v60 = vld [vmem:[%s16262_s13 + $0xca8] sm:$0xff] }
0x11e6   :  { %11823 = vmatpush3.bf16.msra.mxu1 %v11822_v58  ;;  %11857 = vmatpush3.bf16.msra.mxu0 %v11856_v30  ;;  %v8714_v30 = vld [vmem:[%s16262_s13 + $0xb80] sm:$0xff] }
0x11e7   :  { %11825 = vmatprep.subr.bf16.mxu1 %v11824_v21  ;;  %11859 = vmatprep.subr.bf16.mxu0 %v11858_v55  ;;  %v8698_v21 = vld [vmem:[%s16262_s13 + $0xb00] sm:$0xff]  ;;  %v8699_v55 = vld [vmem:[%s16262_s13 + $0xb08] sm:$0xff] }
0x11e8   :  { %v11890_v6 = vpack.c.bf16 %v8699_v55, %v8698_v21  ;;  %v8709_v55 = vld [vmem:[%s16262_s13 + $0xb58] sm:$0xff] }
0x11ea   :  { %11827 = vmatpush3.bf16.msra.mxu1 %v11826_v31  ;;  %11861 = vmatpush3.bf16.msra.mxu0 %v11860_v15  ;;  %v11892_v31 = vpack.c.bf16 %v8717_v54, %v8716_v1  ;;  %v8700_v15 = vld [vmem:[%s16262_s13 + $0xb10] sm:$0xff] }
0x11eb   :  { %11829 = vmatprep.subr.bf16.mxu1 %v11828_v27  ;;  %11863 = vmatprep.subr.bf16.mxu0 %v11862_v62  ;;  %v7366_v27 = vadd.s32 12, %v14781_v45  ;;  %v8719_v62 = vld [vmem:[%s16262_s13 + $0xba8] sm:$0xff]  ;;  %v11894_v4 = vpack.c.bf16 %v8701_v56, %v8700_v15  ;;  %v8740_v54 = vld [vmem:[%s16262_s13 + $0xc30] sm:$0xff]  ;;  %v8710_v56 = vld [vmem:[%s16262_s13 + $0xb60] sm:$0xff] }
0x11ec   :  { %v11896_v38 = vpack.c.bf16 %v8719_v62, %v8718_v29  ;;  %v8711_v29 = vld [vmem:[%s16262_s13 + $0xb68] sm:$0xff]  ;;  %v8729_v62 = vld [vmem:[%s16262_s13 + $0xbf8] sm:$0xff] }
0x11ed   :  { %vm7367_vm6 = vcmp.eq.s32.totalorder %v12242_v10, %v7366_v27  ;;  %v8728_v27 = vld [vmem:[%s16262_s13 + $0xbf0] sm:$0xff] }
0x11ee   :  { %11831 = vmatpush3.bf16.msra.mxu1 %v11830_v44  ;;  %11865 = vmatpush3.bf16.msra.mxu0 %v11864_v34  ;;  %v8720_v44 = vld [vmem:[%s16262_s13 + $0xbb0] sm:$0xff]  ;;  %v11930_v34 = vpack.c.bf16 %v8751_v17, %v8750_v40  ;;  %v8730_v43 = vsel %vm7367_vm6, 1.0, %v16295_v39  ;;  %v11914_v40 = vpack.c.bf16 %v8711_v29, %v8710_v56  ;;  %v11916_v17 = vpack.c.bf16 %v8729_v62, %v8728_v27  ;;  %v8793_v29 = vld [vmem:[%s16262_s13 + $0xdb8] sm:$0xff] }
0x11ef   :  { %11833 = vmatprep.subr.bf16.mxu1 %v11832_v13  ;;  %11867 = vmatprep.subr.bf16.mxu0 %v11866_v49  ;;  %v8735_v13 = vld [vmem:[%s16262_s13 + $0xc08] sm:$0xff]  ;;  %v8721_v49 = vld [vmem:[%s16262_s13 + $0xbb8] sm:$0xff]  ;;  %v8792_v56 = vld [vmem:[%s16262_s13 + $0xdb0] sm:$0xff] }
0x11f0   :  { %v11984_v62 = vpack.c.bf16 %v8793_v29, %v8792_v56 }
0x11f2   :  { %11835 = vmatpush3.bf16.msra.mxu1 %v11834_v8  ;;  %11869 = vmatpush3.bf16.msra.mxu0 %v11868_v2  ;;  %v8705_v8 = vld [vmem:[%s16262_s13 + $0xb38] sm:$0xff]  ;;  %v11932_v2 = vpack.c.bf16 %v8735_v13, %v8734_v37  ;;  %v8742_v37 = vld [vmem:[%s16262_s13 + $0xc40] sm:$0xff]  ;;  %v8743_v13 = vld [vmem:[%s16262_s13 + $0xc48] sm:$0xff] }
0x11f3   :  { %11879 = vmatprep.subr.bf16.mxu1 %v14775_v25  ;;  %11871 = vmatprep.subr.bf16.mxu0 %v11870_v46  ;;  %v11900_v46 = vpack.c.bf16 %v8721_v49, %v8720_v44  ;;  %v11902_v52 = vpack.c.bf16 %v8705_v8, %v8704_v57  ;;  %v8759_v44 = vld [vmem:[%s16262_s13 + $0xcc8] sm:$0xff]  ;;  %v11948_v49 = vpack.c.bf16 %v8743_v13, %v8742_v37  ;;  %v8762_v8 = vld [vmem:[%s16262_s13 + $0xce0] sm:$0xff]  ;;  %v8796_v37 = vld [vmem:[%s16262_s13 + $0xdd0] sm:$0xff] }
0x11f4   :  { %v8797_v13 = vld [vmem:[%s16262_s13 + $0xdd8] sm:$0xff] }
0x11f6   :  { %11873 = vmatpush3.bf16.msra.mxu0 %v11872_v47  ;;  %v8723_v47 = vld [vmem:[%s16262_s13 + $0xbc8] sm:$0xff] }
0x11f7   :  { %11875 = vmatprep.subr.bf16.mxu0 %v11874_v18  ;;  %v8754_v18 = vld [vmem:[%s16262_s13 + $0xca0] sm:$0xff] }
0x11fa   :  { %11877 = vmatpush3.bf16.msra.mxu0 %v11876_v7  ;;  %v8706_v7 = vld [vmem:[%s16262_s13 + $0xb40] sm:$0xff] }
0x11fb   :  { %11921 = vmatprep.subr.bf16.mxu0 %v14775_v25 }
0x12a0   :  { %v9553_v59 = vpop.f32.mrb[162].mxu1 }
0x12a1   :  { %v9554_v24 = vpop.f32.mrb[163].mxu1 }
0x12a2   :  { %v9555_v42 = vadd.f32 %v9554_v24, %v9553_v59  ;;  %v8707_v59 = vld [vmem:[%s16262_s13 + $0xb48] sm:$0xff]  ;;  %v11936_v24 = vpack.c.bf16 %v8737_v33, %v8736_v20  ;;  %v8764_v33 = vld [vmem:[%s16262_s13 + $0xcf0] sm:$0xff] }
0x12a4   :  { %v6637_v0 = vadd.f32 %v9555_v42, %v15689_v32  ;;  %v11888_v32 = vpack.c.bf16 %v8715_v9, %v8714_v30  ;;  %v11904_v42 = vpack.c.bf16 %v8723_v47, %v8722_v53  ;;  %v11906_v30 = vpack.c.bf16 %v8707_v59, %v8706_v7  ;;  %v8708_v9 = vld [vmem:[%s16262_s13 + $0xb50] sm:$0xff]  ;;  %v8746_v53 = vld [vmem:[%s16262_s13 + $0xc60] sm:$0xff]  ;;  %v8765_v47 = vld [vmem:[%s16262_s13 + $0xcf8] sm:$0xff] }
0x12a8   :  { %v6893_v16 = vpop.f32.mrb[164].mxu1  ;;  %v9588_v23 = vpop.f32.mrb[170].mxu0 }
0x12a9   :  { %v6895_v5 = vpop.f32.mrb[165].mxu1  ;;  %v9589_v48 = vpop.f32.mrb[171].mxu0 }
0x12aa   :  { %v9590_v58 = vadd.f32 %v9589_v48, %v9588_v23  ;;  %6995 = vmatprep.mubr.f32.mxu1 %v6895_v5  ;;  %v8738_v23 = vld [vmem:[%s16262_s13 + $0xc20] sm:$0xff]  ;;  %v8739_v5 = vld [vmem:[%s16262_s13 + $0xc28] sm:$0xff]  ;;  %v8725_v48 = vld [vmem:[%s16262_s13 + $0xbd8] sm:$0xff] }
0x12ab   :  { %6996 = vmatmul.mubr.f32.vlgmr.msra.gmra.mrb[166].mxu1 %v6893_v16  ;;  %v11938_v16 = vpack.c.bf16 %v8755_v60, %v8754_v18  ;;  %v11958_v18 = vpack.c.bf16 %v8765_v47, %v8764_v33  ;;  %v8748_v60 = vld [vmem:[%s16262_s13 + $0xc70] sm:$0xff] }
0x12ac   :  { %v15910_v35 = vadd.f32 %v9590_v58, %v6637_v0  ;;  %11881 = vmatpush1.bf16.msra.mxu1 %v14773_v22  ;;  %7255 = vmatprep.mubr.f32.mxu1 %v16295_v39  ;;  %v8724_v0 = vld [vmem:[%s16262_s13 + $0xbd0] sm:$0xff]  ;;  %v8757_v58 = vld [vmem:[%s16262_s13 + $0xcb8] sm:$0xff] }
0x12ad   :  { %11884 = vmatprep.subr.msk.bf16.mxu1 %vm13631_vm2, %v14785_v61  ;;  %v11908_v21 = vpack.c.bf16 %v8725_v48, %v8724_v0  ;;  %v11942_v1 = vpack.c.bf16 %v8757_v58, %v8756_v3  ;;  %v7548_v3 = vadd.s32 13, %v14781_v45  ;;  %v8784_v47 = vld [vmem:[%s16262_s13 + $0xd70] sm:$0xff] }
0x12af   :  { %vm7549_vm3 = vcmp.eq.s32.totalorder %v12242_v10, %v7548_v3 }
0x12b0   :  { %11887 = vmatpush1.bf16.msk.msra.mxu1 %vm13631_vm2, %v14783_v50  ;;  %v7075_v28 = vpop.f32.mrb[172].mxu0 }
0x12b1   :  { %v7077_v19 = vpop.f32.mrb[173].mxu0  ;;  %11889 = vmatprep.subr.bf16.mxu1 %v11888_v32  ;;  %v11940_v32 = vpack.c.bf16 %v8739_v5, %v8738_v23 }
0x12b2   :  { %7177 = vmatprep.mubr.f32.mxu0 %v7077_v19  ;;  %v11910_v19 = vpack.c.bf16 %v8709_v55, %v8708_v9  ;;  %v8787_v9 = vld [vmem:[%s16262_s13 + $0xd88] sm:$0xff]  ;;  %v8789_v55 = vld [vmem:[%s16262_s13 + $0xd98] sm:$0xff] }
0x12b3   :  { %8697 = vmatmul.mubr.msk.f32.vlgmr.msra.gmra.mrb[168].mxu1 %vm3899_vm8, %v8694_v11  ;;  %7178 = vmatmul.mubr.f32.vlgmr.msra.gmra.mrb[174].mxu0 %v7075_v28  ;;  %v8741_v28 = vld [vmem:[%s16262_s13 + $0xc38] sm:$0xff]  ;;  %v8726_v11 = vld [vmem:[%s16262_s13 + $0xbe0] sm:$0xff] }
0x12b4   :  { %11891 = vmatpush3.bf16.msra.mxu1 %v11890_v6  ;;  %11923 = vmatpush1.bf16.msra.mxu0 %v14773_v22  ;;  %v8727_v6 = vld [vmem:[%s16262_s13 + $0xbe8] sm:$0xff] }
0x12b5   :  { %11926 = vmatprep.subr.msk.bf16.mxu0 %vm13631_vm2, %v14785_v61  ;;  %11893 = vmatprep.subr.bf16.mxu1 %v11892_v31  ;;  %v11944_v31 = vpack.c.bf16 %v8741_v28, %v8740_v54  ;;  %v11912_v15 = vpack.c.bf16 %v8727_v6, %v8726_v11  ;;  %v8772_v11 = vld [vmem:[%s16262_s13 + $0xd10] sm:$0xff]  ;;  %v8773_v6 = vld [vmem:[%s16262_s13 + $0xd18] sm:$0xff] }
0x12b6   :  { %7437 = vmatprep.mubr.f32.mxu0 %v16295_v39 }
0x12b8   :  { %11895 = vmatpush3.bf16.msra.mxu1 %v11894_v4  ;;  %11929 = vmatpush1.bf16.msk.msra.mxu0 %vm13631_vm2, %v14783_v50  ;;  %v8712_v4 = vld [vmem:[%s16262_s13 + $0xb70] sm:$0xff] }
0x12b9   :  { %11897 = vmatprep.subr.bf16.mxu1 %v11896_v38  ;;  %11931 = vmatprep.subr.bf16.mxu0 %v11930_v34  ;;  %v11918_v51 = vpack.c.bf16 %v8713_v36, %v8712_v4  ;;  %v8758_v38 = vld [vmem:[%s16262_s13 + $0xcc0] sm:$0xff]  ;;  %v8795_v36 = vld [vmem:[%s16262_s13 + $0xdc8] sm:$0xff] }
0x12ba   :  { %v11946_v34 = vpack.c.bf16 %v8759_v44, %v8758_v38  ;;  %v8794_v4 = vld [vmem:[%s16262_s13 + $0xdc0] sm:$0xff] }
0x12bb   :  { %8733 = vmatmul.mubr.msk.f32.vlgmr.msra.gmra.mrb[176].mxu0 %vm3899_vm8, %v8730_v43  ;;  %v8744_v43 = vld [vmem:[%s16262_s13 + $0xc50] sm:$0xff]  ;;  %v11988_v38 = vpack.c.bf16 %v8795_v36, %v8794_v4  ;;  %v8778_v44 = vld [vmem:[%s16262_s13 + $0xd40] sm:$0xff] }
0x12bc   :  { %11899 = vmatpush3.bf16.msra.mxu1 %v11898_v12  ;;  %11933 = vmatpush3.bf16.msra.mxu0 %v11932_v2  ;;  %v8745_v12 = vld [vmem:[%s16262_s13 + $0xc58] sm:$0xff]  ;;  %v8763_v2 = vld [vmem:[%s16262_s13 + $0xce8] sm:$0xff] }
0x12bd   :  { %11901 = vmatprep.subr.bf16.mxu1 %v11900_v46  ;;  %11935 = vmatprep.subr.bf16.mxu0 %v11934_v26  ;;  %v11952_v57 = vpack.c.bf16 %v8745_v12, %v8744_v43  ;;  %v11954_v46 = vpack.c.bf16 %v8763_v2, %v8762_v8  ;;  %v8747_v26 = vld [vmem:[%s16262_s13 + $0xc68] sm:$0xff]  ;;  %v8798_v12 = vld [vmem:[%s16262_s13 + $0xde0] sm:$0xff] }
0x12be   :  { %v11956_v20 = vpack.c.bf16 %v8747_v26, %v8746_v53  ;;  %v8782_v2 = vld [vmem:[%s16262_s13 + $0xd60] sm:$0xff]  ;;  %v8800_v26 = vld [vmem:[%s16262_s13 + $0xdf0] sm:$0xff] }
0x12c0   :  { %11903 = vmatpush3.bf16.msra.mxu1 %v11902_v52  ;;  %11937 = vmatpush3.bf16.msra.mxu0 %v11936_v24  ;;  %v8749_v52 = vld [vmem:[%s16262_s13 + $0xc78] sm:$0xff] }
0x12c1   :  { %11905 = vmatprep.subr.bf16.mxu1 %v11904_v42  ;;  %11939 = vmatprep.subr.bf16.mxu0 %v11938_v16  ;;  %v11960_v7 = vpack.c.bf16 %v8749_v52, %v8748_v60 }
0x12c4   :  { %11907 = vmatpush3.bf16.msra.mxu1 %v11906_v30  ;;  %11941 = vmatpush3.bf16.msra.mxu0 %v11940_v32  ;;  %v8786_v30 = vld [vmem:[%s16262_s13 + $0xd80] sm:$0xff] }
0x12c5   :  { %11909 = vmatprep.subr.bf16.mxu1 %v11908_v21  ;;  %11943 = vmatprep.subr.bf16.mxu0 %v11942_v1  ;;  %v11972_v45 = vpack.c.bf16 %v8787_v9, %v8786_v30  ;;  %v8771_v21 = vld [vmem:[%s16262_s13 + $0xd08] sm:$0xff]  ;;  %v8802_v9 = vld [vmem:[%s16263_s14] ss:$0 sm:$0xff] }
0x12c8   :  { %11911 = vmatpush3.bf16.msra.mxu1 %v11910_v19  ;;  %11945 = vmatpush3.bf16.msra.mxu0 %v11944_v31  ;;  %v8774_v31 = vld [vmem:[%s16262_s13 + $0xd20] sm:$0xff] }
0x12c9   :  { %11913 = vmatprep.subr.bf16.mxu1 %v11912_v15  ;;  %11947 = vmatprep.subr.bf16.mxu0 %v11946_v34  ;;  %v8775_v15 = vld [vmem:[%s16262_s13 + $0xd28] sm:$0xff] }
0x12ca   :  { %v11982_v27 = vpack.c.bf16 %v8775_v15, %v8774_v31  ;;  %v8779_v34 = vld [vmem:[%s16262_s13 + $0xd48] sm:$0xff] }
0x12cc   :  { %11915 = vmatpush3.bf16.msra.mxu1 %v11914_v40  ;;  %11949 = vmatpush3.bf16.msra.mxu0 %v11948_v49  ;;  %v8776_v40 = vld [vmem:[%s16262_s13 + $0xd30] sm:$0xff]  ;;  %v11990_v49 = vpack.c.bf16 %v8779_v34, %v8778_v44 }
0x12cd   :  { %11917 = vmatprep.subr.bf16.mxu1 %v11916_v17  ;;  %v8777_v17 = vld [vmem:[%s16262_s13 + $0xd38] sm:$0xff] }
0x12d0   :  { %11919 = vmatpush3.bf16.msra.mxu1 %v11918_v51  ;;  %v11986_v51 = vpack.c.bf16 %v8777_v17, %v8776_v40 }
0x12d1   :  { %11963 = vmatprep.subr.bf16.mxu1 %v14775_v25  ;;  %v8760_v25 = vld [vmem:[%s16262_s13 + $0xcd0] sm:$0xff] }
0x12d2   :  { %v11950_v41 = vpack.c.bf16 %v8761_v14, %v8760_v25  ;;  %v11992_v25 = vpack.c.bf16 %v8797_v13, %v8796_v37  ;;  %v8780_v14 = vld [vmem:[%s16262_s13 + $0xd50] sm:$0xff] }
0x12d4   :  { %11951 = vmatprep.subr.bf16.mxu0 %v11950_v41  ;;  %v8781_v41 = vld [vmem:[%s16262_s13 + $0xd58] sm:$0xff] }
0x12d5   :  { %11953 = vmatpush3.bf16.msra.mxu0 %v11952_v57  ;;  %v11994_v43 = vpack.c.bf16 %v8781_v41, %v8780_v14  ;;  %v8799_v57 = vld [vmem:[%s16262_s13 + $0xde8] sm:$0xff] }
0x12d6   :  { %11955 = vmatprep.subr.bf16.mxu0 %v11954_v46  ;;  %v11996_v8 = vpack.c.bf16 %v8799_v57, %v8798_v12  ;;  %v8783_v46 = vld [vmem:[%s16262_s13 + $0xd68] sm:$0xff] }
0x12d7   :  { %v11998_v53 = vpack.c.bf16 %v8783_v46, %v8782_v2 }
0x12d9   :  { %11957 = vmatpush3.bf16.msra.mxu0 %v11956_v20  ;;  %v8801_v20 = vld [vmem:[%s16262_s13 + $0xdf8] sm:$0xff] }
0x12da   :  { %11959 = vmatprep.subr.bf16.mxu0 %v11958_v18  ;;  %v12000_v33 = vpack.c.bf16 %v8801_v20, %v8800_v26  ;;  %v8785_v18 = vld [vmem:[%s16262_s13 + $0xd78] sm:$0xff] }
0x12db   :  { %v12002_v60 = vpack.c.bf16 %v8785_v18, %v8784_v47 }
0x12dd   :  { %11961 = vmatpush3.bf16.msra.mxu0 %v11960_v7 }
0x137e   :  { %v9623_v59 = vpop.f32.mrb[166].mxu1 }
0x137f   :  { %v9624_v24 = vpop.f32.mrb[167].mxu1 }
0x1380   :  { %v9625_v42 = vadd.f32 %v9624_v24, %v9623_v59 }
0x1382   :  { %v7001_v0 = vadd.f32 %v9625_v42, %v15910_v35  ;;  %v8770_v35 = vld [vmem:[%s16262_s13 + $0xd00] sm:$0xff] }
0x1383   :  { %v11974_v1 = vpack.c.bf16 %v8771_v21, %v8770_v35 }
0x1386   :  { %v7257_v16 = vpop.f32.mrb[168].mxu1  ;;  %v9658_v23 = vpop.f32.mrb[174].mxu0 }
0x1387   :  { %v7259_v5 = vpop.f32.mrb[169].mxu1  ;;  %v9659_v48 = vpop.f32.mrb[175].mxu0 }
0x1388   :  { %v9660_v58 = vadd.f32 %v9659_v48, %v9658_v23  ;;  %7359 = vmatprep.mubr.f32.mxu1 %v7259_v5 }
0x1389   :  { %7360 = vmatmul.mubr.f32.vlgmr.msra.gmra.mrb[170].mxu1 %v7257_v16 }
0x138a   :  { %v16130_v32 = vadd.f32 %v9660_v58, %v7001_v0  ;;  %11965 = vmatpush1.bf16.msra.mxu1 %v14773_v22  ;;  %7619 = vmatprep.mubr.f32.mxu1 %v16295_v39  ;;  %v8788_v22 = vld [vmem:[%s16262_s13 + $0xd90] sm:$0xff] }
0x138b   :  { %11968 = vmatprep.subr.msk.bf16.mxu1 %vm13631_vm2, %v14785_v61  ;;  %v8766_v61 = vsel %vm7549_vm3, 1.0, %v16295_v39  ;;  %v11976_v28 = vpack.c.bf16 %v8789_v55, %v8788_v22  ;;  %v8791_v39 = vld [vmem:[%s16262_s13 + $0xda8] sm:$0xff] }
0x138c   :  { %v11980_v19 = vpack.c.bf16 %v8791_v39, %v8790_v63 }
0x138e   :  { %11971 = vmatpush1.bf16.msk.msra.mxu1 %vm13631_vm2, %v14783_v50  ;;  %v7439_v10 = vpop.f32.mrb[176].mxu0  ;;  %v11978_v50 = vpack.c.bf16 %v8773_v6, %v8772_v11 }
0x138f   :  { %v7441_v54 = vpop.f32.mrb[177].mxu0  ;;  %11973 = vmatprep.subr.bf16.mxu1 %v11972_v45 }
0x1390   :  { %7541 = vmatprep.mubr.f32.mxu0 %v7441_v54 }
0x1391   :  { %8769 = vmatmul.mubr.msk.f32.vlgmr.msra.gmra.mrb[172].mxu1 %vm3899_vm8, %v8766_v61  ;;  %7542 = vmatmul.mubr.f32.vlgmr.msra.gmra.mrb[178].mxu0 %v7439_v10  ;;  %vm7738_vm8 = vcmask 320512  }
0x1392   :  { %11975 = vmatpush3.bf16.msra.mxu1 %v11974_v1 }
0x1393   :  { %11977 = vmatprep.subr.bf16.mxu1 %v11976_v28 }
0x1396   :  { %11979 = vmatpush3.bf16.msra.mxu1 %v11978_v50 }
0x1397   :  { %11981 = vmatprep.subr.bf16.mxu1 %v11980_v19 }
0x139a   :  { %11983 = vmatpush3.bf16.msra.mxu1 %v11982_v27 }
0x139b   :  { %11985 = vmatprep.subr.bf16.mxu1 %v11984_v62 }
0x139e   :  { %11987 = vmatpush3.bf16.msra.mxu1 %v11986_v51 }
0x139f   :  { %11989 = vmatprep.subr.bf16.mxu1 %v11988_v38 }
0x13a2   :  { %11991 = vmatpush3.bf16.msra.mxu1 %v11990_v49 }
0x13a3   :  { %11993 = vmatprep.subr.bf16.mxu1 %v11992_v25 }
0x13a6   :  { %11995 = vmatpush3.bf16.msra.mxu1 %v11994_v43 }
0x13a7   :  { %11997 = vmatprep.subr.bf16.mxu1 %v11996_v8 }
0x13aa   :  { %11999 = vmatpush3.bf16.msra.mxu1 %v11998_v53 }
0x13ab   :  { %12001 = vmatprep.subr.bf16.mxu1 %v12000_v33 }
0x13ae   :  { %12003 = vmatpush3.bf16.msra.mxu1 %v12002_v60 }
0x145c   :  { %v9693_v52 = vpop.f32.mrb[170].mxu1 }
0x145d   :  { %v9694_v7 = vpop.f32.mrb[171].mxu1 }
0x145e   :  { %v9695_v59 = vadd.f32 %v9694_v7, %v9693_v52 }
0x1460   :  { %v7365_v24 = vadd.f32 %v9695_v59, %v16130_v32 }
0x1464   :  { %v7621_v42 = vpop.f32.mrb[172].mxu1  ;;  %v9728_v0 = vpop.f32.mrb[178].mxu0 }
0x1465   :  { %v7623_v16 = vpop.f32.mrb[173].mxu1  ;;  %v9729_v23 = vpop.f32.mrb[179].mxu0 }
0x1466   :  { %v9730_v5 = vadd.f32 %v9729_v23, %v9728_v0  ;;  %7723 = vmatprep.mubr.f32.mxu1 %v7623_v16 }
0x1467   :  { %7724 = vmatmul.mubr.f32.vlgmr.msra.gmra.mrb[174].mxu1 %v7621_v42 }
0x1468   :  { %v7547_v48 = vadd.f32 %v9730_v5, %v7365_v24 }
0x153a   :  { %v9763_v3 = vpop.f32.mrb[174].mxu1 }
0x153b   :  { %v9764_v58 = vpop.f32.mrb[175].mxu1 }
0x153c   :  { %v9765_v30 = vadd.f32 %v9764_v58, %v9763_v3 }
0x153e   :  { %v7729_v45 = vadd.f32 %v9765_v30, %v7547_v48 }
0x1540   :  { %v7737_v32 = vadd.f32 %v8802_v9, %v7729_v45 }
0x1542   :  { %7739 = vst.msk [vmem:[#allocation2] sm:$0x3] %vm7738_vm8, %v7737_v32 }
0x1543   :  { %12108 = shalt.err (!%p12105_p4)
}
0x1544   :  { %s12109_s17 = scalar_lea.hbm %s16264_s15, 32 }
0x1545   :  { %p12110_p5 = scmp.ne.s32.totalorder %s16264_s15, %s12109_s17  ;;  %p12113_p6 = scmp.lt.u32.totalorder %s12109_s17, %s16264_s15 }
0x1547   :  { %p12115_p7 = pnand %p12113_p6, %p12110_p5 }
0x1549   :  { %12118 = shalt.err (!%p12115_p7)
}
0x154a   :  { %7749 = dma.vmem_to_hbm [thread:$0]  %s7747_s10, 32, %s16264_s15, [#allocation3]  }
0x154b   :  { %12119 = dma.done.wait [#allocation3], 32  }
0x154c   :  { %12120 = vsyncadd [#allocation3], 4294967264 }
0x154d   :  { %7753 = vsyncpa [#allocation3], 1 }

</bundles_post_ra>
